<compile_context>
chip_gen: v6e
topology: v6e:2x2x1
jax: 0.10.0
libtpu: 0.0.40
codegen_flags: <defaults>
</compile_context>

<pallas_src>
import numpy as np
import jax
import jax.numpy as jnp
from jax.experimental import pallas as pl
from jax.experimental.pallas import tpu as pltpu

N_FFT = 1024
HOP = 256
N_FRAMES_PER_FFT = N_FFT // HOP          # each frame = 4 consecutive hop rows
N_FREQ_KEPT = N_FFT // 2                 # 512 (Nyquist bin dropped; its mel weight is 0)
N_MELS = 80
N_MELS_PAD = 128                         # lane-dense output width
CLIP_VAL = 1e-7
MAX_TILE_T = 1024                        # time tile: ~16 MiB VMEM, safe on v7x (64 MiB/TC)


# ---------------------------------------------------------------------------
# Deterministic parameter construction (librosa-style slaney mel filterbank,
# periodic hann window, DFT basis) — no checkpoint / file loading.
# ---------------------------------------------------------------------------
def _hz_to_mel(f):
    f = np.asarray(f, dtype=np.float64)
    f_sp = 200.0 / 3
    mels = f / f_sp
    min_log_hz = 1000.0
    min_log_mel = min_log_hz / f_sp
    logstep = np.log(6.4) / 27.0
    return np.where(f >= min_log_hz,
                    min_log_mel + np.log(np.maximum(f, 1e-10) / min_log_hz) / logstep,
                    mels)


def _mel_to_hz(m):
    m = np.asarray(m, dtype=np.float64)
    f_sp = 200.0 / 3
    freqs = m * f_sp
    min_log_hz = 1000.0
    min_log_mel = min_log_hz / f_sp
    logstep = np.log(6.4) / 27.0
    return np.where(m >= min_log_mel,
                    min_log_hz * np.exp(logstep * (m - min_log_mel)),
                    freqs)


def mel_filterbank(sr=22050, n_fft=N_FFT, n_mels=N_MELS, fmin=0.0, fmax=8000.0):
    fftfreqs = np.linspace(0.0, sr / 2.0, 1 + n_fft // 2)
    mel_f = _mel_to_hz(np.linspace(_hz_to_mel(fmin), _hz_to_mel(fmax), n_mels + 2))
    fdiff = np.diff(mel_f)
    ramps = mel_f[:, None] - fftfreqs[None, :]
    weights = np.zeros((n_mels, len(fftfreqs)), dtype=np.float64)
    for i in range(n_mels):
        lower = -ramps[i] / fdiff[i]
        upper = ramps[i + 2] / fdiff[i + 1]
        weights[i] = np.maximum(0.0, np.minimum(lower, upper))
    enorm = 2.0 / (mel_f[2:n_mels + 2] - mel_f[:n_mels])       # slaney norm
    weights *= enorm[:, None]
    return weights.astype(np.float32)                          # (80, 513)


def _hann_periodic():
    n = np.arange(N_FFT, dtype=np.float64)
    return 0.5 - 0.5 * np.cos(2.0 * np.pi * n / N_FFT)         # torch.hann_window default


def make_constants():
    window = _hann_periodic()                                   # (1024,)
    n = np.arange(N_FFT, dtype=np.float64)
    k = np.arange(N_FREQ_KEPT, dtype=np.float64)                # 512 bins (Nyquist dropped)
    phase = 2.0 * np.pi * np.outer(n, k) / N_FFT                # (1024, 512)
    # fold hann window into the basis: diag(w) @ [cos | -sin]
    cos_b = np.cos(phase) * window[:, None]
    sin_b = -np.sin(phase) * window[:, None]
    basis = np.concatenate([cos_b, sin_b], axis=1)              # (1024, 1024)
    mel = mel_filterbank()                                      # (80, 513)
    # column 512 (Nyquist, 11025 Hz) is exactly 0 since fmax=8000 Hz; drop it,
    # transpose and pad the mel axis to 128 lanes.
    mel_t = np.zeros((N_FREQ_KEPT, N_MELS_PAD), dtype=np.float32)
    mel_t[:, :N_MELS] = mel[:, :N_FREQ_KEPT].T
    return (jnp.asarray(basis.astype(np.float32), dtype=jnp.bfloat16),  # (1024, 1024) bf16
            jnp.asarray(mel_t, dtype=jnp.bfloat16))                     # (512, 128)   bf16


# ---------------------------------------------------------------------------
# Pallas kernel:
#   frames built in-kernel from hop rows -> windowed-DFT (4 accumulated MXU matmuls)
#   -> power -> mel matmul -> normalization scale -> log(clamp)
# ---------------------------------------------------------------------------
def logmel_kernel(scale_ref, hops_ref, tail_ref, basis_ref, mel_t_ref, out_ref):
    # scale_ref : SMEM (1,)       f32   = 1 / max(|audio|)^2 (normalization, power domain)
    # hops_ref  : (TILE_T, 256)   f32   hop rows i*TILE_T .. i*TILE_T+TILE_T-1 of padded audio
    # tail_ref  : (8, 256)        f32   hop rows (i+1)*TILE_T .. +7 (frames overlap 3 hops)
    # basis_ref : (1024, 1024)    bf16  = diag(hann) @ [cos | -sin]
    # mel_t_ref : (512, 128)      bf16  slaney mel filterbank^T, padded 80 -> 128 lanes
    tile_t = hops_ref.shape[0]
    h = jnp.concatenate([hops_ref[...], tail_ref[...]], axis=0)          # (TILE_T+8, 256)
    acc = jnp.zeros((tile_t, 2 * N_FREQ_KEPT), jnp.float32)
    for j in range(N_FRAMES_PER_FFT):
        # frame t, columns j*256:(j+1)*256 == hop row t+j  ->  4 accumulated K=256 MXU passes;
        # the j>0 sublane-shifted slices are hidden under the previous matmul.
        hj = h[j:j + tile_t, :].astype(jnp.bfloat16)
        acc = acc + jnp.dot(hj, basis_ref[j * HOP:(j + 1) * HOP, :],
                            preferred_element_type=jnp.float32)
    re = acc[:, :N_FREQ_KEPT]                                            # lane split at 512
    im = acc[:, N_FREQ_KEPT:]
    power = (re * re + im * im).astype(jnp.bfloat16)                     # power=2 spectrogram
    mel = jnp.dot(power, mel_t_ref[...], preferred_element_type=jnp.float32)
    # apply the deferred normalization scale BEFORE the clamp (matches normalize -> clamp order)
    out_ref[...] = jnp.log(jnp.maximum(mel * scale_ref[0], CLIP_VAL))    # Vocex._drc


def logmel_pallas(inv_power, hops_ext, basis, mel_t, tile_t, n_tiles):
    tb = tile_t // 8                               # tail block index stride (8-row blocks)
    out_rows = n_tiles * tile_t

    def build(single_buffer_weights):
        wkw = {"pipeline_mode": pl.Buffered(1)} if single_buffer_weights else {}
        return pl.pallas_call(
            logmel_kernel,
            out_shape=jax.ShapeDtypeStruct((out_rows, N_MELS_PAD), jnp.float32),
            grid=(n_tiles,),
            in_specs=[
                pl.BlockSpec(memory_space=pltpu.MemorySpace.SMEM),               # norm scalar
                pl.BlockSpec((tile_t, HOP), lambda i: (i, 0)),                   # this tile's hops
                pl.BlockSpec((8, HOP), lambda i: ((i + 1) * tb, 0)),             # next tile's first 8 hops
                pl.BlockSpec((N_FFT, 2 * N_FREQ_KEPT), lambda i: (0, 0), **wkw),  # resident DFT basis
                pl.BlockSpec((N_FREQ_KEPT, N_MELS_PAD), lambda i: (0, 0), **wkw),  # resident mel weights
            ],
            out_specs=pl.BlockSpec((tile_t, N_MELS_PAD), lambda i: (i, 0)),
            compiler_params=pltpu.CompilerParams(
                dimension_semantics=("parallel",),     # shard time tiles across TCs (v7x megacore)
                vmem_limit_bytes=32 * 1024 * 1024,     # mandatory headroom on v5e, safe on v7x
            ),
        )(inv_power, hops_ext, hops_ext, basis, mel_t)

    try:
        # constant-index weights need no double buffering; frees ~2 MiB VMEM
        return build(True)
    except Exception:
        # pl.Buffered(1) unsupported in this jax version -> default double-buffered weights
        return build(False)


# ---------------------------------------------------------------------------
# Wrapper reproducing OnnxVocexWrapper.forward semantics (sr == 22050 path).
# ---------------------------------------------------------------------------
def _round_up(x, m):
    return ((x + m - 1) // m) * m


def _choose_tile(n_frames):
    # >=2 grid steps whenever possible so v7x megacore uses both TensorCores;
    # tile rows a multiple of 8; capped at MAX_TILE_T.
    half = _round_up(max(1, -(-n_frames // 2)), 8)
    return max(8, min(MAX_TILE_T, half))


def onnx_vocex_forward(audio, consts, sr=22050):
    basis, mel_t = consts
    # TODO(synk): sr != 22050 requires torchaudio-style polyphase resampling, not reproduced here.
    audio = jnp.asarray(audio, jnp.float32)
    # audio / audio.abs().max()  — folded into the kernel as a power-domain scale
    # (NaN for all-zero input, matching the torch reference).
    amax = jnp.max(jnp.abs(audio))
    if audio.ndim == 2:                       # stereo -> mono (division commutes with the mean)
        audio = audio.mean(axis=-1)
    inv_power = jnp.reshape(1.0 / (amax * amax), (1,)).astype(jnp.float32)

    L = audio.shape[0]
    # center=True STFT -> reflect pad by n_fft//2 on both sides
    padded = jnp.pad(audio, (N_FFT // 2, N_FFT // 2), mode="reflect")
    n_frames = 1 + L // HOP
    n_hops = n_frames + N_FRAMES_PER_FFT - 1
    # hop-major audio (no 4x-redundant frames slab): frame t = hops[t..t+3]
    hops = padded[: n_hops * HOP].reshape(n_hops, HOP)                   # (n_hops, 256) f32

    tile_t = _choose_tile(n_frames)
    n_tiles = -(-n_frames // tile_t)
    rows = (n_tiles + 1) * tile_t                                        # main tiles + tail headroom
    hops_ext = jnp.pad(hops, ((0, rows - n_hops), (0, 0)))

    logmel = logmel_pallas(inv_power, hops_ext, basis, mel_t, tile_t, n_tiles)  # (n_tiles*tile_t, 128)
    # padded tail rows hold log(CLIP_VAL) garbage and are sliced off here (never consumed)
    mel = logmel[:n_frames, :N_MELS][None, :, :]                         # (1, T, 80) == mel.transpose(1,2)
    # TODO(synk): VocexModel architecture/weights are not provided in the reference source;
    # the model(mel, inference=True) call cannot be reproduced, so the preprocessed
    # log-mel features (its exact input) are returned as the output list.
    return [mel]


# ---------------------------------------------------------------------------
# Exact (float64, numpy FFT) reference for the self-test.
# ---------------------------------------------------------------------------
def _reference_logmel_np(audio_np):
    a = audio_np.astype(np.float64)
    a = a / np.max(np.abs(a))
    padded = np.pad(a, (N_FFT // 2, N_FFT // 2), mode="reflect")
    n_frames = 1 + (len(padded) - N_FFT) // HOP
    frames = np.stack([padded[t * HOP:t * HOP + N_FFT] for t in range(n_frames)])
    win = _hann_periodic()
    spec = np.abs(np.fft.rfft(frames * win, axis=-1)) ** 2          # (T, 513)
    mel = spec @ mel_filterbank().astype(np.float64).T              # (T, 80)
    return np.log(np.maximum(mel, CLIP_VAL))


if __name__ == "__main__":
    key = jax.random.PRNGKey(0)
    audio = jax.random.normal(key, (2048,), dtype=jnp.float32)   # ~93 ms @ 22.05 kHz -> 9 frames

    consts = make_constants()
    out = onnx_vocex_forward(audio, consts)
    mel = np.asarray(jax.block_until_ready(out[0]))

    ref = _reference_logmel_np(np.asarray(audio))                # (9, 80) float64, exact

    assert mel.shape == (1, 9, N_MELS) and mel.dtype == np.float32
    # bf16 MXU operands (f32 accumulation) give ~1e-2 typical abs error in log-mel;
    # worst case is a mel bin whose contributing FFT bins are all near-cancelled.
    diff = np.abs(mel[0] - ref)
    assert diff.mean() < 0.035, f"mean log-mel error too large: {diff.mean()}"
    assert diff.max() < 0.30, f"max log-mel error too large: {diff.max()}"
    print("KERNEL_OK")
</pallas_src>

<mosaic_0001>
module attributes {stable_mosaic.version = 11 : i64} {
  func.func @logmel_kernel(%arg0: i32, %arg1: memref<1xf32, #tpu.memory_space<smem>>, %arg2: memref<8x256xf32, #tpu.memory_space<vmem>>, %arg3: memref<8x256xf32, #tpu.memory_space<vmem>>, %arg4: memref<1024x1024xbf16, #tpu.memory_space<vmem>>, %arg5: memref<512x128xbf16, #tpu.memory_space<vmem>>, %arg6: memref<8x128xf32, #tpu.memory_space<vmem>>) attributes {dimension_semantics = [#tpu.dimension_semantics<parallel>], iteration_bounds = array<i64: 2>, scalar_prefetch = 0 : i64, scratch_operands = 0 : i64, tpu.core_type = #tpu.core_type<tc>, window_params = [{transform_indices = @transform_0, window_bounds = array<i64: 1>}, {transform_indices = @transform_1, window_bounds = array<i64: 8, 256>}, {transform_indices = @transform_2, window_bounds = array<i64: 8, 256>}, {pipeline_mode = #tpu.pipeline_mode<synchronous>, transform_indices = @transform_3, window_bounds = array<i64: 1024, 1024>}, {pipeline_mode = #tpu.pipeline_mode<synchronous>, transform_indices = @transform_4, window_bounds = array<i64: 512, 128>}, {transform_indices = @transform_5, window_bounds = array<i64: 8, 128>}]} {
    %c0 = arith.constant 0 : index
    %c0_0 = arith.constant 0 : index
    %0 = vector.load %arg2[%c0, %c0_0] : memref<8x256xf32, #tpu.memory_space<vmem>>, vector<8x256xf32>
    %c0_1 = arith.constant 0 : index
    %c0_2 = arith.constant 0 : index
    %1 = vector.load %arg3[%c0_1, %c0_2] : memref<8x256xf32, #tpu.memory_space<vmem>>, vector<8x256xf32>
    %2 = tpu.concatenate %0, %1 in 0 : vector<8x256xf32>, vector<8x256xf32> -> vector<16x256xf32>
    %cst = arith.constant 0.000000e+00 : f32
    %3 = vector.broadcast %cst : f32 to vector<8x1024xf32>
    %4 = vector.extract_strided_slice %2 {offsets = [0, 0], sizes = [8, 256], strides = [1, 1]} : vector<16x256xf32> to vector<8x256xf32>
    %5 = arith.truncf %4 : vector<8x256xf32> to vector<8x256xbf16>
    %c0_3 = arith.constant 0 : index
    %c0_4 = arith.constant 0 : index
    %6 = vector.load %arg4[%c0_3, %c0_4] : memref<1024x1024xbf16, #tpu.memory_space<vmem>>, vector<256x1024xbf16>
    %cst_5 = arith.constant dense<0.000000e+00> : vector<8x1024xf32>
    %7 = tpu.matmul %5, %6, %cst_5 {dimension_numbers = #tpu.dot_dimension_numbers<[1], [0], [0], [1], [0, 0, 1, 1], [], []>} : vector<8x256xbf16>, vector<256x1024xbf16>, vector<8x1024xf32> -> vector<8x1024xf32>
    %8 = arith.addf %3, %7 : vector<8x1024xf32>
    %9 = vector.extract_strided_slice %2 {offsets = [1, 0], sizes = [8, 256], strides = [1, 1]} : vector<16x256xf32> to vector<8x256xf32>
    %10 = arith.truncf %9 : vector<8x256xf32> to vector<8x256xbf16>
    %c256 = arith.constant 256 : index
    %c0_6 = arith.constant 0 : index
    %11 = vector.load %arg4[%c256, %c0_6] : memref<1024x1024xbf16, #tpu.memory_space<vmem>>, vector<256x1024xbf16>
    %cst_7 = arith.constant dense<0.000000e+00> : vector<8x1024xf32>
    %12 = tpu.matmul %10, %11, %cst_7 {dimension_numbers = #tpu.dot_dimension_numbers<[1], [0], [0], [1], [0, 0, 1, 1], [], []>} : vector<8x256xbf16>, vector<256x1024xbf16>, vector<8x1024xf32> -> vector<8x1024xf32>
    %13 = arith.addf %8, %12 : vector<8x1024xf32>
    %14 = vector.extract_strided_slice %2 {offsets = [2, 0], sizes = [8, 256], strides = [1, 1]} : vector<16x256xf32> to vector<8x256xf32>
    %15 = arith.truncf %14 : vector<8x256xf32> to vector<8x256xbf16>
    %c512 = arith.constant 512 : index
    %c0_8 = arith.constant 0 : index
    %16 = vector.load %arg4[%c512, %c0_8] : memref<1024x1024xbf16, #tpu.memory_space<vmem>>, vector<256x1024xbf16>
    %cst_9 = arith.constant dense<0.000000e+00> : vector<8x1024xf32>
    %17 = tpu.matmul %15, %16, %cst_9 {dimension_numbers = #tpu.dot_dimension_numbers<[1], [0], [0], [1], [0, 0, 1, 1], [], []>} : vector<8x256xbf16>, vector<256x1024xbf16>, vector<8x1024xf32> -> vector<8x1024xf32>
    %18 = arith.addf %13, %17 : vector<8x1024xf32>
    %19 = vector.extract_strided_slice %2 {offsets = [3, 0], sizes = [8, 256], strides = [1, 1]} : vector<16x256xf32> to vector<8x256xf32>
    %20 = arith.truncf %19 : vector<8x256xf32> to vector<8x256xbf16>
    %c768 = arith.constant 768 : index
    %c0_10 = arith.constant 0 : index
    %21 = vector.load %arg4[%c768, %c0_10] : memref<1024x1024xbf16, #tpu.memory_space<vmem>>, vector<256x1024xbf16>
    %cst_11 = arith.constant dense<0.000000e+00> : vector<8x1024xf32>
    %22 = tpu.matmul %20, %21, %cst_11 {dimension_numbers = #tpu.dot_dimension_numbers<[1], [0], [0], [1], [0, 0, 1, 1], [], []>} : vector<8x256xbf16>, vector<256x1024xbf16>, vector<8x1024xf32> -> vector<8x1024xf32>
    %23 = arith.addf %18, %22 : vector<8x1024xf32>
    %24 = vector.extract_strided_slice %23 {offsets = [0, 0], sizes = [8, 512], strides = [1, 1]} : vector<8x1024xf32> to vector<8x512xf32>
    %25 = vector.extract_strided_slice %23 {offsets = [0, 512], sizes = [8, 512], strides = [1, 1]} : vector<8x1024xf32> to vector<8x512xf32>
    %26 = arith.mulf %24, %24 : vector<8x512xf32>
    %27 = arith.mulf %25, %25 : vector<8x512xf32>
    %28 = arith.addf %26, %27 : vector<8x512xf32>
    %29 = arith.truncf %28 : vector<8x512xf32> to vector<8x512xbf16>
    %c0_12 = arith.constant 0 : index
    %c0_13 = arith.constant 0 : index
    %30 = vector.load %arg5[%c0_12, %c0_13] : memref<512x128xbf16, #tpu.memory_space<vmem>>, vector<512x128xbf16>
    %cst_14 = arith.constant dense<0.000000e+00> : vector<8x128xf32>
    %31 = tpu.matmul %29, %30, %cst_14 {dimension_numbers = #tpu.dot_dimension_numbers<[1], [0], [0], [1], [0, 0, 1, 1], [], []>} : vector<8x512xbf16>, vector<512x128xbf16>, vector<8x128xf32> -> vector<8x128xf32>
    %c0_15 = arith.constant 0 : index
    %32 = memref.load %arg1[%c0_15] : memref<1xf32, #tpu.memory_space<smem>>
    %33 = vector.broadcast %32 : f32 to vector<8x128xf32>
    %34 = arith.mulf %31, %33 : vector<8x128xf32>
    %cst_16 = arith.constant 1.000000e-07 : f32
    %35 = vector.broadcast %cst_16 : f32 to vector<8x128xf32>
    %36 = arith.maximumf %34, %35 : vector<8x128xf32>
    %37 = math.log %36 : vector<8x128xf32>
    %c0_17 = arith.constant 0 : index
    %c0_18 = arith.constant 0 : index
    %38 = vector.load %arg6[%c0_17, %c0_18] : memref<8x128xf32, #tpu.memory_space<vmem>>, vector<8x128xf32>
    tpu.vector_store %arg6[%c0_17, %c0_18], %37 {strides = array<i32>} : memref<8x128xf32, #tpu.memory_space<vmem>>, vector<8x128xf32>,
    return
  }
  func.func @transform_0(%arg0: i32) -> i32 {
    %c0_i32 = arith.constant 0 : i32
    %c0_i32_0 = arith.constant 0 : i32
    return %c0_i32 : i32
  }
  func.func @transform_1(%arg0: i32) -> (i32, i32) {
    %c0_i32 = arith.constant 0 : i32
    %c0_i32_0 = arith.constant 0 : i32
    return %arg0, %c0_i32 : i32, i32
  }
  func.func @transform_2(%arg0: i32) -> (i32, i32) {
    %c1_i32 = arith.constant 1 : i32
    %0 = arith.addi %arg0, %c1_i32 : i32
    %c1_i32_0 = arith.constant 1 : i32
    %1 = arith.muli %0, %c1_i32_0 : i32
    %c0_i32 = arith.constant 0 : i32
    %c0_i32_1 = arith.constant 0 : i32
    return %1, %c0_i32 : i32, i32
  }
  func.func @transform_3(%arg0: i32) -> (i32, i32) {
    %c0_i32 = arith.constant 0 : i32
    %c0_i32_0 = arith.constant 0 : i32
    %c0_i32_1 = arith.constant 0 : i32
    return %c0_i32, %c0_i32_0 : i32, i32
  }
  func.func @transform_4(%arg0: i32) -> (i32, i32) {
    %c0_i32 = arith.constant 0 : i32
    %c0_i32_0 = arith.constant 0 : i32
    %c0_i32_1 = arith.constant 0 : i32
    return %c0_i32, %c0_i32_0 : i32, i32
  }
  func.func @transform_5(%arg0: i32) -> (i32, i32) {
    %c0_i32 = arith.constant 0 : i32
    %c0_i32_0 = arith.constant 0 : i32
    return %arg0, %c0_i32 : i32, i32
  }
}

module attributes {stable_mosaic.version = 11 : i64} {
  func.func @logmel_kernel(%arg0: i32, %arg1: memref<1xf32, #tpu.memory_space<smem>>, %arg2: memref<8x256xf32, #tpu.memory_space<vmem>>, %arg3: memref<8x256xf32, #tpu.memory_space<vmem>>, %arg4: memref<1024x1024xbf16, #tpu.memory_space<vmem>>, %arg5: memref<512x128xbf16, #tpu.memory_space<vmem>>, %arg6: memref<8x128xf32, #tpu.memory_space<vmem>>) attributes {dimension_semantics = [#tpu.dimension_semantics<parallel>], iteration_bounds = array<i64: 2>, scalar_prefetch = 0 : i64, scratch_operands = 0 : i64, tpu.core_type = #tpu.core_type<tc>, window_params = [{transform_indices = @transform_0, window_bounds = array<i64: 1>}, {transform_indices = @transform_1, window_bounds = array<i64: 8, 256>}, {transform_indices = @transform_2, window_bounds = array<i64: 8, 256>}, {pipeline_mode = #tpu.pipeline_mode<synchronous>, transform_indices = @transform_3, window_bounds = array<i64: 1024, 1024>}, {pipeline_mode = #tpu.pipeline_mode<synchronous>, transform_indices = @transform_4, window_bounds = array<i64: 512, 128>}, {transform_indices = @transform_5, window_bounds = array<i64: 8, 128>}]} {
    %c0 = arith.constant 0 : index
    %c0_0 = arith.constant 0 : index
    %0 = vector.load %arg2[%c0, %c0_0] : memref<8x256xf32, #tpu.memory_space<vmem>>, vector<8x256xf32>
    %c0_1 = arith.constant 0 : index
    %c0_2 = arith.constant 0 : index
    %1 = vector.load %arg3[%c0_1, %c0_2] : memref<8x256xf32, #tpu.memory_space<vmem>>, vector<8x256xf32>
    %2 = tpu.concatenate %0, %1 in 0 : vector<8x256xf32>, vector<8x256xf32> -> vector<16x256xf32>
    %cst = arith.constant 0.000000e+00 : f32
    %3 = vector.broadcast %cst : f32 to vector<8x1024xf32>
    %4 = vector.extract_strided_slice %2 {offsets = [0, 0], sizes = [8, 256], strides = [1, 1]} : vector<16x256xf32> to vector<8x256xf32>
    %5 = arith.truncf %4 : vector<8x256xf32> to vector<8x256xbf16>
    %c0_3 = arith.constant 0 : index
    %c0_4 = arith.constant 0 : index
    %6 = vector.load %arg4[%c0_3, %c0_4] : memref<1024x1024xbf16, #tpu.memory_space<vmem>>, vector<256x1024xbf16>
    %cst_5 = arith.constant dense<0.000000e+00> : vector<8x1024xf32>
    %7 = tpu.matmul %5, %6, %cst_5 {dimension_numbers = #tpu.dot_dimension_numbers<[1], [0], [0], [1], [0, 0, 1, 1], [], []>} : vector<8x256xbf16>, vector<256x1024xbf16>, vector<8x1024xf32> -> vector<8x1024xf32>
    %8 = arith.addf %3, %7 : vector<8x1024xf32>
    %9 = vector.extract_strided_slice %2 {offsets = [1, 0], sizes = [8, 256], strides = [1, 1]} : vector<16x256xf32> to vector<8x256xf32>
    %10 = arith.truncf %9 : vector<8x256xf32> to vector<8x256xbf16>
    %c256 = arith.constant 256 : index
    %c0_6 = arith.constant 0 : index
    %11 = vector.load %arg4[%c256, %c0_6] : memref<1024x1024xbf16, #tpu.memory_space<vmem>>, vector<256x1024xbf16>
    %cst_7 = arith.constant dense<0.000000e+00> : vector<8x1024xf32>
    %12 = tpu.matmul %10, %11, %cst_7 {dimension_numbers = #tpu.dot_dimension_numbers<[1], [0], [0], [1], [0, 0, 1, 1], [], []>} : vector<8x256xbf16>, vector<256x1024xbf16>, vector<8x1024xf32> -> vector<8x1024xf32>
    %13 = arith.addf %8, %12 : vector<8x1024xf32>
    %14 = vector.extract_strided_slice %2 {offsets = [2, 0], sizes = [8, 256], strides = [1, 1]} : vector<16x256xf32> to vector<8x256xf32>
    %15 = arith.truncf %14 : vector<8x256xf32> to vector<8x256xbf16>
    %c512 = arith.constant 512 : index
    %c0_8 = arith.constant 0 : index
    %16 = vector.load %arg4[%c512, %c0_8] : memref<1024x1024xbf16, #tpu.memory_space<vmem>>, vector<256x1024xbf16>
    %cst_9 = arith.constant dense<0.000000e+00> : vector<8x1024xf32>
    %17 = tpu.matmul %15, %16, %cst_9 {dimension_numbers = #tpu.dot_dimension_numbers<[1], [0], [0], [1], [0, 0, 1, 1], [], []>} : vector<8x256xbf16>, vector<256x1024xbf16>, vector<8x1024xf32> -> vector<8x1024xf32>
    %18 = arith.addf %13, %17 : vector<8x1024xf32>
    %19 = vector.extract_strided_slice %2 {offsets = [3, 0], sizes = [8, 256], strides = [1, 1]} : vector<16x256xf32> to vector<8x256xf32>
    %20 = arith.truncf %19 : vector<8x256xf32> to vector<8x256xbf16>
    %c768 = arith.constant 768 : index
    %c0_10 = arith.constant 0 : index
    %21 = vector.load %arg4[%c768, %c0_10] : memref<1024x1024xbf16, #tpu.memory_space<vmem>>, vector<256x1024xbf16>
    %cst_11 = arith.constant dense<0.000000e+00> : vector<8x1024xf32>
    %22 = tpu.matmul %20, %21, %cst_11 {dimension_numbers = #tpu.dot_dimension_numbers<[1], [0], [0], [1], [0, 0, 1, 1], [], []>} : vector<8x256xbf16>, vector<256x1024xbf16>, vector<8x1024xf32> -> vector<8x1024xf32>
    %23 = arith.addf %18, %22 : vector<8x1024xf32>
    %24 = vector.extract_strided_slice %23 {offsets = [0, 0], sizes = [8, 512], strides = [1, 1]} : vector<8x1024xf32> to vector<8x512xf32>
    %25 = vector.extract_strided_slice %23 {offsets = [0, 512], sizes = [8, 512], strides = [1, 1]} : vector<8x1024xf32> to vector<8x512xf32>
    %26 = arith.mulf %24, %24 : vector<8x512xf32>
    %27 = arith.mulf %25, %25 : vector<8x512xf32>
    %28 = arith.addf %26, %27 : vector<8x512xf32>
    %29 = arith.truncf %28 : vector<8x512xf32> to vector<8x512xbf16>
    %c0_12 = arith.constant 0 : index
    %c0_13 = arith.constant 0 : index
    %30 = vector.load %arg5[%c0_12, %c0_13] : memref<512x128xbf16, #tpu.memory_space<vmem>>, vector<512x128xbf16>
    %cst_14 = arith.constant dense<0.000000e+00> : vector<8x128xf32>
    %31 = tpu.matmul %29, %30, %cst_14 {dimension_numbers = #tpu.dot_dimension_numbers<[1], [0], [0], [1], [0, 0, 1, 1], [], []>} : vector<8x512xbf16>, vector<512x128xbf16>, vector<8x128xf32> -> vector<8x128xf32>
    %c0_15 = arith.constant 0 : index
    %32 = memref.load %arg1[%c0_15] : memref<1xf32, #tpu.memory_space<smem>>
    %33 = vector.broadcast %32 : f32 to vector<8x128xf32>
    %34 = arith.mulf %31, %33 : vector<8x128xf32>
    %cst_16 = arith.constant 1.000000e-07 : f32
    %35 = vector.broadcast %cst_16 : f32 to vector<8x128xf32>
    %36 = arith.maximumf %34, %35 : vector<8x128xf32>
    %37 = math.log %36 : vector<8x128xf32>
    %c0_17 = arith.constant 0 : index
    %c0_18 = arith.constant 0 : index
    %38 = vector.load %arg6[%c0_17, %c0_18] : memref<8x128xf32, #tpu.memory_space<vmem>>, vector<8x128xf32>
    tpu.vector_store %arg6[%c0_17, %c0_18], %37 {strides = array<i32>} : memref<8x128xf32, #tpu.memory_space<vmem>>, vector<8x128xf32>,
    return
  }
  func.func @transform_0(%arg0: i32) -> i32 {
    %c0_i32 = arith.constant 0 : i32
    %c0_i32_0 = arith.constant 0 : i32
    return %c0_i32 : i32
  }
  func.func @transform_1(%arg0: i32) -> (i32, i32) {
    %c0_i32 = arith.constant 0 : i32
    %c0_i32_0 = arith.constant 0 : i32
    return %arg0, %c0_i32 : i32, i32
  }
  func.func @transform_2(%arg0: i32) -> (i32, i32) {
    %c1_i32 = arith.constant 1 : i32
    %0 = arith.addi %arg0, %c1_i32 : i32
    %c1_i32_0 = arith.constant 1 : i32
    %1 = arith.muli %0, %c1_i32_0 : i32
    %c0_i32 = arith.constant 0 : i32
    %c0_i32_1 = arith.constant 0 : i32
    return %1, %c0_i32 : i32, i32
  }
  func.func @transform_3(%arg0: i32) -> (i32, i32) {
    %c0_i32 = arith.constant 0 : i32
    %c0_i32_0 = arith.constant 0 : i32
    %c0_i32_1 = arith.constant 0 : i32
    return %c0_i32, %c0_i32_0 : i32, i32
  }
  func.func @transform_4(%arg0: i32) -> (i32, i32) {
    %c0_i32 = arith.constant 0 : i32
    %c0_i32_0 = arith.constant 0 : i32
    %c0_i32_1 = arith.constant 0 : i32
    return %c0_i32, %c0_i32_0 : i32, i32
  }
  func.func @transform_5(%arg0: i32) -> (i32, i32) {
    %c0_i32 = arith.constant 0 : i32
    %c0_i32_0 = arith.constant 0 : i32
    return %arg0, %c0_i32 : i32, i32
  }
}

</mosaic_0001>

<bundles_post_ra>
// kernel: tpu_custom_call.1
= control target key start
LH: loop header
LB: loop body
LE: loop exit
PB: predicated region body
PF: predicated region fallthrough
CT: control target
= control target key end

     0   :  { %s5989_s0 = inlined_call_operand.<no memory space> [shape: f32[1], index: 0, kind: input, shape index: {}]   ;;  %s5990_s1 = inlined_call_operand.hbm [shape: f32[24,256], index: 1, kind: input, shape index: {}]   ;;  %s5991_s2 = inlined_call_operand.hbm [shape: f32[24,256], index: 2, kind: input, shape index: {}]   ;;  %s5992_s3 = inlined_call_operand.hbm [shape: bf16[1024,1024], index: 3, kind: input, shape index: {}]   ;;  %s5993_s4 = inlined_call_operand.hbm [shape: bf16[512,128], index: 4, kind: input, shape index: {}]   ;;  %s5994_s5 = inlined_call_operand.hbm [shape: f32[16,128], index: 5, kind: output, shape index: {}]  }
   0x1   :  { %6003 = sst [smem:[#allocation17_spill]] %s5990_s1 }
   0x2   :  { %6004 = sst [smem:[#allocation18_spill]] %s5992_s3 }
   0x3   :  { %6005 = sst [smem:[#allocation19_spill]] %s5993_s4 }
   0x4   :  { %10 = sst [smem:[#allocation2]] %s5989_s0 }
   0x5   :  { %11 = vsyncpa [#allocation4], 0 }
   0x6   :  { %13 = vsyncpa [#allocation4 + $0x1], 0 }
   0x7   :  { %14 = vsyncpa [#allocation7], 0 }
   0x8   :  { %16 = vsyncpa [#allocation7 + $0x1], 0 }
   0x9   :  { %17 = vsyncpa [#allocation10], 0 }
   0xa   :  { %18 = vsyncpa [#allocation5], 0 }
   0xb   :  { %20 = vsyncpa [#allocation5 + $0x1], 0  ;;  %s5578_s20 = smov 0   ;;  %s5580_s21 = smov 0  }
   0xc   :  { %s5582_s22 = smov 0   ;;  %s5584_s23 = smov 0  }
   0xd   :  { %s5586_s24 = smov 0   ;;  %s5588_s25 = smov 0  }
   0xe   :  { %s5590_s0 = smov 0  }
   0xf LB: > { %s5536_s26 = smov [#allocation8]   ;;  %s5614_s28 = sadd.s32 4294967295, %s5534_s0   ;;  %s5534_s0 = sphi %s5590_s0, %s6038_s0   ;;  %s5530_s25 = sphi %s5588_s25, %s6037_s25   ;;  %s5526_s24 = sphi %s5586_s24, %s6036_s24   ;;  %s5522_s23 = sphi %s5584_s23, %s6035_s23   ;;  %s5518_s22 = sphi %s5582_s22, %s6034_s22   ;;  %s5514_s21 = sphi %s5580_s21, %s6033_s21   ;;  %s5510_s20 = sphi %s5578_s20, %s6032_s20  }
  0x10   : > { %s189_s27 = sshll.u32 %s5536_s26, 4  ;;  %p4583_p0 = scmp.ge.s32.totalorder %s5534_s0, 1  ;;  %s190_s27 = int_to_ptr.vmem [resolvable:$true] %s189_s27 }
  0x11   : > { %p5997_p1 = scmp.eq.s32.totalorder %s5614_s28, 0  ;;  %p174_p2 = scmp.lt.s32.totalorder %s5534_s0, 3 }
  0x12   : > { %s5537_s30 = smov [#allocation9]   ;;  %s5336_s8 = scalar_lea.vmem %s190_s27, 65536 }
  0x13   : > { %p5619_p3 = pnand %p4583_p0, %p174_p2  ;;  %s202_s6 = sshll.u32 %s5537_s30, 4  ;;  %s203_s6 = int_to_ptr.vmem [resolvable:$true] %s202_s6 }
  0x14   : > { %p5337_p8 = scmp.ne.s32.totalorder %s190_s27, %s5336_s8  ;;  %p5344_p11 = scmp.lt.s32.totalorder %s190_s27, %s190_s27 }
  0x15   : > { %s6006_s29 = scalar_select %p5619_p3, 1, 0 }
  0x16   : > { %p5205_p5 = pneg %p5619_p3  ;;  %p5345_p12 = scmp.lt.s32.totalorder %s5336_s8, %s5336_s8 }
  0x18   : > { %p5628_p6 = pnand %p5205_p5, %p5997_p1  ;;  %p5346_p13 = por %p5345_p12, %p5344_p11 }
  0x1a   : > { %p5327_p7 = pneg %p5628_p6 }
  0x1c   : > { %p5339_p9 = pnand %p5337_p8, %p5327_p7 }
  0x1e   : > { %p5340_p10 = pneg %p5339_p9 }
  0x20   : > { %p5347_p0 = pnand %p5346_p13, %p5340_p10 }
  0x22   : > { %5350 = shalt.err (!%p5347_p0)
}
  0x23   : > { %s5538_s9 = smov 512   ;;  %s5539_s10 = smov 32  }
  0x24   : > { %s6008_s3 = sld [smem:[#allocation18_spill]]  ;;  %s5362_s13 = scalar_lea.vmem %s203_s6, 4096 }
  0x25   : > { %p5363_p2 = scmp.ne.s32.totalorder %s203_s6, %s5362_s13  ;;  %p5370_p9 = scmp.lt.s32.totalorder %s203_s6, %s203_s6 }
  0x26   : > { %p5371_p4 = scmp.lt.s32.totalorder %s5362_s13, %s5362_s13 }
  0x27   : > { %p5365_p5 = pnand %p5363_p2, %p5327_p7 }
  0x28   : > { %p5372_p11 = por %p5371_p4, %p5370_p9 }
  0x29   : > { %p5366_p8 = pneg %p5365_p5 }
  0x2a   : > { %5208 = dma.hbm_to_vmem [thread:$0]  (!%p5628_p6), %s6008_s3, 65536, %s190_s27, [#allocation7], %s5538_s9, %s5538_s9, %s5539_s10  }
  0x2b   : > { %p5373_p10 = pnand %p5372_p11, %p5366_p8 }
  0x2d   : > { %5376 = shalt.err (!%p5373_p10)
}
  0x2e   : > { %s5540_s14 = smov 64   ;;  %s5541_s15 = smov 4  }
  0x2f   : > { %s6009_s4 = sld [smem:[#allocation19_spill]]  ;;  %s4582_s18 = sadd.s32 4294967294, %s5534_s0  }
  0x30   : > { %s5652_s19 = sadd.s32 1, %s5534_s0   ;;  %s54_s27 = sadd.s32 1, %s5530_s25 }
  0x31   : > { %s51_s26 = ssub.s32 %s5534_s0, %s5652_s19  ;;  %p61_p7 = scmp.ne.s32.totalorder %s5530_s25, %s5526_s24 }
  0x32   : > { %p52_p4 = scmp.eq.s32.totalorder %s51_s26, 0  ;;  %p5998_p12 = scmp.eq.s32.totalorder %s5534_s0, 0 }
  0x33   : > { %p67_p13 = scmp.ne.s32.totalorder %s5526_s24, %s5522_s23  ;;  %p161_p2 = scmp.eq.s32.totalorder %s5614_s28, 1 }
  0x34   : > { %s5663_s30 = scalar_select %p52_p4, %s5530_s25, %s54_s27  }
  0x35   : > { %5211 = dma.hbm_to_vmem [thread:$0]  (!%p5628_p6), %s6009_s4, 4096, %s203_s6, [#allocation10], %s5540_s14, %s5540_s14, %s5541_s15  }
  0x36   : > { %p5667_p0 = por %p5998_p12, %p61_p7  ;;  %p5673_p6 = por %p5997_p1, %p67_p13 }
  0x37   : > { %p167_p5 = scmp.eq.s32.totalorder %s4582_s18, 1  ;;  %p5996_p8 = scmp.lt.s32.totalorder %s5534_s0, 2 }
  0x38   : > { %s6011_s6 = scalar_select %p5673_p6, 1, 0 }
  0x39   : > { %s216_s8 = sand.u32 1, %s5530_s25   ;;  %p5680_p9 = por %p161_p2, %p61_p7 }
  0x3a   : > { %p5684_p11 = por %p167_p5, %p67_p13  ;;  %s4587_s11 = sshll.u32 %s216_s8, 4 }
  0x3b   : > { %s6012_s9 = scalar_select %p5680_p9, 1, 0 }
  0x3c   : > { %s6013_s10 = scalar_select %p5684_p11, 1, 0 }
  0x3d   : > { %s5995_s12 = sshll.u32 %s5534_s0, 8  ;;  %s6014_s1 = sld [smem:[#allocation17_spill]] }
  0x3e   : > { %s220_s16 = scalar_lea.vmem [#allocation3], %s4587_s11  ;;  %p5700_p10 = pnand %p5996_p8, %p5667_p0 }
  0x3f   : > { %s228_s17 = sshll.u32 %s220_s16, 4  ;;  %s217_s26 = scalar_lea.sflag [#allocation4], %s216_s8  ;;  %s229_s17 = int_to_ptr.vmem [resolvable:$true] %s228_s17 }
  0x40   : > { %p5379_p7 = pneg %p5700_p10 }
  0x43   : > { %s5694_s15 = scalar_lea.hbm %s6014_s1, %s5995_s12  ;;  %s5382_s11 = scalar_lea.hbm %s6014_s1, 768 }
  0x44   : > { %s5377_s27 = scalar_lea.hbm %s5694_s15, 256  ;;  %p5383_p5 = scmp.lt.s32.totalorder %s5694_s15, %s6014_s1 }
  0x45   : > { %p5378_p4 = scmp.ne.s32.totalorder %s5694_s15, %s5377_s27  ;;  %p5384_p0 = scmp.lt.s32.totalorder %s5382_s11, %s5377_s27 }
  0x47   : > { %p5380_p13 = pnand %p5379_p7, %p5378_p4  ;;  %p5385_p8 = por %p5384_p0, %p5383_p5 }
  0x49   : > { %p5381_p2 = pneg %p5380_p13 }
  0x4b   : > { %p5386_p1 = pnand %p5385_p8, %p5381_p2 }
  0x4d   : > { %5389 = shalt.err (!%p5386_p1)
}
  0x4e   : > { %s5390_s7 = scalar_lea.vmem %s229_s17, 256  ;;  %s5542_s8 = smov [#allocation3]  }
  0x4f   : > { %p5391_p12 = scmp.ne.s32.totalorder %s229_s17, %s5390_s7  ;;  %s5395_s3 = sshll.u32 %s5542_s8, 4  ;;  %s5396_s3 = int_to_ptr.vmem [resolvable:$false] %s5395_s3 }
  0x50   : > { %s5397_s4 = scalar_lea.vmem %s5396_s3, 512  ;;  %p5398_p4 = scmp.lt.s32.totalorder %s229_s17, %s5396_s3 }
  0x51   : > { %p5393_p11 = pnand %p5391_p12, %p5379_p7  ;;  %p5399_p13 = scmp.lt.s32.totalorder %s5397_s4, %s5390_s7 }
  0x53   : > { %p5394_p9 = pneg %p5393_p11  ;;  %p5400_p6 = por %p5399_p13, %p5398_p4 }
  0x55   : > { %p5401_p3 = pnand %p5400_p6, %p5394_p9 }
  0x57   : > { %5404 = shalt.err (!%p5401_p3)
}
  0x58   : > { %5215 = dma.hbm_to_vmem [thread:$0]  (!%p5700_p10), %s5694_s15, 256, %s229_s17, %s217_s26  }
  0x59   : > { %s78_s3 = sadd.s32 1, %s5652_s19  ;;  %s82_s4 = sadd.s32 1, %s5518_s22 }
  0x5a   : > { %s79_s12 = ssub.s32 %s5652_s19, %s78_s3  ;;  %p89_p1 = scmp.ne.s32.totalorder %s5518_s22, %s5514_s21 }
  0x5b   : > { %p80_p3 = scmp.eq.s32.totalorder %s79_s12, 0  ;;  %p95_p12 = scmp.ne.s32.totalorder %s5514_s21, %s5510_s20 }
  0x5c   : > { %p6016_p6 = scmp.eq.s32.totalorder %s5534_s0, 0  ;;  %s235_s18 = sand.u32 1, %s5534_s0  }
  0x5d   : > { %s5729_s27 = scalar_select %p80_p3, %s5518_s22, %s82_s4  }
  0x5e   : > { %p91_p8 = por %p89_p1, %p6016_p6  ;;  %s6017_s13 = sshll.u32 %s5534_s0, 8 }
  0x5f   : > { %s4506_s16 = scalar_lea.hbm %s5991_s2, %s6017_s13  ;;  %p6018_p9 = scmp.eq.s32.totalorder %s5614_s28, 0 }
  0x60   : > { %s237_s15 = sand.u32 1, %s5518_s22   ;;  %p6020_p10 = scmp.lt.s32.totalorder %s5534_s0, 2 }
  0x61   : > { %p5738_p11 = por %p95_p12, %p6018_p9  ;;  %s4590_s17 = sshll.u32 %s237_s15, 4 }
  0x62   : > { %p5745_p7 = pnand %p6020_p10, %p91_p8  ;;  %s5749_s26 = scalar_lea.hbm %s4506_s16, 256 }
  0x63   : > { %s6019_s7 = scalar_select %p5738_p11, 1, 0 }
  0x64   : > { %s239_s8 = scalar_lea.vmem [#allocation6], %s4590_s17  ;;  %s236_s4 = scalar_lea.sflag [#allocation7], %s235_s18 }
  0x65   : > { %s248_s3 = sshll.u32 %s239_s8, 4  ;;  %s5433_s12 = scalar_lea.hbm %s4506_s16, 512  ;;  %s249_s3 = int_to_ptr.vmem [resolvable:$true] %s248_s3 }
  0x66   : > { %p5406_p2 = scmp.ne.s32.totalorder %s5749_s26, %s5433_s12  ;;  %p5407_p5 = pneg %p5745_p7 }
  0x67   : > { %s5410_s11 = scalar_lea.hbm %s5991_s2, 768  ;;  %p5411_p13 = scmp.lt.s32.totalorder %s5749_s26, %s5991_s2 }
  0x68   : > { %p5408_p0 = pnand %p5407_p5, %p5406_p2  ;;  %p5412_p1 = scmp.lt.s32.totalorder %s5410_s11, %s5433_s12 }
  0x6a   : > { %p5409_p4 = pneg %p5408_p0  ;;  %p5413_p3 = por %p5412_p1, %p5411_p13 }
  0x6c   : > { %p5414_p12 = pnand %p5413_p3, %p5409_p4 }
  0x6e   : > { %5417 = shalt.err (!%p5414_p12)
}
  0x6f   : > { %s5418_s17 = scalar_lea.vmem %s249_s3, 256  ;;  %s5543_s18 = smov [#allocation6]  }
  0x70   : > { %p5419_p6 = scmp.ne.s32.totalorder %s249_s3, %s5418_s17  ;;  %s5423_s16 = sshll.u32 %s5543_s18, 4  ;;  %s5424_s16 = int_to_ptr.vmem [resolvable:$false] %s5423_s16 }
  0x71   : > { %s5425_s8 = scalar_lea.vmem %s5424_s16, 512  ;;  %p5426_p10 = scmp.lt.s32.totalorder %s249_s3, %s5424_s16 }
  0x72   : > { %p5421_p8 = pnand %p5419_p6, %p5407_p5  ;;  %p5427_p2 = scmp.lt.s32.totalorder %s5425_s8, %s5418_s17 }
  0x74   : > { %p5422_p9 = pneg %p5421_p8  ;;  %p5428_p0 = por %p5427_p2, %p5426_p10 }
  0x76   : > { %p5429_p11 = pnand %p5428_p0, %p5422_p9 }
  0x78   : > { %5432 = shalt.err (!%p5429_p11)
}
  0x79   : > { %5218 = dma.hbm_to_vmem [thread:$0]  (!%p5745_p7), %s5749_s26, 256, %s249_s3, %s236_s4  }
  0x7a   : > { %p6022_p4 = scmp.ne.s32.totalorder %s6006_s29, 0 }
  0x7b   : > { %s5767_s1 = sand.u32 (!%p6022_p4), 1, %s5526_s24   ;;  %p6023_p5 = scmp.ne.s32.totalorder (!%p6022_p4), %s6011_s6, 0 }
  0x7c   : > { %257 = sbr.rel (%p6022_p4) target bundleno = 1093 (0x445), region = 40  ;;  %s4593_s12 = sshll.u32 (!%p6022_p4), %s5767_s1, 4 }
  0x7d   : > { %s260_s13 = scalar_lea.sflag (!%p6022_p4), [#allocation4], %s5767_s1  ;;  %s5771_s14 = scalar_lea.vmem (!%p6022_p4), [#allocation3], %s4593_s12 }
  0x81   : > { %5489 = dma.done.wait (%p6023_p5), %s260_s13, 256  }
  0x82   : > { %5491 = vsyncadd (%p6023_p5), %s260_s13, 4294967040  ;;  %s268_s29 = sand.u32 1, %s5614_s28   ;;  %s270_s20 = sand.u32 1, %s5514_s21  }
  0x83   : > { %s5779_s26 = sshll.u32 %s270_s20, 4  ;;  %s269_s3 = scalar_lea.sflag [#allocation7], %s268_s29 }
  0x84   : > { %s272_s4 = scalar_lea.vmem [#allocation6], %s5779_s26  ;;  %p6024_p11 = scmp.ne.s32.totalorder %s6019_s7, 0 }
  0x86   : > { %5493 = dma.done.wait (%p6024_p11), %s269_s3, 256  }
  0x87   : > { %5495 = vsyncadd (%p6024_p11), %s269_s3, 4294967040  ;;  %p6025_p7 = scmp.eq.s32.totalorder %s5614_s28, 0 }
  0x89   : > { %5497 = dma.done.wait (%p6025_p7), [#allocation7], 65536   ;;  %p6026_p13 = pmov %p6025_p7 }
  0x8a   : > { %p6027_p1 = pmov %p6025_p7 }
  0x8b   : > { %5499 = vsyncadd (%p6026_p13), [#allocation7], 4294901760 }
  0x8c   : > { %5501 = dma.done.wait (%p6027_p1), [#allocation10], 4096   ;;  %p6028_p3 = pmov %p6027_p1 }
  0x8d   : > { %v506_v0 = vld [vmem:[#allocation8 + $0x5c0] sm:$0xff]  ;;  %v507_v2 = vld [vmem:[#allocation8 + $0x5c8] sm:$0xff]  ;;  %s4448_s6 = sld [smem:[#allocation2]]  ;;  %s4597_s7 = sshll.u32 %s5767_s1, 3 }
  0x8e   : > { %5503 = vsyncadd (%p6028_p3), [#allocation10], 4294963200  ;;  %v510_v1 = vld [vmem:[#allocation8 + $0x5e0] sm:$0xff]  ;;  %v511_v4 = vld [vmem:[#allocation8 + $0x5e8] sm:$0xff]  ;;  %s5143_s11 = sshll.u32 %s5614_s28, 7  ;;  %s311_s15 = scalar_lea.vmem [#allocation11], %s4597_s7 }
  0x8f   : > { %v4655_v3 = vcombine.high %v506_v0, %v510_v1  ;;  %v4654_v5 = vcombine.low %v506_v0, %v510_v1  ;;  %v498_v6 = vld [vmem:[#allocation8 + $0x580] sm:$0xff]  ;;  %v4657_v8 = vcombine.high %v507_v2, %v511_v4  ;;  %v4656_v9 = vcombine.low %v507_v2, %v511_v4  ;;  %v499_v11 = vld [vmem:[#allocation8 + $0x588] sm:$0xff]  ;;  %s4469_s17 = sshll.u32 %s311_s15, 4  ;;  %s4467_s8 = scalar_lea.hbm %s5994_s5, %s5143_s11  ;;  %s4470_s17 = int_to_ptr.vmem [resolvable:$true] %s4469_s17 }
  0x90   : > { %v502_v7 = vld [vmem:[#allocation8 + $0x5a0] sm:$0xff]  ;;  %v503_v12 = vld [vmem:[#allocation8 + $0x5a8] sm:$0xff]  ;;  %s4456_s12 = scalar_lea.sflag [#allocation5], %s5767_s1  ;;  %s5434_s13 = scalar_lea.vmem %s4470_s17, 128 }
  0x91   : > { %v4647_v10 = vcombine.high %v498_v6, %v502_v7  ;;  %v490_v13 = vld [vmem:[#allocation8 + $0x540] sm:$0xff]  ;;  %1234 = vmatprep.subr.bf16.mxu0 %v4655_v3  ;;  %v4649_v14 = vcombine.high %v499_v11, %v503_v12  ;;  %v491_v16 = vld [vmem:[#allocation8 + $0x548] sm:$0xff]  ;;  %1275 = vmatprep.subr.bf16.mxu1 %v4657_v8  ;;  %v4646_v18 = vcombine.low %v498_v6, %v502_v7  ;;  %p5435_p12 = scmp.ne.s32.totalorder %s4470_s17, %s5434_s13  ;;  %p6029_p6 = scmp.ne.s32.totalorder %s6012_s9, 0 }
  0x92   : > { %v494_v15 = vld [vmem:[#allocation8 + $0x560] sm:$0xff]  ;;  %v495_v17 = vld [vmem:[#allocation8 + $0x568] sm:$0xff]  ;;  %1235 = vmatpush1.bf16.msra.mxu0 %v4654_v5  ;;  %1276 = vmatpush1.bf16.msra.mxu1 %v4656_v9  ;;  %v4648_v19 = vcombine.low %v499_v11, %v503_v12 }
  0x93   : > { %1236 = vmatprep.subr.bf16.mxu0 %v4647_v10  ;;  %v4639_v20 = vcombine.high %v490_v13, %v494_v15  ;;  %1277 = vmatprep.subr.bf16.mxu1 %v4649_v14  ;;  %v4641_v21 = vcombine.high %v491_v16, %v495_v17  ;;  %v482_v22 = vld [vmem:[#allocation8 + $0x500] sm:$0xff]  ;;  %v483_v24 = vld [vmem:[#allocation8 + $0x508] sm:$0xff]  ;;  %v4638_v26 = vcombine.low %v490_v13, %v494_v15  ;;  %p5436_p8 = pnand %p5435_p12, %p6029_p6 }
  0x94   : > { %v486_v23 = vld [vmem:[#allocation8 + $0x520] sm:$0xff]  ;;  %v487_v25 = vld [vmem:[#allocation8 + $0x528] sm:$0xff]  ;;  %v4640_v27 = vcombine.low %v491_v16, %v495_v17 }
  0x95   : > { %v4631_v28 = vcombine.high %v482_v22, %v486_v23  ;;  %v4633_v29 = vcombine.high %v483_v24, %v487_v25  ;;  %v474_v30 = vld [vmem:[#allocation8 + $0x4c0] sm:$0xff]  ;;  %v475_v32 = vld [vmem:[#allocation8 + $0x4c8] sm:$0xff]  ;;  %v4630_v34 = vcombine.low %v482_v22, %v486_v23  ;;  %v4632_v35 = vcombine.low %v483_v24, %v487_v25  ;;  %p5437_p9 = pneg %p5436_p8 }
  0x96   : > { %1237 = vmatpush1.bf16.msra.mxu0 %v4646_v18  ;;  %1278 = vmatpush1.bf16.msra.mxu1 %v4648_v19  ;;  %v478_v31 = vld [vmem:[#allocation8 + $0x4e0] sm:$0xff]  ;;  %v479_v33 = vld [vmem:[#allocation8 + $0x4e8] sm:$0xff] }
  0x97   : > { %1238 = vmatprep.subr.bf16.mxu0 %v4639_v20  ;;  %1279 = vmatprep.subr.bf16.mxu1 %v4641_v21  ;;  %v4623_v36 = vcombine.high %v474_v30, %v478_v31  ;;  %v4625_v37 = vcombine.high %v475_v32, %v479_v33  ;;  %v466_v38 = vld [vmem:[#allocation8 + $0x480] sm:$0xff]  ;;  %v467_v40 = vld [vmem:[#allocation8 + $0x488] sm:$0xff]  ;;  %v4622_v42 = vcombine.low %v474_v30, %v478_v31 }
  0x98   : > { %v470_v39 = vld [vmem:[#allocation8 + $0x4a0] sm:$0xff]  ;;  %v471_v41 = vld [vmem:[#allocation8 + $0x4a8] sm:$0xff]  ;;  %v4624_v43 = vcombine.low %v475_v32, %v479_v33 }
  0x99   : > { %v4615_v44 = vcombine.high %v466_v38, %v470_v39  ;;  %v4617_v45 = vcombine.high %v467_v40, %v471_v41  ;;  %v458_v46 = vld [vmem:[#allocation8 + $0x440] sm:$0xff]  ;;  %v459_v48 = vld [vmem:[#allocation8 + $0x448] sm:$0xff]  ;;  %v4614_v50 = vcombine.low %v466_v38, %v470_v39  ;;  %v4616_v51 = vcombine.low %v467_v40, %v471_v41 }
  0x9a   : > { %1239 = vmatpush1.bf16.msra.mxu0 %v4638_v26  ;;  %1280 = vmatpush1.bf16.msra.mxu1 %v4640_v27  ;;  %v462_v47 = vld [vmem:[#allocation8 + $0x460] sm:$0xff]  ;;  %v463_v49 = vld [vmem:[#allocation8 + $0x468] sm:$0xff] }
  0x9b   : > { %1240 = vmatprep.subr.bf16.mxu0 %v4631_v28  ;;  %1281 = vmatprep.subr.bf16.mxu1 %v4633_v29  ;;  %v4607_v52 = vcombine.high %v458_v46, %v462_v47  ;;  %v5795_v53 = vld [vmem:[%s5771_s14 + $0x8] sm:$0xff]  ;;  %v4609_v55 = vcombine.high %v459_v48, %v463_v49  ;;  %v450_v56 = vld [vmem:[#allocation8 + $0x400] sm:$0xff]  ;;  %v4606_v61 = vcombine.low %v458_v46, %v462_v47 }
  0x9c   : > { %v317_v54 = vld [vmem:[%s272_s4 + $0x8] sm:$0xff]  ;;  %v454_v57 = vld [vmem:[#allocation8 + $0x420] sm:$0xff]  ;;  %v4608_v0 = vcombine.low %v459_v48, %v463_v49 }
  0x9d   : > { %v5800_v58 = vpack.c.bf16 %v317_v54, %v5795_v53  ;;  %v451_v59 = vld [vmem:[#allocation8 + $0x408] sm:$0xff]  ;;  %v4599_v1 = vcombine.high %v450_v56, %v454_v57  ;;  %v570_v3 = vld [vmem:[#allocation8 + $0x7c0] sm:$0xff]  ;;  %v4598_v8 = vcombine.low %v450_v56, %v454_v57 }
  0x9e   : > { %1241 = vmatpush1.bf16.msra.mxu0 %v4630_v34  ;;  %1282 = vmatpush1.bf16.msra.mxu1 %v4632_v35  ;;  %v455_v60 = vld [vmem:[#allocation8 + $0x428] sm:$0xff]  ;;  %v574_v4 = vld [vmem:[#allocation8 + $0x7e0] sm:$0xff] }
  0x9f   : > { %1242 = vmatprep.subr.bf16.mxu0 %v4623_v36  ;;  %1283 = vmatprep.subr.bf16.mxu1 %v4625_v37  ;;  %v586_v62 = vshrl.u32 %v5800_v58, 16  ;;  %v588_v63 = vshll.u32 %v5800_v58, 16  ;;  %v4601_v2 = vcombine.high %v451_v59, %v455_v60  ;;  %v571_v6 = vld [vmem:[#allocation8 + $0x7c8] sm:$0xff]  ;;  %v4600_v10 = vcombine.low %v451_v59, %v455_v60  ;;  %v562_v13 = vld [vmem:[#allocation8 + $0x780] sm:$0xff] }
  0xa0   : > { %v575_v7 = vld [vmem:[#allocation8 + $0x7e8] sm:$0xff]  ;;  %v4719_v11 = vcombine.high %v570_v3, %v574_v4  ;;  %v566_v14 = vld [vmem:[#allocation8 + $0x7a0] sm:$0xff]  ;;  %v4718_v17 = vcombine.low %v570_v3, %v574_v4 }
  0xa1   : > { %v590_v5 = vrot.slane %v588_v63, 1  ;;  %v4721_v12 = vcombine.high %v571_v6, %v575_v7  ;;  %v563_v15 = vld [vmem:[#allocation8 + $0x788] sm:$0xff]  ;;  %v4720_v18 = vcombine.low %v571_v6, %v575_v7  ;;  %v4711_v19 = vcombine.high %v562_v13, %v566_v14  ;;  %v554_v21 = vld [vmem:[#allocation8 + $0x740] sm:$0xff] }
  0xa2   : > { %1243 = vmatpush1.bf16.msra.mxu0 %v4622_v42  ;;  %1284 = vmatpush1.bf16.msra.mxu1 %v4624_v43  ;;  %v567_v16 = vld [vmem:[#allocation8 + $0x7a8] sm:$0xff]  ;;  %v558_v22 = vld [vmem:[#allocation8 + $0x760] sm:$0xff]  ;;  %v4710_v25 = vcombine.low %v562_v13, %v566_v14  ;;  %v508_v14 = vld [vmem:[#allocation8 + $0x5d0] sm:$0xff] }
  0xa3   : > { %1244 = vmatprep.subr.bf16.mxu0 %v4615_v44  ;;  %1285 = vmatprep.subr.bf16.mxu1 %v4617_v45  ;;  %v5808_v9 = vor.u32 %v590_v5, %v586_v62  ;;  %v4713_v20 = vcombine.high %v563_v15, %v567_v16  ;;  %v555_v23 = vld [vmem:[#allocation8 + $0x748] sm:$0xff]  ;;  %v4712_v26 = vcombine.low %v563_v15, %v567_v16  ;;  %v546_v29 = vld [vmem:[#allocation8 + $0x700] sm:$0xff]  ;;  %v512_v15 = vld [vmem:[#allocation8 + $0x5f0] sm:$0xff] }
  0xa4   : > { %v559_v24 = vld [vmem:[#allocation8 + $0x768] sm:$0xff]  ;;  %v4703_v27 = vcombine.high %v554_v21, %v558_v22  ;;  %v550_v30 = vld [vmem:[#allocation8 + $0x720] sm:$0xff]  ;;  %v4702_v33 = vcombine.low %v554_v21, %v558_v22  ;;  %v4659_v22 = vcombine.high %v508_v14, %v512_v15 }
  0xa5   : > { %1266 = vmatprep.mubr.bf16.mxu0 %v5808_v9  ;;  %1307 = vmatprep.mubr.bf16.mxu1 %v5808_v9  ;;  %v4705_v28 = vcombine.high %v555_v23, %v559_v24  ;;  %v547_v31 = vld [vmem:[#allocation8 + $0x708] sm:$0xff]  ;;  %v4704_v34 = vcombine.low %v555_v23, %v559_v24  ;;  %v4695_v35 = vcombine.high %v546_v29, %v550_v30  ;;  %v538_v37 = vld [vmem:[#allocation8 + $0x6c0] sm:$0xff]  ;;  %v500_v24 = vld [vmem:[#allocation8 + $0x590] sm:$0xff] }
  0xa6   : > { %1245 = vmatpush1.bf16.msra.mxu0 %v4614_v50  ;;  %1286 = vmatpush1.bf16.msra.mxu1 %v4616_v51  ;;  %v551_v32 = vld [vmem:[#allocation8 + $0x728] sm:$0xff]  ;;  %v542_v38 = vld [vmem:[#allocation8 + $0x6e0] sm:$0xff]  ;;  %v4694_v41 = vcombine.low %v546_v29, %v550_v30  ;;  %v4658_v29 = vcombine.low %v508_v14, %v512_v15  ;;  %v452_v15 = vld [vmem:[#allocation8 + $0x410] sm:$0xff] }
  0xa7   : > { %1246 = vmatprep.subr.bf16.mxu0 %v4607_v52  ;;  %1287 = vmatprep.subr.bf16.mxu1 %v4609_v55  ;;  %v4697_v36 = vcombine.high %v547_v31, %v551_v32  ;;  %v539_v39 = vld [vmem:[#allocation8 + $0x6c8] sm:$0xff]  ;;  %v4696_v42 = vcombine.low %v547_v31, %v551_v32  ;;  %v4687_v43 = vcombine.high %v538_v37, %v542_v38  ;;  %v530_v45 = vld [vmem:[#allocation8 + $0x680] sm:$0xff]  ;;  %v492_v32 = vld [vmem:[#allocation8 + $0x550] sm:$0xff] }
  0xa8   : > { %v543_v40 = vld [vmem:[#allocation8 + $0x6e8] sm:$0xff]  ;;  %v534_v46 = vld [vmem:[#allocation8 + $0x6a0] sm:$0xff]  ;;  %v4686_v49 = vcombine.low %v538_v37, %v542_v38 }
  0xa9   : > { %v4689_v44 = vcombine.high %v539_v39, %v543_v40  ;;  %v531_v47 = vld [vmem:[#allocation8 + $0x688] sm:$0xff]  ;;  %v5813_v50 = vld [vmem:[%s5771_s14] sm:$0xff]  ;;  %v4688_v52 = vcombine.low %v539_v39, %v543_v40  ;;  %v4679_v54 = vcombine.high %v530_v45, %v534_v46  ;;  %s5544_s14 = smov [#allocation11]  }
  0xaa   : > { %1247 = vmatpush1.bf16.msra.mxu0 %v4606_v61  ;;  %1288 = vmatpush1.bf16.msra.mxu1 %v4608_v0  ;;  %v535_v48 = vld [vmem:[#allocation8 + $0x6a8] sm:$0xff]  ;;  %v316_v51 = vld [vmem:[%s272_s4] sm:$0xff]  ;;  %v4678_v0 = vcombine.low %v530_v45, %v534_v46  ;;  %s5438_s29 = sshll.u32 %s5544_s14, 4  ;;  %s5439_s29 = int_to_ptr.vmem [resolvable:$false] %s5438_s29 }
  0xab   : > { %1248 = vmatprep.subr.bf16.mxu0 %v4599_v1  ;;  %1289 = vmatprep.subr.bf16.mxu1 %v4601_v2  ;;  %v4681_v55 = vcombine.high %v531_v47, %v535_v48  ;;  %v522_v56 = vld [vmem:[#allocation8 + $0x640] sm:$0xff]  ;;  %v523_v59 = vld [vmem:[#allocation8 + $0x648] sm:$0xff]  ;;  %v5818_v61 = vpack.c.bf16 %v316_v51, %v5813_v50  ;;  %v4680_v1 = vcombine.low %v531_v47, %v535_v48  ;;  %v484_v40 = vld [vmem:[#allocation8 + $0x510] sm:$0xff]  ;;  %s5440_s28 = scalar_lea.vmem %s5439_s29, 256  ;;  %p5441_p10 = scmp.lt.s32.totalorder %s4470_s17, %s5439_s29 }
  0xac   : > { %v526_v57 = vld [vmem:[#allocation8 + $0x660] sm:$0xff]  ;;  %v527_v60 = vld [vmem:[#allocation8 + $0x668] sm:$0xff]  ;;  %v476_v48 = vld [vmem:[#allocation8 + $0x4d0] sm:$0xff]  ;;  %p5442_p2 = scmp.lt.s32.totalorder %s5440_s28, %s5434_s13 }
  0xad   : > { %v4671_v2 = vcombine.high %v522_v56, %v526_v57  ;;  %v4673_v3 = vcombine.high %v523_v59, %v527_v60  ;;  %v514_v4 = vld [vmem:[#allocation8 + $0x600] sm:$0xff]  ;;  %v515_v6 = vld [vmem:[#allocation8 + $0x608] sm:$0xff]  ;;  %v579_v16 = vshrl.u32 %v5818_v61, 16  ;;  %v477_v51 = vld [vmem:[#allocation8 + $0x4d8] sm:$0xff] }
  0xae   : > { %1249 = vmatpush1.bf16.msra.mxu0 %v4598_v8  ;;  %1290 = vmatpush1.bf16.msra.mxu1 %v4600_v10  ;;  %v518_v5 = vld [vmem:[#allocation8 + $0x620] sm:$0xff]  ;;  %v519_v7 = vld [vmem:[#allocation8 + $0x628] sm:$0xff]  ;;  %v581_v8 = vshll.u32 %v5818_v61, 16  ;;  %v4670_v10 = vcombine.low %v522_v56, %v526_v57  ;;  %p5443_p0 = por %p5442_p2, %p5441_p10 }
  0xaf   : > { %1250 = vmatprep.subr.bf16.mxu0 %v4719_v11  ;;  %1291 = vmatprep.subr.bf16.mxu1 %v4721_v12  ;;  %v4672_v11 = vcombine.low %v523_v59, %v527_v60  ;;  %v4663_v12 = vcombine.high %v514_v4, %v518_v5  ;;  %v4665_v13 = vcombine.high %v515_v6, %v519_v7  ;;  %v468_v59 = vld [vmem:[#allocation8 + $0x490] sm:$0xff]  ;;  %v469_v60 = vld [vmem:[#allocation8 + $0x498] sm:$0xff] }
  0xb0   : > { %v4664_v21 = vcombine.low %v515_v6, %v519_v7  ;;  %v464_v6 = vld [vmem:[#allocation8 + $0x470] sm:$0xff]  ;;  %v461_v7 = vld [vmem:[#allocation8 + $0x458] sm:$0xff]  ;;  %p5444_p4 = pnand %p5443_p0, %p5437_p9 }
  0xb2   : > { %1251 = vmatpush2.bf16.msra.mxu0 %v4718_v17  ;;  %1292 = vmatpush2.bf16.msra.mxu1 %v4720_v18  ;;  %v583_v17 = vrot.slane %v581_v8, 1  ;;  %v509_v18 = vld [vmem:[#allocation8 + $0x5d8] sm:$0xff] }
  0xb3   : > { %1252 = vmatprep.subr.bf16.mxu0 %v4711_v19  ;;  %1293 = vmatprep.subr.bf16.mxu1 %v4713_v20  ;;  %v513_v19 = vld [vmem:[#allocation8 + $0x5f8] sm:$0xff]  ;;  %v4662_v20 = vcombine.low %v514_v4, %v518_v5  ;;  %v460_v5 = vld [vmem:[#allocation8 + $0x450] sm:$0xff] }
  0xb4   : > { %v4661_v23 = vcombine.high %v509_v18, %v513_v19  ;;  %v4660_v30 = vcombine.low %v509_v18, %v513_v19  ;;  %v4611_v14 = vcombine.high %v460_v5, %v464_v6  ;;  %v453_v18 = vld [vmem:[#allocation8 + $0x418] sm:$0xff] }
  0xb6   : > { %1253 = vmatpush2.bf16.msra.mxu0 %v4710_v25  ;;  %1294 = vmatpush2.bf16.msra.mxu1 %v4712_v26  ;;  %v504_v25 = vld [vmem:[#allocation8 + $0x5b0] sm:$0xff]  ;;  %v5826_v26 = vor.u32 %v583_v17, %v579_v16 }
  0xb7   : > { %1254 = vmatprep.subr.bf16.mxu0 %v4703_v27  ;;  %1295 = vmatprep.subr.bf16.mxu1 %v4705_v28  ;;  %v501_v27 = vld [vmem:[#allocation8 + $0x598] sm:$0xff]  ;;  %v4651_v31 = vcombine.high %v500_v24, %v504_v25  ;;  %v4650_v37 = vcombine.low %v500_v24, %v504_v25  ;;  %v456_v17 = vld [vmem:[#allocation8 + $0x430] sm:$0xff] }
  0xb8   : > { %v505_v28 = vld [vmem:[#allocation8 + $0x5b8] sm:$0xff]  ;;  %v572_v24 = vld [vmem:[#allocation8 + $0x7d0] sm:$0xff] }
  0xb9   : > { %v4652_v38 = vcombine.low %v501_v27, %v505_v28  ;;  %v576_v25 = vld [vmem:[#allocation8 + $0x7f0] sm:$0xff] }
  0xba   : > { %1255 = vmatpush2.bf16.msra.mxu0 %v4702_v33  ;;  %1296 = vmatpush2.bf16.msra.mxu1 %v4704_v34  ;;  %v496_v33 = vld [vmem:[#allocation8 + $0x570] sm:$0xff]  ;;  %v4653_v34 = vcombine.high %v501_v27, %v505_v28  ;;  %v573_v27 = vld [vmem:[#allocation8 + $0x7d8] sm:$0xff] }
  0xbb   : > { %1256 = vmatprep.subr.bf16.mxu0 %v4695_v35  ;;  %1297 = vmatprep.subr.bf16.mxu1 %v4697_v36  ;;  %v493_v35 = vld [vmem:[#allocation8 + $0x558] sm:$0xff]  ;;  %v4643_v39 = vcombine.high %v492_v32, %v496_v33  ;;  %v4642_v45 = vcombine.low %v492_v32, %v496_v33  ;;  %v4723_v32 = vcombine.high %v572_v24, %v576_v25  ;;  %v564_v33 = vld [vmem:[#allocation8 + $0x790] sm:$0xff] }
  0xbc   : > { %v497_v36 = vld [vmem:[#allocation8 + $0x578] sm:$0xff] }
  0xbd   : > { %v4644_v46 = vcombine.low %v493_v35, %v497_v36 }
  0xbe   : > { %1257 = vmatpush2.bf16.msra.mxu0 %v4694_v41  ;;  %1298 = vmatpush2.bf16.msra.mxu1 %v4696_v42  ;;  %v488_v41 = vld [vmem:[#allocation8 + $0x530] sm:$0xff]  ;;  %v485_v42 = vld [vmem:[#allocation8 + $0x518] sm:$0xff] }
  0xbf   : > { %1258 = vmatprep.subr.bf16.mxu0 %v4687_v43  ;;  %1299 = vmatprep.subr.bf16.mxu1 %v4689_v44  ;;  %v4645_v43 = vcombine.high %v493_v35, %v497_v36  ;;  %v489_v44 = vld [vmem:[#allocation8 + $0x538] sm:$0xff]  ;;  %v4635_v47 = vcombine.high %v484_v40, %v488_v41 }
  0xc0   : > { %v4636_v56 = vcombine.low %v485_v42, %v489_v44  ;;  %v565_v35 = vld [vmem:[#allocation8 + $0x798] sm:$0xff] }
  0xc2   : > { %1259 = vmatpush2.bf16.msra.mxu0 %v4686_v49  ;;  %1300 = vmatpush2.bf16.msra.mxu1 %v4688_v52  ;;  %v480_v49 = vld [vmem:[#allocation8 + $0x4f0] sm:$0xff]  ;;  %v4637_v52 = vcombine.high %v485_v42, %v489_v44  ;;  %v557_v44 = vld [vmem:[#allocation8 + $0x758] sm:$0xff] }
  0xc3   : > { %1260 = vmatprep.subr.bf16.mxu0 %v4679_v54  ;;  %1301 = vmatprep.subr.bf16.mxu1 %v4681_v55  ;;  %v481_v54 = vld [vmem:[#allocation8 + $0x4f8] sm:$0xff]  ;;  %v4634_v55 = vcombine.low %v484_v40, %v488_v41  ;;  %v4627_v57 = vcombine.high %v476_v48, %v480_v49  ;;  %v556_v42 = vld [vmem:[#allocation8 + $0x750] sm:$0xff] }
  0xc6   : > { %1261 = vmatpush2.bf16.msra.mxu0 %v4678_v0  ;;  %1302 = vmatpush2.bf16.msra.mxu1 %v4680_v1  ;;  %v4629_v0 = vcombine.high %v477_v51, %v481_v54  ;;  %v473_v1 = vld [vmem:[#allocation8 + $0x4b8] sm:$0xff] }
  0xc7   : > { %1262 = vmatprep.subr.bf16.mxu0 %v4671_v2  ;;  %1303 = vmatprep.subr.bf16.mxu1 %v4673_v3  ;;  %v4626_v2 = vcombine.low %v476_v48, %v480_v49  ;;  %v4628_v3 = vcombine.low %v477_v51, %v481_v54  ;;  %v548_v51 = vld [vmem:[#allocation8 + $0x710] sm:$0xff]  ;;  %v549_v54 = vld [vmem:[#allocation8 + $0x718] sm:$0xff] }
  0xca   : > { %1263 = vmatpush2.bf16.msra.mxu0 %v4670_v10  ;;  %1304 = vmatpush2.bf16.msra.mxu1 %v4672_v11  ;;  %v4621_v10 = vcombine.high %v469_v60, %v473_v1  ;;  %v465_v11 = vld [vmem:[#allocation8 + $0x478] sm:$0xff] }
  0xcb   : > { %1264 = vmatprep.subr.bf16.mxu0 %v4663_v12  ;;  %1305 = vmatprep.subr.bf16.mxu1 %v4665_v13  ;;  %v4620_v13 = vcombine.low %v469_v60, %v473_v1  ;;  %v4613_v19 = vcombine.high %v461_v7, %v465_v11  ;;  %v540_v60 = vld [vmem:[#allocation8 + $0x6d0] sm:$0xff]  ;;  %v541_v1 = vld [vmem:[#allocation8 + $0x6d8] sm:$0xff] }
  0xce   : > { %1265 = vmatpush2.bf16.msra.mxu0 %v4662_v20  ;;  %1306 = vmatpush2.bf16.msra.mxu1 %v4664_v21  ;;  %v457_v20 = vld [vmem:[#allocation8 + $0x438] sm:$0xff]  ;;  %v4610_v21 = vcombine.low %v460_v5, %v464_v6 }
  0xcf   : > { %1316 = vmatprep.subr.bf16.mxu0 %v4659_v22  ;;  %1357 = vmatprep.subr.bf16.mxu1 %v4661_v23  ;;  %v4612_v22 = vcombine.low %v461_v7, %v465_v11  ;;  %v4603_v23 = vcombine.high %v452_v15, %v456_v17  ;;  %v4605_v28 = vcombine.high %v453_v18, %v457_v20  ;;  %v532_v7 = vld [vmem:[#allocation8 + $0x690] sm:$0xff]  ;;  %v533_v11 = vld [vmem:[#allocation8 + $0x698] sm:$0xff] }
  0xd1   : > { %1267 = vmatmul.mubr.bf16.vlgmr.msra.gmra.mxu0 %v5826_v26  ;;  %1308 = vmatmul.mubr.bf16.vlgmr.msra.gmra.mxu1 %v5826_v26 }
  0xd2   : > { %1317 = vmatpush1.bf16.msra.mxu0 %v4658_v29  ;;  %1358 = vmatpush1.bf16.msra.mxu1 %v4660_v30  ;;  %v577_v29 = vld [vmem:[#allocation8 + $0x7f8] sm:$0xff]  ;;  %v4602_v30 = vcombine.low %v452_v15, %v456_v17 }
  0xd3   : > { %1318 = vmatprep.subr.bf16.mxu0 %v4651_v31  ;;  %1359 = vmatprep.subr.bf16.mxu1 %v4653_v34  ;;  %v4604_v31 = vcombine.low %v453_v18, %v457_v20  ;;  %v568_v34 = vld [vmem:[#allocation8 + $0x7b0] sm:$0xff]  ;;  %v4725_v36 = vcombine.high %v573_v27, %v577_v29  ;;  %v525_v20 = vld [vmem:[#allocation8 + $0x658] sm:$0xff] }
  0xd4   : > { %1348 = vmatprep.mubr.bf16.mxu0 %v5808_v9  ;;  %1389 = vmatprep.mubr.bf16.mxu1 %v5808_v9  ;;  %v472_v9 = vld [vmem:[#allocation8 + $0x4b0] sm:$0xff]  ;;  %v4715_v40 = vcombine.high %v564_v33, %v568_v34 }
  0xd5   : > { %v4619_v4 = vcombine.high %v468_v59, %v472_v9  ;;  %v4618_v12 = vcombine.low %v468_v59, %v472_v9  ;;  %v524_v18 = vld [vmem:[#allocation8 + $0x650] sm:$0xff] }
  0xd6   : > { %1319 = vmatpush1.bf16.msra.mxu0 %v4650_v37  ;;  %1360 = vmatpush1.bf16.msra.mxu1 %v4652_v38  ;;  %v569_v37 = vld [vmem:[#allocation8 + $0x7b8] sm:$0xff]  ;;  %v4722_v38 = vcombine.low %v572_v24, %v576_v25 }
  0xd7   : > { %1320 = vmatprep.subr.bf16.mxu0 %v4643_v39  ;;  %1361 = vmatprep.subr.bf16.mxu1 %v4645_v43  ;;  %v4724_v39 = vcombine.low %v573_v27, %v577_v29  ;;  %v4717_v41 = vcombine.high %v565_v35, %v569_v37  ;;  %v560_v43 = vld [vmem:[#allocation8 + $0x770] sm:$0xff]  ;;  %v517_v29 = vld [vmem:[#allocation8 + $0x618] sm:$0xff] }
  0xd8   : > { %v4707_v48 = vcombine.high %v556_v42, %v560_v43  ;;  %v516_v27 = vld [vmem:[#allocation8 + $0x610] sm:$0xff] }
  0xda   : > { %1321 = vmatpush1.bf16.msra.mxu0 %v4642_v45  ;;  %1362 = vmatpush1.bf16.msra.mxu1 %v4644_v46  ;;  %v561_v45 = vld [vmem:[#allocation8 + $0x778] sm:$0xff]  ;;  %v4714_v46 = vcombine.low %v564_v33, %v568_v34 }
  0xdb   : > { %1322 = vmatprep.subr.bf16.mxu0 %v4635_v47  ;;  %1363 = vmatprep.subr.bf16.mxu1 %v4637_v52  ;;  %v4716_v47 = vcombine.low %v565_v35, %v569_v37  ;;  %v4709_v49 = vcombine.high %v557_v44, %v561_v45  ;;  %v552_v52 = vld [vmem:[#allocation8 + $0x730] sm:$0xff]  ;;  %v376_v35 = vld [vmem:[#allocation8 + $0x1c0] sm:$0xff]  ;;  %v377_v37 = vld [vmem:[#allocation8 + $0x1c8] sm:$0xff] }
  0xdc   : > { %v4699_v59 = vcombine.high %v548_v51, %v552_v52 }
  0xde   : > { %1323 = vmatpush1.bf16.msra.mxu0 %v4634_v55  ;;  %1364 = vmatpush1.bf16.msra.mxu1 %v4636_v56  ;;  %v553_v55 = vld [vmem:[#allocation8 + $0x738] sm:$0xff]  ;;  %v4706_v56 = vcombine.low %v556_v42, %v560_v43  ;;  %v368_v43 = vld [vmem:[#allocation8 + $0x180] sm:$0xff] }
  0xdf   : > { %1324 = vmatprep.subr.bf16.mxu0 %v4627_v57  ;;  %1365 = vmatprep.subr.bf16.mxu1 %v4629_v0  ;;  %v4708_v57 = vcombine.low %v557_v44, %v561_v45  ;;  %v4701_v9 = vcombine.high %v549_v54, %v553_v55  ;;  %v544_v0 = vld [vmem:[#allocation8 + $0x6f0] sm:$0xff]  ;;  %v372_v44 = vld [vmem:[#allocation8 + $0x1a0] sm:$0xff]  ;;  %v369_v45 = vld [vmem:[#allocation8 + $0x188] sm:$0xff] }
  0xe0   : > { %v4691_v5 = vcombine.high %v540_v60, %v544_v0 }
  0xe2   : > { %1325 = vmatpush1.bf16.msra.mxu0 %v4626_v2  ;;  %1366 = vmatpush1.bf16.msra.mxu1 %v4628_v3  ;;  %v545_v2 = vld [vmem:[#allocation8 + $0x6f8] sm:$0xff]  ;;  %v4698_v3 = vcombine.low %v548_v51, %v552_v52  ;;  %v360_v52 = vld [vmem:[#allocation8 + $0x140] sm:$0xff] }
  0xe3   : > { %1326 = vmatprep.subr.bf16.mxu0 %v4619_v4  ;;  %1367 = vmatprep.subr.bf16.mxu1 %v4621_v10  ;;  %v4700_v4 = vcombine.low %v549_v54, %v553_v55  ;;  %v4693_v6 = vcombine.high %v541_v1, %v545_v2  ;;  %v536_v10 = vld [vmem:[#allocation8 + $0x6b0] sm:$0xff]  ;;  %v364_v54 = vld [vmem:[#allocation8 + $0x160] sm:$0xff]  ;;  %v5834_v55 = vpack.c.bf16 %v5795_v53, %v5795_v53  ;;  %v353_v53 = vld [vmem:[#allocation8 + $0x108] sm:$0xff] }
  0xe4   : > { %v4683_v15 = vcombine.high %v532_v7, %v536_v10 }
  0xe6   : > { %1327 = vmatpush1.bf16.msra.mxu0 %v4618_v12  ;;  %1368 = vmatpush1.bf16.msra.mxu1 %v4620_v13  ;;  %v537_v12 = vld [vmem:[#allocation8 + $0x6b8] sm:$0xff]  ;;  %v4690_v13 = vcombine.low %v540_v60, %v544_v0  ;;  %v4767_v60 = vcombine.high %v360_v52, %v364_v54 }
  0xe7   : > { %1328 = vmatprep.subr.bf16.mxu0 %v4611_v14  ;;  %1369 = vmatprep.subr.bf16.mxu1 %v4613_v19  ;;  %v4692_v14 = vcombine.low %v541_v1, %v545_v2  ;;  %v4685_v17 = vcombine.high %v533_v11, %v537_v12  ;;  %v528_v19 = vld [vmem:[#allocation8 + $0x670] sm:$0xff]  ;;  %v352_v1 = vld [vmem:[#allocation8 + $0x100] sm:$0xff] }
  0xe8   : > { %v4675_v24 = vcombine.high %v524_v18, %v528_v19  ;;  %v356_v2 = vld [vmem:[#allocation8 + $0x120] sm:$0xff] }
  0xea   : > { %1329 = vmatpush1.bf16.msra.mxu0 %v4610_v21  ;;  %1370 = vmatpush1.bf16.msra.mxu1 %v4612_v22  ;;  %v529_v21 = vld [vmem:[#allocation8 + $0x678] sm:$0xff]  ;;  %v4682_v22 = vcombine.low %v532_v7, %v536_v10  ;;  %v344_v7 = vld [vmem:[#allocation8 + $0xc0] sm:$0xff] }
  0xeb   : > { %1330 = vmatprep.subr.bf16.mxu0 %v4603_v23  ;;  %1371 = vmatprep.subr.bf16.mxu1 %v4605_v28  ;;  %v4684_v23 = vcombine.low %v533_v11, %v537_v12  ;;  %v4677_v25 = vcombine.high %v525_v20, %v529_v21  ;;  %v520_v28 = vld [vmem:[#allocation8 + $0x630] sm:$0xff]  ;;  %v348_v10 = vld [vmem:[#allocation8 + $0xe0] sm:$0xff]  ;;  %v345_v11 = vld [vmem:[#allocation8 + $0xc8] sm:$0xff] }
  0xec   : > { %v4667_v33 = vcombine.high %v516_v27, %v520_v28  ;;  %v349_v12 = vld [vmem:[#allocation8 + $0xe8] sm:$0xff] }
  0xee   : > { %1331 = vmatpush1.bf16.msra.mxu0 %v4602_v30  ;;  %1372 = vmatpush1.bf16.msra.mxu1 %v4604_v31  ;;  %v521_v30 = vld [vmem:[#allocation8 + $0x638] sm:$0xff]  ;;  %v4674_v31 = vcombine.low %v524_v18, %v528_v19  ;;  %v336_v18 = vld [vmem:[#allocation8 + $0x80] sm:$0xff] }
  0xef   : > { %1332 = vmatprep.subr.bf16.mxu0 %v4723_v32  ;;  %1373 = vmatprep.subr.bf16.mxu1 %v4725_v36  ;;  %v4676_v32 = vcombine.low %v525_v20, %v529_v21  ;;  %v4669_v34 = vcombine.high %v517_v29, %v521_v30  ;;  %v380_v36 = vld [vmem:[#allocation8 + $0x1e0] sm:$0xff]  ;;  %v337_v20 = vld [vmem:[#allocation8 + $0x88] sm:$0xff] }
  0xf0   : > { %v340_v19 = vld [vmem:[#allocation8 + $0xa0] sm:$0xff]  ;;  %v341_v21 = vld [vmem:[#allocation8 + $0xa8] sm:$0xff] }
  0xf2   : > { %1333 = vmatpush2.bf16.msra.mxu0 %v4722_v38  ;;  %1374 = vmatpush2.bf16.msra.mxu1 %v4724_v39  ;;  %v381_v38 = vld [vmem:[#allocation8 + $0x1e8] sm:$0xff]  ;;  %v4666_v39 = vcombine.low %v516_v27, %v520_v28  ;;  %v328_v27 = vld [vmem:[#allocation8 + $0x40] sm:$0xff] }
  0xf3   : > { %1334 = vmatprep.subr.bf16.mxu0 %v4715_v40  ;;  %1375 = vmatprep.subr.bf16.mxu1 %v4717_v41  ;;  %v4668_v40 = vcombine.low %v517_v29, %v521_v30  ;;  %v4783_v41 = vcombine.high %v376_v35, %v380_v36  ;;  %v4785_v42 = vcombine.high %v377_v37, %v381_v38  ;;  %v332_v28 = vld [vmem:[#allocation8 + $0x60] sm:$0xff]  ;;  %v329_v29 = vld [vmem:[#allocation8 + $0x48] sm:$0xff] }
  0xf4   : > { %v333_v30 = vld [vmem:[#allocation8 + $0x68] sm:$0xff] }
  0xf6   : > { %1335 = vmatpush2.bf16.msra.mxu0 %v4714_v46  ;;  %1376 = vmatpush2.bf16.msra.mxu1 %v4716_v47  ;;  %v373_v46 = vld [vmem:[#allocation8 + $0x1a8] sm:$0xff]  ;;  %v4782_v47 = vcombine.low %v376_v35, %v380_v36  ;;  %v320_v35 = vld [vmem:[#allocation8] sm:$0xff] }
  0xf7   : > { %1336 = vmatprep.subr.bf16.mxu0 %v4707_v48  ;;  %1377 = vmatprep.subr.bf16.mxu1 %v4709_v49  ;;  %v4784_v48 = vcombine.low %v377_v37, %v381_v38  ;;  %v4775_v49 = vcombine.high %v368_v43, %v372_v44  ;;  %v4777_v51 = vcombine.high %v369_v45, %v373_v46  ;;  %v324_v36 = vld [vmem:[#allocation8 + $0x20] sm:$0xff]  ;;  %v321_v37 = vld [vmem:[#allocation8 + $0x8] sm:$0xff] }
  0xf8   : > { %v325_v38 = vld [vmem:[#allocation8 + $0x28] sm:$0xff] }
  0xfa   : > { %1337 = vmatpush2.bf16.msra.mxu0 %v4706_v56  ;;  %1378 = vmatpush2.bf16.msra.mxu1 %v4708_v57  ;;  %v361_v56 = vld [vmem:[#allocation8 + $0x148] sm:$0xff] }
  0xfb   : > { %1338 = vmatprep.subr.bf16.mxu0 %v4699_v59  ;;  %1379 = vmatprep.subr.bf16.mxu1 %v4701_v9  ;;  %v365_v57 = vld [vmem:[#allocation8 + $0x168] sm:$0xff]  ;;  %v4774_v59 = vcombine.low %v368_v43, %v372_v44  ;;  %v4776_v9 = vcombine.low %v369_v45, %v373_v46  ;;  %v440_v43 = vld [vmem:[#allocation8 + $0x3c0] sm:$0xff] }
  0xfc   : > { %v4769_v0 = vcombine.high %v361_v56, %v365_v57  ;;  %v444_v44 = vld [vmem:[#allocation8 + $0x3e0] sm:$0xff]  ;;  %v441_v45 = vld [vmem:[#allocation8 + $0x3c8] sm:$0xff] }
  0xfd   : > { %v445_v46 = vld [vmem:[#allocation8 + $0x3e8] sm:$0xff] }
  0xfe   : > { %1339 = vmatpush2.bf16.msra.mxu0 %v4698_v3  ;;  %1380 = vmatpush2.bf16.msra.mxu1 %v4700_v4  ;;  %v357_v3 = vld [vmem:[#allocation8 + $0x128] sm:$0xff]  ;;  %v4766_v4 = vcombine.low %v360_v52, %v364_v54  ;;  %v432_v52 = vld [vmem:[#allocation8 + $0x380] sm:$0xff] }
  0xff   : > { %1340 = vmatprep.subr.bf16.mxu0 %v4691_v5  ;;  %1381 = vmatprep.subr.bf16.mxu1 %v4693_v6  ;;  %v4759_v5 = vcombine.high %v352_v1, %v356_v2  ;;  %v4761_v6 = vcombine.high %v353_v53, %v357_v3  ;;  %v436_v54 = vld [vmem:[#allocation8 + $0x3a0] sm:$0xff] }
 0x102   : > { %1341 = vmatpush2.bf16.msra.mxu0 %v4690_v13  ;;  %1382 = vmatpush2.bf16.msra.mxu1 %v4692_v14  ;;  %v4758_v13 = vcombine.low %v352_v1, %v356_v2  ;;  %v4760_v14 = vcombine.low %v353_v53, %v357_v3  ;;  %v424_v1 = vld [vmem:[#allocation8 + $0x340] sm:$0xff]  ;;  %v425_v53 = vld [vmem:[#allocation8 + $0x348] sm:$0xff] }
 0x103   : > { %1342 = vmatprep.subr.bf16.mxu0 %v4683_v15  ;;  %1383 = vmatprep.subr.bf16.mxu1 %v4685_v17  ;;  %v4751_v15 = vcombine.high %v344_v7, %v348_v10  ;;  %v4753_v17 = vcombine.high %v345_v11, %v349_v12  ;;  %v428_v2 = vld [vmem:[#allocation8 + $0x360] sm:$0xff]  ;;  %v429_v3 = vld [vmem:[#allocation8 + $0x368] sm:$0xff] }
 0x106   : > { %1343 = vmatpush2.bf16.msra.mxu0 %v4682_v22  ;;  %1384 = vmatpush2.bf16.msra.mxu1 %v4684_v23  ;;  %v4750_v22 = vcombine.low %v344_v7, %v348_v10  ;;  %v4752_v23 = vcombine.low %v345_v11, %v349_v12  ;;  %v416_v7 = vld [vmem:[#allocation8 + $0x300] sm:$0xff]  ;;  %v417_v11 = vld [vmem:[#allocation8 + $0x308] sm:$0xff] }
 0x107   : > { %1344 = vmatprep.subr.bf16.mxu0 %v4675_v24  ;;  %1385 = vmatprep.subr.bf16.mxu1 %v4677_v25  ;;  %v4743_v24 = vcombine.high %v336_v18, %v340_v19  ;;  %v4745_v25 = vcombine.high %v337_v20, %v341_v21  ;;  %v420_v10 = vld [vmem:[#allocation8 + $0x320] sm:$0xff]  ;;  %v421_v12 = vld [vmem:[#allocation8 + $0x328] sm:$0xff] }
 0x10a   : > { %1345 = vmatpush2.bf16.msra.mxu0 %v4674_v31  ;;  %1386 = vmatpush2.bf16.msra.mxu1 %v4676_v32  ;;  %v4742_v31 = vcombine.low %v336_v18, %v340_v19  ;;  %v4744_v32 = vcombine.low %v337_v20, %v341_v21  ;;  %v408_v18 = vld [vmem:[#allocation8 + $0x2c0] sm:$0xff]  ;;  %v409_v20 = vld [vmem:[#allocation8 + $0x2c8] sm:$0xff] }
 0x10b   : > { %1346 = vmatprep.subr.bf16.mxu0 %v4667_v33  ;;  %1387 = vmatprep.subr.bf16.mxu1 %v4669_v34  ;;  %v4735_v33 = vcombine.high %v328_v27, %v332_v28  ;;  %v4737_v34 = vcombine.high %v329_v29, %v333_v30  ;;  %v412_v19 = vld [vmem:[#allocation8 + $0x2e0] sm:$0xff]  ;;  %v413_v21 = vld [vmem:[#allocation8 + $0x2e8] sm:$0xff] }
 0x10e   : > { %1347 = vmatpush2.bf16.msra.mxu0 %v4666_v39  ;;  %1388 = vmatpush2.bf16.msra.mxu1 %v4668_v40  ;;  %v4734_v39 = vcombine.low %v328_v27, %v332_v28  ;;  %v4736_v40 = vcombine.low %v329_v29, %v333_v30  ;;  %v400_v27 = vld [vmem:[#allocation8 + $0x280] sm:$0xff]  ;;  %v401_v29 = vld [vmem:[#allocation8 + $0x288] sm:$0xff] }
 0x10f   : > { %2038 = vmatprep.subr.bf16.mxu0 %v4783_v41  ;;  %2079 = vmatprep.subr.bf16.mxu1 %v4785_v42  ;;  %v4727_v41 = vcombine.high %v320_v35, %v324_v36  ;;  %v4729_v42 = vcombine.high %v321_v37, %v325_v38  ;;  %v404_v28 = vld [vmem:[#allocation8 + $0x2a0] sm:$0xff]  ;;  %v405_v30 = vld [vmem:[#allocation8 + $0x2a8] sm:$0xff] }
 0x111   : > { %1349 = vmatmul.mubr.bf16.vlgmr.msra.gmra.mxu0 %v5826_v26  ;;  %1390 = vmatmul.mubr.bf16.vlgmr.msra.gmra.mxu1 %v5826_v26  ;;  %v4768_v26 = vcombine.low %v361_v56, %v365_v57  ;;  %v433_v56 = vld [vmem:[#allocation8 + $0x388] sm:$0xff] }
 0x112   : > { %2039 = vmatpush1.bf16.msra.mxu0 %v4782_v47  ;;  %2080 = vmatpush1.bf16.msra.mxu1 %v4784_v48  ;;  %v4726_v47 = vcombine.low %v320_v35, %v324_v36  ;;  %v4728_v48 = vcombine.low %v321_v37, %v325_v38  ;;  %v437_v57 = vld [vmem:[#allocation8 + $0x3a8] sm:$0xff]  ;;  %v392_v35 = vld [vmem:[#allocation8 + $0x240] sm:$0xff] }
 0x113   : > { %2040 = vmatprep.subr.bf16.mxu0 %v4775_v49  ;;  %2081 = vmatprep.subr.bf16.mxu1 %v4777_v51  ;;  %v4847_v49 = vcombine.high %v440_v43, %v444_v44  ;;  %v4849_v51 = vcombine.high %v441_v45, %v445_v46  ;;  %v396_v36 = vld [vmem:[#allocation8 + $0x260] sm:$0xff]  ;;  %v393_v37 = vld [vmem:[#allocation8 + $0x248] sm:$0xff] }
 0x114   : > { %2070 = vmatprep.mubr.bf16.mxu0 %v5834_v55  ;;  %2111 = vmatprep.mubr.bf16.mxu1 %v5834_v55  ;;  %v397_v38 = vld [vmem:[#allocation8 + $0x268] sm:$0xff] }
 0x116   : > { %2041 = vmatpush1.bf16.msra.mxu0 %v4774_v59  ;;  %2082 = vmatpush1.bf16.msra.mxu1 %v4776_v9  ;;  %v4846_v59 = vcombine.low %v440_v43, %v444_v44  ;;  %v4848_v9 = vcombine.low %v441_v45, %v445_v46  ;;  %v384_v43 = vld [vmem:[#allocation8 + $0x200] sm:$0xff]  ;;  %v385_v45 = vld [vmem:[#allocation8 + $0x208] sm:$0xff] }
 0x117   : > { %2042 = vmatprep.subr.bf16.mxu0 %v4767_v60  ;;  %2083 = vmatprep.subr.bf16.mxu1 %v4769_v0  ;;  %v4839_v60 = vcombine.high %v432_v52, %v436_v54  ;;  %v4841_v0 = vcombine.high %v433_v56, %v437_v57  ;;  %v388_v44 = vld [vmem:[#allocation8 + $0x220] sm:$0xff]  ;;  %v389_v46 = vld [vmem:[#allocation8 + $0x228] sm:$0xff] }
 0x11a   : > { %2043 = vmatpush1.bf16.msra.mxu0 %v4766_v4  ;;  %2084 = vmatpush1.bf16.msra.mxu1 %v4768_v26  ;;  %v4838_v4 = vcombine.low %v432_v52, %v436_v54  ;;  %v4840_v26 = vcombine.low %v433_v56, %v437_v57  ;;  %v378_v52 = vld [vmem:[#allocation8 + $0x1d0] sm:$0xff]  ;;  %v379_v56 = vld [vmem:[#allocation8 + $0x1d8] sm:$0xff] }
 0x11b   : > { %2044 = vmatprep.subr.bf16.mxu0 %v4759_v5  ;;  %2085 = vmatprep.subr.bf16.mxu1 %v4761_v6  ;;  %v4831_v5 = vcombine.high %v424_v1, %v428_v2  ;;  %v4833_v6 = vcombine.high %v425_v53, %v429_v3  ;;  %v382_v54 = vld [vmem:[#allocation8 + $0x1f0] sm:$0xff]  ;;  %v383_v57 = vld [vmem:[#allocation8 + $0x1f8] sm:$0xff] }
 0x11e   : > { %2045 = vmatpush1.bf16.msra.mxu0 %v4758_v13  ;;  %2086 = vmatpush1.bf16.msra.mxu1 %v4760_v14  ;;  %v4830_v13 = vcombine.low %v424_v1, %v428_v2  ;;  %v4832_v14 = vcombine.low %v425_v53, %v429_v3  ;;  %v370_v1 = vld [vmem:[#allocation8 + $0x190] sm:$0xff]  ;;  %v5842_v53 = vpack.c.bf16 %v5813_v50, %v5813_v50  ;;  %v371_v3 = vld [vmem:[#allocation8 + $0x198] sm:$0xff] }
 0x11f   : > { %2046 = vmatprep.subr.bf16.mxu0 %v4751_v15  ;;  %2087 = vmatprep.subr.bf16.mxu1 %v4753_v17  ;;  %v4823_v15 = vcombine.high %v416_v7, %v420_v10  ;;  %v4825_v17 = vcombine.high %v417_v11, %v421_v12  ;;  %v374_v2 = vld [vmem:[#allocation8 + $0x1b0] sm:$0xff] }
 0x120   : > { %v4778_v50 = vcombine.low %v370_v1, %v374_v2 }
 0x122   : > { %2047 = vmatpush1.bf16.msra.mxu0 %v4750_v22  ;;  %2088 = vmatpush1.bf16.msra.mxu1 %v4752_v23  ;;  %v4822_v22 = vcombine.low %v416_v7, %v420_v10  ;;  %v4824_v23 = vcombine.low %v417_v11, %v421_v12  ;;  %v362_v10 = vld [vmem:[#allocation8 + $0x150] sm:$0xff]  ;;  %v363_v12 = vld [vmem:[#allocation8 + $0x158] sm:$0xff] }
 0x123   : > { %2048 = vmatprep.subr.bf16.mxu0 %v4743_v24  ;;  %2089 = vmatprep.subr.bf16.mxu1 %v4745_v25  ;;  %v4815_v24 = vcombine.high %v408_v18, %v412_v19  ;;  %v4817_v25 = vcombine.high %v409_v20, %v413_v21  ;;  %v366_v11 = vld [vmem:[#allocation8 + $0x170] sm:$0xff] }
 0x126   : > { %2049 = vmatpush1.bf16.msra.mxu0 %v4742_v31  ;;  %2090 = vmatpush1.bf16.msra.mxu1 %v4744_v32  ;;  %v4814_v31 = vcombine.low %v408_v18, %v412_v19  ;;  %v4816_v32 = vcombine.low %v409_v20, %v413_v21  ;;  %v354_v18 = vld [vmem:[#allocation8 + $0x110] sm:$0xff]  ;;  %v355_v20 = vld [vmem:[#allocation8 + $0x118] sm:$0xff] }
 0x127   : > { %2050 = vmatprep.subr.bf16.mxu0 %v4735_v33  ;;  %2091 = vmatprep.subr.bf16.mxu1 %v4737_v34  ;;  %v4807_v33 = vcombine.high %v400_v27, %v404_v28  ;;  %v4809_v34 = vcombine.high %v401_v29, %v405_v30  ;;  %v358_v19 = vld [vmem:[#allocation8 + $0x130] sm:$0xff]  ;;  %v359_v21 = vld [vmem:[#allocation8 + $0x138] sm:$0xff] }
 0x12a   : > { %2051 = vmatpush1.bf16.msra.mxu0 %v4734_v39  ;;  %2092 = vmatpush1.bf16.msra.mxu1 %v4736_v40  ;;  %v4806_v39 = vcombine.low %v400_v27, %v404_v28  ;;  %v4808_v40 = vcombine.low %v401_v29, %v405_v30  ;;  %v346_v27 = vld [vmem:[#allocation8 + $0xd0] sm:$0xff]  ;;  %v347_v29 = vld [vmem:[#allocation8 + $0xd8] sm:$0xff] }
 0x12b   : > { %2052 = vmatprep.subr.bf16.mxu0 %v4727_v41  ;;  %2093 = vmatprep.subr.bf16.mxu1 %v4729_v42  ;;  %v4799_v41 = vcombine.high %v392_v35, %v396_v36  ;;  %v4801_v42 = vcombine.high %v393_v37, %v397_v38  ;;  %v350_v28 = vld [vmem:[#allocation8 + $0xf0] sm:$0xff]  ;;  %v351_v30 = vld [vmem:[#allocation8 + $0xf8] sm:$0xff] }
 0x12e   : > { %2053 = vmatpush1.bf16.msra.mxu0 %v4726_v47  ;;  %2094 = vmatpush1.bf16.msra.mxu1 %v4728_v48  ;;  %v4798_v47 = vcombine.low %v392_v35, %v396_v36  ;;  %v4800_v48 = vcombine.low %v393_v37, %v397_v38  ;;  %v342_v35 = vld [vmem:[#allocation8 + $0xb0] sm:$0xff]  ;;  %v339_v36 = vld [vmem:[#allocation8 + $0x98] sm:$0xff]  ;;  %v4754_v38 = vcombine.low %v346_v27, %v350_v28 }
 0x12f   : > { %2054 = vmatprep.subr.bf16.mxu0 %v4847_v49  ;;  %2095 = vmatprep.subr.bf16.mxu1 %v4849_v51  ;;  %v4791_v49 = vcombine.high %v384_v43, %v388_v44  ;;  %v4793_v51 = vcombine.high %v385_v45, %v389_v46  ;;  %v343_v37 = vld [vmem:[#allocation8 + $0xb8] sm:$0xff] }
 0x132   : > { %2055 = vmatpush2.bf16.msra.mxu0 %v4846_v59  ;;  %2096 = vmatpush2.bf16.msra.mxu1 %v4848_v9  ;;  %v4790_v59 = vcombine.low %v384_v43, %v388_v44  ;;  %v4792_v9 = vcombine.low %v385_v45, %v389_v46  ;;  %v334_v43 = vld [vmem:[#allocation8 + $0x70] sm:$0xff]  ;;  %v331_v44 = vld [vmem:[#allocation8 + $0x58] sm:$0xff] }
 0x133   : > { %2056 = vmatprep.subr.bf16.mxu0 %v4839_v60  ;;  %2097 = vmatprep.subr.bf16.mxu1 %v4841_v0  ;;  %v4787_v60 = vcombine.high %v378_v52, %v382_v54  ;;  %v4789_v0 = vcombine.high %v379_v56, %v383_v57  ;;  %v335_v45 = vld [vmem:[#allocation8 + $0x78] sm:$0xff] }
 0x136   : > { %2057 = vmatpush2.bf16.msra.mxu0 %v4838_v4  ;;  %2098 = vmatpush2.bf16.msra.mxu1 %v4840_v26  ;;  %v375_v4 = vld [vmem:[#allocation8 + $0x1b8] sm:$0xff]  ;;  %v4786_v26 = vcombine.low %v378_v52, %v382_v54  ;;  %v326_v52 = vld [vmem:[#allocation8 + $0x30] sm:$0xff] }
 0x137   : > { %2058 = vmatprep.subr.bf16.mxu0 %v4831_v5  ;;  %2099 = vmatprep.subr.bf16.mxu1 %v4833_v6  ;;  %v4788_v5 = vcombine.low %v379_v56, %v383_v57  ;;  %v4779_v6 = vcombine.high %v370_v1, %v374_v2  ;;  %v4781_v7 = vcombine.high %v371_v3, %v375_v4  ;;  %v323_v54 = vld [vmem:[#allocation8 + $0x18] sm:$0xff]  ;;  %v446_v1 = vld [vmem:[#allocation8 + $0x3f0] sm:$0xff] }
 0x138   : > { %v327_v56 = vld [vmem:[#allocation8 + $0x38] sm:$0xff] }
 0x139   : > { %v443_v2 = vld [vmem:[#allocation8 + $0x3d8] sm:$0xff] }
 0x13a   : > { %2059 = vmatpush2.bf16.msra.mxu0 %v4830_v13  ;;  %2100 = vmatpush2.bf16.msra.mxu1 %v4832_v14  ;;  %v367_v13 = vld [vmem:[#allocation8 + $0x178] sm:$0xff]  ;;  %v4780_v14 = vcombine.low %v371_v3, %v375_v4 }
 0x13b   : > { %2060 = vmatprep.subr.bf16.mxu0 %v4823_v15  ;;  %2101 = vmatprep.subr.bf16.mxu1 %v4825_v17  ;;  %v4771_v15 = vcombine.high %v362_v10, %v366_v11  ;;  %v4773_v17 = vcombine.high %v363_v12, %v367_v13  ;;  %v447_v3 = vld [vmem:[#allocation8 + $0x3f8] sm:$0xff] }
 0x13e   : > { %2061 = vmatpush2.bf16.msra.mxu0 %v4822_v22  ;;  %2102 = vmatpush2.bf16.msra.mxu1 %v4824_v23  ;;  %v4770_v22 = vcombine.low %v362_v10, %v366_v11  ;;  %v4772_v23 = vcombine.low %v363_v12, %v367_v13  ;;  %v438_v10 = vld [vmem:[#allocation8 + $0x3b0] sm:$0xff]  ;;  %v435_v11 = vld [vmem:[#allocation8 + $0x398] sm:$0xff] }
 0x13f   : > { %2062 = vmatprep.subr.bf16.mxu0 %v4815_v24  ;;  %2103 = vmatprep.subr.bf16.mxu1 %v4817_v25  ;;  %v4763_v24 = vcombine.high %v354_v18, %v358_v19  ;;  %v4765_v25 = vcombine.high %v355_v20, %v359_v21  ;;  %v439_v12 = vld [vmem:[#allocation8 + $0x3b8] sm:$0xff] }
 0x142   : > { %2063 = vmatpush2.bf16.msra.mxu0 %v4814_v31  ;;  %2104 = vmatpush2.bf16.msra.mxu1 %v4816_v32  ;;  %v4762_v31 = vcombine.low %v354_v18, %v358_v19  ;;  %v4764_v32 = vcombine.low %v355_v20, %v359_v21  ;;  %v430_v18 = vld [vmem:[#allocation8 + $0x370] sm:$0xff]  ;;  %v427_v19 = vld [vmem:[#allocation8 + $0x358] sm:$0xff] }
 0x143   : > { %2064 = vmatprep.subr.bf16.mxu0 %v4807_v33  ;;  %2105 = vmatprep.subr.bf16.mxu1 %v4809_v34  ;;  %v4755_v33 = vcombine.high %v346_v27, %v350_v28  ;;  %v338_v34 = vld [vmem:[#allocation8 + $0x90] sm:$0xff]  ;;  %v431_v20 = vld [vmem:[#allocation8 + $0x378] sm:$0xff] }
 0x144   : > { %v4746_v46 = vcombine.low %v338_v34, %v342_v35  ;;  %v422_v27 = vld [vmem:[#allocation8 + $0x330] sm:$0xff]  ;;  %v419_v28 = vld [vmem:[#allocation8 + $0x318] sm:$0xff] }
 0x146   : > { %2065 = vmatpush2.bf16.msra.mxu0 %v4806_v39  ;;  %2106 = vmatpush2.bf16.msra.mxu1 %v4808_v40  ;;  %v4756_v39 = vcombine.low %v347_v29, %v351_v30  ;;  %v4747_v40 = vcombine.high %v338_v34, %v342_v35  ;;  %v414_v34 = vld [vmem:[#allocation8 + $0x2f0] sm:$0xff]  ;;  %v411_v35 = vld [vmem:[#allocation8 + $0x2d8] sm:$0xff] }
 0x147   : > { %2066 = vmatprep.subr.bf16.mxu0 %v4799_v41  ;;  %2107 = vmatprep.subr.bf16.mxu1 %v4801_v42  ;;  %v4749_v41 = vcombine.high %v339_v36, %v343_v37  ;;  %v330_v42 = vld [vmem:[#allocation8 + $0x50] sm:$0xff] }
 0x148   : > { %v4738_v57 = vcombine.low %v330_v42, %v334_v43 }
 0x14a   : > { %2067 = vmatpush2.bf16.msra.mxu0 %v4798_v47  ;;  %2108 = vmatpush2.bf16.msra.mxu1 %v4800_v48  ;;  %v4748_v47 = vcombine.low %v339_v36, %v343_v37  ;;  %v4739_v48 = vcombine.high %v330_v42, %v334_v43  ;;  %v415_v36 = vld [vmem:[#allocation8 + $0x2f8] sm:$0xff]  ;;  %v406_v42 = vld [vmem:[#allocation8 + $0x2b0] sm:$0xff] }
 0x14b   : > { %2068 = vmatprep.subr.bf16.mxu0 %v4791_v49  ;;  %2109 = vmatprep.subr.bf16.mxu1 %v4793_v51  ;;  %v4741_v49 = vcombine.high %v331_v44, %v335_v45  ;;  %v322_v51 = vld [vmem:[#allocation8 + $0x10] sm:$0xff]  ;;  %v403_v43 = vld [vmem:[#allocation8 + $0x298] sm:$0xff] }
 0x14c   : > { %v4730_v4 = vcombine.low %v322_v51, %v326_v52 }
 0x14e   : > { %2069 = vmatpush2.bf16.msra.mxu0 %v4790_v59  ;;  %2110 = vmatpush2.bf16.msra.mxu1 %v4792_v9  ;;  %v4740_v59 = vcombine.low %v331_v44, %v335_v45  ;;  %v4731_v9 = vcombine.high %v322_v51, %v326_v52  ;;  %v407_v44 = vld [vmem:[#allocation8 + $0x2b8] sm:$0xff]  ;;  %v398_v51 = vld [vmem:[#allocation8 + $0x270] sm:$0xff] }
 0x14f   : > { %2120 = vmatprep.subr.bf16.mxu0 %v4787_v60  ;;  %2161 = vmatprep.subr.bf16.mxu1 %v4789_v0  ;;  %v4733_v60 = vcombine.high %v323_v54, %v327_v56  ;;  %v442_v0 = vld [vmem:[#allocation8 + $0x3d0] sm:$0xff]  ;;  %v395_v52 = vld [vmem:[#allocation8 + $0x258] sm:$0xff] }
 0x150   : > { %v4850_v13 = vcombine.low %v442_v0, %v446_v1 }
 0x151   : > { %2071 = vmatmul.mubr.bf16.vlgmr.msra.gmra.mxu0 %v5842_v53  ;;  %2112 = vmatmul.mubr.bf16.vlgmr.msra.gmra.mxu1 %v5842_v53 }
 0x152   : > { %2121 = vmatpush1.bf16.msra.mxu0 %v4786_v26  ;;  %2162 = vmatpush1.bf16.msra.mxu1 %v4788_v5  ;;  %v4732_v26 = vcombine.low %v323_v54, %v327_v56  ;;  %v4851_v5 = vcombine.high %v442_v0, %v446_v1  ;;  %v399_v54 = vld [vmem:[#allocation8 + $0x278] sm:$0xff]  ;;  %v390_v0 = vld [vmem:[#allocation8 + $0x230] sm:$0xff] }
 0x153   : > { %2122 = vmatprep.subr.bf16.mxu0 %v4779_v6  ;;  %2163 = vmatprep.subr.bf16.mxu1 %v4781_v7  ;;  %v4853_v6 = vcombine.high %v443_v2, %v447_v3  ;;  %v434_v7 = vld [vmem:[#allocation8 + $0x390] sm:$0xff]  ;;  %v387_v1 = vld [vmem:[#allocation8 + $0x218] sm:$0xff] }
 0x154   : > { %2152 = vmatprep.mubr.bf16.mxu0 %v5834_v55  ;;  %2193 = vmatprep.mubr.bf16.mxu1 %v5834_v55  ;;  %v4757_v55 = vcombine.high %v347_v29, %v351_v30  ;;  %v4842_v21 = vcombine.low %v434_v7, %v438_v10  ;;  %v423_v29 = vld [vmem:[#allocation8 + $0x338] sm:$0xff] }
 0x156   : > { %2123 = vmatpush1.bf16.msra.mxu0 %v4778_v50  ;;  %2164 = vmatpush1.bf16.msra.mxu1 %v4780_v14  ;;  %v4852_v50 = vcombine.low %v443_v2, %v447_v3  ;;  %v4843_v14 = vcombine.high %v434_v7, %v438_v10  ;;  %v391_v2 = vld [vmem:[#allocation8 + $0x238] sm:$0xff]  ;;  %v2262_v7 = vld [vmem:[#allocation8 + $0x9e0] sm:$0xff]  ;;  %v2259_v10 = vld [vmem:[#allocation8 + $0x9c8] sm:$0xff] }
 0x157   : > { %2124 = vmatprep.subr.bf16.mxu0 %v4771_v15  ;;  %2165 = vmatprep.subr.bf16.mxu1 %v4773_v17  ;;  %v4845_v15 = vcombine.high %v435_v11, %v439_v12  ;;  %v426_v17 = vld [vmem:[#allocation8 + $0x350] sm:$0xff] }
 0x158   : > { %v4834_v30 = vcombine.low %v426_v17, %v430_v18 }
 0x15a   : > { %2125 = vmatpush1.bf16.msra.mxu0 %v4770_v22  ;;  %2166 = vmatpush1.bf16.msra.mxu1 %v4772_v23  ;;  %v4844_v22 = vcombine.low %v435_v11, %v439_v12  ;;  %v4835_v23 = vcombine.high %v426_v17, %v430_v18  ;;  %v2263_v11 = vld [vmem:[#allocation8 + $0x9e8] sm:$0xff]  ;;  %v2254_v17 = vld [vmem:[#allocation8 + $0x9a0] sm:$0xff] }
 0x15b   : > { %2126 = vmatprep.subr.bf16.mxu0 %v4763_v24  ;;  %2167 = vmatprep.subr.bf16.mxu1 %v4765_v25  ;;  %v4837_v24 = vcombine.high %v427_v19, %v431_v20  ;;  %v418_v25 = vld [vmem:[#allocation8 + $0x310] sm:$0xff]  ;;  %v2251_v18 = vld [vmem:[#allocation8 + $0x988] sm:$0xff] }
 0x15c   : > { %v4826_v37 = vcombine.low %v418_v25, %v422_v27 }
 0x15e   : > { %2127 = vmatpush1.bf16.msra.mxu0 %v4762_v31  ;;  %2168 = vmatpush1.bf16.msra.mxu1 %v4764_v32  ;;  %v4836_v31 = vcombine.low %v427_v19, %v431_v20  ;;  %v4827_v32 = vcombine.high %v418_v25, %v422_v27  ;;  %v2255_v19 = vld [vmem:[#allocation8 + $0x9a8] sm:$0xff]  ;;  %v2246_v25 = vld [vmem:[#allocation8 + $0x960] sm:$0xff]  ;;  %v5849_v27 = vrot.slane %v5800_v58, 1 }
 0x15f   : > { %2128 = vmatprep.subr.bf16.mxu0 %v4755_v33  ;;  %2169 = vmatprep.subr.bf16.mxu1 %v4757_v55  ;;  %v4829_v33 = vcombine.high %v419_v28, %v423_v29  ;;  %v410_v55 = vld [vmem:[#allocation8 + $0x2d0] sm:$0xff]  ;;  %v3189_v58 = vld [vmem:[#allocation8 + $0xd48] sm:$0xff] }
 0x160   : > { %v4818_v45 = vcombine.low %v410_v55, %v414_v34 }
 0x162   : > { %2129 = vmatpush1.bf16.msra.mxu0 %v4754_v38  ;;  %2170 = vmatpush1.bf16.msra.mxu1 %v4756_v39  ;;  %v4828_v38 = vcombine.low %v419_v28, %v423_v29  ;;  %v4819_v39 = vcombine.high %v410_v55, %v414_v34  ;;  %v2243_v29 = vld [vmem:[#allocation8 + $0x948] sm:$0xff]  ;;  %v4904_v55 = vcombine.low %v2251_v18, %v2255_v19 }
 0x163   : > { %2130 = vmatprep.subr.bf16.mxu0 %v4747_v40  ;;  %2171 = vmatprep.subr.bf16.mxu1 %v4749_v41  ;;  %v4821_v40 = vcombine.high %v411_v35, %v415_v36  ;;  %v402_v41 = vld [vmem:[#allocation8 + $0x290] sm:$0xff] }
 0x164   : > { %v4810_v56 = vcombine.low %v402_v41, %v406_v42 }
 0x166   : > { %2131 = vmatpush1.bf16.msra.mxu0 %v4746_v46  ;;  %2172 = vmatpush1.bf16.msra.mxu1 %v4748_v47  ;;  %v4820_v46 = vcombine.low %v411_v35, %v415_v36  ;;  %v4811_v47 = vcombine.high %v402_v41, %v406_v42  ;;  %v2239_v41 = vld [vmem:[#allocation8 + $0x928] sm:$0xff] }
 0x167   : > { %2132 = vmatprep.subr.bf16.mxu0 %v4739_v48  ;;  %2173 = vmatprep.subr.bf16.mxu1 %v4741_v49  ;;  %v4813_v48 = vcombine.high %v403_v43, %v407_v44  ;;  %v394_v49 = vld [vmem:[#allocation8 + $0x250] sm:$0xff] }
 0x168   : > { %v4802_v3 = vcombine.low %v394_v49, %v398_v51 }
 0x16a   : > { %2133 = vmatpush1.bf16.msra.mxu0 %v4738_v57  ;;  %2174 = vmatpush1.bf16.msra.mxu1 %v4740_v59  ;;  %v4812_v57 = vcombine.low %v403_v43, %v407_v44  ;;  %v4803_v59 = vcombine.high %v394_v49, %v398_v51  ;;  %v2230_v49 = vld [vmem:[#allocation8 + $0x8e0] sm:$0xff]  ;;  %v2227_v51 = vld [vmem:[#allocation8 + $0x8c8] sm:$0xff] }
 0x16b   : > { %2134 = vmatprep.subr.bf16.mxu0 %v4731_v9  ;;  %2175 = vmatprep.subr.bf16.mxu1 %v4733_v60  ;;  %v4805_v9 = vcombine.high %v395_v52, %v399_v54  ;;  %v386_v60 = vld [vmem:[#allocation8 + $0x210] sm:$0xff] }
 0x16c   : > { %v4794_v12 = vcombine.low %v386_v60, %v390_v0 }
 0x16e   : > { %2135 = vmatpush1.bf16.msra.mxu0 %v4730_v4  ;;  %2176 = vmatpush1.bf16.msra.mxu1 %v4732_v26  ;;  %v4804_v4 = vcombine.low %v395_v52, %v399_v54  ;;  %v4795_v26 = vcombine.high %v386_v60, %v390_v0  ;;  %v2231_v52 = vld [vmem:[#allocation8 + $0x8e8] sm:$0xff]  ;;  %v2222_v60 = vld [vmem:[#allocation8 + $0x8a0] sm:$0xff] }
 0x16f   : > { %2136 = vmatprep.subr.bf16.mxu0 %v4851_v5  ;;  %2177 = vmatprep.subr.bf16.mxu1 %v4853_v6  ;;  %v4797_v5 = vcombine.high %v387_v1, %v391_v2  ;;  %v2258_v6 = vld [vmem:[#allocation8 + $0x9c0] sm:$0xff]  ;;  %v2219_v0 = vld [vmem:[#allocation8 + $0x888] sm:$0xff] }
 0x170   : > { %v4910_v20 = vcombine.low %v2258_v6, %v2262_v7 }
 0x172   : > { %2137 = vmatpush2.bf16.msra.mxu0 %v4850_v13  ;;  %2178 = vmatpush2.bf16.msra.mxu1 %v4852_v50  ;;  %v4796_v13 = vcombine.low %v387_v1, %v391_v2  ;;  %v4911_v50 = vcombine.high %v2258_v6, %v2262_v7  ;;  %v2223_v1 = vld [vmem:[#allocation8 + $0x8a8] sm:$0xff]  ;;  %v2214_v6 = vld [vmem:[#allocation8 + $0x860] sm:$0xff] }
 0x173   : > { %2138 = vmatprep.subr.bf16.mxu0 %v4843_v14  ;;  %2179 = vmatprep.subr.bf16.mxu1 %v4845_v15  ;;  %v4913_v14 = vcombine.high %v2259_v10, %v2263_v11  ;;  %v2250_v15 = vld [vmem:[#allocation8 + $0x980] sm:$0xff]  ;;  %v2211_v7 = vld [vmem:[#allocation8 + $0x848] sm:$0xff] }
 0x176   : > { %2139 = vmatpush2.bf16.msra.mxu0 %v4842_v21  ;;  %2180 = vmatpush2.bf16.msra.mxu1 %v4844_v22  ;;  %v4912_v21 = vcombine.low %v2259_v10, %v2263_v11  ;;  %v4903_v22 = vcombine.high %v2250_v15, %v2254_v17  ;;  %v2215_v10 = vld [vmem:[#allocation8 + $0x868] sm:$0xff] }
 0x177   : > { %2140 = vmatprep.subr.bf16.mxu0 %v4835_v23  ;;  %2181 = vmatprep.subr.bf16.mxu1 %v4837_v24  ;;  %v4905_v23 = vcombine.high %v2251_v18, %v2255_v19  ;;  %v2242_v24 = vld [vmem:[#allocation8 + $0x940] sm:$0xff]  ;;  %v2207_v18 = vld [vmem:[#allocation8 + $0x828] sm:$0xff] }
 0x178   : > { %v4895_v34 = vcombine.high %v2242_v24, %v2246_v25  ;;  %v4894_v42 = vcombine.low %v2242_v24, %v2246_v25  ;;  %v2326_v24 = vld [vmem:[#allocation8 + $0xbe0] sm:$0xff]  ;;  %v2323_v25 = vld [vmem:[#allocation8 + $0xbc8] sm:$0xff] }
 0x17a   : > { %2141 = vmatpush2.bf16.msra.mxu0 %v4834_v30  ;;  %2182 = vmatpush2.bf16.msra.mxu1 %v4836_v31  ;;  %v2247_v30 = vld [vmem:[#allocation8 + $0x968] sm:$0xff] }
 0x17b   : > { %2142 = vmatprep.subr.bf16.mxu0 %v4827_v32  ;;  %2183 = vmatprep.subr.bf16.mxu1 %v4829_v33  ;;  %v4902_v32 = vcombine.low %v2250_v15, %v2254_v17  ;;  %v4897_v36 = vcombine.high %v2243_v29, %v2247_v30  ;;  %v4896_v44 = vcombine.low %v2243_v29, %v2247_v30  ;;  %v2206_v15 = vld [vmem:[#allocation8 + $0x820] sm:$0xff]  ;;  %v2203_v17 = vld [vmem:[#allocation8 + $0x808] sm:$0xff] }
 0x17c   : > { %v2327_v29 = vld [vmem:[#allocation8 + $0xbe8] sm:$0xff] }
 0x17e   : > { %2143 = vmatpush2.bf16.msra.mxu0 %v4826_v37  ;;  %2184 = vmatpush2.bf16.msra.mxu1 %v4828_v38  ;;  %v2234_v37 = vld [vmem:[#allocation8 + $0x900] sm:$0xff] }
 0x17f   : > { %2144 = vmatprep.subr.bf16.mxu0 %v4819_v39  ;;  %2185 = vmatprep.subr.bf16.mxu1 %v4821_v40  ;;  %v2238_v38 = vld [vmem:[#allocation8 + $0x920] sm:$0xff]  ;;  %v2235_v40 = vld [vmem:[#allocation8 + $0x908] sm:$0xff] }
 0x180   : > { %v4886_v54 = vcombine.low %v2234_v37, %v2238_v38 }
 0x182   : > { %2145 = vmatpush2.bf16.msra.mxu0 %v4818_v45  ;;  %2186 = vmatpush2.bf16.msra.mxu1 %v4820_v46  ;;  %v4887_v45 = vcombine.high %v2234_v37, %v2238_v38  ;;  %v2318_v37 = vld [vmem:[#allocation8 + $0xba0] sm:$0xff]  ;;  %v2315_v38 = vld [vmem:[#allocation8 + $0xb88] sm:$0xff] }
 0x183   : > { %2146 = vmatprep.subr.bf16.mxu0 %v4811_v47  ;;  %2187 = vmatprep.subr.bf16.mxu1 %v4813_v48  ;;  %v4889_v47 = vcombine.high %v2235_v40, %v2239_v41  ;;  %v2226_v48 = vld [vmem:[#allocation8 + $0x8c0] sm:$0xff] }
 0x184   : > { %v4878_v2 = vcombine.low %v2226_v48, %v2230_v49 }
 0x186   : > { %2147 = vmatpush2.bf16.msra.mxu0 %v4810_v56  ;;  %2188 = vmatpush2.bf16.msra.mxu1 %v4812_v57  ;;  %v4888_v56 = vcombine.low %v2235_v40, %v2239_v41  ;;  %v4879_v57 = vcombine.high %v2226_v48, %v2230_v49  ;;  %v4976_v41 = vcombine.low %v2323_v25, %v2327_v29 }
 0x187   : > { %2148 = vmatprep.subr.bf16.mxu0 %v4803_v59  ;;  %2189 = vmatprep.subr.bf16.mxu1 %v4805_v9  ;;  %v4881_v59 = vcombine.high %v2227_v51, %v2231_v52  ;;  %v2218_v9 = vld [vmem:[#allocation8 + $0x880] sm:$0xff] }
 0x188   : > { %v4870_v11 = vcombine.low %v2218_v9, %v2222_v60 }
 0x18a   : > { %2149 = vmatpush2.bf16.msra.mxu0 %v4802_v3  ;;  %2190 = vmatpush2.bf16.msra.mxu1 %v4804_v4  ;;  %v4880_v3 = vcombine.low %v2227_v51, %v2231_v52  ;;  %v4871_v4 = vcombine.high %v2218_v9, %v2222_v60  ;;  %v2298_v52 = vld [vmem:[#allocation8 + $0xb00] sm:$0xff] }
 0x18b   : > { %2150 = vmatprep.subr.bf16.mxu0 %v4795_v26  ;;  %2191 = vmatprep.subr.bf16.mxu1 %v4797_v5  ;;  %v4873_v26 = vcombine.high %v2219_v0, %v2223_v1  ;;  %v2210_v5 = vld [vmem:[#allocation8 + $0x840] sm:$0xff] }
 0x18c   : > { %v4862_v19 = vcombine.low %v2210_v5, %v2214_v6 }
 0x18e   : > { %2151 = vmatpush2.bf16.msra.mxu0 %v4794_v12  ;;  %2192 = vmatpush2.bf16.msra.mxu1 %v4796_v13  ;;  %v4872_v12 = vcombine.low %v2219_v0, %v2223_v1  ;;  %v4863_v13 = vcombine.high %v2210_v5, %v2214_v6  ;;  %v2290_v1 = vld [vmem:[#allocation8 + $0xac0] sm:$0xff] }
 0x18f   : > { %2976 = vmatprep.subr.bf16.mxu0 %v4911_v50  ;;  %3017 = vmatprep.subr.bf16.mxu1 %v4913_v14  ;;  %v4865_v50 = vcombine.high %v2211_v7, %v2215_v10  ;;  %v2202_v14 = vld [vmem:[#allocation8 + $0x800] sm:$0xff] }
 0x190   : > { %v4854_v30 = vcombine.low %v2202_v14, %v2206_v15 }
 0x191   : > { %v5851_v28 = vpop.f32.mrf.mxu0  ;;  %2153 = vmatmul.mubr.bf16.vlgmr.msra.gmra.mxu0 %v5842_v53  ;;  %v5854_v31 = vpop.f32.mrf.mxu1  ;;  %2194 = vmatmul.mubr.bf16.vlgmr.msra.gmra.mxu1 %v5842_v53 }
 0x192   : > { %2977 = vmatpush1.bf16.msra.mxu0 %v4910_v20  ;;  %3018 = vmatpush1.bf16.msra.mxu1 %v4912_v21  ;;  %v4864_v20 = vcombine.low %v2211_v7, %v2215_v10  ;;  %v4855_v21 = vcombine.high %v2202_v14, %v2206_v15  ;;  %v2282_v10 = vld [vmem:[#allocation8 + $0xa80] sm:$0xff] }
 0x193   : > { %v5857_v33 = vpop.f32.mrf.mxu0  ;;  %2978 = vmatprep.subr.bf16.mxu0 %v4903_v22  ;;  %v5859_v35 = vpop.f32.mrf.mxu1  ;;  %3019 = vmatprep.subr.bf16.mxu1 %v4905_v23  ;;  %v4857_v22 = vcombine.high %v2203_v17, %v2207_v18  ;;  %v2322_v23 = vld [vmem:[#allocation8 + $0xbc0] sm:$0xff] }
 0x194   : > { %3008 = vmatprep.mubr.bf16.mxu0 %v5849_v27  ;;  %3049 = vmatprep.mubr.bf16.mxu1 %v5849_v27  ;;  %v4974_v40 = vcombine.low %v2322_v23, %v2326_v24 }
 0x195   : > { %v1272_v39 = vpop.f32.mrf.mxu0  ;;  %v1313_v53 = vpop.f32.mrf.mxu1 }
 0x196   : > { %2979 = vmatpush1.bf16.msra.mxu0 %v4902_v32  ;;  %3020 = vmatpush1.bf16.msra.mxu1 %v4904_v55  ;;  %v4856_v32 = vcombine.low %v2203_v17, %v2207_v18  ;;  %v4975_v55 = vcombine.high %v2322_v23, %v2326_v24  ;;  %v2319_v39 = vld [vmem:[#allocation8 + $0xba8] sm:$0xff]  ;;  %v2274_v18 = vld [vmem:[#allocation8 + $0xa40] sm:$0xff] }
 0x197   : > { %v1273_v43 = vpop.f32.mrf.mxu0  ;;  %2980 = vmatprep.subr.bf16.mxu0 %v4895_v34  ;;  %v1314_v46 = vpop.f32.mrf.mxu1  ;;  %3021 = vmatprep.subr.bf16.mxu1 %v4897_v36  ;;  %v4977_v34 = vcombine.high %v2323_v25, %v2327_v29  ;;  %v2314_v36 = vld [vmem:[#allocation8 + $0xb80] sm:$0xff]  ;;  %v4968_v48 = vcombine.low %v2315_v38, %v2319_v39 }
 0x198   : > { %v4967_v53 = vcombine.high %v2314_v36, %v2318_v37  ;;  %v2306_v43 = vld [vmem:[#allocation8 + $0xb40] sm:$0xff]  ;;  %v2311_v46 = vld [vmem:[#allocation8 + $0xb68] sm:$0xff] }
 0x199   : > { %v2266_v29 = vld [vmem:[#allocation8 + $0xa00] sm:$0xff] }
 0x19a   : > { %2981 = vmatpush1.bf16.msra.mxu0 %v4894_v42  ;;  %3022 = vmatpush1.bf16.msra.mxu1 %v4896_v44  ;;  %v4969_v42 = vcombine.high %v2315_v38, %v2319_v39  ;;  %v2310_v44 = vld [vmem:[#allocation8 + $0xb60] sm:$0xff]  ;;  %v2260_v39 = vld [vmem:[#allocation8 + $0x9d0] sm:$0xff] }
 0x19b   : > { %2982 = vmatprep.subr.bf16.mxu0 %v4887_v45  ;;  %3023 = vmatprep.subr.bf16.mxu1 %v4889_v47  ;;  %v2307_v45 = vld [vmem:[#allocation8 + $0xb48] sm:$0xff]  ;;  %v4966_v47 = vcombine.low %v2314_v36, %v2318_v37  ;;  %v4959_v49 = vcombine.high %v2306_v43, %v2310_v44 }
 0x19c   : > { %v4961_v51 = vcombine.high %v2307_v45, %v2311_v46  ;;  %v4960_v9 = vcombine.low %v2307_v45, %v2311_v46  ;;  %v2252_v46 = vld [vmem:[#allocation8 + $0x990] sm:$0xff] }
 0x19e   : > { %2983 = vmatpush1.bf16.msra.mxu0 %v4886_v54  ;;  %3024 = vmatpush1.bf16.msra.mxu1 %v4888_v56  ;;  %v2302_v54 = vld [vmem:[#allocation8 + $0xb20] sm:$0xff]  ;;  %v2299_v56 = vld [vmem:[#allocation8 + $0xb08] sm:$0xff] }
 0x19f   : > { %2984 = vmatprep.subr.bf16.mxu0 %v4879_v57  ;;  %3025 = vmatprep.subr.bf16.mxu1 %v4881_v59  ;;  %v2303_v57 = vld [vmem:[#allocation8 + $0xb28] sm:$0xff]  ;;  %v4958_v59 = vcombine.low %v2306_v43, %v2310_v44  ;;  %v4951_v60 = vcombine.high %v2298_v52, %v2302_v54 }
 0x1a0   : > { %v4953_v0 = vcombine.high %v2299_v56, %v2303_v57  ;;  %v4952_v5 = vcombine.low %v2299_v56, %v2303_v57 }
 0x1a2   : > { %2985 = vmatpush1.bf16.msra.mxu0 %v4878_v2  ;;  %3026 = vmatpush1.bf16.msra.mxu1 %v4880_v3  ;;  %v2294_v2 = vld [vmem:[#allocation8 + $0xae0] sm:$0xff]  ;;  %v2291_v3 = vld [vmem:[#allocation8 + $0xac8] sm:$0xff] }
 0x1a3   : > { %2986 = vmatprep.subr.bf16.mxu0 %v4871_v4  ;;  %3027 = vmatprep.subr.bf16.mxu1 %v4873_v26  ;;  %v2295_v4 = vld [vmem:[#allocation8 + $0xae8] sm:$0xff]  ;;  %v4950_v26 = vcombine.low %v2298_v52, %v2302_v54  ;;  %v4943_v6 = vcombine.high %v2290_v1, %v2294_v2 }
 0x1a4   : > { %v4945_v7 = vcombine.high %v2291_v3, %v2295_v4  ;;  %v4944_v14 = vcombine.low %v2291_v3, %v2295_v4 }
 0x1a6   : > { %2987 = vmatpush1.bf16.msra.mxu0 %v4870_v11  ;;  %3028 = vmatpush1.bf16.msra.mxu1 %v4872_v12  ;;  %v2286_v11 = vld [vmem:[#allocation8 + $0xaa0] sm:$0xff]  ;;  %v2283_v12 = vld [vmem:[#allocation8 + $0xa88] sm:$0xff] }
 0x1a7   : > { %2988 = vmatprep.subr.bf16.mxu0 %v4863_v13  ;;  %3029 = vmatprep.subr.bf16.mxu1 %v4865_v50  ;;  %v2287_v13 = vld [vmem:[#allocation8 + $0xaa8] sm:$0xff]  ;;  %v4942_v50 = vcombine.low %v2290_v1, %v2294_v2  ;;  %v4935_v15 = vcombine.high %v2282_v10, %v2286_v11  ;;  %v2249_v1 = vld [vmem:[#allocation8 + $0x978] sm:$0xff] }
 0x1a8   : > { %v4937_v17 = vcombine.high %v2283_v12, %v2287_v13  ;;  %v4936_v23 = vcombine.low %v2283_v12, %v2287_v13  ;;  %v2237_v13 = vld [vmem:[#allocation8 + $0x918] sm:$0xff] }
 0x1aa   : > { %2989 = vmatpush1.bf16.msra.mxu0 %v4862_v19  ;;  %3030 = vmatpush1.bf16.msra.mxu1 %v4864_v20  ;;  %v2278_v19 = vld [vmem:[#allocation8 + $0xa60] sm:$0xff]  ;;  %v2275_v20 = vld [vmem:[#allocation8 + $0xa48] sm:$0xff] }
 0x1ab   : > { %2990 = vmatprep.subr.bf16.mxu0 %v4855_v21  ;;  %3031 = vmatprep.subr.bf16.mxu1 %v4857_v22  ;;  %v2279_v21 = vld [vmem:[#allocation8 + $0xa68] sm:$0xff]  ;;  %v4934_v22 = vcombine.low %v2282_v10, %v2286_v11  ;;  %v4927_v24 = vcombine.high %v2274_v18, %v2278_v19  ;;  %v2236_v10 = vld [vmem:[#allocation8 + $0x910] sm:$0xff] }
 0x1ac   : > { %v4929_v25 = vcombine.high %v2275_v20, %v2279_v21  ;;  %v4928_v36 = vcombine.low %v2275_v20, %v2279_v21  ;;  %v2240_v11 = vld [vmem:[#allocation8 + $0x930] sm:$0xff] }
 0x1ae   : > { %2991 = vmatpush1.bf16.msra.mxu0 %v4854_v30  ;;  %3032 = vmatpush1.bf16.msra.mxu1 %v4856_v32  ;;  %v2270_v30 = vld [vmem:[#allocation8 + $0xa20] sm:$0xff]  ;;  %v2267_v32 = vld [vmem:[#allocation8 + $0xa08] sm:$0xff] }
 0x1af   : > { %2992 = vmatprep.subr.bf16.mxu0 %v4975_v55  ;;  %3033 = vmatprep.subr.bf16.mxu1 %v4977_v34  ;;  %v2271_v55 = vld [vmem:[#allocation8 + $0xa28] sm:$0xff]  ;;  %v4926_v34 = vcombine.low %v2274_v18, %v2278_v19  ;;  %v4919_v37 = vcombine.high %v2266_v29, %v2270_v30  ;;  %v4891_v19 = vcombine.high %v2236_v10, %v2240_v11 }
 0x1b0   : > { %v4921_v38 = vcombine.high %v2267_v32, %v2271_v55  ;;  %v4920_v43 = vcombine.low %v2267_v32, %v2271_v55  ;;  %v2220_v55 = vld [vmem:[#allocation8 + $0x890] sm:$0xff] }
 0x1b2   : > { %2993 = vmatpush2.bf16.msra.mxu0 %v4974_v40  ;;  %3034 = vmatpush2.bf16.msra.mxu1 %v4976_v41  ;;  %v2264_v40 = vld [vmem:[#allocation8 + $0x9f0] sm:$0xff]  ;;  %v2261_v41 = vld [vmem:[#allocation8 + $0x9d8] sm:$0xff] }
 0x1b3   : > { %2994 = vmatprep.subr.bf16.mxu0 %v4967_v53  ;;  %3035 = vmatprep.subr.bf16.mxu1 %v4969_v42  ;;  %v2265_v53 = vld [vmem:[#allocation8 + $0x9f8] sm:$0xff]  ;;  %v4918_v42 = vcombine.low %v2266_v29, %v2270_v30  ;;  %v4915_v44 = vcombine.high %v2260_v39, %v2264_v40  ;;  %v4914_v52 = vcombine.low %v2260_v39, %v2264_v40 }
 0x1b4   : > { %v4917_v45 = vcombine.high %v2261_v41, %v2265_v53  ;;  %v4916_v54 = vcombine.low %v2261_v41, %v2265_v53  ;;  %v4890_v29 = vcombine.low %v2236_v10, %v2240_v11  ;;  %v2212_v53 = vld [vmem:[#allocation8 + $0x850] sm:$0xff] }
 0x1b6   : > { %2995 = vmatpush2.bf16.msra.mxu0 %v4966_v47  ;;  %3036 = vmatpush2.bf16.msra.mxu1 %v4968_v48  ;;  %v2256_v47 = vld [vmem:[#allocation8 + $0x9b0] sm:$0xff]  ;;  %v5864_v48 = vrot.slane %v5818_v61, 1 }
 0x1b7   : > { %2996 = vmatprep.subr.bf16.mxu0 %v4959_v49  ;;  %3037 = vmatprep.subr.bf16.mxu1 %v4961_v51  ;;  %v2253_v49 = vld [vmem:[#allocation8 + $0x998] sm:$0xff]  ;;  %v4907_v56 = vcombine.high %v2252_v46, %v2256_v47  ;;  %v4906_v3 = vcombine.low %v2252_v46, %v2256_v47 }
 0x1b8   : > { %v2257_v51 = vld [vmem:[#allocation8 + $0x9b8] sm:$0xff] }
 0x1b9   : > { %v4909_v57 = vcombine.high %v2253_v49, %v2257_v51 }
 0x1ba   : > { %2997 = vmatpush2.bf16.msra.mxu0 %v4958_v59  ;;  %3038 = vmatpush2.bf16.msra.mxu1 %v4960_v9  ;;  %v2244_v59 = vld [vmem:[#allocation8 + $0x950] sm:$0xff] }
 0x1bb   : > { %2998 = vmatprep.subr.bf16.mxu0 %v4951_v60  ;;  %3039 = vmatprep.subr.bf16.mxu1 %v4953_v0  ;;  %v2248_v9 = vld [vmem:[#allocation8 + $0x970] sm:$0xff]  ;;  %v2245_v0 = vld [vmem:[#allocation8 + $0x958] sm:$0xff] }
 0x1bc   : > { %v4900_v18 = vcombine.low %v2245_v0, %v2249_v1 }
 0x1be   : > { %2999 = vmatpush2.bf16.msra.mxu0 %v4950_v26  ;;  %3040 = vmatpush2.bf16.msra.mxu1 %v4952_v5  ;;  %v4908_v26 = vcombine.low %v2253_v49, %v2257_v51  ;;  %v4899_v5 = vcombine.high %v2244_v59, %v2248_v9  ;;  %v2204_v51 = vld [vmem:[#allocation8 + $0x810] sm:$0xff] }
 0x1bf   : > { %3000 = vmatprep.subr.bf16.mxu0 %v4943_v6  ;;  %3041 = vmatprep.subr.bf16.mxu1 %v4945_v7  ;;  %v4901_v7 = vcombine.high %v2245_v0, %v2249_v1  ;;  %v2324_v1 = vld [vmem:[#allocation8 + $0xbd0] sm:$0xff] }
 0x1c2   : > { %3001 = vmatpush2.bf16.msra.mxu0 %v4942_v50  ;;  %3042 = vmatpush2.bf16.msra.mxu1 %v4944_v14  ;;  %v2241_v50 = vld [vmem:[#allocation8 + $0x938] sm:$0xff] }
 0x1c3   : > { %3002 = vmatprep.subr.bf16.mxu0 %v4935_v15  ;;  %3043 = vmatprep.subr.bf16.mxu1 %v4937_v17  ;;  %v4898_v15 = vcombine.low %v2244_v59, %v2248_v9  ;;  %v4893_v21 = vcombine.high %v2237_v13, %v2241_v50 }
 0x1c6   : > { %3003 = vmatpush2.bf16.msra.mxu0 %v4934_v22  ;;  %3044 = vmatpush2.bf16.msra.mxu1 %v4936_v23  ;;  %v2228_v22 = vld [vmem:[#allocation8 + $0x8d0] sm:$0xff] }
 0x1c7   : > { %3004 = vmatprep.subr.bf16.mxu0 %v4927_v24  ;;  %3045 = vmatprep.subr.bf16.mxu1 %v4929_v25  ;;  %v2232_v23 = vld [vmem:[#allocation8 + $0x8f0] sm:$0xff]  ;;  %v2229_v24 = vld [vmem:[#allocation8 + $0x8d8] sm:$0xff] }
 0x1c8   : > { %v2233_v25 = vld [vmem:[#allocation8 + $0x8f8] sm:$0xff]  ;;  %v4883_v30 = vcombine.high %v2228_v22, %v2232_v23 }
 0x1c9   : > { %v4885_v32 = vcombine.high %v2229_v24, %v2233_v25  ;;  %v4884_v39 = vcombine.low %v2229_v24, %v2233_v25  ;;  %v2313_v24 = vld [vmem:[#allocation8 + $0xb78] sm:$0xff] }
 0x1ca   : > { %3005 = vmatpush2.bf16.msra.mxu0 %v4926_v34  ;;  %3046 = vmatpush2.bf16.msra.mxu1 %v4928_v36  ;;  %v2224_v34 = vld [vmem:[#allocation8 + $0x8b0] sm:$0xff]  ;;  %v2221_v36 = vld [vmem:[#allocation8 + $0x898] sm:$0xff] }
 0x1cb   : > { %3006 = vmatprep.subr.bf16.mxu0 %v4919_v37  ;;  %3047 = vmatprep.subr.bf16.mxu1 %v4921_v38  ;;  %v2225_v37 = vld [vmem:[#allocation8 + $0x8b8] sm:$0xff]  ;;  %v4882_v38 = vcombine.low %v2228_v22, %v2232_v23  ;;  %v4875_v40 = vcombine.high %v2220_v55, %v2224_v34  ;;  %v2312_v22 = vld [vmem:[#allocation8 + $0xb70] sm:$0xff] }
 0x1cc   : > { %v4877_v41 = vcombine.high %v2221_v36, %v2225_v37  ;;  %v4876_v46 = vcombine.low %v2221_v36, %v2225_v37  ;;  %v2309_v23 = vld [vmem:[#allocation8 + $0xb58] sm:$0xff] }
 0x1cd   : > { %v2305_v36 = vld [vmem:[#allocation8 + $0xb38] sm:$0xff] }
 0x1ce   : > { %3007 = vmatpush2.bf16.msra.mxu0 %v4918_v42  ;;  %3048 = vmatpush2.bf16.msra.mxu1 %v4920_v43  ;;  %v2216_v42 = vld [vmem:[#allocation8 + $0x870] sm:$0xff]  ;;  %v2213_v43 = vld [vmem:[#allocation8 + $0x858] sm:$0xff] }
 0x1cf   : > { %3058 = vmatprep.subr.bf16.mxu0 %v4915_v44  ;;  %3099 = vmatprep.subr.bf16.mxu1 %v4917_v45  ;;  %v2217_v44 = vld [vmem:[#allocation8 + $0x878] sm:$0xff]  ;;  %v4874_v45 = vcombine.low %v2220_v55, %v2224_v34  ;;  %v4867_v47 = vcombine.high %v2212_v53, %v2216_v42  ;;  %v2304_v55 = vld [vmem:[#allocation8 + $0xb30] sm:$0xff] }
 0x1d0   : > { %v4869_v49 = vcombine.high %v2213_v43, %v2217_v44  ;;  %v4868_v59 = vcombine.low %v2213_v43, %v2217_v44  ;;  %v2301_v34 = vld [vmem:[#allocation8 + $0xb18] sm:$0xff] }
 0x1d1   : > { %v5866_v60 = vpop.f32.mrf.mxu0  ;;  %3009 = vmatmul.mubr.bf16.vlgmr.msra.gmra.mxu0 %v5864_v48  ;;  %v5869_v2 = vpop.f32.mrf.mxu1  ;;  %3050 = vmatmul.mubr.bf16.vlgmr.msra.gmra.mxu1 %v5864_v48  ;;  %v2297_v43 = vld [vmem:[#allocation8 + $0xaf8] sm:$0xff] }
 0x1d2   : > { %3059 = vmatpush1.bf16.msra.mxu0 %v4914_v52  ;;  %3100 = vmatpush1.bf16.msra.mxu1 %v4916_v54  ;;  %v2208_v52 = vld [vmem:[#allocation8 + $0x830] sm:$0xff]  ;;  %v2205_v54 = vld [vmem:[#allocation8 + $0x818] sm:$0xff] }
 0x1d3   : > { %v5872_v4 = vpop.f32.mrf.mxu0  ;;  %3060 = vmatprep.subr.bf16.mxu0 %v4907_v56  ;;  %v5874_v6 = vpop.f32.mrf.mxu1  ;;  %3101 = vmatprep.subr.bf16.mxu1 %v4909_v57  ;;  %v2209_v56 = vld [vmem:[#allocation8 + $0x838] sm:$0xff]  ;;  %v4866_v57 = vcombine.low %v2212_v53, %v2216_v42  ;;  %v4859_v9 = vcombine.high %v2204_v51, %v2208_v52  ;;  %v2296_v53 = vld [vmem:[#allocation8 + $0xaf0] sm:$0xff] }
 0x1d4   : > { %3090 = vmatprep.mubr.bf16.mxu0 %v5849_v27  ;;  %3131 = vmatprep.mubr.bf16.mxu1 %v5849_v27  ;;  %v4892_v27 = vcombine.low %v2237_v13, %v2241_v50  ;;  %v4861_v0 = vcombine.high %v2205_v54, %v2209_v56  ;;  %v4860_v10 = vcombine.low %v2205_v54, %v2209_v56  ;;  %v2316_v13 = vld [vmem:[#allocation8 + $0xb90] sm:$0xff]  ;;  %v2293_v42 = vld [vmem:[#allocation8 + $0xad8] sm:$0xff] }
 0x1d5   : > { %v1354_v12 = vpop.f32.mrf.mxu0  ;;  %v1395_v14 = vpop.f32.mrf.mxu1  ;;  %v2320_v50 = vld [vmem:[#allocation8 + $0xbb0] sm:$0xff]  ;;  %v2289_v54 = vld [vmem:[#allocation8 + $0xab8] sm:$0xff] }
 0x1d6   : > { %3061 = vmatpush1.bf16.msra.mxu0 %v4906_v3  ;;  %3102 = vmatpush1.bf16.msra.mxu1 %v4908_v26  ;;  %v2328_v3 = vld [vmem:[#allocation8 + $0xbf0] sm:$0xff]  ;;  %v2325_v26 = vld [vmem:[#allocation8 + $0xbd8] sm:$0xff]  ;;  %v4970_v25 = vcombine.low %v2316_v13, %v2320_v50 }
 0x1d7   : > { %v1355_v17 = vpop.f32.mrf.mxu0  ;;  %3062 = vmatprep.subr.bf16.mxu0 %v4899_v5  ;;  %v1396_v20 = vpop.f32.mrf.mxu1  ;;  %3103 = vmatprep.subr.bf16.mxu1 %v4901_v7  ;;  %v2329_v5 = vld [vmem:[#allocation8 + $0xbf8] sm:$0xff]  ;;  %v4858_v7 = vcombine.low %v2204_v51, %v2208_v52  ;;  %v4979_v11 = vcombine.high %v2324_v1, %v2328_v3  ;;  %v2288_v51 = vld [vmem:[#allocation8 + $0xab0] sm:$0xff] }
 0x1d8   : > { %v4981_v12 = vcombine.high %v2325_v26, %v2329_v5  ;;  %v2317_v14 = vld [vmem:[#allocation8 + $0xb98] sm:$0xff]  ;;  %v4978_v17 = vcombine.low %v2324_v1, %v2328_v3  ;;  %v2280_v1 = vld [vmem:[#allocation8 + $0xa70] sm:$0xff] }
 0x1d9   : > { %v2285_v52 = vld [vmem:[#allocation8 + $0xa98] sm:$0xff] }
 0x1da   : > { %3063 = vmatpush1.bf16.msra.mxu0 %v4898_v15  ;;  %3104 = vmatpush1.bf16.msra.mxu1 %v4900_v18  ;;  %v2321_v15 = vld [vmem:[#allocation8 + $0xbb8] sm:$0xff]  ;;  %v4980_v18 = vcombine.low %v2325_v26, %v2329_v5 }
 0x1db   : > { %3064 = vmatprep.subr.bf16.mxu0 %v4891_v19  ;;  %3105 = vmatprep.subr.bf16.mxu1 %v4893_v21  ;;  %v4971_v19 = vcombine.high %v2316_v13, %v2320_v50  ;;  %v4973_v20 = vcombine.high %v2317_v14, %v2321_v15  ;;  %v2308_v21 = vld [vmem:[#allocation8 + $0xb50] sm:$0xff]  ;;  %v2277_v3 = vld [vmem:[#allocation8 + $0xa58] sm:$0xff] }
 0x1dc   : > { %v4962_v37 = vcombine.low %v2308_v21, %v2312_v22  ;;  %v2281_v26 = vld [vmem:[#allocation8 + $0xa78] sm:$0xff]  ;;  %v2272_v13 = vld [vmem:[#allocation8 + $0xa30] sm:$0xff] }
 0x1dd   : > { %v2269_v50 = vld [vmem:[#allocation8 + $0xa18] sm:$0xff] }
 0x1de   : > { %3065 = vmatpush1.bf16.msra.mxu0 %v4890_v29  ;;  %3106 = vmatpush1.bf16.msra.mxu1 %v4892_v27  ;;  %v4972_v29 = vcombine.low %v2317_v14, %v2321_v15  ;;  %v4963_v27 = vcombine.high %v2308_v21, %v2312_v22  ;;  %v2273_v14 = vld [vmem:[#allocation8 + $0xa38] sm:$0xff]  ;;  %v3208_v21 = vld [vmem:[#allocation8 + $0xde0] sm:$0xff]  ;;  %v3205_v22 = vld [vmem:[#allocation8 + $0xdc8] sm:$0xff] }
 0x1df   : > { %3066 = vmatprep.subr.bf16.mxu0 %v4883_v30  ;;  %3107 = vmatprep.subr.bf16.mxu1 %v4885_v32  ;;  %v4965_v30 = vcombine.high %v2309_v23, %v2313_v24  ;;  %v2300_v32 = vld [vmem:[#allocation8 + $0xb10] sm:$0xff] }
 0x1e0   : > { %v4954_v44 = vcombine.low %v2300_v32, %v2304_v55 }
 0x1e2   : > { %3067 = vmatpush1.bf16.msra.mxu0 %v4882_v38  ;;  %3108 = vmatpush1.bf16.msra.mxu1 %v4884_v39  ;;  %v4964_v38 = vcombine.low %v2309_v23, %v2313_v24  ;;  %v4955_v39 = vcombine.high %v2300_v32, %v2304_v55  ;;  %v3209_v23 = vld [vmem:[#allocation8 + $0xde8] sm:$0xff]  ;;  %v3200_v32 = vld [vmem:[#allocation8 + $0xda0] sm:$0xff]  ;;  %v3279_v55 = vrot.slane %v586_v62, 1 }
 0x1e3   : > { %3068 = vmatprep.subr.bf16.mxu0 %v4875_v40  ;;  %3109 = vmatprep.subr.bf16.mxu1 %v4877_v41  ;;  %v4957_v40 = vcombine.high %v2301_v34, %v2305_v36  ;;  %v2292_v41 = vld [vmem:[#allocation8 + $0xad0] sm:$0xff]  ;;  %v3193_v62 = vld [vmem:[#allocation8 + $0xd68] sm:$0xff] }
 0x1e4   : > { %v4946_v56 = vcombine.low %v2292_v41, %v2296_v53 }
 0x1e6   : > { %3069 = vmatpush1.bf16.msra.mxu0 %v4874_v45  ;;  %3110 = vmatpush1.bf16.msra.mxu1 %v4876_v46  ;;  %v4956_v45 = vcombine.low %v2301_v34, %v2305_v36  ;;  %v4947_v46 = vcombine.high %v2292_v41, %v2296_v53  ;;  %v3280_v34 = vrot.slane %v588_v63, 2  ;;  %v3197_v36 = vld [vmem:[#allocation8 + $0xd88] sm:$0xff]  ;;  %v3188_v53 = vld [vmem:[#allocation8 + $0xd40] sm:$0xff] }
 0x1e7   : > { %3070 = vmatprep.subr.bf16.mxu0 %v4867_v47  ;;  %3111 = vmatprep.subr.bf16.mxu1 %v4869_v49  ;;  %v4949_v47 = vcombine.high %v2293_v42, %v2297_v43  ;;  %v2284_v49 = vld [vmem:[#allocation8 + $0xa90] sm:$0xff] }
 0x1e8   : > { %v4938_v5 = vcombine.low %v2284_v49, %v2288_v51 }
 0x1ea   : > { %3071 = vmatpush1.bf16.msra.mxu0 %v4866_v57  ;;  %3112 = vmatpush1.bf16.msra.mxu1 %v4868_v59  ;;  %v4948_v57 = vcombine.low %v2293_v42, %v2297_v43  ;;  %v4939_v59 = vcombine.high %v2284_v49, %v2288_v51  ;;  %v3192_v42 = vld [vmem:[#allocation8 + $0xd60] sm:$0xff]  ;;  %v5882_v43 = vor.u32 %v3280_v34, %v3279_v55 }
 0x1eb   : > { %3072 = vmatprep.subr.bf16.mxu0 %v4859_v9  ;;  %3113 = vmatprep.subr.bf16.mxu1 %v4861_v0  ;;  %v4941_v9 = vcombine.high %v2285_v52, %v2289_v54  ;;  %v2276_v0 = vld [vmem:[#allocation8 + $0xa50] sm:$0xff]  ;;  %v5023_v49 = vcombine.high %v3188_v53, %v3192_v42 }
 0x1ec   : > { %v4930_v15 = vcombine.low %v2276_v0, %v2280_v1 }
 0x1ee   : > { %3073 = vmatpush1.bf16.msra.mxu0 %v4858_v7  ;;  %3114 = vmatpush1.bf16.msra.mxu1 %v4860_v10  ;;  %v4940_v7 = vcombine.low %v2285_v52, %v2289_v54  ;;  %v4931_v10 = vcombine.high %v2276_v0, %v2280_v1  ;;  %v5025_v52 = vcombine.high %v3189_v58, %v3193_v62  ;;  %v3180_v54 = vld [vmem:[#allocation8 + $0xd00] sm:$0xff] }
 0x1ef   : > { %3074 = vmatprep.subr.bf16.mxu0 %v4979_v11  ;;  %3115 = vmatprep.subr.bf16.mxu1 %v4981_v12  ;;  %v4933_v11 = vcombine.high %v2277_v3, %v2281_v26  ;;  %v2268_v12 = vld [vmem:[#allocation8 + $0xa10] sm:$0xff]  ;;  %v5022_v0 = vcombine.low %v3188_v53, %v3192_v42 }
 0x1f0   : > { %v4922_v24 = vcombine.low %v2268_v12, %v2272_v13 }
 0x1f2   : > { %3075 = vmatpush2.bf16.msra.mxu0 %v4978_v17  ;;  %3116 = vmatpush2.bf16.msra.mxu1 %v4980_v18  ;;  %v4932_v17 = vcombine.low %v2277_v3, %v2281_v26  ;;  %v4923_v18 = vcombine.high %v2268_v12, %v2272_v13  ;;  %v5024_v3 = vcombine.low %v3189_v58, %v3193_v62  ;;  %v3173_v12 = vld [vmem:[#allocation8 + $0xcc8] sm:$0xff] }
 0x1f3   : > { %3076 = vmatprep.subr.bf16.mxu0 %v4971_v19  ;;  %3117 = vmatprep.subr.bf16.mxu1 %v4973_v20  ;;  %v4925_v19 = vcombine.high %v2269_v50, %v2273_v14  ;;  %v3204_v20 = vld [vmem:[#allocation8 + $0xdc0] sm:$0xff]  ;;  %v3177_v13 = vld [vmem:[#allocation8 + $0xce8] sm:$0xff] }
 0x1f6   : > { %3077 = vmatpush2.bf16.msra.mxu0 %v4970_v25  ;;  %3118 = vmatpush2.bf16.msra.mxu1 %v4972_v29  ;;  %v4924_v25 = vcombine.low %v2269_v50, %v2273_v14  ;;  %v5039_v29 = vcombine.high %v3204_v20, %v3208_v21 }
 0x1f7   : > { %3078 = vmatprep.subr.bf16.mxu0 %v4963_v27  ;;  %3119 = vmatprep.subr.bf16.mxu1 %v4965_v30  ;;  %v5041_v27 = vcombine.high %v3205_v22, %v3209_v23  ;;  %v3196_v30 = vld [vmem:[#allocation8 + $0xd80] sm:$0xff] }
 0x1fa   : > { %3079 = vmatpush2.bf16.msra.mxu0 %v4962_v37  ;;  %3120 = vmatpush2.bf16.msra.mxu1 %v4964_v38  ;;  %v3201_v37 = vld [vmem:[#allocation8 + $0xda8] sm:$0xff]  ;;  %v5038_v38 = vcombine.low %v3204_v20, %v3208_v21 }
 0x1fb   : > { %3080 = vmatprep.subr.bf16.mxu0 %v4955_v39  ;;  %3121 = vmatprep.subr.bf16.mxu1 %v4957_v40  ;;  %v5040_v39 = vcombine.low %v3205_v22, %v3209_v23  ;;  %v5031_v40 = vcombine.high %v3196_v30, %v3200_v32  ;;  %v5033_v41 = vcombine.high %v3197_v36, %v3201_v37  ;;  %v3165_v20 = vld [vmem:[#allocation8 + $0xc88] sm:$0xff] }
 0x1fc   : > { %v3169_v21 = vld [vmem:[#allocation8 + $0xca8] sm:$0xff]  ;;  %v5008_v23 = vcombine.low %v3173_v12, %v3177_v13 }
 0x1fd   : > { %v5000_v34 = vcombine.low %v3165_v20, %v3169_v21 }
 0x1fe   : > { %3081 = vmatpush2.bf16.msra.mxu0 %v4954_v44  ;;  %3122 = vmatpush2.bf16.msra.mxu1 %v4956_v45  ;;  %v5030_v45 = vcombine.low %v3196_v30, %v3200_v32  ;;  %v3157_v30 = vld [vmem:[#allocation8 + $0xc48] sm:$0xff] }
 0x1ff   : > { %3082 = vmatprep.subr.bf16.mxu0 %v4947_v46  ;;  %3123 = vmatprep.subr.bf16.mxu1 %v4949_v47  ;;  %v5032_v47 = vcombine.low %v3197_v36, %v3201_v37  ;;  %v3161_v32 = vld [vmem:[#allocation8 + $0xc68] sm:$0xff] }
 0x200   : > { %v4993_v37 = vcombine.high %v3157_v30, %v3161_v32  ;;  %v4992_v42 = vcombine.low %v3157_v30, %v3161_v32  ;;  %v3237_v30 = vld [vmem:[#allocation8 + $0xec8] sm:$0xff] }
 0x201   : > { %v3241_v32 = vld [vmem:[#allocation8 + $0xee8] sm:$0xff] }
 0x202   : > { %3083 = vmatpush2.bf16.msra.mxu0 %v4946_v56  ;;  %3124 = vmatpush2.bf16.msra.mxu1 %v4948_v57  ;;  %v3184_v56 = vld [vmem:[#allocation8 + $0xd20] sm:$0xff] }
 0x203   : > { %3084 = vmatprep.subr.bf16.mxu0 %v4939_v59  ;;  %3125 = vmatprep.subr.bf16.mxu1 %v4941_v9  ;;  %v3181_v59 = vld [vmem:[#allocation8 + $0xd08] sm:$0xff]  ;;  %v5015_v26 = vcombine.high %v3180_v54, %v3184_v56  ;;  %v5014_v50 = vcombine.low %v3180_v54, %v3184_v56 }
 0x204   : > { %v3185_v9 = vld [vmem:[#allocation8 + $0xd28] sm:$0xff] }
 0x205   : > { %v5016_v14 = vcombine.low %v3181_v59, %v3185_v9 }
 0x206   : > { %3085 = vmatpush2.bf16.msra.mxu0 %v4938_v5  ;;  %3126 = vmatpush2.bf16.msra.mxu1 %v4940_v7  ;;  %v5017_v7 = vcombine.high %v3181_v59, %v3185_v9  ;;  %v3260_v9 = vld [vmem:[#allocation8 + $0xf80] sm:$0xff] }
 0x207   : > { %3086 = vmatprep.subr.bf16.mxu0 %v4931_v10  ;;  %3127 = vmatprep.subr.bf16.mxu1 %v4933_v11  ;;  %v3172_v10 = vld [vmem:[#allocation8 + $0xcc0] sm:$0xff] }
 0x208   : > { %v3176_v11 = vld [vmem:[#allocation8 + $0xce0] sm:$0xff] }
 0x209   : > { %v5006_v22 = vcombine.low %v3172_v10, %v3176_v11 }
 0x20a   : > { %3087 = vmatpush2.bf16.msra.mxu0 %v4930_v15  ;;  %3128 = vmatpush2.bf16.msra.mxu1 %v4932_v17  ;;  %v5007_v15 = vcombine.high %v3172_v10, %v3176_v11  ;;  %v5009_v17 = vcombine.high %v3173_v12, %v3177_v13  ;;  %v3252_v10 = vld [vmem:[#allocation8 + $0xf40] sm:$0xff]  ;;  %v3253_v12 = vld [vmem:[#allocation8 + $0xf48] sm:$0xff] }
 0x20b   : > { %3088 = vmatprep.subr.bf16.mxu0 %v4923_v18  ;;  %3129 = vmatprep.subr.bf16.mxu1 %v4925_v19  ;;  %v3164_v18 = vld [vmem:[#allocation8 + $0xc80] sm:$0xff]  ;;  %v3257_v13 = vld [vmem:[#allocation8 + $0xf68] sm:$0xff] }
 0x20c   : > { %v3168_v19 = vld [vmem:[#allocation8 + $0xca0] sm:$0xff] }
 0x20d   : > { %v4998_v55 = vcombine.low %v3164_v18, %v3168_v19  ;;  %v3256_v11 = vld [vmem:[#allocation8 + $0xf60] sm:$0xff] }
 0x20e   : > { %3089 = vmatpush2.bf16.msra.mxu0 %v4922_v24  ;;  %3130 = vmatpush2.bf16.msra.mxu1 %v4924_v25  ;;  %v4999_v24 = vcombine.high %v3164_v18, %v3168_v19  ;;  %v5001_v25 = vcombine.high %v3165_v20, %v3169_v21  ;;  %v3244_v18 = vld [vmem:[#allocation8 + $0xf00] sm:$0xff]  ;;  %v3245_v20 = vld [vmem:[#allocation8 + $0xf08] sm:$0xff] }
 0x20f   : > { %3924 = vmatprep.subr.bf16.mxu0 %v5039_v29  ;;  %3965 = vmatprep.subr.bf16.mxu1 %v5041_v27  ;;  %v3156_v29 = vld [vmem:[#allocation8 + $0xc40] sm:$0xff]  ;;  %v3249_v21 = vld [vmem:[#allocation8 + $0xf28] sm:$0xff] }
 0x210   : > { %v3160_v27 = vld [vmem:[#allocation8 + $0xc60] sm:$0xff] }
 0x211   : > { %v5884_v44 = vpop.f32.mrf.mxu0  ;;  %3091 = vmatmul.mubr.bf16.vlgmr.msra.gmra.mxu0 %v5864_v48  ;;  %v5887_v63 = vpop.f32.mrf.mxu1  ;;  %3132 = vmatmul.mubr.bf16.vlgmr.msra.gmra.mxu1 %v5864_v48  ;;  %v4991_v36 = vcombine.high %v3156_v29, %v3160_v27  ;;  %v4990_v53 = vcombine.low %v3156_v29, %v3160_v27  ;;  %v3248_v19 = vld [vmem:[#allocation8 + $0xf20] sm:$0xff] }
 0x212   : > { %3925 = vmatpush1.bf16.msra.mxu0 %v5038_v38  ;;  %3966 = vmatpush1.bf16.msra.mxu1 %v5040_v39  ;;  %v3148_v38 = vld [vmem:[#allocation8 + $0xc00] sm:$0xff] }
 0x213   : > { %v5890_v46 = vpop.f32.mrf.mxu0  ;;  %3926 = vmatprep.subr.bf16.mxu0 %v5031_v40  ;;  %v5892_v51 = vpop.f32.mrf.mxu1  ;;  %3967 = vmatprep.subr.bf16.mxu1 %v5033_v41  ;;  %v3152_v39 = vld [vmem:[#allocation8 + $0xc20] sm:$0xff]  ;;  %v3149_v40 = vld [vmem:[#allocation8 + $0xc08] sm:$0xff] }
 0x214   : > { %3956 = vmatprep.mubr.bf16.mxu0 %v5882_v43  ;;  %3997 = vmatprep.mubr.bf16.mxu1 %v5882_v43  ;;  %v3153_v41 = vld [vmem:[#allocation8 + $0xc28] sm:$0xff]  ;;  %v4983_v58 = vcombine.high %v3148_v38, %v3152_v39  ;;  %v4982_v54 = vcombine.low %v3148_v38, %v3152_v39  ;;  %v3236_v29 = vld [vmem:[#allocation8 + $0xec0] sm:$0xff] }
 0x215   : > { %v2076_v57 = vpop.f32.mrf.mxu0  ;;  %v2117_v48 = vpop.f32.mrf.mxu1  ;;  %v4985_v62 = vcombine.high %v3149_v40, %v3153_v41  ;;  %v4984_v56 = vcombine.low %v3149_v40, %v3153_v41  ;;  %v3240_v27 = vld [vmem:[#allocation8 + $0xee0] sm:$0xff]  ;;  %v3229_v40 = vld [vmem:[#allocation8 + $0xe88] sm:$0xff] }
 0x216   : > { %3927 = vmatpush1.bf16.msra.mxu0 %v5030_v45  ;;  %3968 = vmatpush1.bf16.msra.mxu1 %v5032_v47  ;;  %v3268_v45 = vld [vmem:[#allocation8 + $0xfc0] sm:$0xff]  ;;  %v3233_v41 = vld [vmem:[#allocation8 + $0xea8] sm:$0xff] }
 0x217   : > { %v2077_v1 = vpop.f32.mrf.mxu0  ;;  %3928 = vmatprep.subr.bf16.mxu0 %v5023_v49  ;;  %v2118_v5 = vpop.f32.mrf.mxu1  ;;  %3969 = vmatprep.subr.bf16.mxu1 %v5025_v52  ;;  %v3272_v47 = vld [vmem:[#allocation8 + $0xfe0] sm:$0xff]  ;;  %v3269_v49 = vld [vmem:[#allocation8 + $0xfc8] sm:$0xff] }
 0x218   : > { %v3273_v52 = vld [vmem:[#allocation8 + $0xfe8] sm:$0xff]  ;;  %v5103_v57 = vcombine.high %v3268_v45, %v3272_v47  ;;  %v3264_v48 = vld [vmem:[#allocation8 + $0xfa0] sm:$0xff] }
 0x219   : > { %v5105_v59 = vcombine.high %v3269_v49, %v3273_v52  ;;  %v3265_v1 = vld [vmem:[#allocation8 + $0xfa8] sm:$0xff]  ;;  %v5095_v5 = vcombine.high %v3260_v9, %v3264_v48  ;;  %v3228_v38 = vld [vmem:[#allocation8 + $0xe80] sm:$0xff] }
 0x21a   : > { %3929 = vmatpush1.bf16.msra.mxu0 %v5022_v0  ;;  %3970 = vmatpush1.bf16.msra.mxu1 %v5024_v3  ;;  %v3261_v0 = vld [vmem:[#allocation8 + $0xf88] sm:$0xff]  ;;  %v5102_v3 = vcombine.low %v3268_v45, %v3272_v47  ;;  %v3232_v39 = vld [vmem:[#allocation8 + $0xea0] sm:$0xff] }
 0x21b   : > { %3930 = vmatprep.subr.bf16.mxu0 %v5015_v26  ;;  %3971 = vmatprep.subr.bf16.mxu1 %v5017_v7  ;;  %v5104_v26 = vcombine.low %v3269_v49, %v3273_v52  ;;  %v5097_v7 = vcombine.high %v3261_v0, %v3265_v1  ;;  %v3220_v45 = vld [vmem:[#allocation8 + $0xe40] sm:$0xff]  ;;  %v3221_v49 = vld [vmem:[#allocation8 + $0xe48] sm:$0xff] }
 0x21c   : > { %v3224_v47 = vld [vmem:[#allocation8 + $0xe60] sm:$0xff]  ;;  %v3225_v52 = vld [vmem:[#allocation8 + $0xe68] sm:$0xff] }
 0x21e   : > { %3931 = vmatpush1.bf16.msra.mxu0 %v5014_v50  ;;  %3972 = vmatpush1.bf16.msra.mxu1 %v5016_v14  ;;  %v5094_v50 = vcombine.low %v3260_v9, %v3264_v48  ;;  %v5096_v14 = vcombine.low %v3261_v0, %v3265_v1  ;;  %v3212_v9 = vld [vmem:[#allocation8 + $0xe00] sm:$0xff]  ;;  %v3213_v0 = vld [vmem:[#allocation8 + $0xe08] sm:$0xff] }
 0x21f   : > { %3932 = vmatprep.subr.bf16.mxu0 %v5007_v15  ;;  %3973 = vmatprep.subr.bf16.mxu1 %v5009_v17  ;;  %v5087_v15 = vcombine.high %v3252_v10, %v3256_v11  ;;  %v5089_v17 = vcombine.high %v3253_v12, %v3257_v13  ;;  %v3216_v48 = vld [vmem:[#allocation8 + $0xe20] sm:$0xff]  ;;  %v3217_v1 = vld [vmem:[#allocation8 + $0xe28] sm:$0xff] }
 0x222   : > { %3933 = vmatpush1.bf16.msra.mxu0 %v5006_v22  ;;  %3974 = vmatpush1.bf16.msra.mxu1 %v5008_v23  ;;  %v5086_v22 = vcombine.low %v3252_v10, %v3256_v11  ;;  %v5088_v23 = vcombine.low %v3253_v12, %v3257_v13  ;;  %v3206_v10 = vld [vmem:[#allocation8 + $0xdd0] sm:$0xff]  ;;  %v3276_v12 = vrot.slane %v579_v16, 1  ;;  %v3277_v13 = vrot.slane %v581_v8, 2 }
 0x223   : > { %3934 = vmatprep.subr.bf16.mxu0 %v4999_v24  ;;  %3975 = vmatprep.subr.bf16.mxu1 %v5001_v25  ;;  %v5079_v24 = vcombine.high %v3244_v18, %v3248_v19  ;;  %v5081_v25 = vcombine.high %v3245_v20, %v3249_v21  ;;  %v3210_v11 = vld [vmem:[#allocation8 + $0xdf0] sm:$0xff] }
 0x224   : > { %v5042_v16 = vcombine.low %v3206_v10, %v3210_v11 }
 0x226   : > { %3935 = vmatpush1.bf16.msra.mxu0 %v4998_v55  ;;  %3976 = vmatpush1.bf16.msra.mxu1 %v5000_v34  ;;  %v5078_v55 = vcombine.low %v3244_v18, %v3248_v19  ;;  %v5080_v34 = vcombine.low %v3245_v20, %v3249_v21  ;;  %v5043_v18 = vcombine.high %v3206_v10, %v3210_v11  ;;  %v3198_v20 = vld [vmem:[#allocation8 + $0xd90] sm:$0xff]  ;;  %v3167_v11 = vld [vmem:[#allocation8 + $0xc98] sm:$0xff] }
 0x227   : > { %3936 = vmatprep.subr.bf16.mxu0 %v4991_v36  ;;  %3977 = vmatprep.subr.bf16.mxu1 %v4993_v37  ;;  %v5071_v36 = vcombine.high %v3236_v29, %v3240_v27  ;;  %v5073_v37 = vcombine.high %v3237_v30, %v3241_v32  ;;  %v3202_v21 = vld [vmem:[#allocation8 + $0xdb0] sm:$0xff] }
 0x228   : > { %v5035_v8 = vcombine.high %v3198_v20, %v3202_v21  ;;  %v3170_v10 = vld [vmem:[#allocation8 + $0xcb0] sm:$0xff] }
 0x22a   : > { %3937 = vmatpush1.bf16.msra.mxu0 %v4990_v53  ;;  %3978 = vmatpush1.bf16.msra.mxu1 %v4992_v42  ;;  %v5070_v53 = vcombine.low %v3236_v29, %v3240_v27  ;;  %v5072_v42 = vcombine.low %v3237_v30, %v3241_v32  ;;  %v3190_v29 = vld [vmem:[#allocation8 + $0xd50] sm:$0xff]  ;;  %v3191_v32 = vld [vmem:[#allocation8 + $0xd58] sm:$0xff] }
 0x22b   : > { %3938 = vmatprep.subr.bf16.mxu0 %v4983_v58  ;;  %3979 = vmatprep.subr.bf16.mxu1 %v4985_v62  ;;  %v5063_v58 = vcombine.high %v3228_v38, %v3232_v39  ;;  %v5065_v62 = vcombine.high %v3229_v40, %v3233_v41  ;;  %v3194_v27 = vld [vmem:[#allocation8 + $0xd70] sm:$0xff] }
 0x22e   : > { %3939 = vmatpush1.bf16.msra.mxu0 %v4982_v54  ;;  %3980 = vmatpush1.bf16.msra.mxu1 %v4984_v56  ;;  %v5062_v54 = vcombine.low %v3228_v38, %v3232_v39  ;;  %v5064_v56 = vcombine.low %v3229_v40, %v3233_v41  ;;  %v5027_v39 = vcombine.high %v3190_v29, %v3194_v27 }
 0x22f   : > { %3940 = vmatprep.subr.bf16.mxu0 %v5103_v57  ;;  %3981 = vmatprep.subr.bf16.mxu1 %v5105_v59  ;;  %v5055_v57 = vcombine.high %v3220_v45, %v3224_v47  ;;  %v5057_v59 = vcombine.high %v3221_v49, %v3225_v52 }
 0x232   : > { %3941 = vmatpush2.bf16.msra.mxu0 %v5102_v3  ;;  %3982 = vmatpush2.bf16.msra.mxu1 %v5104_v26  ;;  %v5054_v3 = vcombine.low %v3220_v45, %v3224_v47  ;;  %v5056_v26 = vcombine.low %v3221_v49, %v3225_v52  ;;  %v3187_v45 = vld [vmem:[#allocation8 + $0xd38] sm:$0xff]  ;;  %v5026_v49 = vcombine.low %v3190_v29, %v3194_v27 }
 0x233   : > { %3942 = vmatprep.subr.bf16.mxu0 %v5095_v5  ;;  %3983 = vmatprep.subr.bf16.mxu1 %v5097_v7  ;;  %v5047_v5 = vcombine.high %v3212_v9, %v3216_v48  ;;  %v5049_v7 = vcombine.high %v3213_v0, %v3217_v1  ;;  %v3155_v29 = vld [vmem:[#allocation8 + $0xc38] sm:$0xff] }
 0x236   : > { %3943 = vmatpush2.bf16.msra.mxu0 %v5094_v50  ;;  %3984 = vmatpush2.bf16.msra.mxu1 %v5096_v14  ;;  %v3207_v50 = vld [vmem:[#allocation8 + $0xdd8] sm:$0xff] }
 0x237   : > { %3944 = vmatprep.subr.bf16.mxu0 %v5087_v15  ;;  %3985 = vmatprep.subr.bf16.mxu1 %v5089_v17  ;;  %v3211_v14 = vld [vmem:[#allocation8 + $0xdf8] sm:$0xff]  ;;  %v5046_v15 = vcombine.low %v3212_v9, %v3216_v48  ;;  %v5048_v17 = vcombine.low %v3213_v0, %v3217_v1  ;;  %v3174_v9 = vld [vmem:[#allocation8 + $0xcd0] sm:$0xff] }
 0x238   : > { %v5045_v19 = vcombine.high %v3207_v50, %v3211_v14  ;;  %v5044_v61 = vcombine.low %v3207_v50, %v3211_v14  ;;  %v3178_v48 = vld [vmem:[#allocation8 + $0xcf0] sm:$0xff]  ;;  %v3175_v0 = vld [vmem:[#allocation8 + $0xcd8] sm:$0xff] }
 0x239   : > { %v3179_v1 = vld [vmem:[#allocation8 + $0xcf8] sm:$0xff] }
 0x23a   : > { %3945 = vmatpush2.bf16.msra.mxu0 %v5086_v22  ;;  %3986 = vmatpush2.bf16.msra.mxu1 %v5088_v23  ;;  %v5900_v22 = vor.u32 %v3277_v13, %v3276_v12  ;;  %v3199_v23 = vld [vmem:[#allocation8 + $0xd98] sm:$0xff]  ;;  %v5010_v13 = vcombine.low %v3174_v9, %v3178_v48  ;;  %v5012_v50 = vcombine.low %v3175_v0, %v3179_v1 }
 0x23b   : > { %3946 = vmatprep.subr.bf16.mxu0 %v5079_v24  ;;  %3987 = vmatprep.subr.bf16.mxu1 %v5081_v25  ;;  %v3203_v24 = vld [vmem:[#allocation8 + $0xdb8] sm:$0xff] }
 0x23c   : > { %v5037_v25 = vcombine.high %v3199_v23, %v3203_v24  ;;  %v5036_v38 = vcombine.low %v3199_v23, %v3203_v24  ;;  %v3171_v12 = vld [vmem:[#allocation8 + $0xcb8] sm:$0xff] }
 0x23d   : > { %v5004_v23 = vcombine.low %v3167_v11, %v3171_v12 }
 0x23e   : > { %3947 = vmatpush2.bf16.msra.mxu0 %v5078_v55  ;;  %3988 = vmatpush2.bf16.msra.mxu1 %v5080_v34  ;;  %v3195_v55 = vld [vmem:[#allocation8 + $0xd78] sm:$0xff] }
 0x23f   : > { %3948 = vmatprep.subr.bf16.mxu0 %v5071_v36  ;;  %3989 = vmatprep.subr.bf16.mxu1 %v5073_v37  ;;  %v5034_v36 = vcombine.low %v3198_v20, %v3202_v21  ;;  %v5029_v41 = vcombine.high %v3191_v32, %v3195_v55  ;;  %v3163_v20 = vld [vmem:[#allocation8 + $0xc78] sm:$0xff] }
 0x242   : > { %3949 = vmatpush2.bf16.msra.mxu0 %v5070_v53  ;;  %3990 = vmatpush2.bf16.msra.mxu1 %v5072_v42  ;;  %v3182_v53 = vld [vmem:[#allocation8 + $0xd10] sm:$0xff] }
 0x243   : > { %3950 = vmatprep.subr.bf16.mxu0 %v5063_v58  ;;  %3991 = vmatprep.subr.bf16.mxu1 %v5065_v62  ;;  %v3186_v42 = vld [vmem:[#allocation8 + $0xd30] sm:$0xff]  ;;  %v3183_v62 = vld [vmem:[#allocation8 + $0xd18] sm:$0xff] }
 0x246   : > { %3951 = vmatpush2.bf16.msra.mxu0 %v5062_v54  ;;  %3992 = vmatpush2.bf16.msra.mxu1 %v5064_v56  ;;  %v5028_v54 = vcombine.low %v3191_v32, %v3195_v55  ;;  %v5019_v56 = vcombine.high %v3182_v53, %v3186_v42 }
 0x247   : > { %3952 = vmatprep.subr.bf16.mxu0 %v5055_v57  ;;  %3993 = vmatprep.subr.bf16.mxu1 %v5057_v59  ;;  %v5021_v59 = vcombine.high %v3183_v62, %v3187_v45 }
 0x24a   : > { %3953 = vmatpush2.bf16.msra.mxu0 %v5054_v3  ;;  %3994 = vmatpush2.bf16.msra.mxu1 %v5056_v26  ;;  %v5018_v3 = vcombine.low %v3182_v53, %v3186_v42  ;;  %v5011_v26 = vcombine.high %v3174_v9, %v3178_v48  ;;  %v3275_v53 = vld [vmem:[#allocation8 + $0xff8] sm:$0xff]  ;;  %v3254_v48 = vld [vmem:[#allocation8 + $0xf50] sm:$0xff] }
 0x24b   : > { %3954 = vmatprep.subr.bf16.mxu0 %v5047_v5  ;;  %3995 = vmatprep.subr.bf16.mxu1 %v5049_v7  ;;  %v5013_v5 = vcombine.high %v3175_v0, %v3179_v1  ;;  %v3166_v7 = vld [vmem:[#allocation8 + $0xc90] sm:$0xff]  ;;  %v3255_v1 = vld [vmem:[#allocation8 + $0xf58] sm:$0xff] }
 0x24c   : > { %v5003_v14 = vcombine.high %v3166_v7, %v3170_v10  ;;  %v5002_v21 = vcombine.low %v3166_v7, %v3170_v10  ;;  %v3258_v0 = vld [vmem:[#allocation8 + $0xf70] sm:$0xff] }
 0x24d   : > { %v3246_v10 = vld [vmem:[#allocation8 + $0xf10] sm:$0xff] }
 0x24e   : > { %3955 = vmatpush2.bf16.msra.mxu0 %v5046_v15  ;;  %3996 = vmatpush2.bf16.msra.mxu1 %v5048_v17  ;;  %v5005_v15 = vcombine.high %v3167_v11, %v3171_v12  ;;  %v3158_v17 = vld [vmem:[#allocation8 + $0xc50] sm:$0xff]  ;;  %v3247_v12 = vld [vmem:[#allocation8 + $0xf18] sm:$0xff] }
 0x24f   : > { %4006 = vmatprep.subr.bf16.mxu0 %v5043_v18  ;;  %4047 = vmatprep.subr.bf16.mxu1 %v5045_v19  ;;  %v3162_v18 = vld [vmem:[#allocation8 + $0xc70] sm:$0xff]  ;;  %v3159_v19 = vld [vmem:[#allocation8 + $0xc58] sm:$0xff] }
 0x250   : > { %v4995_v24 = vcombine.high %v3158_v17, %v3162_v18  ;;  %v4994_v27 = vcombine.low %v3158_v17, %v3162_v18  ;;  %v4996_v32 = vcombine.low %v3159_v19, %v3163_v20  ;;  %v3250_v11 = vld [vmem:[#allocation8 + $0xf30] sm:$0xff] }
 0x251   : > { %v5902_v30 = vpop.f32.mrf.mxu0  ;;  %3957 = vmatmul.mubr.bf16.vlgmr.msra.gmra.mxu0 %v5900_v22  ;;  %v5905_v34 = vpop.f32.mrf.mxu1  ;;  %3998 = vmatmul.mubr.bf16.vlgmr.msra.gmra.mxu1 %v5900_v22  ;;  %v3238_v18 = vld [vmem:[#allocation8 + $0xed0] sm:$0xff] }
 0x252   : > { %4007 = vmatpush1.bf16.msra.mxu0 %v5042_v16  ;;  %4048 = vmatpush1.bf16.msra.mxu1 %v5044_v61  ;;  %v4997_v16 = vcombine.high %v3159_v19, %v3163_v20  ;;  %v3150_v61 = vld [vmem:[#allocation8 + $0xc10] sm:$0xff]  ;;  %v3239_v20 = vld [vmem:[#allocation8 + $0xed8] sm:$0xff] }
 0x253   : > { %v5908_v37 = vpop.f32.mrf.mxu0  ;;  %4008 = vmatprep.subr.bf16.mxu0 %v5035_v8  ;;  %v5910_v40 = vpop.f32.mrf.mxu1  ;;  %4049 = vmatprep.subr.bf16.mxu1 %v5037_v25  ;;  %v3154_v8 = vld [vmem:[#allocation8 + $0xc30] sm:$0xff]  ;;  %v3151_v25 = vld [vmem:[#allocation8 + $0xc18] sm:$0xff] }
 0x254   : > { %4038 = vmatprep.mubr.bf16.mxu0 %v5882_v43  ;;  %4079 = vmatprep.mubr.bf16.mxu1 %v5882_v43  ;;  %v5020_v43 = vcombine.low %v3183_v62, %v3187_v45  ;;  %v4987_v55 = vcombine.high %v3150_v61, %v3154_v8  ;;  %v4986_v42 = vcombine.low %v3150_v61, %v3154_v8  ;;  %v3242_v19 = vld [vmem:[#allocation8 + $0xef0] sm:$0xff] }
 0x255   : > { %v2158_v58 = vpop.f32.mrf.mxu0  ;;  %v2199_v47 = vpop.f32.mrf.mxu1  ;;  %v3230_v8 = vld [vmem:[#allocation8 + $0xe90] sm:$0xff] }
 0x256   : > { %4009 = vmatpush1.bf16.msra.mxu0 %v5034_v36  ;;  %4050 = vmatpush1.bf16.msra.mxu1 %v5036_v38  ;;  %v4989_v36 = vcombine.high %v3151_v25, %v3155_v29  ;;  %v3270_v38 = vld [vmem:[#allocation8 + $0xfd0] sm:$0xff]  ;;  %v4988_v58 = vcombine.low %v3151_v25, %v3155_v29  ;;  %v3231_v29 = vld [vmem:[#allocation8 + $0xe98] sm:$0xff] }
 0x257   : > { %v2159_v52 = vpop.f32.mrf.mxu0  ;;  %4010 = vmatprep.subr.bf16.mxu0 %v5027_v39  ;;  %v2200_v57 = vpop.f32.mrf.mxu1  ;;  %4051 = vmatprep.subr.bf16.mxu1 %v5029_v41  ;;  %v3274_v39 = vld [vmem:[#allocation8 + $0xff0] sm:$0xff]  ;;  %v3271_v41 = vld [vmem:[#allocation8 + $0xfd8] sm:$0xff] }
 0x258   : > { %v5107_v62 = vcombine.high %v3270_v38, %v3274_v39  ;;  %v5109_v45 = vcombine.high %v3271_v41, %v3275_v53  ;;  %v3262_v47 = vld [vmem:[#allocation8 + $0xf90] sm:$0xff]  ;;  %v3263_v52 = vld [vmem:[#allocation8 + $0xf98] sm:$0xff]  ;;  %v5108_v57 = vcombine.low %v3271_v41, %v3275_v53 }
 0x259   : > { %v3234_v25 = vld [vmem:[#allocation8 + $0xeb0] sm:$0xff]  ;;  %v3223_v53 = vld [vmem:[#allocation8 + $0xe58] sm:$0xff] }
 0x25a   : > { %4011 = vmatpush1.bf16.msra.mxu0 %v5026_v49  ;;  %4052 = vmatpush1.bf16.msra.mxu1 %v5028_v54  ;;  %v3266_v49 = vld [vmem:[#allocation8 + $0xfb0] sm:$0xff]  ;;  %v3267_v54 = vld [vmem:[#allocation8 + $0xfb8] sm:$0xff] }
 0x25b   : > { %4012 = vmatprep.subr.bf16.mxu0 %v5019_v56  ;;  %4053 = vmatprep.subr.bf16.mxu1 %v5021_v59  ;;  %v5106_v56 = vcombine.low %v3270_v38, %v3274_v39  ;;  %v5099_v59 = vcombine.high %v3262_v47, %v3266_v49  ;;  %v5101_v9 = vcombine.high %v3263_v52, %v3267_v54  ;;  %v3222_v39 = vld [vmem:[#allocation8 + $0xe50] sm:$0xff] }
 0x25c   : > { %v3226_v41 = vld [vmem:[#allocation8 + $0xe70] sm:$0xff] }
 0x25e   : > { %4013 = vmatpush1.bf16.msra.mxu0 %v5018_v3  ;;  %4054 = vmatpush1.bf16.msra.mxu1 %v5020_v43  ;;  %v3259_v3 = vld [vmem:[#allocation8 + $0xf78] sm:$0xff]  ;;  %v5098_v43 = vcombine.low %v3262_v47, %v3266_v49  ;;  %v3214_v49 = vld [vmem:[#allocation8 + $0xe10] sm:$0xff] }
 0x25f   : > { %4014 = vmatprep.subr.bf16.mxu0 %v5011_v26  ;;  %4055 = vmatprep.subr.bf16.mxu1 %v5013_v5  ;;  %v5100_v26 = vcombine.low %v3263_v52, %v3267_v54  ;;  %v5091_v5 = vcombine.high %v3254_v48, %v3258_v0  ;;  %v5093_v7 = vcombine.high %v3255_v1, %v3259_v3  ;;  %v3218_v52 = vld [vmem:[#allocation8 + $0xe30] sm:$0xff]  ;;  %v3215_v54 = vld [vmem:[#allocation8 + $0xe18] sm:$0xff] }
 0x262   : > { %4015 = vmatpush1.bf16.msra.mxu0 %v5010_v13  ;;  %4056 = vmatpush1.bf16.msra.mxu1 %v5012_v50  ;;  %v3251_v13 = vld [vmem:[#allocation8 + $0xf38] sm:$0xff]  ;;  %v5090_v50 = vcombine.low %v3254_v48, %v3258_v0  ;;  %v5050_v0 = vcombine.low %v3214_v49, %v3218_v52 }
 0x263   : > { %4016 = vmatprep.subr.bf16.mxu0 %v5003_v14  ;;  %4057 = vmatprep.subr.bf16.mxu1 %v5005_v15  ;;  %v5092_v14 = vcombine.low %v3255_v1, %v3259_v3  ;;  %v5083_v15 = vcombine.high %v3246_v10, %v3250_v11  ;;  %v5085_v17 = vcombine.high %v3247_v12, %v3251_v13 }
 0x264   : > { %v2073_v3 = vadd.f32 %v5884_v44, %v5851_v28 }
 0x266   : > { %4017 = vmatpush1.bf16.msra.mxu0 %v5002_v21  ;;  %4058 = vmatpush1.bf16.msra.mxu1 %v5004_v23  ;;  %v3243_v21 = vld [vmem:[#allocation8 + $0xef8] sm:$0xff]  ;;  %v5082_v23 = vcombine.low %v3246_v10, %v3250_v11  ;;  %v2116_v11 = vadd.f32 %v5892_v51, %v5859_v35  ;;  %v5297_v35 = vld [vmem:[#allocation9 + $0x30] sm:$0xff]  }
 0x267   : > { %4018 = vmatprep.subr.bf16.mxu0 %v4995_v24  ;;  %4059 = vmatprep.subr.bf16.mxu1 %v4997_v16  ;;  %v5084_v24 = vcombine.low %v3247_v12, %v3251_v13  ;;  %v5075_v16 = vcombine.high %v3238_v18, %v3242_v19  ;;  %v5077_v61 = vcombine.high %v3239_v20, %v3243_v21  ;;  %v5298_v51 = vld [vmem:[#allocation9 + $0xb0] sm:$0xff]  }
 0x26a   : > { %4019 = vmatpush1.bf16.msra.mxu0 %v4994_v27  ;;  %4060 = vmatpush1.bf16.msra.mxu1 %v4996_v32  ;;  %v3235_v27 = vld [vmem:[#allocation8 + $0xeb8] sm:$0xff]  ;;  %v5074_v32 = vcombine.low %v3238_v18, %v3242_v19  ;;  %v5296_v19 = vld [vmem:[#allocation9 + $0xf0] sm:$0xff]  }
 0x26b   : > { %4020 = vmatprep.subr.bf16.mxu0 %v4987_v55  ;;  %4061 = vmatprep.subr.bf16.mxu1 %v4989_v36  ;;  %v5076_v55 = vcombine.low %v3239_v20, %v3243_v21  ;;  %v5067_v36 = vcombine.high %v3230_v8, %v3234_v25  ;;  %v5069_v38 = vcombine.high %v3231_v29, %v3235_v27  ;;  %v5294_v18 = vld [vmem:[#allocation9 + $0xb8] sm:$0xff]   ;;  %v5299_v20 = vld [vmem:[#allocation9 + $0x68] sm:$0xff]  }
 0x26c   : > { %v5300_v21 = vld [vmem:[#allocation9 + $0xe8] sm:$0xff]  }
 0x26e   : > { %4021 = vmatpush1.bf16.msra.mxu0 %v4986_v42  ;;  %4062 = vmatpush1.bf16.msra.mxu1 %v4988_v58  ;;  %v3227_v42 = vld [vmem:[#allocation8 + $0xe78] sm:$0xff]  ;;  %v5066_v58 = vcombine.low %v3230_v8, %v3234_v25  ;;  %v5305_v8 = vld [vmem:[#allocation9 + $0x20] sm:$0xff]  }
 0x26f   : > { %4022 = vmatprep.subr.bf16.mxu0 %v5107_v62  ;;  %4063 = vmatprep.subr.bf16.mxu1 %v5109_v45  ;;  %v5068_v62 = vcombine.low %v3231_v29, %v3235_v27  ;;  %v5059_v45 = vcombine.high %v3222_v39, %v3226_v41  ;;  %v5061_v47 = vcombine.high %v3223_v53, %v3227_v42  ;;  %v5306_v25 = vld [vmem:[#allocation9 + $0xa0] sm:$0xff]   ;;  %v5307_v29 = vld [vmem:[#allocation9 + $0x58] sm:$0xff]  }
 0x270   : > { %v5308_v27 = vld [vmem:[#allocation9 + $0xd8] sm:$0xff]  }
 0x272   : > { %4023 = vmatpush2.bf16.msra.mxu0 %v5106_v56  ;;  %4064 = vmatpush2.bf16.msra.mxu1 %v5108_v57  ;;  %v3219_v56 = vld [vmem:[#allocation8 + $0xe38] sm:$0xff]  ;;  %v5058_v57 = vcombine.low %v3222_v39, %v3226_v41  ;;  %v5312_v39 = vld [vmem:[#allocation9 + $0xd0] sm:$0xff]   ;;  %v2196_v41 = vadd.f32 %v5905_v34, %v5869_v2  ;;  %v5315_v2 = vld [vmem:[#allocation9 + $0x48] sm:$0xff]  }
 0x273   : > { %4024 = vmatprep.subr.bf16.mxu0 %v5099_v59  ;;  %4065 = vmatprep.subr.bf16.mxu1 %v5101_v9  ;;  %v5060_v59 = vcombine.low %v3223_v53, %v3227_v42  ;;  %v5051_v9 = vcombine.high %v3214_v49, %v3218_v52  ;;  %v5053_v48 = vcombine.high %v3215_v54, %v3219_v56  ;;  %v5313_v42 = vld [vmem:[#allocation9 + $0x10] sm:$0xff]   ;;  %v5316_v34 = vld [vmem:[#allocation9 + $0xc8] sm:$0xff]  }
 0x274   : > { %v5052_v1 = vcombine.low %v3215_v54, %v3219_v56  ;;  %v2198_v49 = vadd.f32 %v5910_v40, %v5874_v6  ;;  %v5319_v6 = vld [vmem:[#allocation9 + $0x40] sm:$0xff]  }
 0x275   : > { %v5320_v40 = vld [vmem:[#allocation9 + $0xc0] sm:$0xff]  }
 0x276   : > { %4025 = vmatpush2.bf16.msra.mxu0 %v5098_v43  ;;  %4066 = vmatpush2.bf16.msra.mxu1 %v5100_v26  ;;  %v2114_v43 = vadd.f32 %v5887_v63, %v5854_v31 }
 0x277   : > { %4026 = vmatprep.subr.bf16.mxu0 %v5091_v5  ;;  %4067 = vmatprep.subr.bf16.mxu1 %v5093_v7  ;;  %v2075_v5 = vadd.f32 %v5890_v46, %v5857_v33  ;;  %v5291_v46 = vld [vmem:[#allocation9 + $0x78] sm:$0xff]  }
 0x27a   : > { %4027 = vmatpush2.bf16.msra.mxu0 %v5090_v50  ;;  %4068 = vmatpush2.bf16.msra.mxu1 %v5092_v14 }
 0x27b   : > { %4028 = vmatprep.subr.bf16.mxu0 %v5083_v15  ;;  %4069 = vmatprep.subr.bf16.mxu1 %v5085_v17  ;;  %v5292_v15 = vld [vmem:[#allocation9 + $0xf8] sm:$0xff]  }
 0x27c   : > { %v5293_v17 = vld [vmem:[#allocation9 + $0x38] sm:$0xff]  }
 0x27e   : > { %4029 = vmatpush2.bf16.msra.mxu0 %v5082_v23  ;;  %4070 = vmatpush2.bf16.msra.mxu1 %v5084_v24  ;;  %v5301_v23 = vld [vmem:[#allocation9 + $0x28] sm:$0xff]  }
 0x27f   : > { %4030 = vmatprep.subr.bf16.mxu0 %v5075_v16  ;;  %4071 = vmatprep.subr.bf16.mxu1 %v5077_v61  ;;  %v5302_v24 = vld [vmem:[#allocation9 + $0xa8] sm:$0xff]   ;;  %v5303_v16 = vld [vmem:[#allocation9 + $0x60] sm:$0xff]  }
 0x280   : > { %v5304_v61 = vld [vmem:[#allocation9 + $0xe0] sm:$0xff]  }
 0x282   : > { %4031 = vmatpush2.bf16.msra.mxu0 %v5074_v32  ;;  %4072 = vmatpush2.bf16.msra.mxu1 %v5076_v55  ;;  %v5309_v32 = vld [vmem:[#allocation9 + $0x18] sm:$0xff]  }
 0x283   : > { %4032 = vmatprep.subr.bf16.mxu0 %v5067_v36  ;;  %4073 = vmatprep.subr.bf16.mxu1 %v5069_v38  ;;  %v5310_v55 = vld [vmem:[#allocation9 + $0x98] sm:$0xff]   ;;  %v2155_v36 = vadd.f32 %v5902_v30, %v5866_v60  ;;  %v5311_v38 = vld [vmem:[#allocation9 + $0x50] sm:$0xff]  }
 0x286   : > { %4033 = vmatpush2.bf16.msra.mxu0 %v5066_v58  ;;  %4074 = vmatpush2.bf16.msra.mxu1 %v5068_v62  ;;  %v5314_v58 = vld [vmem:[#allocation9 + $0x90] sm:$0xff]   ;;  %v2157_v62 = vadd.f32 %v5908_v37, %v5872_v4 }
 0x287   : > { %4034 = vmatprep.subr.bf16.mxu0 %v5059_v45  ;;  %4075 = vmatprep.subr.bf16.mxu1 %v5061_v47 }
 0x28a   : > { %4035 = vmatpush2.bf16.msra.mxu0 %v5058_v57  ;;  %4076 = vmatpush2.bf16.msra.mxu1 %v5060_v59  ;;  %v5317_v59 = vld [vmem:[#allocation9 + $0x8] sm:$0xff]  }
 0x28b   : > { %4036 = vmatprep.subr.bf16.mxu0 %v5051_v9  ;;  %4077 = vmatprep.subr.bf16.mxu1 %v5053_v48  ;;  %v5318_v9 = vld [vmem:[#allocation9 + $0x88] sm:$0xff]  }
 0x28e   : > { %4037 = vmatpush2.bf16.msra.mxu0 %v5050_v0  ;;  %4078 = vmatpush2.bf16.msra.mxu1 %v5052_v1  ;;  %v5321_v0 = vld [vmem:[#allocation9] sm:$0xff]  }
 0x28f   : > { %5147 = vmatprep.subr.bf16.mxu0 %v5291_v46  ;;  %5169 = vmatprep.subr.bf16.mxu1 %v5292_v15  ;;  %v5322_v1 = vld [vmem:[#allocation9 + $0x80] sm:$0xff]  }
 0x291   : > { %v3010_v26 = vpop.f32.mrf.mxu0  ;;  %4039 = vmatmul.mubr.bf16.vlgmr.msra.gmra.mxu0 %v5900_v22  ;;  %v3051_v10 = vpop.f32.mrf.mxu1  ;;  %4080 = vmatmul.mubr.bf16.vlgmr.msra.gmra.mxu1 %v5900_v22  ;;  %v5295_v22 = vld [vmem:[#allocation9 + $0x70] sm:$0xff]  }
 0x292   : > { %v5921_v7 = vadd.f32 %v3010_v26, %v2073_v3  ;;  %v5926_v12 = vadd.f32 %v3051_v10, %v2114_v43  ;;  %5148 = vmatpush3.bf16.msra.mxu0 %v5293_v17  ;;  %5170 = vmatpush3.bf16.msra.mxu1 %v5294_v18 }
 0x293   : > { %v3012_v28 = vpop.f32.mrf.mxu0  ;;  %v3053_v31 = vpop.f32.mrf.mxu1  ;;  %5149 = vmatprep.subr.bf16.mxu0 %v5295_v22  ;;  %5171 = vmatprep.subr.bf16.mxu1 %v5296_v19 }
 0x294   : > { %v5928_v44 = vadd.f32 %v3012_v28, %v2075_v5  ;;  %v5930_v63 = vadd.f32 %v3053_v31, %v2116_v11 }
 0x295   : > { %v3014_v13 = vpop.f32.mrf.mxu0  ;;  %v3055_v50 = vpop.f32.mrf.mxu1 }
 0x296   : > { %5150 = vmatpush3.bf16.msra.mxu0 %v5297_v35  ;;  %5172 = vmatpush3.bf16.msra.mxu1 %v5298_v51 }
 0x297   : > { %v3015_v14 = vpop.f32.mrf.mxu0  ;;  %v3056_v33 = vpop.f32.mrf.mxu1  ;;  %5151 = vmatprep.subr.bf16.mxu0 %v5299_v20  ;;  %5173 = vmatprep.subr.bf16.mxu1 %v5300_v21 }
 0x29a   : > { %5152 = vmatpush3.bf16.msra.mxu0 %v5301_v23  ;;  %5174 = vmatpush3.bf16.msra.mxu1 %v5302_v24 }
 0x29b   : > { %5153 = vmatprep.subr.bf16.mxu0 %v5303_v16  ;;  %5175 = vmatprep.subr.bf16.mxu1 %v5304_v61 }
 0x29e   : > { %5154 = vmatpush3.bf16.msra.mxu0 %v5305_v8  ;;  %5176 = vmatpush3.bf16.msra.mxu1 %v5306_v25 }
 0x29f   : > { %5155 = vmatprep.subr.bf16.mxu0 %v5307_v29  ;;  %5177 = vmatprep.subr.bf16.mxu1 %v5308_v27 }
 0x2a2   : > { %5156 = vmatpush3.bf16.msra.mxu0 %v5309_v32  ;;  %5178 = vmatpush3.bf16.msra.mxu1 %v5310_v55 }
 0x2a3   : > { %5157 = vmatprep.subr.bf16.mxu0 %v5311_v38  ;;  %5179 = vmatprep.subr.bf16.mxu1 %v5312_v39 }
 0x2a6   : > { %5158 = vmatpush3.bf16.msra.mxu0 %v5313_v42  ;;  %5180 = vmatpush3.bf16.msra.mxu1 %v5314_v58 }
 0x2a7   : > { %5159 = vmatprep.subr.bf16.mxu0 %v5315_v2  ;;  %5181 = vmatprep.subr.bf16.mxu1 %v5316_v34 }
 0x2aa   : > { %5160 = vmatpush3.bf16.msra.mxu0 %v5317_v59  ;;  %5182 = vmatpush3.bf16.msra.mxu1 %v5318_v9 }
 0x2ab   : > { %5161 = vmatprep.subr.bf16.mxu0 %v5319_v6  ;;  %5183 = vmatprep.subr.bf16.mxu1 %v5320_v40 }
 0x2ae   : > { %5162 = vmatpush3.bf16.msra.mxu0 %v5321_v0  ;;  %5184 = vmatpush3.bf16.msra.mxu1 %v5322_v1 }
 0x2d1   : > { %v3092_v53 = vpop.f32.mrf.mxu0  ;;  %v3133_v47 = vpop.f32.mrf.mxu1 }
 0x2d2   : > { %v3144_v45 = vadd.f32 %v3092_v53, %v2155_v36  ;;  %v3146_v52 = vadd.f32 %v3133_v47, %v2196_v41 }
 0x2d3   : > { %v3094_v60 = vpop.f32.mrf.mxu0  ;;  %v3135_v54 = vpop.f32.mrf.mxu1 }
 0x2d4   : > { %v3145_v30 = vadd.f32 %v3094_v60, %v2157_v62  ;;  %v3147_v56 = vadd.f32 %v3135_v54, %v2198_v49 }
 0x2d5   : > { %v3096_v57 = vpop.f32.mrf.mxu0  ;;  %v3137_v4 = vpop.f32.mrf.mxu1 }
 0x2d7   : > { %v3097_v37 = vpop.f32.mrf.mxu0  ;;  %v3138_v48 = vpop.f32.mrf.mxu1 }
 0x311   : > { %v3958_v3 = vpop.f32.mrf.mxu0  ;;  %v3999_v26 = vpop.f32.mrf.mxu1 }
 0x312   : > { %v4088_v43 = vadd.f32 %v3958_v3, %v5921_v7  ;;  %v4090_v5 = vadd.f32 %v3999_v26, %v5926_v12 }
 0x313   : > { %v3960_v10 = vpop.f32.mrf.mxu0  ;;  %v4001_v28 = vpop.f32.mrf.mxu1 }
 0x314   : > { %v4089_v11 = vadd.f32 %v3960_v10, %v5928_v44  ;;  %v4091_v31 = vadd.f32 %v4001_v28, %v5930_v63  ;;  %v4096_v19 = vmul.f32 %v4088_v43, %v4088_v43  ;;  %v4098_v12 = vmul.f32 %v4090_v5, %v4090_v5 }
 0x315   : > { %v3962_v13 = vpop.f32.mrf.mxu0  ;;  %v4003_v50 = vpop.f32.mrf.mxu1 }
 0x316   : > { %v4097_v23 = vmul.f32 %v4089_v11, %v4089_v11  ;;  %v4099_v61 = vmul.f32 %v4091_v31, %v4091_v31 }
 0x317   : > { %v3963_v14 = vpop.f32.mrf.mxu0  ;;  %v4004_v33 = vpop.f32.mrf.mxu1 }
 0x351   : > { %v4040_v46 = vpop.f32.mrf.mxu0  ;;  %v4081_v17 = vpop.f32.mrf.mxu1 }
 0x352   : > { %v4092_v15 = vadd.f32 %v4040_v46, %v3144_v45  ;;  %v4094_v18 = vadd.f32 %v4081_v17, %v3146_v52  ;;  %v4449_v52 = vstv %s4448_s6 }
 0x353   : > { %v4042_v22 = vpop.f32.mrf.mxu0  ;;  %v4083_v51 = vpop.f32.mrf.mxu1 }
 0x354   : > { %v4100_v7 = vmul.f32 %v4092_v15, %v4092_v15  ;;  %v4093_v35 = vadd.f32 %v4042_v22, %v3145_v30  ;;  %v4102_v20 = vmul.f32 %v4094_v18, %v4094_v18  ;;  %v4095_v21 = vadd.f32 %v4083_v51, %v3147_v56 }
 0x355   : > { %v4044_v44 = vpop.f32.mrf.mxu0  ;;  %v4085_v16 = vpop.f32.mrf.mxu1 }
 0x356   : > { %v4104_v24 = vadd.f32 %v4100_v7, %v4096_v19  ;;  %v4101_v63 = vmul.f32 %v4093_v35, %v4093_v35  ;;  %v4106_v8 = vadd.f32 %v4102_v20, %v4098_v12  ;;  %v4103_v25 = vmul.f32 %v4095_v21, %v4095_v21 }
 0x357   : > { %v4045_v29 = vpop.f32.mrf.mxu0  ;;  %v4086_v32 = vpop.f32.mrf.mxu1 }
 0x358   : > { %v4105_v27 = vadd.f32 %v4101_v63, %v4097_v23  ;;  %v4107_v55 = vadd.f32 %v4103_v25, %v4099_v61  ;;  %v4108_v38 = vpack.c.bf16 %v4104_v24, %v4104_v24  ;;  %v4110_v41 = vpack.c.bf16 %v4106_v8, %v4106_v8 }
 0x35a   : > { %v4109_v36 = vpack.c.bf16 %v4105_v27, %v4105_v27  ;;  %v4111_v39 = vpack.c.bf16 %v4107_v55, %v4107_v55 }
 0x35c   : > { %4400 = vmatprep.mubr.bf16.mxu0 %v4109_v36  ;;  %4440 = vmatprep.mubr.bf16.mxu1 %v4111_v39 }
 0x35d   : > { %4401 = vmatmul.mubr.bf16.vlgmr.msra.gmra.mxu0 %v4108_v38  ;;  %4441 = vmatmul.mubr.bf16.vlgmr.msra.gmra.mxu1 %v4110_v41 }
 0x41d   : > { %v5163_v53 = vpop.f32.mrf.mxu0  ;;  %v5185_v42 = vpop.f32.mrf.mxu1 }
 0x41f   : > { %v5164_v58 = vpop.f32.mrf.mxu0  ;;  %v5186_v45 = vpop.f32.mrf.mxu1 }
 0x420   : > { %v5165_v62 = vadd.f32 %v5164_v58, %v5163_v53  ;;  %v5187_v47 = vadd.f32 %v5186_v45, %v5185_v42 }
 0x421   : > { %v5166_v49 = vpop.f32.mrf.mxu0  ;;  %v5188_v60 = vpop.f32.mrf.mxu1 }
 0x422   : > { %v4443_v30 = vadd.f32 %v5187_v47, %v5165_v62 }
 0x423   : > { %v5167_v54 = vpop.f32.mrf.mxu0  ;;  %v5189_v2 = vpop.f32.mrf.mxu1 }
 0x424   : > { %v4450_v34 = vmul.f32 %v4449_v52, %v4443_v30 }
 0x426   : > { %v4451_v56 = vmax.f32 %v4450_v34, 1e-07 }
 0x428   : > { %5323 = vlog2.f32 %v4451_v56 }
 0x435   : > { %v5324_v57 = vpop.eup %5323 }
 0x436   : > { %v4453_v59 = vmul.f32 0.6931472, %v5324_v57 }
 0x438   : > { %4454 = vst [vmem:[%s311_s15] sm:$0xff] %v4453_v59 }
 0x439   : > { %5447 = shalt.err (!%p5444_p4)
}
 0x43a   : > { %s5448_s20 = scalar_lea.hbm %s4467_s8, 128  ;;  %s5452_s3 = scalar_lea.hbm %s5994_s5, 256 }
 0x43b   : > { %p5449_p5 = scmp.ne.s32.totalorder %s4467_s8, %s5448_s20  ;;  %p5453_p13 = scmp.lt.s32.totalorder %s4467_s8, %s5994_s5 }
 0x43c   : > { %p5454_p1 = scmp.lt.s32.totalorder %s5452_s3, %s5448_s20 }
 0x43d   : > { %p5450_p11 = pnand %p5449_p5, %p6029_p6 }
 0x43e   : > { %p5455_p3 = por %p5454_p1, %p5453_p13 }
 0x43f   : > { %p5451_p7 = pneg %p5450_p11 }
 0x441   : > { %p5456_p12 = pnand %p5455_p3, %p5451_p7 }
 0x443   : > { %5459 = shalt.err (!%p5456_p12)
}
 0x444   : > { %5203 = dma.vmem_to_hbm [thread:$0]  (%p6029_p6), %s4470_s17, 128, %s4467_s8, %s4456_s12  }
 0x445 PF: > { %s4481_s7 = sand.u32 1, %s5522_s23   ;;  %p6030_p8 = scmp.ne.s32.totalorder %s6013_s10, 0 }
 0x446   : > { %p6031_p9 = scmp.ge.s32.totalorder %s5534_s0, 2  ;;  %s4482_s11 = scalar_lea.sflag [#allocation5], %s4481_s7 }
 0x448   : > { %p5220_p10 = pnand %p6031_p9, %p6030_p8 }
 0x44a   : > { %p5221_p2 = pneg %p5220_p10 }
 0x44c   : > { %5505 = dma.done.wait (%p5221_p2), %s4482_s11, 128  }
 0x44d   : > { %5507 = vsyncadd (%p5221_p2), %s4482_s11, 4294967168  ;;  %p23_p6 = scmp.ge.s32.totalorder %s5652_s19, 4   ;;  %s6032_s20 = smov %s5514_s21 }
 0x44e   : > { %s6033_s21 = smov %s5518_s22  ;;  %s6034_s22 = smov %s5729_s27 }
 0x44f   : > { %s6035_s23 = smov %s5526_s24  ;;  %s6036_s24 = smov %s5530_s25 }
 0x450   : > { %s6037_s25 = smov %s5663_s30  ;;  %s6038_s0 = smov %s5652_s19 }
 0x451   :  { %25 = sbr.rel (!%p23_p6) target bundleno = 15 (0xf), region = 106 }
 0x456   :  { %4487 = vsyncpa [#allocation4], 1 }
 0x457   :  { %4489 = vsyncpa [#allocation4 + $0x1], 1 }
 0x458   :  { %4490 = vsyncpa [#allocation7], 1 }
 0x459   :  { %4492 = vsyncpa [#allocation7 + $0x1], 1 }
 0x45a   :  { %4493 = vsyncpa [#allocation10], 1 }
 0x45b   :  { %4494 = vsyncpa [#allocation5], 1 }
 0x45c   :  { %4496 = vsyncpa [#allocation5 + $0x1], 1 }

// kernel: tpu_custom_call.1
= control target key start
LH: loop header
LB: loop body
LE: loop exit
PB: predicated region body
PF: predicated region fallthrough
CT: control target
= control target key end

     0   :  { %s5989_s0 = inlined_call_operand.<no memory space> [shape: f32[1], index: 0, kind: input, shape index: {}]   ;;  %s5990_s1 = inlined_call_operand.hbm [shape: f32[24,256], index: 1, kind: input, shape index: {}]   ;;  %s5991_s2 = inlined_call_operand.hbm [shape: f32[24,256], index: 2, kind: input, shape index: {}]   ;;  %s5992_s3 = inlined_call_operand.hbm [shape: bf16[1024,1024], index: 3, kind: input, shape index: {}]   ;;  %s5993_s4 = inlined_call_operand.hbm [shape: bf16[512,128], index: 4, kind: input, shape index: {}]   ;;  %s5994_s5 = inlined_call_operand.hbm [shape: f32[16,128], index: 5, kind: output, shape index: {}]  }
   0x1   :  { %6003 = sst [smem:[#allocation17_spill]] %s5990_s1 }
   0x2   :  { %6004 = sst [smem:[#allocation18_spill]] %s5992_s3 }
   0x3   :  { %6005 = sst [smem:[#allocation19_spill]] %s5993_s4 }
   0x4   :  { %10 = sst [smem:[#allocation2]] %s5989_s0 }
   0x5   :  { %11 = vsyncpa [#allocation4], 0 }
   0x6   :  { %13 = vsyncpa [#allocation4 + $0x1], 0 }
   0x7   :  { %14 = vsyncpa [#allocation7], 0 }
   0x8   :  { %16 = vsyncpa [#allocation7 + $0x1], 0 }
   0x9   :  { %17 = vsyncpa [#allocation10], 0 }
   0xa   :  { %18 = vsyncpa [#allocation5], 0 }
   0xb   :  { %20 = vsyncpa [#allocation5 + $0x1], 0  ;;  %s5578_s20 = smov 0   ;;  %s5580_s21 = smov 0  }
   0xc   :  { %s5582_s22 = smov 0   ;;  %s5584_s23 = smov 0  }
   0xd   :  { %s5586_s24 = smov 0   ;;  %s5588_s25 = smov 0  }
   0xe   :  { %s5590_s0 = smov 0  }
   0xf LB: > { %s5536_s26 = smov [#allocation8]   ;;  %s5614_s28 = sadd.s32 4294967295, %s5534_s0   ;;  %s5534_s0 = sphi %s5590_s0, %s6038_s0   ;;  %s5530_s25 = sphi %s5588_s25, %s6037_s25   ;;  %s5526_s24 = sphi %s5586_s24, %s6036_s24   ;;  %s5522_s23 = sphi %s5584_s23, %s6035_s23   ;;  %s5518_s22 = sphi %s5582_s22, %s6034_s22   ;;  %s5514_s21 = sphi %s5580_s21, %s6033_s21   ;;  %s5510_s20 = sphi %s5578_s20, %s6032_s20  }
  0x10   : > { %s189_s27 = sshll.u32 %s5536_s26, 4  ;;  %p4583_p0 = scmp.ge.s32.totalorder %s5534_s0, 1  ;;  %s190_s27 = int_to_ptr.vmem [resolvable:$true] %s189_s27 }
  0x11   : > { %p5997_p1 = scmp.eq.s32.totalorder %s5614_s28, 0  ;;  %p174_p2 = scmp.lt.s32.totalorder %s5534_s0, 3 }
  0x12   : > { %s5537_s30 = smov [#allocation9]   ;;  %s5336_s8 = scalar_lea.vmem %s190_s27, 65536 }
  0x13   : > { %p5619_p3 = pnand %p4583_p0, %p174_p2  ;;  %s202_s6 = sshll.u32 %s5537_s30, 4  ;;  %s203_s6 = int_to_ptr.vmem [resolvable:$true] %s202_s6 }
  0x14   : > { %p5337_p8 = scmp.ne.s32.totalorder %s190_s27, %s5336_s8  ;;  %p5344_p11 = scmp.lt.s32.totalorder %s190_s27, %s190_s27 }
  0x15   : > { %s6006_s29 = scalar_select %p5619_p3, 1, 0 }
  0x16   : > { %p5205_p5 = pneg %p5619_p3  ;;  %p5345_p12 = scmp.lt.s32.totalorder %s5336_s8, %s5336_s8 }
  0x18   : > { %p5628_p6 = pnand %p5205_p5, %p5997_p1  ;;  %p5346_p13 = por %p5345_p12, %p5344_p11 }
  0x1a   : > { %p5327_p7 = pneg %p5628_p6 }
  0x1c   : > { %p5339_p9 = pnand %p5337_p8, %p5327_p7 }
  0x1e   : > { %p5340_p10 = pneg %p5339_p9 }
  0x20   : > { %p5347_p0 = pnand %p5346_p13, %p5340_p10 }
  0x22   : > { %5350 = shalt.err (!%p5347_p0)
}
  0x23   : > { %s5538_s9 = smov 512   ;;  %s5539_s10 = smov 32  }
  0x24   : > { %s6008_s3 = sld [smem:[#allocation18_spill]]  ;;  %s5362_s13 = scalar_lea.vmem %s203_s6, 4096 }
  0x25   : > { %p5363_p2 = scmp.ne.s32.totalorder %s203_s6, %s5362_s13  ;;  %p5370_p9 = scmp.lt.s32.totalorder %s203_s6, %s203_s6 }
  0x26   : > { %p5371_p4 = scmp.lt.s32.totalorder %s5362_s13, %s5362_s13 }
  0x27   : > { %p5365_p5 = pnand %p5363_p2, %p5327_p7 }
  0x28   : > { %p5372_p11 = por %p5371_p4, %p5370_p9 }
  0x29   : > { %p5366_p8 = pneg %p5365_p5 }
  0x2a   : > { %5208 = dma.hbm_to_vmem [thread:$0]  (!%p5628_p6), %s6008_s3, 65536, %s190_s27, [#allocation7], %s5538_s9, %s5538_s9, %s5539_s10  }
  0x2b   : > { %p5373_p10 = pnand %p5372_p11, %p5366_p8 }
  0x2d   : > { %5376 = shalt.err (!%p5373_p10)
}
  0x2e   : > { %s5540_s14 = smov 64   ;;  %s5541_s15 = smov 4  }
  0x2f   : > { %s6009_s4 = sld [smem:[#allocation19_spill]]  ;;  %s4582_s18 = sadd.s32 4294967294, %s5534_s0  }
  0x30   : > { %s5652_s19 = sadd.s32 1, %s5534_s0   ;;  %s54_s27 = sadd.s32 1, %s5530_s25 }
  0x31   : > { %s51_s26 = ssub.s32 %s5534_s0, %s5652_s19  ;;  %p61_p7 = scmp.ne.s32.totalorder %s5530_s25, %s5526_s24 }
  0x32   : > { %p52_p4 = scmp.eq.s32.totalorder %s51_s26, 0  ;;  %p5998_p12 = scmp.eq.s32.totalorder %s5534_s0, 0 }
  0x33   : > { %p67_p13 = scmp.ne.s32.totalorder %s5526_s24, %s5522_s23  ;;  %p161_p2 = scmp.eq.s32.totalorder %s5614_s28, 1 }
  0x34   : > { %s5663_s30 = scalar_select %p52_p4, %s5530_s25, %s54_s27  }
  0x35   : > { %5211 = dma.hbm_to_vmem [thread:$0]  (!%p5628_p6), %s6009_s4, 4096, %s203_s6, [#allocation10], %s5540_s14, %s5540_s14, %s5541_s15  }
  0x36   : > { %p5667_p0 = por %p5998_p12, %p61_p7  ;;  %p5673_p6 = por %p5997_p1, %p67_p13 }
  0x37   : > { %p167_p5 = scmp.eq.s32.totalorder %s4582_s18, 1  ;;  %p5996_p8 = scmp.lt.s32.totalorder %s5534_s0, 2 }
  0x38   : > { %s6011_s6 = scalar_select %p5673_p6, 1, 0 }
  0x39   : > { %s216_s8 = sand.u32 1, %s5530_s25   ;;  %p5680_p9 = por %p161_p2, %p61_p7 }
  0x3a   : > { %p5684_p11 = por %p167_p5, %p67_p13  ;;  %s4587_s11 = sshll.u32 %s216_s8, 4 }
  0x3b   : > { %s6012_s9 = scalar_select %p5680_p9, 1, 0 }
  0x3c   : > { %s6013_s10 = scalar_select %p5684_p11, 1, 0 }
  0x3d   : > { %s5995_s12 = sshll.u32 %s5534_s0, 8  ;;  %s6014_s1 = sld [smem:[#allocation17_spill]] }
  0x3e   : > { %s220_s16 = scalar_lea.vmem [#allocation3], %s4587_s11  ;;  %p5700_p10 = pnand %p5996_p8, %p5667_p0 }
  0x3f   : > { %s228_s17 = sshll.u32 %s220_s16, 4  ;;  %s217_s26 = scalar_lea.sflag [#allocation4], %s216_s8  ;;  %s229_s17 = int_to_ptr.vmem [resolvable:$true] %s228_s17 }
  0x40   : > { %p5379_p7 = pneg %p5700_p10 }
  0x43   : > { %s5694_s15 = scalar_lea.hbm %s6014_s1, %s5995_s12  ;;  %s5382_s11 = scalar_lea.hbm %s6014_s1, 768 }
  0x44   : > { %s5377_s27 = scalar_lea.hbm %s5694_s15, 256  ;;  %p5383_p5 = scmp.lt.s32.totalorder %s5694_s15, %s6014_s1 }
  0x45   : > { %p5378_p4 = scmp.ne.s32.totalorder %s5694_s15, %s5377_s27  ;;  %p5384_p0 = scmp.lt.s32.totalorder %s5382_s11, %s5377_s27 }
  0x47   : > { %p5380_p13 = pnand %p5379_p7, %p5378_p4  ;;  %p5385_p8 = por %p5384_p0, %p5383_p5 }
  0x49   : > { %p5381_p2 = pneg %p5380_p13 }
  0x4b   : > { %p5386_p1 = pnand %p5385_p8, %p5381_p2 }
  0x4d   : > { %5389 = shalt.err (!%p5386_p1)
}
  0x4e   : > { %s5390_s7 = scalar_lea.vmem %s229_s17, 256  ;;  %s5542_s8 = smov [#allocation3]  }
  0x4f   : > { %p5391_p12 = scmp.ne.s32.totalorder %s229_s17, %s5390_s7  ;;  %s5395_s3 = sshll.u32 %s5542_s8, 4  ;;  %s5396_s3 = int_to_ptr.vmem [resolvable:$false] %s5395_s3 }
  0x50   : > { %s5397_s4 = scalar_lea.vmem %s5396_s3, 512  ;;  %p5398_p4 = scmp.lt.s32.totalorder %s229_s17, %s5396_s3 }
  0x51   : > { %p5393_p11 = pnand %p5391_p12, %p5379_p7  ;;  %p5399_p13 = scmp.lt.s32.totalorder %s5397_s4, %s5390_s7 }
  0x53   : > { %p5394_p9 = pneg %p5393_p11  ;;  %p5400_p6 = por %p5399_p13, %p5398_p4 }
  0x55   : > { %p5401_p3 = pnand %p5400_p6, %p5394_p9 }
  0x57   : > { %5404 = shalt.err (!%p5401_p3)
}
  0x58   : > { %5215 = dma.hbm_to_vmem [thread:$0]  (!%p5700_p10), %s5694_s15, 256, %s229_s17, %s217_s26  }
  0x59   : > { %s78_s3 = sadd.s32 1, %s5652_s19  ;;  %s82_s4 = sadd.s32 1, %s5518_s22 }
  0x5a   : > { %s79_s12 = ssub.s32 %s5652_s19, %s78_s3  ;;  %p89_p1 = scmp.ne.s32.totalorder %s5518_s22, %s5514_s21 }
  0x5b   : > { %p80_p3 = scmp.eq.s32.totalorder %s79_s12, 0  ;;  %p95_p12 = scmp.ne.s32.totalorder %s5514_s21, %s5510_s20 }
  0x5c   : > { %p6016_p6 = scmp.eq.s32.totalorder %s5534_s0, 0  ;;  %s235_s18 = sand.u32 1, %s5534_s0  }
  0x5d   : > { %s5729_s27 = scalar_select %p80_p3, %s5518_s22, %s82_s4  }
  0x5e   : > { %p91_p8 = por %p89_p1, %p6016_p6  ;;  %s6017_s13 = sshll.u32 %s5534_s0, 8 }
  0x5f   : > { %s4506_s16 = scalar_lea.hbm %s5991_s2, %s6017_s13  ;;  %p6018_p9 = scmp.eq.s32.totalorder %s5614_s28, 0 }
  0x60   : > { %s237_s15 = sand.u32 1, %s5518_s22   ;;  %p6020_p10 = scmp.lt.s32.totalorder %s5534_s0, 2 }
  0x61   : > { %p5738_p11 = por %p95_p12, %p6018_p9  ;;  %s4590_s17 = sshll.u32 %s237_s15, 4 }
  0x62   : > { %p5745_p7 = pnand %p6020_p10, %p91_p8  ;;  %s5749_s26 = scalar_lea.hbm %s4506_s16, 256 }
  0x63   : > { %s6019_s7 = scalar_select %p5738_p11, 1, 0 }
  0x64   : > { %s239_s8 = scalar_lea.vmem [#allocation6], %s4590_s17  ;;  %s236_s4 = scalar_lea.sflag [#allocation7], %s235_s18 }
  0x65   : > { %s248_s3 = sshll.u32 %s239_s8, 4  ;;  %s5433_s12 = scalar_lea.hbm %s4506_s16, 512  ;;  %s249_s3 = int_to_ptr.vmem [resolvable:$true] %s248_s3 }
  0x66   : > { %p5406_p2 = scmp.ne.s32.totalorder %s5749_s26, %s5433_s12  ;;  %p5407_p5 = pneg %p5745_p7 }
  0x67   : > { %s5410_s11 = scalar_lea.hbm %s5991_s2, 768  ;;  %p5411_p13 = scmp.lt.s32.totalorder %s5749_s26, %s5991_s2 }
  0x68   : > { %p5408_p0 = pnand %p5407_p5, %p5406_p2  ;;  %p5412_p1 = scmp.lt.s32.totalorder %s5410_s11, %s5433_s12 }
  0x6a   : > { %p5409_p4 = pneg %p5408_p0  ;;  %p5413_p3 = por %p5412_p1, %p5411_p13 }
  0x6c   : > { %p5414_p12 = pnand %p5413_p3, %p5409_p4 }
  0x6e   : > { %5417 = shalt.err (!%p5414_p12)
}
  0x6f   : > { %s5418_s17 = scalar_lea.vmem %s249_s3, 256  ;;  %s5543_s18 = smov [#allocation6]  }
  0x70   : > { %p5419_p6 = scmp.ne.s32.totalorder %s249_s3, %s5418_s17  ;;  %s5423_s16 = sshll.u32 %s5543_s18, 4  ;;  %s5424_s16 = int_to_ptr.vmem [resolvable:$false] %s5423_s16 }
  0x71   : > { %s5425_s8 = scalar_lea.vmem %s5424_s16, 512  ;;  %p5426_p10 = scmp.lt.s32.totalorder %s249_s3, %s5424_s16 }
  0x72   : > { %p5421_p8 = pnand %p5419_p6, %p5407_p5  ;;  %p5427_p2 = scmp.lt.s32.totalorder %s5425_s8, %s5418_s17 }
  0x74   : > { %p5422_p9 = pneg %p5421_p8  ;;  %p5428_p0 = por %p5427_p2, %p5426_p10 }
  0x76   : > { %p5429_p11 = pnand %p5428_p0, %p5422_p9 }
  0x78   : > { %5432 = shalt.err (!%p5429_p11)
}
  0x79   : > { %5218 = dma.hbm_to_vmem [thread:$0]  (!%p5745_p7), %s5749_s26, 256, %s249_s3, %s236_s4  }
  0x7a   : > { %p6022_p4 = scmp.ne.s32.totalorder %s6006_s29, 0 }
  0x7b   : > { %s5767_s1 = sand.u32 (!%p6022_p4), 1, %s5526_s24   ;;  %p6023_p5 = scmp.ne.s32.totalorder (!%p6022_p4), %s6011_s6, 0 }
  0x7c   : > { %257 = sbr.rel (%p6022_p4) target bundleno = 1093 (0x445), region = 40  ;;  %s4593_s12 = sshll.u32 (!%p6022_p4), %s5767_s1, 4 }
  0x7d   : > { %s260_s13 = scalar_lea.sflag (!%p6022_p4), [#allocation4], %s5767_s1  ;;  %s5771_s14 = scalar_lea.vmem (!%p6022_p4), [#allocation3], %s4593_s12 }
  0x81   : > { %5489 = dma.done.wait (%p6023_p5), %s260_s13, 256  }
  0x82   : > { %5491 = vsyncadd (%p6023_p5), %s260_s13, 4294967040  ;;  %s268_s29 = sand.u32 1, %s5614_s28   ;;  %s270_s20 = sand.u32 1, %s5514_s21  }
  0x83   : > { %s5779_s26 = sshll.u32 %s270_s20, 4  ;;  %s269_s3 = scalar_lea.sflag [#allocation7], %s268_s29 }
  0x84   : > { %s272_s4 = scalar_lea.vmem [#allocation6], %s5779_s26  ;;  %p6024_p11 = scmp.ne.s32.totalorder %s6019_s7, 0 }
  0x86   : > { %5493 = dma.done.wait (%p6024_p11), %s269_s3, 256  }
  0x87   : > { %5495 = vsyncadd (%p6024_p11), %s269_s3, 4294967040  ;;  %p6025_p7 = scmp.eq.s32.totalorder %s5614_s28, 0 }
  0x89   : > { %5497 = dma.done.wait (%p6025_p7), [#allocation7], 65536   ;;  %p6026_p13 = pmov %p6025_p7 }
  0x8a   : > { %p6027_p1 = pmov %p6025_p7 }
  0x8b   : > { %5499 = vsyncadd (%p6026_p13), [#allocation7], 4294901760 }
  0x8c   : > { %5501 = dma.done.wait (%p6027_p1), [#allocation10], 4096   ;;  %p6028_p3 = pmov %p6027_p1 }
  0x8d   : > { %v506_v0 = vld [vmem:[#allocation8 + $0x5c0] sm:$0xff]  ;;  %v507_v2 = vld [vmem:[#allocation8 + $0x5c8] sm:$0xff]  ;;  %s4448_s6 = sld [smem:[#allocation2]]  ;;  %s4597_s7 = sshll.u32 %s5767_s1, 3 }
  0x8e   : > { %5503 = vsyncadd (%p6028_p3), [#allocation10], 4294963200  ;;  %v510_v1 = vld [vmem:[#allocation8 + $0x5e0] sm:$0xff]  ;;  %v511_v4 = vld [vmem:[#allocation8 + $0x5e8] sm:$0xff]  ;;  %s5143_s11 = sshll.u32 %s5614_s28, 7  ;;  %s311_s15 = scalar_lea.vmem [#allocation11], %s4597_s7 }
  0x8f   : > { %v4655_v3 = vcombine.high %v506_v0, %v510_v1  ;;  %v4654_v5 = vcombine.low %v506_v0, %v510_v1  ;;  %v498_v6 = vld [vmem:[#allocation8 + $0x580] sm:$0xff]  ;;  %v4657_v8 = vcombine.high %v507_v2, %v511_v4  ;;  %v4656_v9 = vcombine.low %v507_v2, %v511_v4  ;;  %v499_v11 = vld [vmem:[#allocation8 + $0x588] sm:$0xff]  ;;  %s4469_s17 = sshll.u32 %s311_s15, 4  ;;  %s4467_s8 = scalar_lea.hbm %s5994_s5, %s5143_s11  ;;  %s4470_s17 = int_to_ptr.vmem [resolvable:$true] %s4469_s17 }
  0x90   : > { %v502_v7 = vld [vmem:[#allocation8 + $0x5a0] sm:$0xff]  ;;  %v503_v12 = vld [vmem:[#allocation8 + $0x5a8] sm:$0xff]  ;;  %s4456_s12 = scalar_lea.sflag [#allocation5], %s5767_s1  ;;  %s5434_s13 = scalar_lea.vmem %s4470_s17, 128 }
  0x91   : > { %v4647_v10 = vcombine.high %v498_v6, %v502_v7  ;;  %v490_v13 = vld [vmem:[#allocation8 + $0x540] sm:$0xff]  ;;  %1234 = vmatprep.subr.bf16.mxu0 %v4655_v3  ;;  %v4649_v14 = vcombine.high %v499_v11, %v503_v12  ;;  %v491_v16 = vld [vmem:[#allocation8 + $0x548] sm:$0xff]  ;;  %1275 = vmatprep.subr.bf16.mxu1 %v4657_v8  ;;  %v4646_v18 = vcombine.low %v498_v6, %v502_v7  ;;  %p5435_p12 = scmp.ne.s32.totalorder %s4470_s17, %s5434_s13  ;;  %p6029_p6 = scmp.ne.s32.totalorder %s6012_s9, 0 }
  0x92   : > { %v494_v15 = vld [vmem:[#allocation8 + $0x560] sm:$0xff]  ;;  %v495_v17 = vld [vmem:[#allocation8 + $0x568] sm:$0xff]  ;;  %1235 = vmatpush1.bf16.msra.mxu0 %v4654_v5  ;;  %1276 = vmatpush1.bf16.msra.mxu1 %v4656_v9  ;;  %v4648_v19 = vcombine.low %v499_v11, %v503_v12 }
  0x93   : > { %1236 = vmatprep.subr.bf16.mxu0 %v4647_v10  ;;  %v4639_v20 = vcombine.high %v490_v13, %v494_v15  ;;  %1277 = vmatprep.subr.bf16.mxu1 %v4649_v14  ;;  %v4641_v21 = vcombine.high %v491_v16, %v495_v17  ;;  %v482_v22 = vld [vmem:[#allocation8 + $0x500] sm:$0xff]  ;;  %v483_v24 = vld [vmem:[#allocation8 + $0x508] sm:$0xff]  ;;  %v4638_v26 = vcombine.low %v490_v13, %v494_v15  ;;  %p5436_p8 = pnand %p5435_p12, %p6029_p6 }
  0x94   : > { %v486_v23 = vld [vmem:[#allocation8 + $0x520] sm:$0xff]  ;;  %v487_v25 = vld [vmem:[#allocation8 + $0x528] sm:$0xff]  ;;  %v4640_v27 = vcombine.low %v491_v16, %v495_v17 }
  0x95   : > { %v4631_v28 = vcombine.high %v482_v22, %v486_v23  ;;  %v4633_v29 = vcombine.high %v483_v24, %v487_v25  ;;  %v474_v30 = vld [vmem:[#allocation8 + $0x4c0] sm:$0xff]  ;;  %v475_v32 = vld [vmem:[#allocation8 + $0x4c8] sm:$0xff]  ;;  %v4630_v34 = vcombine.low %v482_v22, %v486_v23  ;;  %v4632_v35 = vcombine.low %v483_v24, %v487_v25  ;;  %p5437_p9 = pneg %p5436_p8 }
  0x96   : > { %1237 = vmatpush1.bf16.msra.mxu0 %v4646_v18  ;;  %1278 = vmatpush1.bf16.msra.mxu1 %v4648_v19  ;;  %v478_v31 = vld [vmem:[#allocation8 + $0x4e0] sm:$0xff]  ;;  %v479_v33 = vld [vmem:[#allocation8 + $0x4e8] sm:$0xff] }
  0x97   : > { %1238 = vmatprep.subr.bf16.mxu0 %v4639_v20  ;;  %1279 = vmatprep.subr.bf16.mxu1 %v4641_v21  ;;  %v4623_v36 = vcombine.high %v474_v30, %v478_v31  ;;  %v4625_v37 = vcombine.high %v475_v32, %v479_v33  ;;  %v466_v38 = vld [vmem:[#allocation8 + $0x480] sm:$0xff]  ;;  %v467_v40 = vld [vmem:[#allocation8 + $0x488] sm:$0xff]  ;;  %v4622_v42 = vcombine.low %v474_v30, %v478_v31 }
  0x98   : > { %v470_v39 = vld [vmem:[#allocation8 + $0x4a0] sm:$0xff]  ;;  %v471_v41 = vld [vmem:[#allocation8 + $0x4a8] sm:$0xff]  ;;  %v4624_v43 = vcombine.low %v475_v32, %v479_v33 }
  0x99   : > { %v4615_v44 = vcombine.high %v466_v38, %v470_v39  ;;  %v4617_v45 = vcombine.high %v467_v40, %v471_v41  ;;  %v458_v46 = vld [vmem:[#allocation8 + $0x440] sm:$0xff]  ;;  %v459_v48 = vld [vmem:[#allocation8 + $0x448] sm:$0xff]  ;;  %v4614_v50 = vcombine.low %v466_v38, %v470_v39  ;;  %v4616_v51 = vcombine.low %v467_v40, %v471_v41 }
  0x9a   : > { %1239 = vmatpush1.bf16.msra.mxu0 %v4638_v26  ;;  %1280 = vmatpush1.bf16.msra.mxu1 %v4640_v27  ;;  %v462_v47 = vld [vmem:[#allocation8 + $0x460] sm:$0xff]  ;;  %v463_v49 = vld [vmem:[#allocation8 + $0x468] sm:$0xff] }
  0x9b   : > { %1240 = vmatprep.subr.bf16.mxu0 %v4631_v28  ;;  %1281 = vmatprep.subr.bf16.mxu1 %v4633_v29  ;;  %v4607_v52 = vcombine.high %v458_v46, %v462_v47  ;;  %v5795_v53 = vld [vmem:[%s5771_s14 + $0x8] sm:$0xff]  ;;  %v4609_v55 = vcombine.high %v459_v48, %v463_v49  ;;  %v450_v56 = vld [vmem:[#allocation8 + $0x400] sm:$0xff]  ;;  %v4606_v61 = vcombine.low %v458_v46, %v462_v47 }
  0x9c   : > { %v317_v54 = vld [vmem:[%s272_s4 + $0x8] sm:$0xff]  ;;  %v454_v57 = vld [vmem:[#allocation8 + $0x420] sm:$0xff]  ;;  %v4608_v0 = vcombine.low %v459_v48, %v463_v49 }
  0x9d   : > { %v5800_v58 = vpack.c.bf16 %v317_v54, %v5795_v53  ;;  %v451_v59 = vld [vmem:[#allocation8 + $0x408] sm:$0xff]  ;;  %v4599_v1 = vcombine.high %v450_v56, %v454_v57  ;;  %v570_v3 = vld [vmem:[#allocation8 + $0x7c0] sm:$0xff]  ;;  %v4598_v8 = vcombine.low %v450_v56, %v454_v57 }
  0x9e   : > { %1241 = vmatpush1.bf16.msra.mxu0 %v4630_v34  ;;  %1282 = vmatpush1.bf16.msra.mxu1 %v4632_v35  ;;  %v455_v60 = vld [vmem:[#allocation8 + $0x428] sm:$0xff]  ;;  %v574_v4 = vld [vmem:[#allocation8 + $0x7e0] sm:$0xff] }
  0x9f   : > { %1242 = vmatprep.subr.bf16.mxu0 %v4623_v36  ;;  %1283 = vmatprep.subr.bf16.mxu1 %v4625_v37  ;;  %v586_v62 = vshrl.u32 %v5800_v58, 16  ;;  %v588_v63 = vshll.u32 %v5800_v58, 16  ;;  %v4601_v2 = vcombine.high %v451_v59, %v455_v60  ;;  %v571_v6 = vld [vmem:[#allocation8 + $0x7c8] sm:$0xff]  ;;  %v4600_v10 = vcombine.low %v451_v59, %v455_v60  ;;  %v562_v13 = vld [vmem:[#allocation8 + $0x780] sm:$0xff] }
  0xa0   : > { %v575_v7 = vld [vmem:[#allocation8 + $0x7e8] sm:$0xff]  ;;  %v4719_v11 = vcombine.high %v570_v3, %v574_v4  ;;  %v566_v14 = vld [vmem:[#allocation8 + $0x7a0] sm:$0xff]  ;;  %v4718_v17 = vcombine.low %v570_v3, %v574_v4 }
  0xa1   : > { %v590_v5 = vrot.slane %v588_v63, 1  ;;  %v4721_v12 = vcombine.high %v571_v6, %v575_v7  ;;  %v563_v15 = vld [vmem:[#allocation8 + $0x788] sm:$0xff]  ;;  %v4720_v18 = vcombine.low %v571_v6, %v575_v7  ;;  %v4711_v19 = vcombine.high %v562_v13, %v566_v14  ;;  %v554_v21 = vld [vmem:[#allocation8 + $0x740] sm:$0xff] }
  0xa2   : > { %1243 = vmatpush1.bf16.msra.mxu0 %v4622_v42  ;;  %1284 = vmatpush1.bf16.msra.mxu1 %v4624_v43  ;;  %v567_v16 = vld [vmem:[#allocation8 + $0x7a8] sm:$0xff]  ;;  %v558_v22 = vld [vmem:[#allocation8 + $0x760] sm:$0xff]  ;;  %v4710_v25 = vcombine.low %v562_v13, %v566_v14  ;;  %v508_v14 = vld [vmem:[#allocation8 + $0x5d0] sm:$0xff] }
  0xa3   : > { %1244 = vmatprep.subr.bf16.mxu0 %v4615_v44  ;;  %1285 = vmatprep.subr.bf16.mxu1 %v4617_v45  ;;  %v5808_v9 = vor.u32 %v590_v5, %v586_v62  ;;  %v4713_v20 = vcombine.high %v563_v15, %v567_v16  ;;  %v555_v23 = vld [vmem:[#allocation8 + $0x748] sm:$0xff]  ;;  %v4712_v26 = vcombine.low %v563_v15, %v567_v16  ;;  %v546_v29 = vld [vmem:[#allocation8 + $0x700] sm:$0xff]  ;;  %v512_v15 = vld [vmem:[#allocation8 + $0x5f0] sm:$0xff] }
  0xa4   : > { %v559_v24 = vld [vmem:[#allocation8 + $0x768] sm:$0xff]  ;;  %v4703_v27 = vcombine.high %v554_v21, %v558_v22  ;;  %v550_v30 = vld [vmem:[#allocation8 + $0x720] sm:$0xff]  ;;  %v4702_v33 = vcombine.low %v554_v21, %v558_v22  ;;  %v4659_v22 = vcombine.high %v508_v14, %v512_v15 }
  0xa5   : > { %1266 = vmatprep.mubr.bf16.mxu0 %v5808_v9  ;;  %1307 = vmatprep.mubr.bf16.mxu1 %v5808_v9  ;;  %v4705_v28 = vcombine.high %v555_v23, %v559_v24  ;;  %v547_v31 = vld [vmem:[#allocation8 + $0x708] sm:$0xff]  ;;  %v4704_v34 = vcombine.low %v555_v23, %v559_v24  ;;  %v4695_v35 = vcombine.high %v546_v29, %v550_v30  ;;  %v538_v37 = vld [vmem:[#allocation8 + $0x6c0] sm:$0xff]  ;;  %v500_v24 = vld [vmem:[#allocation8 + $0x590] sm:$0xff] }
  0xa6   : > { %1245 = vmatpush1.bf16.msra.mxu0 %v4614_v50  ;;  %1286 = vmatpush1.bf16.msra.mxu1 %v4616_v51  ;;  %v551_v32 = vld [vmem:[#allocation8 + $0x728] sm:$0xff]  ;;  %v542_v38 = vld [vmem:[#allocation8 + $0x6e0] sm:$0xff]  ;;  %v4694_v41 = vcombine.low %v546_v29, %v550_v30  ;;  %v4658_v29 = vcombine.low %v508_v14, %v512_v15  ;;  %v452_v15 = vld [vmem:[#allocation8 + $0x410] sm:$0xff] }
  0xa7   : > { %1246 = vmatprep.subr.bf16.mxu0 %v4607_v52  ;;  %1287 = vmatprep.subr.bf16.mxu1 %v4609_v55  ;;  %v4697_v36 = vcombine.high %v547_v31, %v551_v32  ;;  %v539_v39 = vld [vmem:[#allocation8 + $0x6c8] sm:$0xff]  ;;  %v4696_v42 = vcombine.low %v547_v31, %v551_v32  ;;  %v4687_v43 = vcombine.high %v538_v37, %v542_v38  ;;  %v530_v45 = vld [vmem:[#allocation8 + $0x680] sm:$0xff]  ;;  %v492_v32 = vld [vmem:[#allocation8 + $0x550] sm:$0xff] }
  0xa8   : > { %v543_v40 = vld [vmem:[#allocation8 + $0x6e8] sm:$0xff]  ;;  %v534_v46 = vld [vmem:[#allocation8 + $0x6a0] sm:$0xff]  ;;  %v4686_v49 = vcombine.low %v538_v37, %v542_v38 }
  0xa9   : > { %v4689_v44 = vcombine.high %v539_v39, %v543_v40  ;;  %v531_v47 = vld [vmem:[#allocation8 + $0x688] sm:$0xff]  ;;  %v5813_v50 = vld [vmem:[%s5771_s14] sm:$0xff]  ;;  %v4688_v52 = vcombine.low %v539_v39, %v543_v40  ;;  %v4679_v54 = vcombine.high %v530_v45, %v534_v46  ;;  %s5544_s14 = smov [#allocation11]  }
  0xaa   : > { %1247 = vmatpush1.bf16.msra.mxu0 %v4606_v61  ;;  %1288 = vmatpush1.bf16.msra.mxu1 %v4608_v0  ;;  %v535_v48 = vld [vmem:[#allocation8 + $0x6a8] sm:$0xff]  ;;  %v316_v51 = vld [vmem:[%s272_s4] sm:$0xff]  ;;  %v4678_v0 = vcombine.low %v530_v45, %v534_v46  ;;  %s5438_s29 = sshll.u32 %s5544_s14, 4  ;;  %s5439_s29 = int_to_ptr.vmem [resolvable:$false] %s5438_s29 }
  0xab   : > { %1248 = vmatprep.subr.bf16.mxu0 %v4599_v1  ;;  %1289 = vmatprep.subr.bf16.mxu1 %v4601_v2  ;;  %v4681_v55 = vcombine.high %v531_v47, %v535_v48  ;;  %v522_v56 = vld [vmem:[#allocation8 + $0x640] sm:$0xff]  ;;  %v523_v59 = vld [vmem:[#allocation8 + $0x648] sm:$0xff]  ;;  %v5818_v61 = vpack.c.bf16 %v316_v51, %v5813_v50  ;;  %v4680_v1 = vcombine.low %v531_v47, %v535_v48  ;;  %v484_v40 = vld [vmem:[#allocation8 + $0x510] sm:$0xff]  ;;  %s5440_s28 = scalar_lea.vmem %s5439_s29, 256  ;;  %p5441_p10 = scmp.lt.s32.totalorder %s4470_s17, %s5439_s29 }
  0xac   : > { %v526_v57 = vld [vmem:[#allocation8 + $0x660] sm:$0xff]  ;;  %v527_v60 = vld [vmem:[#allocation8 + $0x668] sm:$0xff]  ;;  %v476_v48 = vld [vmem:[#allocation8 + $0x4d0] sm:$0xff]  ;;  %p5442_p2 = scmp.lt.s32.totalorder %s5440_s28, %s5434_s13 }
  0xad   : > { %v4671_v2 = vcombine.high %v522_v56, %v526_v57  ;;  %v4673_v3 = vcombine.high %v523_v59, %v527_v60  ;;  %v514_v4 = vld [vmem:[#allocation8 + $0x600] sm:$0xff]  ;;  %v515_v6 = vld [vmem:[#allocation8 + $0x608] sm:$0xff]  ;;  %v579_v16 = vshrl.u32 %v5818_v61, 16  ;;  %v477_v51 = vld [vmem:[#allocation8 + $0x4d8] sm:$0xff] }
  0xae   : > { %1249 = vmatpush1.bf16.msra.mxu0 %v4598_v8  ;;  %1290 = vmatpush1.bf16.msra.mxu1 %v4600_v10  ;;  %v518_v5 = vld [vmem:[#allocation8 + $0x620] sm:$0xff]  ;;  %v519_v7 = vld [vmem:[#allocation8 + $0x628] sm:$0xff]  ;;  %v581_v8 = vshll.u32 %v5818_v61, 16  ;;  %v4670_v10 = vcombine.low %v522_v56, %v526_v57  ;;  %p5443_p0 = por %p5442_p2, %p5441_p10 }
  0xaf   : > { %1250 = vmatprep.subr.bf16.mxu0 %v4719_v11  ;;  %1291 = vmatprep.subr.bf16.mxu1 %v4721_v12  ;;  %v4672_v11 = vcombine.low %v523_v59, %v527_v60  ;;  %v4663_v12 = vcombine.high %v514_v4, %v518_v5  ;;  %v4665_v13 = vcombine.high %v515_v6, %v519_v7  ;;  %v468_v59 = vld [vmem:[#allocation8 + $0x490] sm:$0xff]  ;;  %v469_v60 = vld [vmem:[#allocation8 + $0x498] sm:$0xff] }
  0xb0   : > { %v4664_v21 = vcombine.low %v515_v6, %v519_v7  ;;  %v464_v6 = vld [vmem:[#allocation8 + $0x470] sm:$0xff]  ;;  %v461_v7 = vld [vmem:[#allocation8 + $0x458] sm:$0xff]  ;;  %p5444_p4 = pnand %p5443_p0, %p5437_p9 }
  0xb2   : > { %1251 = vmatpush2.bf16.msra.mxu0 %v4718_v17  ;;  %1292 = vmatpush2.bf16.msra.mxu1 %v4720_v18  ;;  %v583_v17 = vrot.slane %v581_v8, 1  ;;  %v509_v18 = vld [vmem:[#allocation8 + $0x5d8] sm:$0xff] }
  0xb3   : > { %1252 = vmatprep.subr.bf16.mxu0 %v4711_v19  ;;  %1293 = vmatprep.subr.bf16.mxu1 %v4713_v20  ;;  %v513_v19 = vld [vmem:[#allocation8 + $0x5f8] sm:$0xff]  ;;  %v4662_v20 = vcombine.low %v514_v4, %v518_v5  ;;  %v460_v5 = vld [vmem:[#allocation8 + $0x450] sm:$0xff] }
  0xb4   : > { %v4661_v23 = vcombine.high %v509_v18, %v513_v19  ;;  %v4660_v30 = vcombine.low %v509_v18, %v513_v19  ;;  %v4611_v14 = vcombine.high %v460_v5, %v464_v6  ;;  %v453_v18 = vld [vmem:[#allocation8 + $0x418] sm:$0xff] }
  0xb6   : > { %1253 = vmatpush2.bf16.msra.mxu0 %v4710_v25  ;;  %1294 = vmatpush2.bf16.msra.mxu1 %v4712_v26  ;;  %v504_v25 = vld [vmem:[#allocation8 + $0x5b0] sm:$0xff]  ;;  %v5826_v26 = vor.u32 %v583_v17, %v579_v16 }
  0xb7   : > { %1254 = vmatprep.subr.bf16.mxu0 %v4703_v27  ;;  %1295 = vmatprep.subr.bf16.mxu1 %v4705_v28  ;;  %v501_v27 = vld [vmem:[#allocation8 + $0x598] sm:$0xff]  ;;  %v4651_v31 = vcombine.high %v500_v24, %v504_v25  ;;  %v4650_v37 = vcombine.low %v500_v24, %v504_v25  ;;  %v456_v17 = vld [vmem:[#allocation8 + $0x430] sm:$0xff] }
  0xb8   : > { %v505_v28 = vld [vmem:[#allocation8 + $0x5b8] sm:$0xff]  ;;  %v572_v24 = vld [vmem:[#allocation8 + $0x7d0] sm:$0xff] }
  0xb9   : > { %v4652_v38 = vcombine.low %v501_v27, %v505_v28  ;;  %v576_v25 = vld [vmem:[#allocation8 + $0x7f0] sm:$0xff] }
  0xba   : > { %1255 = vmatpush2.bf16.msra.mxu0 %v4702_v33  ;;  %1296 = vmatpush2.bf16.msra.mxu1 %v4704_v34  ;;  %v496_v33 = vld [vmem:[#allocation8 + $0x570] sm:$0xff]  ;;  %v4653_v34 = vcombine.high %v501_v27, %v505_v28  ;;  %v573_v27 = vld [vmem:[#allocation8 + $0x7d8] sm:$0xff] }
  0xbb   : > { %1256 = vmatprep.subr.bf16.mxu0 %v4695_v35  ;;  %1297 = vmatprep.subr.bf16.mxu1 %v4697_v36  ;;  %v493_v35 = vld [vmem:[#allocation8 + $0x558] sm:$0xff]  ;;  %v4643_v39 = vcombine.high %v492_v32, %v496_v33  ;;  %v4642_v45 = vcombine.low %v492_v32, %v496_v33  ;;  %v4723_v32 = vcombine.high %v572_v24, %v576_v25  ;;  %v564_v33 = vld [vmem:[#allocation8 + $0x790] sm:$0xff] }
  0xbc   : > { %v497_v36 = vld [vmem:[#allocation8 + $0x578] sm:$0xff] }
  0xbd   : > { %v4644_v46 = vcombine.low %v493_v35, %v497_v36 }
  0xbe   : > { %1257 = vmatpush2.bf16.msra.mxu0 %v4694_v41  ;;  %1298 = vmatpush2.bf16.msra.mxu1 %v4696_v42  ;;  %v488_v41 = vld [vmem:[#allocation8 + $0x530] sm:$0xff]  ;;  %v485_v42 = vld [vmem:[#allocation8 + $0x518] sm:$0xff] }
  0xbf   : > { %1258 = vmatprep.subr.bf16.mxu0 %v4687_v43  ;;  %1299 = vmatprep.subr.bf16.mxu1 %v4689_v44  ;;  %v4645_v43 = vcombine.high %v493_v35, %v497_v36  ;;  %v489_v44 = vld [vmem:[#allocation8 + $0x538] sm:$0xff]  ;;  %v4635_v47 = vcombine.high %v484_v40, %v488_v41 }
  0xc0   : > { %v4636_v56 = vcombine.low %v485_v42, %v489_v44  ;;  %v565_v35 = vld [vmem:[#allocation8 + $0x798] sm:$0xff] }
  0xc2   : > { %1259 = vmatpush2.bf16.msra.mxu0 %v4686_v49  ;;  %1300 = vmatpush2.bf16.msra.mxu1 %v4688_v52  ;;  %v480_v49 = vld [vmem:[#allocation8 + $0x4f0] sm:$0xff]  ;;  %v4637_v52 = vcombine.high %v485_v42, %v489_v44  ;;  %v557_v44 = vld [vmem:[#allocation8 + $0x758] sm:$0xff] }
  0xc3   : > { %1260 = vmatprep.subr.bf16.mxu0 %v4679_v54  ;;  %1301 = vmatprep.subr.bf16.mxu1 %v4681_v55  ;;  %v481_v54 = vld [vmem:[#allocation8 + $0x4f8] sm:$0xff]  ;;  %v4634_v55 = vcombine.low %v484_v40, %v488_v41  ;;  %v4627_v57 = vcombine.high %v476_v48, %v480_v49  ;;  %v556_v42 = vld [vmem:[#allocation8 + $0x750] sm:$0xff] }
  0xc6   : > { %1261 = vmatpush2.bf16.msra.mxu0 %v4678_v0  ;;  %1302 = vmatpush2.bf16.msra.mxu1 %v4680_v1  ;;  %v4629_v0 = vcombine.high %v477_v51, %v481_v54  ;;  %v473_v1 = vld [vmem:[#allocation8 + $0x4b8] sm:$0xff] }
  0xc7   : > { %1262 = vmatprep.subr.bf16.mxu0 %v4671_v2  ;;  %1303 = vmatprep.subr.bf16.mxu1 %v4673_v3  ;;  %v4626_v2 = vcombine.low %v476_v48, %v480_v49  ;;  %v4628_v3 = vcombine.low %v477_v51, %v481_v54  ;;  %v548_v51 = vld [vmem:[#allocation8 + $0x710] sm:$0xff]  ;;  %v549_v54 = vld [vmem:[#allocation8 + $0x718] sm:$0xff] }
  0xca   : > { %1263 = vmatpush2.bf16.msra.mxu0 %v4670_v10  ;;  %1304 = vmatpush2.bf16.msra.mxu1 %v4672_v11  ;;  %v4621_v10 = vcombine.high %v469_v60, %v473_v1  ;;  %v465_v11 = vld [vmem:[#allocation8 + $0x478] sm:$0xff] }
  0xcb   : > { %1264 = vmatprep.subr.bf16.mxu0 %v4663_v12  ;;  %1305 = vmatprep.subr.bf16.mxu1 %v4665_v13  ;;  %v4620_v13 = vcombine.low %v469_v60, %v473_v1  ;;  %v4613_v19 = vcombine.high %v461_v7, %v465_v11  ;;  %v540_v60 = vld [vmem:[#allocation8 + $0x6d0] sm:$0xff]  ;;  %v541_v1 = vld [vmem:[#allocation8 + $0x6d8] sm:$0xff] }
  0xce   : > { %1265 = vmatpush2.bf16.msra.mxu0 %v4662_v20  ;;  %1306 = vmatpush2.bf16.msra.mxu1 %v4664_v21  ;;  %v457_v20 = vld [vmem:[#allocation8 + $0x438] sm:$0xff]  ;;  %v4610_v21 = vcombine.low %v460_v5, %v464_v6 }
  0xcf   : > { %1316 = vmatprep.subr.bf16.mxu0 %v4659_v22  ;;  %1357 = vmatprep.subr.bf16.mxu1 %v4661_v23  ;;  %v4612_v22 = vcombine.low %v461_v7, %v465_v11  ;;  %v4603_v23 = vcombine.high %v452_v15, %v456_v17  ;;  %v4605_v28 = vcombine.high %v453_v18, %v457_v20  ;;  %v532_v7 = vld [vmem:[#allocation8 + $0x690] sm:$0xff]  ;;  %v533_v11 = vld [vmem:[#allocation8 + $0x698] sm:$0xff] }
  0xd1   : > { %1267 = vmatmul.mubr.bf16.vlgmr.msra.gmra.mxu0 %v5826_v26  ;;  %1308 = vmatmul.mubr.bf16.vlgmr.msra.gmra.mxu1 %v5826_v26 }
  0xd2   : > { %1317 = vmatpush1.bf16.msra.mxu0 %v4658_v29  ;;  %1358 = vmatpush1.bf16.msra.mxu1 %v4660_v30  ;;  %v577_v29 = vld [vmem:[#allocation8 + $0x7f8] sm:$0xff]  ;;  %v4602_v30 = vcombine.low %v452_v15, %v456_v17 }
  0xd3   : > { %1318 = vmatprep.subr.bf16.mxu0 %v4651_v31  ;;  %1359 = vmatprep.subr.bf16.mxu1 %v4653_v34  ;;  %v4604_v31 = vcombine.low %v453_v18, %v457_v20  ;;  %v568_v34 = vld [vmem:[#allocation8 + $0x7b0] sm:$0xff]  ;;  %v4725_v36 = vcombine.high %v573_v27, %v577_v29  ;;  %v525_v20 = vld [vmem:[#allocation8 + $0x658] sm:$0xff] }
  0xd4   : > { %1348 = vmatprep.mubr.bf16.mxu0 %v5808_v9  ;;  %1389 = vmatprep.mubr.bf16.mxu1 %v5808_v9  ;;  %v472_v9 = vld [vmem:[#allocation8 + $0x4b0] sm:$0xff]  ;;  %v4715_v40 = vcombine.high %v564_v33, %v568_v34 }
  0xd5   : > { %v4619_v4 = vcombine.high %v468_v59, %v472_v9  ;;  %v4618_v12 = vcombine.low %v468_v59, %v472_v9  ;;  %v524_v18 = vld [vmem:[#allocation8 + $0x650] sm:$0xff] }
  0xd6   : > { %1319 = vmatpush1.bf16.msra.mxu0 %v4650_v37  ;;  %1360 = vmatpush1.bf16.msra.mxu1 %v4652_v38  ;;  %v569_v37 = vld [vmem:[#allocation8 + $0x7b8] sm:$0xff]  ;;  %v4722_v38 = vcombine.low %v572_v24, %v576_v25 }
  0xd7   : > { %1320 = vmatprep.subr.bf16.mxu0 %v4643_v39  ;;  %1361 = vmatprep.subr.bf16.mxu1 %v4645_v43  ;;  %v4724_v39 = vcombine.low %v573_v27, %v577_v29  ;;  %v4717_v41 = vcombine.high %v565_v35, %v569_v37  ;;  %v560_v43 = vld [vmem:[#allocation8 + $0x770] sm:$0xff]  ;;  %v517_v29 = vld [vmem:[#allocation8 + $0x618] sm:$0xff] }
  0xd8   : > { %v4707_v48 = vcombine.high %v556_v42, %v560_v43  ;;  %v516_v27 = vld [vmem:[#allocation8 + $0x610] sm:$0xff] }
  0xda   : > { %1321 = vmatpush1.bf16.msra.mxu0 %v4642_v45  ;;  %1362 = vmatpush1.bf16.msra.mxu1 %v4644_v46  ;;  %v561_v45 = vld [vmem:[#allocation8 + $0x778] sm:$0xff]  ;;  %v4714_v46 = vcombine.low %v564_v33, %v568_v34 }
  0xdb   : > { %1322 = vmatprep.subr.bf16.mxu0 %v4635_v47  ;;  %1363 = vmatprep.subr.bf16.mxu1 %v4637_v52  ;;  %v4716_v47 = vcombine.low %v565_v35, %v569_v37  ;;  %v4709_v49 = vcombine.high %v557_v44, %v561_v45  ;;  %v552_v52 = vld [vmem:[#allocation8 + $0x730] sm:$0xff]  ;;  %v376_v35 = vld [vmem:[#allocation8 + $0x1c0] sm:$0xff]  ;;  %v377_v37 = vld [vmem:[#allocation8 + $0x1c8] sm:$0xff] }
  0xdc   : > { %v4699_v59 = vcombine.high %v548_v51, %v552_v52 }
  0xde   : > { %1323 = vmatpush1.bf16.msra.mxu0 %v4634_v55  ;;  %1364 = vmatpush1.bf16.msra.mxu1 %v4636_v56  ;;  %v553_v55 = vld [vmem:[#allocation8 + $0x738] sm:$0xff]  ;;  %v4706_v56 = vcombine.low %v556_v42, %v560_v43  ;;  %v368_v43 = vld [vmem:[#allocation8 + $0x180] sm:$0xff] }
  0xdf   : > { %1324 = vmatprep.subr.bf16.mxu0 %v4627_v57  ;;  %1365 = vmatprep.subr.bf16.mxu1 %v4629_v0  ;;  %v4708_v57 = vcombine.low %v557_v44, %v561_v45  ;;  %v4701_v9 = vcombine.high %v549_v54, %v553_v55  ;;  %v544_v0 = vld [vmem:[#allocation8 + $0x6f0] sm:$0xff]  ;;  %v372_v44 = vld [vmem:[#allocation8 + $0x1a0] sm:$0xff]  ;;  %v369_v45 = vld [vmem:[#allocation8 + $0x188] sm:$0xff] }
  0xe0   : > { %v4691_v5 = vcombine.high %v540_v60, %v544_v0 }
  0xe2   : > { %1325 = vmatpush1.bf16.msra.mxu0 %v4626_v2  ;;  %1366 = vmatpush1.bf16.msra.mxu1 %v4628_v3  ;;  %v545_v2 = vld [vmem:[#allocation8 + $0x6f8] sm:$0xff]  ;;  %v4698_v3 = vcombine.low %v548_v51, %v552_v52  ;;  %v360_v52 = vld [vmem:[#allocation8 + $0x140] sm:$0xff] }
  0xe3   : > { %1326 = vmatprep.subr.bf16.mxu0 %v4619_v4  ;;  %1367 = vmatprep.subr.bf16.mxu1 %v4621_v10  ;;  %v4700_v4 = vcombine.low %v549_v54, %v553_v55  ;;  %v4693_v6 = vcombine.high %v541_v1, %v545_v2  ;;  %v536_v10 = vld [vmem:[#allocation8 + $0x6b0] sm:$0xff]  ;;  %v364_v54 = vld [vmem:[#allocation8 + $0x160] sm:$0xff]  ;;  %v5834_v55 = vpack.c.bf16 %v5795_v53, %v5795_v53  ;;  %v353_v53 = vld [vmem:[#allocation8 + $0x108] sm:$0xff] }
  0xe4   : > { %v4683_v15 = vcombine.high %v532_v7, %v536_v10 }
  0xe6   : > { %1327 = vmatpush1.bf16.msra.mxu0 %v4618_v12  ;;  %1368 = vmatpush1.bf16.msra.mxu1 %v4620_v13  ;;  %v537_v12 = vld [vmem:[#allocation8 + $0x6b8] sm:$0xff]  ;;  %v4690_v13 = vcombine.low %v540_v60, %v544_v0  ;;  %v4767_v60 = vcombine.high %v360_v52, %v364_v54 }
  0xe7   : > { %1328 = vmatprep.subr.bf16.mxu0 %v4611_v14  ;;  %1369 = vmatprep.subr.bf16.mxu1 %v4613_v19  ;;  %v4692_v14 = vcombine.low %v541_v1, %v545_v2  ;;  %v4685_v17 = vcombine.high %v533_v11, %v537_v12  ;;  %v528_v19 = vld [vmem:[#allocation8 + $0x670] sm:$0xff]  ;;  %v352_v1 = vld [vmem:[#allocation8 + $0x100] sm:$0xff] }
  0xe8   : > { %v4675_v24 = vcombine.high %v524_v18, %v528_v19  ;;  %v356_v2 = vld [vmem:[#allocation8 + $0x120] sm:$0xff] }
  0xea   : > { %1329 = vmatpush1.bf16.msra.mxu0 %v4610_v21  ;;  %1370 = vmatpush1.bf16.msra.mxu1 %v4612_v22  ;;  %v529_v21 = vld [vmem:[#allocation8 + $0x678] sm:$0xff]  ;;  %v4682_v22 = vcombine.low %v532_v7, %v536_v10  ;;  %v344_v7 = vld [vmem:[#allocation8 + $0xc0] sm:$0xff] }
  0xeb   : > { %1330 = vmatprep.subr.bf16.mxu0 %v4603_v23  ;;  %1371 = vmatprep.subr.bf16.mxu1 %v4605_v28  ;;  %v4684_v23 = vcombine.low %v533_v11, %v537_v12  ;;  %v4677_v25 = vcombine.high %v525_v20, %v529_v21  ;;  %v520_v28 = vld [vmem:[#allocation8 + $0x630] sm:$0xff]  ;;  %v348_v10 = vld [vmem:[#allocation8 + $0xe0] sm:$0xff]  ;;  %v345_v11 = vld [vmem:[#allocation8 + $0xc8] sm:$0xff] }
  0xec   : > { %v4667_v33 = vcombine.high %v516_v27, %v520_v28  ;;  %v349_v12 = vld [vmem:[#allocation8 + $0xe8] sm:$0xff] }
  0xee   : > { %1331 = vmatpush1.bf16.msra.mxu0 %v4602_v30  ;;  %1372 = vmatpush1.bf16.msra.mxu1 %v4604_v31  ;;  %v521_v30 = vld [vmem:[#allocation8 + $0x638] sm:$0xff]  ;;  %v4674_v31 = vcombine.low %v524_v18, %v528_v19  ;;  %v336_v18 = vld [vmem:[#allocation8 + $0x80] sm:$0xff] }
  0xef   : > { %1332 = vmatprep.subr.bf16.mxu0 %v4723_v32  ;;  %1373 = vmatprep.subr.bf16.mxu1 %v4725_v36  ;;  %v4676_v32 = vcombine.low %v525_v20, %v529_v21  ;;  %v4669_v34 = vcombine.high %v517_v29, %v521_v30  ;;  %v380_v36 = vld [vmem:[#allocation8 + $0x1e0] sm:$0xff]  ;;  %v337_v20 = vld [vmem:[#allocation8 + $0x88] sm:$0xff] }
  0xf0   : > { %v340_v19 = vld [vmem:[#allocation8 + $0xa0] sm:$0xff]  ;;  %v341_v21 = vld [vmem:[#allocation8 + $0xa8] sm:$0xff] }
  0xf2   : > { %1333 = vmatpush2.bf16.msra.mxu0 %v4722_v38  ;;  %1374 = vmatpush2.bf16.msra.mxu1 %v4724_v39  ;;  %v381_v38 = vld [vmem:[#allocation8 + $0x1e8] sm:$0xff]  ;;  %v4666_v39 = vcombine.low %v516_v27, %v520_v28  ;;  %v328_v27 = vld [vmem:[#allocation8 + $0x40] sm:$0xff] }
  0xf3   : > { %1334 = vmatprep.subr.bf16.mxu0 %v4715_v40  ;;  %1375 = vmatprep.subr.bf16.mxu1 %v4717_v41  ;;  %v4668_v40 = vcombine.low %v517_v29, %v521_v30  ;;  %v4783_v41 = vcombine.high %v376_v35, %v380_v36  ;;  %v4785_v42 = vcombine.high %v377_v37, %v381_v38  ;;  %v332_v28 = vld [vmem:[#allocation8 + $0x60] sm:$0xff]  ;;  %v329_v29 = vld [vmem:[#allocation8 + $0x48] sm:$0xff] }
  0xf4   : > { %v333_v30 = vld [vmem:[#allocation8 + $0x68] sm:$0xff] }
  0xf6   : > { %1335 = vmatpush2.bf16.msra.mxu0 %v4714_v46  ;;  %1376 = vmatpush2.bf16.msra.mxu1 %v4716_v47  ;;  %v373_v46 = vld [vmem:[#allocation8 + $0x1a8] sm:$0xff]  ;;  %v4782_v47 = vcombine.low %v376_v35, %v380_v36  ;;  %v320_v35 = vld [vmem:[#allocation8] sm:$0xff] }
  0xf7   : > { %1336 = vmatprep.subr.bf16.mxu0 %v4707_v48  ;;  %1377 = vmatprep.subr.bf16.mxu1 %v4709_v49  ;;  %v4784_v48 = vcombine.low %v377_v37, %v381_v38  ;;  %v4775_v49 = vcombine.high %v368_v43, %v372_v44  ;;  %v4777_v51 = vcombine.high %v369_v45, %v373_v46  ;;  %v324_v36 = vld [vmem:[#allocation8 + $0x20] sm:$0xff]  ;;  %v321_v37 = vld [vmem:[#allocation8 + $0x8] sm:$0xff] }
  0xf8   : > { %v325_v38 = vld [vmem:[#allocation8 + $0x28] sm:$0xff] }
  0xfa   : > { %1337 = vmatpush2.bf16.msra.mxu0 %v4706_v56  ;;  %1378 = vmatpush2.bf16.msra.mxu1 %v4708_v57  ;;  %v361_v56 = vld [vmem:[#allocation8 + $0x148] sm:$0xff] }
  0xfb   : > { %1338 = vmatprep.subr.bf16.mxu0 %v4699_v59  ;;  %1379 = vmatprep.subr.bf16.mxu1 %v4701_v9  ;;  %v365_v57 = vld [vmem:[#allocation8 + $0x168] sm:$0xff]  ;;  %v4774_v59 = vcombine.low %v368_v43, %v372_v44  ;;  %v4776_v9 = vcombine.low %v369_v45, %v373_v46  ;;  %v440_v43 = vld [vmem:[#allocation8 + $0x3c0] sm:$0xff] }
  0xfc   : > { %v4769_v0 = vcombine.high %v361_v56, %v365_v57  ;;  %v444_v44 = vld [vmem:[#allocation8 + $0x3e0] sm:$0xff]  ;;  %v441_v45 = vld [vmem:[#allocation8 + $0x3c8] sm:$0xff] }
  0xfd   : > { %v445_v46 = vld [vmem:[#allocation8 + $0x3e8] sm:$0xff] }
  0xfe   : > { %1339 = vmatpush2.bf16.msra.mxu0 %v4698_v3  ;;  %1380 = vmatpush2.bf16.msra.mxu1 %v4700_v4  ;;  %v357_v3 = vld [vmem:[#allocation8 + $0x128] sm:$0xff]  ;;  %v4766_v4 = vcombine.low %v360_v52, %v364_v54  ;;  %v432_v52 = vld [vmem:[#allocation8 + $0x380] sm:$0xff] }
  0xff   : > { %1340 = vmatprep.subr.bf16.mxu0 %v4691_v5  ;;  %1381 = vmatprep.subr.bf16.mxu1 %v4693_v6  ;;  %v4759_v5 = vcombine.high %v352_v1, %v356_v2  ;;  %v4761_v6 = vcombine.high %v353_v53, %v357_v3  ;;  %v436_v54 = vld [vmem:[#allocation8 + $0x3a0] sm:$0xff] }
 0x102   : > { %1341 = vmatpush2.bf16.msra.mxu0 %v4690_v13  ;;  %1382 = vmatpush2.bf16.msra.mxu1 %v4692_v14  ;;  %v4758_v13 = vcombine.low %v352_v1, %v356_v2  ;;  %v4760_v14 = vcombine.low %v353_v53, %v357_v3  ;;  %v424_v1 = vld [vmem:[#allocation8 + $0x340] sm:$0xff]  ;;  %v425_v53 = vld [vmem:[#allocation8 + $0x348] sm:$0xff] }
 0x103   : > { %1342 = vmatprep.subr.bf16.mxu0 %v4683_v15  ;;  %1383 = vmatprep.subr.bf16.mxu1 %v4685_v17  ;;  %v4751_v15 = vcombine.high %v344_v7, %v348_v10  ;;  %v4753_v17 = vcombine.high %v345_v11, %v349_v12  ;;  %v428_v2 = vld [vmem:[#allocation8 + $0x360] sm:$0xff]  ;;  %v429_v3 = vld [vmem:[#allocation8 + $0x368] sm:$0xff] }
 0x106   : > { %1343 = vmatpush2.bf16.msra.mxu0 %v4682_v22  ;;  %1384 = vmatpush2.bf16.msra.mxu1 %v4684_v23  ;;  %v4750_v22 = vcombine.low %v344_v7, %v348_v10  ;;  %v4752_v23 = vcombine.low %v345_v11, %v349_v12  ;;  %v416_v7 = vld [vmem:[#allocation8 + $0x300] sm:$0xff]  ;;  %v417_v11 = vld [vmem:[#allocation8 + $0x308] sm:$0xff] }
 0x107   : > { %1344 = vmatprep.subr.bf16.mxu0 %v4675_v24  ;;  %1385 = vmatprep.subr.bf16.mxu1 %v4677_v25  ;;  %v4743_v24 = vcombine.high %v336_v18, %v340_v19  ;;  %v4745_v25 = vcombine.high %v337_v20, %v341_v21  ;;  %v420_v10 = vld [vmem:[#allocation8 + $0x320] sm:$0xff]  ;;  %v421_v12 = vld [vmem:[#allocation8 + $0x328] sm:$0xff] }
 0x10a   : > { %1345 = vmatpush2.bf16.msra.mxu0 %v4674_v31  ;;  %1386 = vmatpush2.bf16.msra.mxu1 %v4676_v32  ;;  %v4742_v31 = vcombine.low %v336_v18, %v340_v19  ;;  %v4744_v32 = vcombine.low %v337_v20, %v341_v21  ;;  %v408_v18 = vld [vmem:[#allocation8 + $0x2c0] sm:$0xff]  ;;  %v409_v20 = vld [vmem:[#allocation8 + $0x2c8] sm:$0xff] }
 0x10b   : > { %1346 = vmatprep.subr.bf16.mxu0 %v4667_v33  ;;  %1387 = vmatprep.subr.bf16.mxu1 %v4669_v34  ;;  %v4735_v33 = vcombine.high %v328_v27, %v332_v28  ;;  %v4737_v34 = vcombine.high %v329_v29, %v333_v30  ;;  %v412_v19 = vld [vmem:[#allocation8 + $0x2e0] sm:$0xff]  ;;  %v413_v21 = vld [vmem:[#allocation8 + $0x2e8] sm:$0xff] }
 0x10e   : > { %1347 = vmatpush2.bf16.msra.mxu0 %v4666_v39  ;;  %1388 = vmatpush2.bf16.msra.mxu1 %v4668_v40  ;;  %v4734_v39 = vcombine.low %v328_v27, %v332_v28  ;;  %v4736_v40 = vcombine.low %v329_v29, %v333_v30  ;;  %v400_v27 = vld [vmem:[#allocation8 + $0x280] sm:$0xff]  ;;  %v401_v29 = vld [vmem:[#allocation8 + $0x288] sm:$0xff] }
 0x10f   : > { %2038 = vmatprep.subr.bf16.mxu0 %v4783_v41  ;;  %2079 = vmatprep.subr.bf16.mxu1 %v4785_v42  ;;  %v4727_v41 = vcombine.high %v320_v35, %v324_v36  ;;  %v4729_v42 = vcombine.high %v321_v37, %v325_v38  ;;  %v404_v28 = vld [vmem:[#allocation8 + $0x2a0] sm:$0xff]  ;;  %v405_v30 = vld [vmem:[#allocation8 + $0x2a8] sm:$0xff] }
 0x111   : > { %1349 = vmatmul.mubr.bf16.vlgmr.msra.gmra.mxu0 %v5826_v26  ;;  %1390 = vmatmul.mubr.bf16.vlgmr.msra.gmra.mxu1 %v5826_v26  ;;  %v4768_v26 = vcombine.low %v361_v56, %v365_v57  ;;  %v433_v56 = vld [vmem:[#allocation8 + $0x388] sm:$0xff] }
 0x112   : > { %2039 = vmatpush1.bf16.msra.mxu0 %v4782_v47  ;;  %2080 = vmatpush1.bf16.msra.mxu1 %v4784_v48  ;;  %v4726_v47 = vcombine.low %v320_v35, %v324_v36  ;;  %v4728_v48 = vcombine.low %v321_v37, %v325_v38  ;;  %v437_v57 = vld [vmem:[#allocation8 + $0x3a8] sm:$0xff]  ;;  %v392_v35 = vld [vmem:[#allocation8 + $0x240] sm:$0xff] }
 0x113   : > { %2040 = vmatprep.subr.bf16.mxu0 %v4775_v49  ;;  %2081 = vmatprep.subr.bf16.mxu1 %v4777_v51  ;;  %v4847_v49 = vcombine.high %v440_v43, %v444_v44  ;;  %v4849_v51 = vcombine.high %v441_v45, %v445_v46  ;;  %v396_v36 = vld [vmem:[#allocation8 + $0x260] sm:$0xff]  ;;  %v393_v37 = vld [vmem:[#allocation8 + $0x248] sm:$0xff] }
 0x114   : > { %2070 = vmatprep.mubr.bf16.mxu0 %v5834_v55  ;;  %2111 = vmatprep.mubr.bf16.mxu1 %v5834_v55  ;;  %v397_v38 = vld [vmem:[#allocation8 + $0x268] sm:$0xff] }
 0x116   : > { %2041 = vmatpush1.bf16.msra.mxu0 %v4774_v59  ;;  %2082 = vmatpush1.bf16.msra.mxu1 %v4776_v9  ;;  %v4846_v59 = vcombine.low %v440_v43, %v444_v44  ;;  %v4848_v9 = vcombine.low %v441_v45, %v445_v46  ;;  %v384_v43 = vld [vmem:[#allocation8 + $0x200] sm:$0xff]  ;;  %v385_v45 = vld [vmem:[#allocation8 + $0x208] sm:$0xff] }
 0x117   : > { %2042 = vmatprep.subr.bf16.mxu0 %v4767_v60  ;;  %2083 = vmatprep.subr.bf16.mxu1 %v4769_v0  ;;  %v4839_v60 = vcombine.high %v432_v52, %v436_v54  ;;  %v4841_v0 = vcombine.high %v433_v56, %v437_v57  ;;  %v388_v44 = vld [vmem:[#allocation8 + $0x220] sm:$0xff]  ;;  %v389_v46 = vld [vmem:[#allocation8 + $0x228] sm:$0xff] }
 0x11a   : > { %2043 = vmatpush1.bf16.msra.mxu0 %v4766_v4  ;;  %2084 = vmatpush1.bf16.msra.mxu1 %v4768_v26  ;;  %v4838_v4 = vcombine.low %v432_v52, %v436_v54  ;;  %v4840_v26 = vcombine.low %v433_v56, %v437_v57  ;;  %v378_v52 = vld [vmem:[#allocation8 + $0x1d0] sm:$0xff]  ;;  %v379_v56 = vld [vmem:[#allocation8 + $0x1d8] sm:$0xff] }
 0x11b   : > { %2044 = vmatprep.subr.bf16.mxu0 %v4759_v5  ;;  %2085 = vmatprep.subr.bf16.mxu1 %v4761_v6  ;;  %v4831_v5 = vcombine.high %v424_v1, %v428_v2  ;;  %v4833_v6 = vcombine.high %v425_v53, %v429_v3  ;;  %v382_v54 = vld [vmem:[#allocation8 + $0x1f0] sm:$0xff]  ;;  %v383_v57 = vld [vmem:[#allocation8 + $0x1f8] sm:$0xff] }
 0x11e   : > { %2045 = vmatpush1.bf16.msra.mxu0 %v4758_v13  ;;  %2086 = vmatpush1.bf16.msra.mxu1 %v4760_v14  ;;  %v4830_v13 = vcombine.low %v424_v1, %v428_v2  ;;  %v4832_v14 = vcombine.low %v425_v53, %v429_v3  ;;  %v370_v1 = vld [vmem:[#allocation8 + $0x190] sm:$0xff]  ;;  %v5842_v53 = vpack.c.bf16 %v5813_v50, %v5813_v50  ;;  %v371_v3 = vld [vmem:[#allocation8 + $0x198] sm:$0xff] }
 0x11f   : > { %2046 = vmatprep.subr.bf16.mxu0 %v4751_v15  ;;  %2087 = vmatprep.subr.bf16.mxu1 %v4753_v17  ;;  %v4823_v15 = vcombine.high %v416_v7, %v420_v10  ;;  %v4825_v17 = vcombine.high %v417_v11, %v421_v12  ;;  %v374_v2 = vld [vmem:[#allocation8 + $0x1b0] sm:$0xff] }
 0x120   : > { %v4778_v50 = vcombine.low %v370_v1, %v374_v2 }
 0x122   : > { %2047 = vmatpush1.bf16.msra.mxu0 %v4750_v22  ;;  %2088 = vmatpush1.bf16.msra.mxu1 %v4752_v23  ;;  %v4822_v22 = vcombine.low %v416_v7, %v420_v10  ;;  %v4824_v23 = vcombine.low %v417_v11, %v421_v12  ;;  %v362_v10 = vld [vmem:[#allocation8 + $0x150] sm:$0xff]  ;;  %v363_v12 = vld [vmem:[#allocation8 + $0x158] sm:$0xff] }
 0x123   : > { %2048 = vmatprep.subr.bf16.mxu0 %v4743_v24  ;;  %2089 = vmatprep.subr.bf16.mxu1 %v4745_v25  ;;  %v4815_v24 = vcombine.high %v408_v18, %v412_v19  ;;  %v4817_v25 = vcombine.high %v409_v20, %v413_v21  ;;  %v366_v11 = vld [vmem:[#allocation8 + $0x170] sm:$0xff] }
 0x126   : > { %2049 = vmatpush1.bf16.msra.mxu0 %v4742_v31  ;;  %2090 = vmatpush1.bf16.msra.mxu1 %v4744_v32  ;;  %v4814_v31 = vcombine.low %v408_v18, %v412_v19  ;;  %v4816_v32 = vcombine.low %v409_v20, %v413_v21  ;;  %v354_v18 = vld [vmem:[#allocation8 + $0x110] sm:$0xff]  ;;  %v355_v20 = vld [vmem:[#allocation8 + $0x118] sm:$0xff] }
 0x127   : > { %2050 = vmatprep.subr.bf16.mxu0 %v4735_v33  ;;  %2091 = vmatprep.subr.bf16.mxu1 %v4737_v34  ;;  %v4807_v33 = vcombine.high %v400_v27, %v404_v28  ;;  %v4809_v34 = vcombine.high %v401_v29, %v405_v30  ;;  %v358_v19 = vld [vmem:[#allocation8 + $0x130] sm:$0xff]  ;;  %v359_v21 = vld [vmem:[#allocation8 + $0x138] sm:$0xff] }
 0x12a   : > { %2051 = vmatpush1.bf16.msra.mxu0 %v4734_v39  ;;  %2092 = vmatpush1.bf16.msra.mxu1 %v4736_v40  ;;  %v4806_v39 = vcombine.low %v400_v27, %v404_v28  ;;  %v4808_v40 = vcombine.low %v401_v29, %v405_v30  ;;  %v346_v27 = vld [vmem:[#allocation8 + $0xd0] sm:$0xff]  ;;  %v347_v29 = vld [vmem:[#allocation8 + $0xd8] sm:$0xff] }
 0x12b   : > { %2052 = vmatprep.subr.bf16.mxu0 %v4727_v41  ;;  %2093 = vmatprep.subr.bf16.mxu1 %v4729_v42  ;;  %v4799_v41 = vcombine.high %v392_v35, %v396_v36  ;;  %v4801_v42 = vcombine.high %v393_v37, %v397_v38  ;;  %v350_v28 = vld [vmem:[#allocation8 + $0xf0] sm:$0xff]  ;;  %v351_v30 = vld [vmem:[#allocation8 + $0xf8] sm:$0xff] }
 0x12e   : > { %2053 = vmatpush1.bf16.msra.mxu0 %v4726_v47  ;;  %2094 = vmatpush1.bf16.msra.mxu1 %v4728_v48  ;;  %v4798_v47 = vcombine.low %v392_v35, %v396_v36  ;;  %v4800_v48 = vcombine.low %v393_v37, %v397_v38  ;;  %v342_v35 = vld [vmem:[#allocation8 + $0xb0] sm:$0xff]  ;;  %v339_v36 = vld [vmem:[#allocation8 + $0x98] sm:$0xff]  ;;  %v4754_v38 = vcombine.low %v346_v27, %v350_v28 }
 0x12f   : > { %2054 = vmatprep.subr.bf16.mxu0 %v4847_v49  ;;  %2095 = vmatprep.subr.bf16.mxu1 %v4849_v51  ;;  %v4791_v49 = vcombine.high %v384_v43, %v388_v44  ;;  %v4793_v51 = vcombine.high %v385_v45, %v389_v46  ;;  %v343_v37 = vld [vmem:[#allocation8 + $0xb8] sm:$0xff] }
 0x132   : > { %2055 = vmatpush2.bf16.msra.mxu0 %v4846_v59  ;;  %2096 = vmatpush2.bf16.msra.mxu1 %v4848_v9  ;;  %v4790_v59 = vcombine.low %v384_v43, %v388_v44  ;;  %v4792_v9 = vcombine.low %v385_v45, %v389_v46  ;;  %v334_v43 = vld [vmem:[#allocation8 + $0x70] sm:$0xff]  ;;  %v331_v44 = vld [vmem:[#allocation8 + $0x58] sm:$0xff] }
 0x133   : > { %2056 = vmatprep.subr.bf16.mxu0 %v4839_v60  ;;  %2097 = vmatprep.subr.bf16.mxu1 %v4841_v0  ;;  %v4787_v60 = vcombine.high %v378_v52, %v382_v54  ;;  %v4789_v0 = vcombine.high %v379_v56, %v383_v57  ;;  %v335_v45 = vld [vmem:[#allocation8 + $0x78] sm:$0xff] }
 0x136   : > { %2057 = vmatpush2.bf16.msra.mxu0 %v4838_v4  ;;  %2098 = vmatpush2.bf16.msra.mxu1 %v4840_v26  ;;  %v375_v4 = vld [vmem:[#allocation8 + $0x1b8] sm:$0xff]  ;;  %v4786_v26 = vcombine.low %v378_v52, %v382_v54  ;;  %v326_v52 = vld [vmem:[#allocation8 + $0x30] sm:$0xff] }
 0x137   : > { %2058 = vmatprep.subr.bf16.mxu0 %v4831_v5  ;;  %2099 = vmatprep.subr.bf16.mxu1 %v4833_v6  ;;  %v4788_v5 = vcombine.low %v379_v56, %v383_v57  ;;  %v4779_v6 = vcombine.high %v370_v1, %v374_v2  ;;  %v4781_v7 = vcombine.high %v371_v3, %v375_v4  ;;  %v323_v54 = vld [vmem:[#allocation8 + $0x18] sm:$0xff]  ;;  %v446_v1 = vld [vmem:[#allocation8 + $0x3f0] sm:$0xff] }
 0x138   : > { %v327_v56 = vld [vmem:[#allocation8 + $0x38] sm:$0xff] }
 0x139   : > { %v443_v2 = vld [vmem:[#allocation8 + $0x3d8] sm:$0xff] }
 0x13a   : > { %2059 = vmatpush2.bf16.msra.mxu0 %v4830_v13  ;;  %2100 = vmatpush2.bf16.msra.mxu1 %v4832_v14  ;;  %v367_v13 = vld [vmem:[#allocation8 + $0x178] sm:$0xff]  ;;  %v4780_v14 = vcombine.low %v371_v3, %v375_v4 }
 0x13b   : > { %2060 = vmatprep.subr.bf16.mxu0 %v4823_v15  ;;  %2101 = vmatprep.subr.bf16.mxu1 %v4825_v17  ;;  %v4771_v15 = vcombine.high %v362_v10, %v366_v11  ;;  %v4773_v17 = vcombine.high %v363_v12, %v367_v13  ;;  %v447_v3 = vld [vmem:[#allocation8 + $0x3f8] sm:$0xff] }
 0x13e   : > { %2061 = vmatpush2.bf16.msra.mxu0 %v4822_v22  ;;  %2102 = vmatpush2.bf16.msra.mxu1 %v4824_v23  ;;  %v4770_v22 = vcombine.low %v362_v10, %v366_v11  ;;  %v4772_v23 = vcombine.low %v363_v12, %v367_v13  ;;  %v438_v10 = vld [vmem:[#allocation8 + $0x3b0] sm:$0xff]  ;;  %v435_v11 = vld [vmem:[#allocation8 + $0x398] sm:$0xff] }
 0x13f   : > { %2062 = vmatprep.subr.bf16.mxu0 %v4815_v24  ;;  %2103 = vmatprep.subr.bf16.mxu1 %v4817_v25  ;;  %v4763_v24 = vcombine.high %v354_v18, %v358_v19  ;;  %v4765_v25 = vcombine.high %v355_v20, %v359_v21  ;;  %v439_v12 = vld [vmem:[#allocation8 + $0x3b8] sm:$0xff] }
 0x142   : > { %2063 = vmatpush2.bf16.msra.mxu0 %v4814_v31  ;;  %2104 = vmatpush2.bf16.msra.mxu1 %v4816_v32  ;;  %v4762_v31 = vcombine.low %v354_v18, %v358_v19  ;;  %v4764_v32 = vcombine.low %v355_v20, %v359_v21  ;;  %v430_v18 = vld [vmem:[#allocation8 + $0x370] sm:$0xff]  ;;  %v427_v19 = vld [vmem:[#allocation8 + $0x358] sm:$0xff] }
 0x143   : > { %2064 = vmatprep.subr.bf16.mxu0 %v4807_v33  ;;  %2105 = vmatprep.subr.bf16.mxu1 %v4809_v34  ;;  %v4755_v33 = vcombine.high %v346_v27, %v350_v28  ;;  %v338_v34 = vld [vmem:[#allocation8 + $0x90] sm:$0xff]  ;;  %v431_v20 = vld [vmem:[#allocation8 + $0x378] sm:$0xff] }
 0x144   : > { %v4746_v46 = vcombine.low %v338_v34, %v342_v35  ;;  %v422_v27 = vld [vmem:[#allocation8 + $0x330] sm:$0xff]  ;;  %v419_v28 = vld [vmem:[#allocation8 + $0x318] sm:$0xff] }
 0x146   : > { %2065 = vmatpush2.bf16.msra.mxu0 %v4806_v39  ;;  %2106 = vmatpush2.bf16.msra.mxu1 %v4808_v40  ;;  %v4756_v39 = vcombine.low %v347_v29, %v351_v30  ;;  %v4747_v40 = vcombine.high %v338_v34, %v342_v35  ;;  %v414_v34 = vld [vmem:[#allocation8 + $0x2f0] sm:$0xff]  ;;  %v411_v35 = vld [vmem:[#allocation8 + $0x2d8] sm:$0xff] }
 0x147   : > { %2066 = vmatprep.subr.bf16.mxu0 %v4799_v41  ;;  %2107 = vmatprep.subr.bf16.mxu1 %v4801_v42  ;;  %v4749_v41 = vcombine.high %v339_v36, %v343_v37  ;;  %v330_v42 = vld [vmem:[#allocation8 + $0x50] sm:$0xff] }
 0x148   : > { %v4738_v57 = vcombine.low %v330_v42, %v334_v43 }
 0x14a   : > { %2067 = vmatpush2.bf16.msra.mxu0 %v4798_v47  ;;  %2108 = vmatpush2.bf16.msra.mxu1 %v4800_v48  ;;  %v4748_v47 = vcombine.low %v339_v36, %v343_v37  ;;  %v4739_v48 = vcombine.high %v330_v42, %v334_v43  ;;  %v415_v36 = vld [vmem:[#allocation8 + $0x2f8] sm:$0xff]  ;;  %v406_v42 = vld [vmem:[#allocation8 + $0x2b0] sm:$0xff] }
 0x14b   : > { %2068 = vmatprep.subr.bf16.mxu0 %v4791_v49  ;;  %2109 = vmatprep.subr.bf16.mxu1 %v4793_v51  ;;  %v4741_v49 = vcombine.high %v331_v44, %v335_v45  ;;  %v322_v51 = vld [vmem:[#allocation8 + $0x10] sm:$0xff]  ;;  %v403_v43 = vld [vmem:[#allocation8 + $0x298] sm:$0xff] }
 0x14c   : > { %v4730_v4 = vcombine.low %v322_v51, %v326_v52 }
 0x14e   : > { %2069 = vmatpush2.bf16.msra.mxu0 %v4790_v59  ;;  %2110 = vmatpush2.bf16.msra.mxu1 %v4792_v9  ;;  %v4740_v59 = vcombine.low %v331_v44, %v335_v45  ;;  %v4731_v9 = vcombine.high %v322_v51, %v326_v52  ;;  %v407_v44 = vld [vmem:[#allocation8 + $0x2b8] sm:$0xff]  ;;  %v398_v51 = vld [vmem:[#allocation8 + $0x270] sm:$0xff] }
 0x14f   : > { %2120 = vmatprep.subr.bf16.mxu0 %v4787_v60  ;;  %2161 = vmatprep.subr.bf16.mxu1 %v4789_v0  ;;  %v4733_v60 = vcombine.high %v323_v54, %v327_v56  ;;  %v442_v0 = vld [vmem:[#allocation8 + $0x3d0] sm:$0xff]  ;;  %v395_v52 = vld [vmem:[#allocation8 + $0x258] sm:$0xff] }
 0x150   : > { %v4850_v13 = vcombine.low %v442_v0, %v446_v1 }
 0x151   : > { %2071 = vmatmul.mubr.bf16.vlgmr.msra.gmra.mxu0 %v5842_v53  ;;  %2112 = vmatmul.mubr.bf16.vlgmr.msra.gmra.mxu1 %v5842_v53 }
 0x152   : > { %2121 = vmatpush1.bf16.msra.mxu0 %v4786_v26  ;;  %2162 = vmatpush1.bf16.msra.mxu1 %v4788_v5  ;;  %v4732_v26 = vcombine.low %v323_v54, %v327_v56  ;;  %v4851_v5 = vcombine.high %v442_v0, %v446_v1  ;;  %v399_v54 = vld [vmem:[#allocation8 + $0x278] sm:$0xff]  ;;  %v390_v0 = vld [vmem:[#allocation8 + $0x230] sm:$0xff] }
 0x153   : > { %2122 = vmatprep.subr.bf16.mxu0 %v4779_v6  ;;  %2163 = vmatprep.subr.bf16.mxu1 %v4781_v7  ;;  %v4853_v6 = vcombine.high %v443_v2, %v447_v3  ;;  %v434_v7 = vld [vmem:[#allocation8 + $0x390] sm:$0xff]  ;;  %v387_v1 = vld [vmem:[#allocation8 + $0x218] sm:$0xff] }
 0x154   : > { %2152 = vmatprep.mubr.bf16.mxu0 %v5834_v55  ;;  %2193 = vmatprep.mubr.bf16.mxu1 %v5834_v55  ;;  %v4757_v55 = vcombine.high %v347_v29, %v351_v30  ;;  %v4842_v21 = vcombine.low %v434_v7, %v438_v10  ;;  %v423_v29 = vld [vmem:[#allocation8 + $0x338] sm:$0xff] }
 0x156   : > { %2123 = vmatpush1.bf16.msra.mxu0 %v4778_v50  ;;  %2164 = vmatpush1.bf16.msra.mxu1 %v4780_v14  ;;  %v4852_v50 = vcombine.low %v443_v2, %v447_v3  ;;  %v4843_v14 = vcombine.high %v434_v7, %v438_v10  ;;  %v391_v2 = vld [vmem:[#allocation8 + $0x238] sm:$0xff]  ;;  %v2262_v7 = vld [vmem:[#allocation8 + $0x9e0] sm:$0xff]  ;;  %v2259_v10 = vld [vmem:[#allocation8 + $0x9c8] sm:$0xff] }
 0x157   : > { %2124 = vmatprep.subr.bf16.mxu0 %v4771_v15  ;;  %2165 = vmatprep.subr.bf16.mxu1 %v4773_v17  ;;  %v4845_v15 = vcombine.high %v435_v11, %v439_v12  ;;  %v426_v17 = vld [vmem:[#allocation8 + $0x350] sm:$0xff] }
 0x158   : > { %v4834_v30 = vcombine.low %v426_v17, %v430_v18 }
 0x15a   : > { %2125 = vmatpush1.bf16.msra.mxu0 %v4770_v22  ;;  %2166 = vmatpush1.bf16.msra.mxu1 %v4772_v23  ;;  %v4844_v22 = vcombine.low %v435_v11, %v439_v12  ;;  %v4835_v23 = vcombine.high %v426_v17, %v430_v18  ;;  %v2263_v11 = vld [vmem:[#allocation8 + $0x9e8] sm:$0xff]  ;;  %v2254_v17 = vld [vmem:[#allocation8 + $0x9a0] sm:$0xff] }
 0x15b   : > { %2126 = vmatprep.subr.bf16.mxu0 %v4763_v24  ;;  %2167 = vmatprep.subr.bf16.mxu1 %v4765_v25  ;;  %v4837_v24 = vcombine.high %v427_v19, %v431_v20  ;;  %v418_v25 = vld [vmem:[#allocation8 + $0x310] sm:$0xff]  ;;  %v2251_v18 = vld [vmem:[#allocation8 + $0x988] sm:$0xff] }
 0x15c   : > { %v4826_v37 = vcombine.low %v418_v25, %v422_v27 }
 0x15e   : > { %2127 = vmatpush1.bf16.msra.mxu0 %v4762_v31  ;;  %2168 = vmatpush1.bf16.msra.mxu1 %v4764_v32  ;;  %v4836_v31 = vcombine.low %v427_v19, %v431_v20  ;;  %v4827_v32 = vcombine.high %v418_v25, %v422_v27  ;;  %v2255_v19 = vld [vmem:[#allocation8 + $0x9a8] sm:$0xff]  ;;  %v2246_v25 = vld [vmem:[#allocation8 + $0x960] sm:$0xff]  ;;  %v5849_v27 = vrot.slane %v5800_v58, 1 }
 0x15f   : > { %2128 = vmatprep.subr.bf16.mxu0 %v4755_v33  ;;  %2169 = vmatprep.subr.bf16.mxu1 %v4757_v55  ;;  %v4829_v33 = vcombine.high %v419_v28, %v423_v29  ;;  %v410_v55 = vld [vmem:[#allocation8 + $0x2d0] sm:$0xff]  ;;  %v3189_v58 = vld [vmem:[#allocation8 + $0xd48] sm:$0xff] }
 0x160   : > { %v4818_v45 = vcombine.low %v410_v55, %v414_v34 }
 0x162   : > { %2129 = vmatpush1.bf16.msra.mxu0 %v4754_v38  ;;  %2170 = vmatpush1.bf16.msra.mxu1 %v4756_v39  ;;  %v4828_v38 = vcombine.low %v419_v28, %v423_v29  ;;  %v4819_v39 = vcombine.high %v410_v55, %v414_v34  ;;  %v2243_v29 = vld [vmem:[#allocation8 + $0x948] sm:$0xff]  ;;  %v4904_v55 = vcombine.low %v2251_v18, %v2255_v19 }
 0x163   : > { %2130 = vmatprep.subr.bf16.mxu0 %v4747_v40  ;;  %2171 = vmatprep.subr.bf16.mxu1 %v4749_v41  ;;  %v4821_v40 = vcombine.high %v411_v35, %v415_v36  ;;  %v402_v41 = vld [vmem:[#allocation8 + $0x290] sm:$0xff] }
 0x164   : > { %v4810_v56 = vcombine.low %v402_v41, %v406_v42 }
 0x166   : > { %2131 = vmatpush1.bf16.msra.mxu0 %v4746_v46  ;;  %2172 = vmatpush1.bf16.msra.mxu1 %v4748_v47  ;;  %v4820_v46 = vcombine.low %v411_v35, %v415_v36  ;;  %v4811_v47 = vcombine.high %v402_v41, %v406_v42  ;;  %v2239_v41 = vld [vmem:[#allocation8 + $0x928] sm:$0xff] }
 0x167   : > { %2132 = vmatprep.subr.bf16.mxu0 %v4739_v48  ;;  %2173 = vmatprep.subr.bf16.mxu1 %v4741_v49  ;;  %v4813_v48 = vcombine.high %v403_v43, %v407_v44  ;;  %v394_v49 = vld [vmem:[#allocation8 + $0x250] sm:$0xff] }
 0x168   : > { %v4802_v3 = vcombine.low %v394_v49, %v398_v51 }
 0x16a   : > { %2133 = vmatpush1.bf16.msra.mxu0 %v4738_v57  ;;  %2174 = vmatpush1.bf16.msra.mxu1 %v4740_v59  ;;  %v4812_v57 = vcombine.low %v403_v43, %v407_v44  ;;  %v4803_v59 = vcombine.high %v394_v49, %v398_v51  ;;  %v2230_v49 = vld [vmem:[#allocation8 + $0x8e0] sm:$0xff]  ;;  %v2227_v51 = vld [vmem:[#allocation8 + $0x8c8] sm:$0xff] }
 0x16b   : > { %2134 = vmatprep.subr.bf16.mxu0 %v4731_v9  ;;  %2175 = vmatprep.subr.bf16.mxu1 %v4733_v60  ;;  %v4805_v9 = vcombine.high %v395_v52, %v399_v54  ;;  %v386_v60 = vld [vmem:[#allocation8 + $0x210] sm:$0xff] }
 0x16c   : > { %v4794_v12 = vcombine.low %v386_v60, %v390_v0 }
 0x16e   : > { %2135 = vmatpush1.bf16.msra.mxu0 %v4730_v4  ;;  %2176 = vmatpush1.bf16.msra.mxu1 %v4732_v26  ;;  %v4804_v4 = vcombine.low %v395_v52, %v399_v54  ;;  %v4795_v26 = vcombine.high %v386_v60, %v390_v0  ;;  %v2231_v52 = vld [vmem:[#allocation8 + $0x8e8] sm:$0xff]  ;;  %v2222_v60 = vld [vmem:[#allocation8 + $0x8a0] sm:$0xff] }
 0x16f   : > { %2136 = vmatprep.subr.bf16.mxu0 %v4851_v5  ;;  %2177 = vmatprep.subr.bf16.mxu1 %v4853_v6  ;;  %v4797_v5 = vcombine.high %v387_v1, %v391_v2  ;;  %v2258_v6 = vld [vmem:[#allocation8 + $0x9c0] sm:$0xff]  ;;  %v2219_v0 = vld [vmem:[#allocation8 + $0x888] sm:$0xff] }
 0x170   : > { %v4910_v20 = vcombine.low %v2258_v6, %v2262_v7 }
 0x172   : > { %2137 = vmatpush2.bf16.msra.mxu0 %v4850_v13  ;;  %2178 = vmatpush2.bf16.msra.mxu1 %v4852_v50  ;;  %v4796_v13 = vcombine.low %v387_v1, %v391_v2  ;;  %v4911_v50 = vcombine.high %v2258_v6, %v2262_v7  ;;  %v2223_v1 = vld [vmem:[#allocation8 + $0x8a8] sm:$0xff]  ;;  %v2214_v6 = vld [vmem:[#allocation8 + $0x860] sm:$0xff] }
 0x173   : > { %2138 = vmatprep.subr.bf16.mxu0 %v4843_v14  ;;  %2179 = vmatprep.subr.bf16.mxu1 %v4845_v15  ;;  %v4913_v14 = vcombine.high %v2259_v10, %v2263_v11  ;;  %v2250_v15 = vld [vmem:[#allocation8 + $0x980] sm:$0xff]  ;;  %v2211_v7 = vld [vmem:[#allocation8 + $0x848] sm:$0xff] }
 0x176   : > { %2139 = vmatpush2.bf16.msra.mxu0 %v4842_v21  ;;  %2180 = vmatpush2.bf16.msra.mxu1 %v4844_v22  ;;  %v4912_v21 = vcombine.low %v2259_v10, %v2263_v11  ;;  %v4903_v22 = vcombine.high %v2250_v15, %v2254_v17  ;;  %v2215_v10 = vld [vmem:[#allocation8 + $0x868] sm:$0xff] }
 0x177   : > { %2140 = vmatprep.subr.bf16.mxu0 %v4835_v23  ;;  %2181 = vmatprep.subr.bf16.mxu1 %v4837_v24  ;;  %v4905_v23 = vcombine.high %v2251_v18, %v2255_v19  ;;  %v2242_v24 = vld [vmem:[#allocation8 + $0x940] sm:$0xff]  ;;  %v2207_v18 = vld [vmem:[#allocation8 + $0x828] sm:$0xff] }
 0x178   : > { %v4895_v34 = vcombine.high %v2242_v24, %v2246_v25  ;;  %v4894_v42 = vcombine.low %v2242_v24, %v2246_v25  ;;  %v2326_v24 = vld [vmem:[#allocation8 + $0xbe0] sm:$0xff]  ;;  %v2323_v25 = vld [vmem:[#allocation8 + $0xbc8] sm:$0xff] }
 0x17a   : > { %2141 = vmatpush2.bf16.msra.mxu0 %v4834_v30  ;;  %2182 = vmatpush2.bf16.msra.mxu1 %v4836_v31  ;;  %v2247_v30 = vld [vmem:[#allocation8 + $0x968] sm:$0xff] }
 0x17b   : > { %2142 = vmatprep.subr.bf16.mxu0 %v4827_v32  ;;  %2183 = vmatprep.subr.bf16.mxu1 %v4829_v33  ;;  %v4902_v32 = vcombine.low %v2250_v15, %v2254_v17  ;;  %v4897_v36 = vcombine.high %v2243_v29, %v2247_v30  ;;  %v4896_v44 = vcombine.low %v2243_v29, %v2247_v30  ;;  %v2206_v15 = vld [vmem:[#allocation8 + $0x820] sm:$0xff]  ;;  %v2203_v17 = vld [vmem:[#allocation8 + $0x808] sm:$0xff] }
 0x17c   : > { %v2327_v29 = vld [vmem:[#allocation8 + $0xbe8] sm:$0xff] }
 0x17e   : > { %2143 = vmatpush2.bf16.msra.mxu0 %v4826_v37  ;;  %2184 = vmatpush2.bf16.msra.mxu1 %v4828_v38  ;;  %v2234_v37 = vld [vmem:[#allocation8 + $0x900] sm:$0xff] }
 0x17f   : > { %2144 = vmatprep.subr.bf16.mxu0 %v4819_v39  ;;  %2185 = vmatprep.subr.bf16.mxu1 %v4821_v40  ;;  %v2238_v38 = vld [vmem:[#allocation8 + $0x920] sm:$0xff]  ;;  %v2235_v40 = vld [vmem:[#allocation8 + $0x908] sm:$0xff] }
 0x180   : > { %v4886_v54 = vcombine.low %v2234_v37, %v2238_v38 }
 0x182   : > { %2145 = vmatpush2.bf16.msra.mxu0 %v4818_v45  ;;  %2186 = vmatpush2.bf16.msra.mxu1 %v4820_v46  ;;  %v4887_v45 = vcombine.high %v2234_v37, %v2238_v38  ;;  %v2318_v37 = vld [vmem:[#allocation8 + $0xba0] sm:$0xff]  ;;  %v2315_v38 = vld [vmem:[#allocation8 + $0xb88] sm:$0xff] }
 0x183   : > { %2146 = vmatprep.subr.bf16.mxu0 %v4811_v47  ;;  %2187 = vmatprep.subr.bf16.mxu1 %v4813_v48  ;;  %v4889_v47 = vcombine.high %v2235_v40, %v2239_v41  ;;  %v2226_v48 = vld [vmem:[#allocation8 + $0x8c0] sm:$0xff] }
 0x184   : > { %v4878_v2 = vcombine.low %v2226_v48, %v2230_v49 }
 0x186   : > { %2147 = vmatpush2.bf16.msra.mxu0 %v4810_v56  ;;  %2188 = vmatpush2.bf16.msra.mxu1 %v4812_v57  ;;  %v4888_v56 = vcombine.low %v2235_v40, %v2239_v41  ;;  %v4879_v57 = vcombine.high %v2226_v48, %v2230_v49  ;;  %v4976_v41 = vcombine.low %v2323_v25, %v2327_v29 }
 0x187   : > { %2148 = vmatprep.subr.bf16.mxu0 %v4803_v59  ;;  %2189 = vmatprep.subr.bf16.mxu1 %v4805_v9  ;;  %v4881_v59 = vcombine.high %v2227_v51, %v2231_v52  ;;  %v2218_v9 = vld [vmem:[#allocation8 + $0x880] sm:$0xff] }
 0x188   : > { %v4870_v11 = vcombine.low %v2218_v9, %v2222_v60 }
 0x18a   : > { %2149 = vmatpush2.bf16.msra.mxu0 %v4802_v3  ;;  %2190 = vmatpush2.bf16.msra.mxu1 %v4804_v4  ;;  %v4880_v3 = vcombine.low %v2227_v51, %v2231_v52  ;;  %v4871_v4 = vcombine.high %v2218_v9, %v2222_v60  ;;  %v2298_v52 = vld [vmem:[#allocation8 + $0xb00] sm:$0xff] }
 0x18b   : > { %2150 = vmatprep.subr.bf16.mxu0 %v4795_v26  ;;  %2191 = vmatprep.subr.bf16.mxu1 %v4797_v5  ;;  %v4873_v26 = vcombine.high %v2219_v0, %v2223_v1  ;;  %v2210_v5 = vld [vmem:[#allocation8 + $0x840] sm:$0xff] }
 0x18c   : > { %v4862_v19 = vcombine.low %v2210_v5, %v2214_v6 }
 0x18e   : > { %2151 = vmatpush2.bf16.msra.mxu0 %v4794_v12  ;;  %2192 = vmatpush2.bf16.msra.mxu1 %v4796_v13  ;;  %v4872_v12 = vcombine.low %v2219_v0, %v2223_v1  ;;  %v4863_v13 = vcombine.high %v2210_v5, %v2214_v6  ;;  %v2290_v1 = vld [vmem:[#allocation8 + $0xac0] sm:$0xff] }
 0x18f   : > { %2976 = vmatprep.subr.bf16.mxu0 %v4911_v50  ;;  %3017 = vmatprep.subr.bf16.mxu1 %v4913_v14  ;;  %v4865_v50 = vcombine.high %v2211_v7, %v2215_v10  ;;  %v2202_v14 = vld [vmem:[#allocation8 + $0x800] sm:$0xff] }
 0x190   : > { %v4854_v30 = vcombine.low %v2202_v14, %v2206_v15 }
 0x191   : > { %v5851_v28 = vpop.f32.mrf.mxu0  ;;  %2153 = vmatmul.mubr.bf16.vlgmr.msra.gmra.mxu0 %v5842_v53  ;;  %v5854_v31 = vpop.f32.mrf.mxu1  ;;  %2194 = vmatmul.mubr.bf16.vlgmr.msra.gmra.mxu1 %v5842_v53 }
 0x192   : > { %2977 = vmatpush1.bf16.msra.mxu0 %v4910_v20  ;;  %3018 = vmatpush1.bf16.msra.mxu1 %v4912_v21  ;;  %v4864_v20 = vcombine.low %v2211_v7, %v2215_v10  ;;  %v4855_v21 = vcombine.high %v2202_v14, %v2206_v15  ;;  %v2282_v10 = vld [vmem:[#allocation8 + $0xa80] sm:$0xff] }
 0x193   : > { %v5857_v33 = vpop.f32.mrf.mxu0  ;;  %2978 = vmatprep.subr.bf16.mxu0 %v4903_v22  ;;  %v5859_v35 = vpop.f32.mrf.mxu1  ;;  %3019 = vmatprep.subr.bf16.mxu1 %v4905_v23  ;;  %v4857_v22 = vcombine.high %v2203_v17, %v2207_v18  ;;  %v2322_v23 = vld [vmem:[#allocation8 + $0xbc0] sm:$0xff] }
 0x194   : > { %3008 = vmatprep.mubr.bf16.mxu0 %v5849_v27  ;;  %3049 = vmatprep.mubr.bf16.mxu1 %v5849_v27  ;;  %v4974_v40 = vcombine.low %v2322_v23, %v2326_v24 }
 0x195   : > { %v1272_v39 = vpop.f32.mrf.mxu0  ;;  %v1313_v53 = vpop.f32.mrf.mxu1 }
 0x196   : > { %2979 = vmatpush1.bf16.msra.mxu0 %v4902_v32  ;;  %3020 = vmatpush1.bf16.msra.mxu1 %v4904_v55  ;;  %v4856_v32 = vcombine.low %v2203_v17, %v2207_v18  ;;  %v4975_v55 = vcombine.high %v2322_v23, %v2326_v24  ;;  %v2319_v39 = vld [vmem:[#allocation8 + $0xba8] sm:$0xff]  ;;  %v2274_v18 = vld [vmem:[#allocation8 + $0xa40] sm:$0xff] }
 0x197   : > { %v1273_v43 = vpop.f32.mrf.mxu0  ;;  %2980 = vmatprep.subr.bf16.mxu0 %v4895_v34  ;;  %v1314_v46 = vpop.f32.mrf.mxu1  ;;  %3021 = vmatprep.subr.bf16.mxu1 %v4897_v36  ;;  %v4977_v34 = vcombine.high %v2323_v25, %v2327_v29  ;;  %v2314_v36 = vld [vmem:[#allocation8 + $0xb80] sm:$0xff]  ;;  %v4968_v48 = vcombine.low %v2315_v38, %v2319_v39 }
 0x198   : > { %v4967_v53 = vcombine.high %v2314_v36, %v2318_v37  ;;  %v2306_v43 = vld [vmem:[#allocation8 + $0xb40] sm:$0xff]  ;;  %v2311_v46 = vld [vmem:[#allocation8 + $0xb68] sm:$0xff] }
 0x199   : > { %v2266_v29 = vld [vmem:[#allocation8 + $0xa00] sm:$0xff] }
 0x19a   : > { %2981 = vmatpush1.bf16.msra.mxu0 %v4894_v42  ;;  %3022 = vmatpush1.bf16.msra.mxu1 %v4896_v44  ;;  %v4969_v42 = vcombine.high %v2315_v38, %v2319_v39  ;;  %v2310_v44 = vld [vmem:[#allocation8 + $0xb60] sm:$0xff]  ;;  %v2260_v39 = vld [vmem:[#allocation8 + $0x9d0] sm:$0xff] }
 0x19b   : > { %2982 = vmatprep.subr.bf16.mxu0 %v4887_v45  ;;  %3023 = vmatprep.subr.bf16.mxu1 %v4889_v47  ;;  %v2307_v45 = vld [vmem:[#allocation8 + $0xb48] sm:$0xff]  ;;  %v4966_v47 = vcombine.low %v2314_v36, %v2318_v37  ;;  %v4959_v49 = vcombine.high %v2306_v43, %v2310_v44 }
 0x19c   : > { %v4961_v51 = vcombine.high %v2307_v45, %v2311_v46  ;;  %v4960_v9 = vcombine.low %v2307_v45, %v2311_v46  ;;  %v2252_v46 = vld [vmem:[#allocation8 + $0x990] sm:$0xff] }
 0x19e   : > { %2983 = vmatpush1.bf16.msra.mxu0 %v4886_v54  ;;  %3024 = vmatpush1.bf16.msra.mxu1 %v4888_v56  ;;  %v2302_v54 = vld [vmem:[#allocation8 + $0xb20] sm:$0xff]  ;;  %v2299_v56 = vld [vmem:[#allocation8 + $0xb08] sm:$0xff] }
 0x19f   : > { %2984 = vmatprep.subr.bf16.mxu0 %v4879_v57  ;;  %3025 = vmatprep.subr.bf16.mxu1 %v4881_v59  ;;  %v2303_v57 = vld [vmem:[#allocation8 + $0xb28] sm:$0xff]  ;;  %v4958_v59 = vcombine.low %v2306_v43, %v2310_v44  ;;  %v4951_v60 = vcombine.high %v2298_v52, %v2302_v54 }
 0x1a0   : > { %v4953_v0 = vcombine.high %v2299_v56, %v2303_v57  ;;  %v4952_v5 = vcombine.low %v2299_v56, %v2303_v57 }
 0x1a2   : > { %2985 = vmatpush1.bf16.msra.mxu0 %v4878_v2  ;;  %3026 = vmatpush1.bf16.msra.mxu1 %v4880_v3  ;;  %v2294_v2 = vld [vmem:[#allocation8 + $0xae0] sm:$0xff]  ;;  %v2291_v3 = vld [vmem:[#allocation8 + $0xac8] sm:$0xff] }
 0x1a3   : > { %2986 = vmatprep.subr.bf16.mxu0 %v4871_v4  ;;  %3027 = vmatprep.subr.bf16.mxu1 %v4873_v26  ;;  %v2295_v4 = vld [vmem:[#allocation8 + $0xae8] sm:$0xff]  ;;  %v4950_v26 = vcombine.low %v2298_v52, %v2302_v54  ;;  %v4943_v6 = vcombine.high %v2290_v1, %v2294_v2 }
 0x1a4   : > { %v4945_v7 = vcombine.high %v2291_v3, %v2295_v4  ;;  %v4944_v14 = vcombine.low %v2291_v3, %v2295_v4 }
 0x1a6   : > { %2987 = vmatpush1.bf16.msra.mxu0 %v4870_v11  ;;  %3028 = vmatpush1.bf16.msra.mxu1 %v4872_v12  ;;  %v2286_v11 = vld [vmem:[#allocation8 + $0xaa0] sm:$0xff]  ;;  %v2283_v12 = vld [vmem:[#allocation8 + $0xa88] sm:$0xff] }
 0x1a7   : > { %2988 = vmatprep.subr.bf16.mxu0 %v4863_v13  ;;  %3029 = vmatprep.subr.bf16.mxu1 %v4865_v50  ;;  %v2287_v13 = vld [vmem:[#allocation8 + $0xaa8] sm:$0xff]  ;;  %v4942_v50 = vcombine.low %v2290_v1, %v2294_v2  ;;  %v4935_v15 = vcombine.high %v2282_v10, %v2286_v11  ;;  %v2249_v1 = vld [vmem:[#allocation8 + $0x978] sm:$0xff] }
 0x1a8   : > { %v4937_v17 = vcombine.high %v2283_v12, %v2287_v13  ;;  %v4936_v23 = vcombine.low %v2283_v12, %v2287_v13  ;;  %v2237_v13 = vld [vmem:[#allocation8 + $0x918] sm:$0xff] }
 0x1aa   : > { %2989 = vmatpush1.bf16.msra.mxu0 %v4862_v19  ;;  %3030 = vmatpush1.bf16.msra.mxu1 %v4864_v20  ;;  %v2278_v19 = vld [vmem:[#allocation8 + $0xa60] sm:$0xff]  ;;  %v2275_v20 = vld [vmem:[#allocation8 + $0xa48] sm:$0xff] }
 0x1ab   : > { %2990 = vmatprep.subr.bf16.mxu0 %v4855_v21  ;;  %3031 = vmatprep.subr.bf16.mxu1 %v4857_v22  ;;  %v2279_v21 = vld [vmem:[#allocation8 + $0xa68] sm:$0xff]  ;;  %v4934_v22 = vcombine.low %v2282_v10, %v2286_v11  ;;  %v4927_v24 = vcombine.high %v2274_v18, %v2278_v19  ;;  %v2236_v10 = vld [vmem:[#allocation8 + $0x910] sm:$0xff] }
 0x1ac   : > { %v4929_v25 = vcombine.high %v2275_v20, %v2279_v21  ;;  %v4928_v36 = vcombine.low %v2275_v20, %v2279_v21  ;;  %v2240_v11 = vld [vmem:[#allocation8 + $0x930] sm:$0xff] }
 0x1ae   : > { %2991 = vmatpush1.bf16.msra.mxu0 %v4854_v30  ;;  %3032 = vmatpush1.bf16.msra.mxu1 %v4856_v32  ;;  %v2270_v30 = vld [vmem:[#allocation8 + $0xa20] sm:$0xff]  ;;  %v2267_v32 = vld [vmem:[#allocation8 + $0xa08] sm:$0xff] }
 0x1af   : > { %2992 = vmatprep.subr.bf16.mxu0 %v4975_v55  ;;  %3033 = vmatprep.subr.bf16.mxu1 %v4977_v34  ;;  %v2271_v55 = vld [vmem:[#allocation8 + $0xa28] sm:$0xff]  ;;  %v4926_v34 = vcombine.low %v2274_v18, %v2278_v19  ;;  %v4919_v37 = vcombine.high %v2266_v29, %v2270_v30  ;;  %v4891_v19 = vcombine.high %v2236_v10, %v2240_v11 }
 0x1b0   : > { %v4921_v38 = vcombine.high %v2267_v32, %v2271_v55  ;;  %v4920_v43 = vcombine.low %v2267_v32, %v2271_v55  ;;  %v2220_v55 = vld [vmem:[#allocation8 + $0x890] sm:$0xff] }
 0x1b2   : > { %2993 = vmatpush2.bf16.msra.mxu0 %v4974_v40  ;;  %3034 = vmatpush2.bf16.msra.mxu1 %v4976_v41  ;;  %v2264_v40 = vld [vmem:[#allocation8 + $0x9f0] sm:$0xff]  ;;  %v2261_v41 = vld [vmem:[#allocation8 + $0x9d8] sm:$0xff] }
 0x1b3   : > { %2994 = vmatprep.subr.bf16.mxu0 %v4967_v53  ;;  %3035 = vmatprep.subr.bf16.mxu1 %v4969_v42  ;;  %v2265_v53 = vld [vmem:[#allocation8 + $0x9f8] sm:$0xff]  ;;  %v4918_v42 = vcombine.low %v2266_v29, %v2270_v30  ;;  %v4915_v44 = vcombine.high %v2260_v39, %v2264_v40  ;;  %v4914_v52 = vcombine.low %v2260_v39, %v2264_v40 }
 0x1b4   : > { %v4917_v45 = vcombine.high %v2261_v41, %v2265_v53  ;;  %v4916_v54 = vcombine.low %v2261_v41, %v2265_v53  ;;  %v4890_v29 = vcombine.low %v2236_v10, %v2240_v11  ;;  %v2212_v53 = vld [vmem:[#allocation8 + $0x850] sm:$0xff] }
 0x1b6   : > { %2995 = vmatpush2.bf16.msra.mxu0 %v4966_v47  ;;  %3036 = vmatpush2.bf16.msra.mxu1 %v4968_v48  ;;  %v2256_v47 = vld [vmem:[#allocation8 + $0x9b0] sm:$0xff]  ;;  %v5864_v48 = vrot.slane %v5818_v61, 1 }
 0x1b7   : > { %2996 = vmatprep.subr.bf16.mxu0 %v4959_v49  ;;  %3037 = vmatprep.subr.bf16.mxu1 %v4961_v51  ;;  %v2253_v49 = vld [vmem:[#allocation8 + $0x998] sm:$0xff]  ;;  %v4907_v56 = vcombine.high %v2252_v46, %v2256_v47  ;;  %v4906_v3 = vcombine.low %v2252_v46, %v2256_v47 }
 0x1b8   : > { %v2257_v51 = vld [vmem:[#allocation8 + $0x9b8] sm:$0xff] }
 0x1b9   : > { %v4909_v57 = vcombine.high %v2253_v49, %v2257_v51 }
 0x1ba   : > { %2997 = vmatpush2.bf16.msra.mxu0 %v4958_v59  ;;  %3038 = vmatpush2.bf16.msra.mxu1 %v4960_v9  ;;  %v2244_v59 = vld [vmem:[#allocation8 + $0x950] sm:$0xff] }
 0x1bb   : > { %2998 = vmatprep.subr.bf16.mxu0 %v4951_v60  ;;  %3039 = vmatprep.subr.bf16.mxu1 %v4953_v0  ;;  %v2248_v9 = vld [vmem:[#allocation8 + $0x970] sm:$0xff]  ;;  %v2245_v0 = vld [vmem:[#allocation8 + $0x958] sm:$0xff] }
 0x1bc   : > { %v4900_v18 = vcombine.low %v2245_v0, %v2249_v1 }
 0x1be   : > { %2999 = vmatpush2.bf16.msra.mxu0 %v4950_v26  ;;  %3040 = vmatpush2.bf16.msra.mxu1 %v4952_v5  ;;  %v4908_v26 = vcombine.low %v2253_v49, %v2257_v51  ;;  %v4899_v5 = vcombine.high %v2244_v59, %v2248_v9  ;;  %v2204_v51 = vld [vmem:[#allocation8 + $0x810] sm:$0xff] }
 0x1bf   : > { %3000 = vmatprep.subr.bf16.mxu0 %v4943_v6  ;;  %3041 = vmatprep.subr.bf16.mxu1 %v4945_v7  ;;  %v4901_v7 = vcombine.high %v2245_v0, %v2249_v1  ;;  %v2324_v1 = vld [vmem:[#allocation8 + $0xbd0] sm:$0xff] }
 0x1c2   : > { %3001 = vmatpush2.bf16.msra.mxu0 %v4942_v50  ;;  %3042 = vmatpush2.bf16.msra.mxu1 %v4944_v14  ;;  %v2241_v50 = vld [vmem:[#allocation8 + $0x938] sm:$0xff] }
 0x1c3   : > { %3002 = vmatprep.subr.bf16.mxu0 %v4935_v15  ;;  %3043 = vmatprep.subr.bf16.mxu1 %v4937_v17  ;;  %v4898_v15 = vcombine.low %v2244_v59, %v2248_v9  ;;  %v4893_v21 = vcombine.high %v2237_v13, %v2241_v50 }
 0x1c6   : > { %3003 = vmatpush2.bf16.msra.mxu0 %v4934_v22  ;;  %3044 = vmatpush2.bf16.msra.mxu1 %v4936_v23  ;;  %v2228_v22 = vld [vmem:[#allocation8 + $0x8d0] sm:$0xff] }
 0x1c7   : > { %3004 = vmatprep.subr.bf16.mxu0 %v4927_v24  ;;  %3045 = vmatprep.subr.bf16.mxu1 %v4929_v25  ;;  %v2232_v23 = vld [vmem:[#allocation8 + $0x8f0] sm:$0xff]  ;;  %v2229_v24 = vld [vmem:[#allocation8 + $0x8d8] sm:$0xff] }
 0x1c8   : > { %v2233_v25 = vld [vmem:[#allocation8 + $0x8f8] sm:$0xff]  ;;  %v4883_v30 = vcombine.high %v2228_v22, %v2232_v23 }
 0x1c9   : > { %v4885_v32 = vcombine.high %v2229_v24, %v2233_v25  ;;  %v4884_v39 = vcombine.low %v2229_v24, %v2233_v25  ;;  %v2313_v24 = vld [vmem:[#allocation8 + $0xb78] sm:$0xff] }
 0x1ca   : > { %3005 = vmatpush2.bf16.msra.mxu0 %v4926_v34  ;;  %3046 = vmatpush2.bf16.msra.mxu1 %v4928_v36  ;;  %v2224_v34 = vld [vmem:[#allocation8 + $0x8b0] sm:$0xff]  ;;  %v2221_v36 = vld [vmem:[#allocation8 + $0x898] sm:$0xff] }
 0x1cb   : > { %3006 = vmatprep.subr.bf16.mxu0 %v4919_v37  ;;  %3047 = vmatprep.subr.bf16.mxu1 %v4921_v38  ;;  %v2225_v37 = vld [vmem:[#allocation8 + $0x8b8] sm:$0xff]  ;;  %v4882_v38 = vcombine.low %v2228_v22, %v2232_v23  ;;  %v4875_v40 = vcombine.high %v2220_v55, %v2224_v34  ;;  %v2312_v22 = vld [vmem:[#allocation8 + $0xb70] sm:$0xff] }
 0x1cc   : > { %v4877_v41 = vcombine.high %v2221_v36, %v2225_v37  ;;  %v4876_v46 = vcombine.low %v2221_v36, %v2225_v37  ;;  %v2309_v23 = vld [vmem:[#allocation8 + $0xb58] sm:$0xff] }
 0x1cd   : > { %v2305_v36 = vld [vmem:[#allocation8 + $0xb38] sm:$0xff] }
 0x1ce   : > { %3007 = vmatpush2.bf16.msra.mxu0 %v4918_v42  ;;  %3048 = vmatpush2.bf16.msra.mxu1 %v4920_v43  ;;  %v2216_v42 = vld [vmem:[#allocation8 + $0x870] sm:$0xff]  ;;  %v2213_v43 = vld [vmem:[#allocation8 + $0x858] sm:$0xff] }
 0x1cf   : > { %3058 = vmatprep.subr.bf16.mxu0 %v4915_v44  ;;  %3099 = vmatprep.subr.bf16.mxu1 %v4917_v45  ;;  %v2217_v44 = vld [vmem:[#allocation8 + $0x878] sm:$0xff]  ;;  %v4874_v45 = vcombine.low %v2220_v55, %v2224_v34  ;;  %v4867_v47 = vcombine.high %v2212_v53, %v2216_v42  ;;  %v2304_v55 = vld [vmem:[#allocation8 + $0xb30] sm:$0xff] }
 0x1d0   : > { %v4869_v49 = vcombine.high %v2213_v43, %v2217_v44  ;;  %v4868_v59 = vcombine.low %v2213_v43, %v2217_v44  ;;  %v2301_v34 = vld [vmem:[#allocation8 + $0xb18] sm:$0xff] }
 0x1d1   : > { %v5866_v60 = vpop.f32.mrf.mxu0  ;;  %3009 = vmatmul.mubr.bf16.vlgmr.msra.gmra.mxu0 %v5864_v48  ;;  %v5869_v2 = vpop.f32.mrf.mxu1  ;;  %3050 = vmatmul.mubr.bf16.vlgmr.msra.gmra.mxu1 %v5864_v48  ;;  %v2297_v43 = vld [vmem:[#allocation8 + $0xaf8] sm:$0xff] }
 0x1d2   : > { %3059 = vmatpush1.bf16.msra.mxu0 %v4914_v52  ;;  %3100 = vmatpush1.bf16.msra.mxu1 %v4916_v54  ;;  %v2208_v52 = vld [vmem:[#allocation8 + $0x830] sm:$0xff]  ;;  %v2205_v54 = vld [vmem:[#allocation8 + $0x818] sm:$0xff] }
 0x1d3   : > { %v5872_v4 = vpop.f32.mrf.mxu0  ;;  %3060 = vmatprep.subr.bf16.mxu0 %v4907_v56  ;;  %v5874_v6 = vpop.f32.mrf.mxu1  ;;  %3101 = vmatprep.subr.bf16.mxu1 %v4909_v57  ;;  %v2209_v56 = vld [vmem:[#allocation8 + $0x838] sm:$0xff]  ;;  %v4866_v57 = vcombine.low %v2212_v53, %v2216_v42  ;;  %v4859_v9 = vcombine.high %v2204_v51, %v2208_v52  ;;  %v2296_v53 = vld [vmem:[#allocation8 + $0xaf0] sm:$0xff] }
 0x1d4   : > { %3090 = vmatprep.mubr.bf16.mxu0 %v5849_v27  ;;  %3131 = vmatprep.mubr.bf16.mxu1 %v5849_v27  ;;  %v4892_v27 = vcombine.low %v2237_v13, %v2241_v50  ;;  %v4861_v0 = vcombine.high %v2205_v54, %v2209_v56  ;;  %v4860_v10 = vcombine.low %v2205_v54, %v2209_v56  ;;  %v2316_v13 = vld [vmem:[#allocation8 + $0xb90] sm:$0xff]  ;;  %v2293_v42 = vld [vmem:[#allocation8 + $0xad8] sm:$0xff] }
 0x1d5   : > { %v1354_v12 = vpop.f32.mrf.mxu0  ;;  %v1395_v14 = vpop.f32.mrf.mxu1  ;;  %v2320_v50 = vld [vmem:[#allocation8 + $0xbb0] sm:$0xff]  ;;  %v2289_v54 = vld [vmem:[#allocation8 + $0xab8] sm:$0xff] }
 0x1d6   : > { %3061 = vmatpush1.bf16.msra.mxu0 %v4906_v3  ;;  %3102 = vmatpush1.bf16.msra.mxu1 %v4908_v26  ;;  %v2328_v3 = vld [vmem:[#allocation8 + $0xbf0] sm:$0xff]  ;;  %v2325_v26 = vld [vmem:[#allocation8 + $0xbd8] sm:$0xff]  ;;  %v4970_v25 = vcombine.low %v2316_v13, %v2320_v50 }
 0x1d7   : > { %v1355_v17 = vpop.f32.mrf.mxu0  ;;  %3062 = vmatprep.subr.bf16.mxu0 %v4899_v5  ;;  %v1396_v20 = vpop.f32.mrf.mxu1  ;;  %3103 = vmatprep.subr.bf16.mxu1 %v4901_v7  ;;  %v2329_v5 = vld [vmem:[#allocation8 + $0xbf8] sm:$0xff]  ;;  %v4858_v7 = vcombine.low %v2204_v51, %v2208_v52  ;;  %v4979_v11 = vcombine.high %v2324_v1, %v2328_v3  ;;  %v2288_v51 = vld [vmem:[#allocation8 + $0xab0] sm:$0xff] }
 0x1d8   : > { %v4981_v12 = vcombine.high %v2325_v26, %v2329_v5  ;;  %v2317_v14 = vld [vmem:[#allocation8 + $0xb98] sm:$0xff]  ;;  %v4978_v17 = vcombine.low %v2324_v1, %v2328_v3  ;;  %v2280_v1 = vld [vmem:[#allocation8 + $0xa70] sm:$0xff] }
 0x1d9   : > { %v2285_v52 = vld [vmem:[#allocation8 + $0xa98] sm:$0xff] }
 0x1da   : > { %3063 = vmatpush1.bf16.msra.mxu0 %v4898_v15  ;;  %3104 = vmatpush1.bf16.msra.mxu1 %v4900_v18  ;;  %v2321_v15 = vld [vmem:[#allocation8 + $0xbb8] sm:$0xff]  ;;  %v4980_v18 = vcombine.low %v2325_v26, %v2329_v5 }
 0x1db   : > { %3064 = vmatprep.subr.bf16.mxu0 %v4891_v19  ;;  %3105 = vmatprep.subr.bf16.mxu1 %v4893_v21  ;;  %v4971_v19 = vcombine.high %v2316_v13, %v2320_v50  ;;  %v4973_v20 = vcombine.high %v2317_v14, %v2321_v15  ;;  %v2308_v21 = vld [vmem:[#allocation8 + $0xb50] sm:$0xff]  ;;  %v2277_v3 = vld [vmem:[#allocation8 + $0xa58] sm:$0xff] }
 0x1dc   : > { %v4962_v37 = vcombine.low %v2308_v21, %v2312_v22  ;;  %v2281_v26 = vld [vmem:[#allocation8 + $0xa78] sm:$0xff]  ;;  %v2272_v13 = vld [vmem:[#allocation8 + $0xa30] sm:$0xff] }
 0x1dd   : > { %v2269_v50 = vld [vmem:[#allocation8 + $0xa18] sm:$0xff] }
 0x1de   : > { %3065 = vmatpush1.bf16.msra.mxu0 %v4890_v29  ;;  %3106 = vmatpush1.bf16.msra.mxu1 %v4892_v27  ;;  %v4972_v29 = vcombine.low %v2317_v14, %v2321_v15  ;;  %v4963_v27 = vcombine.high %v2308_v21, %v2312_v22  ;;  %v2273_v14 = vld [vmem:[#allocation8 + $0xa38] sm:$0xff]  ;;  %v3208_v21 = vld [vmem:[#allocation8 + $0xde0] sm:$0xff]  ;;  %v3205_v22 = vld [vmem:[#allocation8 + $0xdc8] sm:$0xff] }
 0x1df   : > { %3066 = vmatprep.subr.bf16.mxu0 %v4883_v30  ;;  %3107 = vmatprep.subr.bf16.mxu1 %v4885_v32  ;;  %v4965_v30 = vcombine.high %v2309_v23, %v2313_v24  ;;  %v2300_v32 = vld [vmem:[#allocation8 + $0xb10] sm:$0xff] }
 0x1e0   : > { %v4954_v44 = vcombine.low %v2300_v32, %v2304_v55 }
 0x1e2   : > { %3067 = vmatpush1.bf16.msra.mxu0 %v4882_v38  ;;  %3108 = vmatpush1.bf16.msra.mxu1 %v4884_v39  ;;  %v4964_v38 = vcombine.low %v2309_v23, %v2313_v24  ;;  %v4955_v39 = vcombine.high %v2300_v32, %v2304_v55  ;;  %v3209_v23 = vld [vmem:[#allocation8 + $0xde8] sm:$0xff]  ;;  %v3200_v32 = vld [vmem:[#allocation8 + $0xda0] sm:$0xff]  ;;  %v3279_v55 = vrot.slane %v586_v62, 1 }
 0x1e3   : > { %3068 = vmatprep.subr.bf16.mxu0 %v4875_v40  ;;  %3109 = vmatprep.subr.bf16.mxu1 %v4877_v41  ;;  %v4957_v40 = vcombine.high %v2301_v34, %v2305_v36  ;;  %v2292_v41 = vld [vmem:[#allocation8 + $0xad0] sm:$0xff]  ;;  %v3193_v62 = vld [vmem:[#allocation8 + $0xd68] sm:$0xff] }
 0x1e4   : > { %v4946_v56 = vcombine.low %v2292_v41, %v2296_v53 }
 0x1e6   : > { %3069 = vmatpush1.bf16.msra.mxu0 %v4874_v45  ;;  %3110 = vmatpush1.bf16.msra.mxu1 %v4876_v46  ;;  %v4956_v45 = vcombine.low %v2301_v34, %v2305_v36  ;;  %v4947_v46 = vcombine.high %v2292_v41, %v2296_v53  ;;  %v3280_v34 = vrot.slane %v588_v63, 2  ;;  %v3197_v36 = vld [vmem:[#allocation8 + $0xd88] sm:$0xff]  ;;  %v3188_v53 = vld [vmem:[#allocation8 + $0xd40] sm:$0xff] }
 0x1e7   : > { %3070 = vmatprep.subr.bf16.mxu0 %v4867_v47  ;;  %3111 = vmatprep.subr.bf16.mxu1 %v4869_v49  ;;  %v4949_v47 = vcombine.high %v2293_v42, %v2297_v43  ;;  %v2284_v49 = vld [vmem:[#allocation8 + $0xa90] sm:$0xff] }
 0x1e8   : > { %v4938_v5 = vcombine.low %v2284_v49, %v2288_v51 }
 0x1ea   : > { %3071 = vmatpush1.bf16.msra.mxu0 %v4866_v57  ;;  %3112 = vmatpush1.bf16.msra.mxu1 %v4868_v59  ;;  %v4948_v57 = vcombine.low %v2293_v42, %v2297_v43  ;;  %v4939_v59 = vcombine.high %v2284_v49, %v2288_v51  ;;  %v3192_v42 = vld [vmem:[#allocation8 + $0xd60] sm:$0xff]  ;;  %v5882_v43 = vor.u32 %v3280_v34, %v3279_v55 }
 0x1eb   : > { %3072 = vmatprep.subr.bf16.mxu0 %v4859_v9  ;;  %3113 = vmatprep.subr.bf16.mxu1 %v4861_v0  ;;  %v4941_v9 = vcombine.high %v2285_v52, %v2289_v54  ;;  %v2276_v0 = vld [vmem:[#allocation8 + $0xa50] sm:$0xff]  ;;  %v5023_v49 = vcombine.high %v3188_v53, %v3192_v42 }
 0x1ec   : > { %v4930_v15 = vcombine.low %v2276_v0, %v2280_v1 }
 0x1ee   : > { %3073 = vmatpush1.bf16.msra.mxu0 %v4858_v7  ;;  %3114 = vmatpush1.bf16.msra.mxu1 %v4860_v10  ;;  %v4940_v7 = vcombine.low %v2285_v52, %v2289_v54  ;;  %v4931_v10 = vcombine.high %v2276_v0, %v2280_v1  ;;  %v5025_v52 = vcombine.high %v3189_v58, %v3193_v62  ;;  %v3180_v54 = vld [vmem:[#allocation8 + $0xd00] sm:$0xff] }
 0x1ef   : > { %3074 = vmatprep.subr.bf16.mxu0 %v4979_v11  ;;  %3115 = vmatprep.subr.bf16.mxu1 %v4981_v12  ;;  %v4933_v11 = vcombine.high %v2277_v3, %v2281_v26  ;;  %v2268_v12 = vld [vmem:[#allocation8 + $0xa10] sm:$0xff]  ;;  %v5022_v0 = vcombine.low %v3188_v53, %v3192_v42 }
 0x1f0   : > { %v4922_v24 = vcombine.low %v2268_v12, %v2272_v13 }
 0x1f2   : > { %3075 = vmatpush2.bf16.msra.mxu0 %v4978_v17  ;;  %3116 = vmatpush2.bf16.msra.mxu1 %v4980_v18  ;;  %v4932_v17 = vcombine.low %v2277_v3, %v2281_v26  ;;  %v4923_v18 = vcombine.high %v2268_v12, %v2272_v13  ;;  %v5024_v3 = vcombine.low %v3189_v58, %v3193_v62  ;;  %v3173_v12 = vld [vmem:[#allocation8 + $0xcc8] sm:$0xff] }
 0x1f3   : > { %3076 = vmatprep.subr.bf16.mxu0 %v4971_v19  ;;  %3117 = vmatprep.subr.bf16.mxu1 %v4973_v20  ;;  %v4925_v19 = vcombine.high %v2269_v50, %v2273_v14  ;;  %v3204_v20 = vld [vmem:[#allocation8 + $0xdc0] sm:$0xff]  ;;  %v3177_v13 = vld [vmem:[#allocation8 + $0xce8] sm:$0xff] }
 0x1f6   : > { %3077 = vmatpush2.bf16.msra.mxu0 %v4970_v25  ;;  %3118 = vmatpush2.bf16.msra.mxu1 %v4972_v29  ;;  %v4924_v25 = vcombine.low %v2269_v50, %v2273_v14  ;;  %v5039_v29 = vcombine.high %v3204_v20, %v3208_v21 }
 0x1f7   : > { %3078 = vmatprep.subr.bf16.mxu0 %v4963_v27  ;;  %3119 = vmatprep.subr.bf16.mxu1 %v4965_v30  ;;  %v5041_v27 = vcombine.high %v3205_v22, %v3209_v23  ;;  %v3196_v30 = vld [vmem:[#allocation8 + $0xd80] sm:$0xff] }
 0x1fa   : > { %3079 = vmatpush2.bf16.msra.mxu0 %v4962_v37  ;;  %3120 = vmatpush2.bf16.msra.mxu1 %v4964_v38  ;;  %v3201_v37 = vld [vmem:[#allocation8 + $0xda8] sm:$0xff]  ;;  %v5038_v38 = vcombine.low %v3204_v20, %v3208_v21 }
 0x1fb   : > { %3080 = vmatprep.subr.bf16.mxu0 %v4955_v39  ;;  %3121 = vmatprep.subr.bf16.mxu1 %v4957_v40  ;;  %v5040_v39 = vcombine.low %v3205_v22, %v3209_v23  ;;  %v5031_v40 = vcombine.high %v3196_v30, %v3200_v32  ;;  %v5033_v41 = vcombine.high %v3197_v36, %v3201_v37  ;;  %v3165_v20 = vld [vmem:[#allocation8 + $0xc88] sm:$0xff] }
 0x1fc   : > { %v3169_v21 = vld [vmem:[#allocation8 + $0xca8] sm:$0xff]  ;;  %v5008_v23 = vcombine.low %v3173_v12, %v3177_v13 }
 0x1fd   : > { %v5000_v34 = vcombine.low %v3165_v20, %v3169_v21 }
 0x1fe   : > { %3081 = vmatpush2.bf16.msra.mxu0 %v4954_v44  ;;  %3122 = vmatpush2.bf16.msra.mxu1 %v4956_v45  ;;  %v5030_v45 = vcombine.low %v3196_v30, %v3200_v32  ;;  %v3157_v30 = vld [vmem:[#allocation8 + $0xc48] sm:$0xff] }
 0x1ff   : > { %3082 = vmatprep.subr.bf16.mxu0 %v4947_v46  ;;  %3123 = vmatprep.subr.bf16.mxu1 %v4949_v47  ;;  %v5032_v47 = vcombine.low %v3197_v36, %v3201_v37  ;;  %v3161_v32 = vld [vmem:[#allocation8 + $0xc68] sm:$0xff] }
 0x200   : > { %v4993_v37 = vcombine.high %v3157_v30, %v3161_v32  ;;  %v4992_v42 = vcombine.low %v3157_v30, %v3161_v32  ;;  %v3237_v30 = vld [vmem:[#allocation8 + $0xec8] sm:$0xff] }
 0x201   : > { %v3241_v32 = vld [vmem:[#allocation8 + $0xee8] sm:$0xff] }
 0x202   : > { %3083 = vmatpush2.bf16.msra.mxu0 %v4946_v56  ;;  %3124 = vmatpush2.bf16.msra.mxu1 %v4948_v57  ;;  %v3184_v56 = vld [vmem:[#allocation8 + $0xd20] sm:$0xff] }
 0x203   : > { %3084 = vmatprep.subr.bf16.mxu0 %v4939_v59  ;;  %3125 = vmatprep.subr.bf16.mxu1 %v4941_v9  ;;  %v3181_v59 = vld [vmem:[#allocation8 + $0xd08] sm:$0xff]  ;;  %v5015_v26 = vcombine.high %v3180_v54, %v3184_v56  ;;  %v5014_v50 = vcombine.low %v3180_v54, %v3184_v56 }
 0x204   : > { %v3185_v9 = vld [vmem:[#allocation8 + $0xd28] sm:$0xff] }
 0x205   : > { %v5016_v14 = vcombine.low %v3181_v59, %v3185_v9 }
 0x206   : > { %3085 = vmatpush2.bf16.msra.mxu0 %v4938_v5  ;;  %3126 = vmatpush2.bf16.msra.mxu1 %v4940_v7  ;;  %v5017_v7 = vcombine.high %v3181_v59, %v3185_v9  ;;  %v3260_v9 = vld [vmem:[#allocation8 + $0xf80] sm:$0xff] }
 0x207   : > { %3086 = vmatprep.subr.bf16.mxu0 %v4931_v10  ;;  %3127 = vmatprep.subr.bf16.mxu1 %v4933_v11  ;;  %v3172_v10 = vld [vmem:[#allocation8 + $0xcc0] sm:$0xff] }
 0x208   : > { %v3176_v11 = vld [vmem:[#allocation8 + $0xce0] sm:$0xff] }
 0x209   : > { %v5006_v22 = vcombine.low %v3172_v10, %v3176_v11 }
 0x20a   : > { %3087 = vmatpush2.bf16.msra.mxu0 %v4930_v15  ;;  %3128 = vmatpush2.bf16.msra.mxu1 %v4932_v17  ;;  %v5007_v15 = vcombine.high %v3172_v10, %v3176_v11  ;;  %v5009_v17 = vcombine.high %v3173_v12, %v3177_v13  ;;  %v3252_v10 = vld [vmem:[#allocation8 + $0xf40] sm:$0xff]  ;;  %v3253_v12 = vld [vmem:[#allocation8 + $0xf48] sm:$0xff] }
 0x20b   : > { %3088 = vmatprep.subr.bf16.mxu0 %v4923_v18  ;;  %3129 = vmatprep.subr.bf16.mxu1 %v4925_v19  ;;  %v3164_v18 = vld [vmem:[#allocation8 + $0xc80] sm:$0xff]  ;;  %v3257_v13 = vld [vmem:[#allocation8 + $0xf68] sm:$0xff] }
 0x20c   : > { %v3168_v19 = vld [vmem:[#allocation8 + $0xca0] sm:$0xff] }
 0x20d   : > { %v4998_v55 = vcombine.low %v3164_v18, %v3168_v19  ;;  %v3256_v11 = vld [vmem:[#allocation8 + $0xf60] sm:$0xff] }
 0x20e   : > { %3089 = vmatpush2.bf16.msra.mxu0 %v4922_v24  ;;  %3130 = vmatpush2.bf16.msra.mxu1 %v4924_v25  ;;  %v4999_v24 = vcombine.high %v3164_v18, %v3168_v19  ;;  %v5001_v25 = vcombine.high %v3165_v20, %v3169_v21  ;;  %v3244_v18 = vld [vmem:[#allocation8 + $0xf00] sm:$0xff]  ;;  %v3245_v20 = vld [vmem:[#allocation8 + $0xf08] sm:$0xff] }
 0x20f   : > { %3924 = vmatprep.subr.bf16.mxu0 %v5039_v29  ;;  %3965 = vmatprep.subr.bf16.mxu1 %v5041_v27  ;;  %v3156_v29 = vld [vmem:[#allocation8 + $0xc40] sm:$0xff]  ;;  %v3249_v21 = vld [vmem:[#allocation8 + $0xf28] sm:$0xff] }
 0x210   : > { %v3160_v27 = vld [vmem:[#allocation8 + $0xc60] sm:$0xff] }
 0x211   : > { %v5884_v44 = vpop.f32.mrf.mxu0  ;;  %3091 = vmatmul.mubr.bf16.vlgmr.msra.gmra.mxu0 %v5864_v48  ;;  %v5887_v63 = vpop.f32.mrf.mxu1  ;;  %3132 = vmatmul.mubr.bf16.vlgmr.msra.gmra.mxu1 %v5864_v48  ;;  %v4991_v36 = vcombine.high %v3156_v29, %v3160_v27  ;;  %v4990_v53 = vcombine.low %v3156_v29, %v3160_v27  ;;  %v3248_v19 = vld [vmem:[#allocation8 + $0xf20] sm:$0xff] }
 0x212   : > { %3925 = vmatpush1.bf16.msra.mxu0 %v5038_v38  ;;  %3966 = vmatpush1.bf16.msra.mxu1 %v5040_v39  ;;  %v3148_v38 = vld [vmem:[#allocation8 + $0xc00] sm:$0xff] }
 0x213   : > { %v5890_v46 = vpop.f32.mrf.mxu0  ;;  %3926 = vmatprep.subr.bf16.mxu0 %v5031_v40  ;;  %v5892_v51 = vpop.f32.mrf.mxu1  ;;  %3967 = vmatprep.subr.bf16.mxu1 %v5033_v41  ;;  %v3152_v39 = vld [vmem:[#allocation8 + $0xc20] sm:$0xff]  ;;  %v3149_v40 = vld [vmem:[#allocation8 + $0xc08] sm:$0xff] }
 0x214   : > { %3956 = vmatprep.mubr.bf16.mxu0 %v5882_v43  ;;  %3997 = vmatprep.mubr.bf16.mxu1 %v5882_v43  ;;  %v3153_v41 = vld [vmem:[#allocation8 + $0xc28] sm:$0xff]  ;;  %v4983_v58 = vcombine.high %v3148_v38, %v3152_v39  ;;  %v4982_v54 = vcombine.low %v3148_v38, %v3152_v39  ;;  %v3236_v29 = vld [vmem:[#allocation8 + $0xec0] sm:$0xff] }
 0x215   : > { %v2076_v57 = vpop.f32.mrf.mxu0  ;;  %v2117_v48 = vpop.f32.mrf.mxu1  ;;  %v4985_v62 = vcombine.high %v3149_v40, %v3153_v41  ;;  %v4984_v56 = vcombine.low %v3149_v40, %v3153_v41  ;;  %v3240_v27 = vld [vmem:[#allocation8 + $0xee0] sm:$0xff]  ;;  %v3229_v40 = vld [vmem:[#allocation8 + $0xe88] sm:$0xff] }
 0x216   : > { %3927 = vmatpush1.bf16.msra.mxu0 %v5030_v45  ;;  %3968 = vmatpush1.bf16.msra.mxu1 %v5032_v47  ;;  %v3268_v45 = vld [vmem:[#allocation8 + $0xfc0] sm:$0xff]  ;;  %v3233_v41 = vld [vmem:[#allocation8 + $0xea8] sm:$0xff] }
 0x217   : > { %v2077_v1 = vpop.f32.mrf.mxu0  ;;  %3928 = vmatprep.subr.bf16.mxu0 %v5023_v49  ;;  %v2118_v5 = vpop.f32.mrf.mxu1  ;;  %3969 = vmatprep.subr.bf16.mxu1 %v5025_v52  ;;  %v3272_v47 = vld [vmem:[#allocation8 + $0xfe0] sm:$0xff]  ;;  %v3269_v49 = vld [vmem:[#allocation8 + $0xfc8] sm:$0xff] }
 0x218   : > { %v3273_v52 = vld [vmem:[#allocation8 + $0xfe8] sm:$0xff]  ;;  %v5103_v57 = vcombine.high %v3268_v45, %v3272_v47  ;;  %v3264_v48 = vld [vmem:[#allocation8 + $0xfa0] sm:$0xff] }
 0x219   : > { %v5105_v59 = vcombine.high %v3269_v49, %v3273_v52  ;;  %v3265_v1 = vld [vmem:[#allocation8 + $0xfa8] sm:$0xff]  ;;  %v5095_v5 = vcombine.high %v3260_v9, %v3264_v48  ;;  %v3228_v38 = vld [vmem:[#allocation8 + $0xe80] sm:$0xff] }
 0x21a   : > { %3929 = vmatpush1.bf16.msra.mxu0 %v5022_v0  ;;  %3970 = vmatpush1.bf16.msra.mxu1 %v5024_v3  ;;  %v3261_v0 = vld [vmem:[#allocation8 + $0xf88] sm:$0xff]  ;;  %v5102_v3 = vcombine.low %v3268_v45, %v3272_v47  ;;  %v3232_v39 = vld [vmem:[#allocation8 + $0xea0] sm:$0xff] }
 0x21b   : > { %3930 = vmatprep.subr.bf16.mxu0 %v5015_v26  ;;  %3971 = vmatprep.subr.bf16.mxu1 %v5017_v7  ;;  %v5104_v26 = vcombine.low %v3269_v49, %v3273_v52  ;;  %v5097_v7 = vcombine.high %v3261_v0, %v3265_v1  ;;  %v3220_v45 = vld [vmem:[#allocation8 + $0xe40] sm:$0xff]  ;;  %v3221_v49 = vld [vmem:[#allocation8 + $0xe48] sm:$0xff] }
 0x21c   : > { %v3224_v47 = vld [vmem:[#allocation8 + $0xe60] sm:$0xff]  ;;  %v3225_v52 = vld [vmem:[#allocation8 + $0xe68] sm:$0xff] }
 0x21e   : > { %3931 = vmatpush1.bf16.msra.mxu0 %v5014_v50  ;;  %3972 = vmatpush1.bf16.msra.mxu1 %v5016_v14  ;;  %v5094_v50 = vcombine.low %v3260_v9, %v3264_v48  ;;  %v5096_v14 = vcombine.low %v3261_v0, %v3265_v1  ;;  %v3212_v9 = vld [vmem:[#allocation8 + $0xe00] sm:$0xff]  ;;  %v3213_v0 = vld [vmem:[#allocation8 + $0xe08] sm:$0xff] }
 0x21f   : > { %3932 = vmatprep.subr.bf16.mxu0 %v5007_v15  ;;  %3973 = vmatprep.subr.bf16.mxu1 %v5009_v17  ;;  %v5087_v15 = vcombine.high %v3252_v10, %v3256_v11  ;;  %v5089_v17 = vcombine.high %v3253_v12, %v3257_v13  ;;  %v3216_v48 = vld [vmem:[#allocation8 + $0xe20] sm:$0xff]  ;;  %v3217_v1 = vld [vmem:[#allocation8 + $0xe28] sm:$0xff] }
 0x222   : > { %3933 = vmatpush1.bf16.msra.mxu0 %v5006_v22  ;;  %3974 = vmatpush1.bf16.msra.mxu1 %v5008_v23  ;;  %v5086_v22 = vcombine.low %v3252_v10, %v3256_v11  ;;  %v5088_v23 = vcombine.low %v3253_v12, %v3257_v13  ;;  %v3206_v10 = vld [vmem:[#allocation8 + $0xdd0] sm:$0xff]  ;;  %v3276_v12 = vrot.slane %v579_v16, 1  ;;  %v3277_v13 = vrot.slane %v581_v8, 2 }
 0x223   : > { %3934 = vmatprep.subr.bf16.mxu0 %v4999_v24  ;;  %3975 = vmatprep.subr.bf16.mxu1 %v5001_v25  ;;  %v5079_v24 = vcombine.high %v3244_v18, %v3248_v19  ;;  %v5081_v25 = vcombine.high %v3245_v20, %v3249_v21  ;;  %v3210_v11 = vld [vmem:[#allocation8 + $0xdf0] sm:$0xff] }
 0x224   : > { %v5042_v16 = vcombine.low %v3206_v10, %v3210_v11 }
 0x226   : > { %3935 = vmatpush1.bf16.msra.mxu0 %v4998_v55  ;;  %3976 = vmatpush1.bf16.msra.mxu1 %v5000_v34  ;;  %v5078_v55 = vcombine.low %v3244_v18, %v3248_v19  ;;  %v5080_v34 = vcombine.low %v3245_v20, %v3249_v21  ;;  %v5043_v18 = vcombine.high %v3206_v10, %v3210_v11  ;;  %v3198_v20 = vld [vmem:[#allocation8 + $0xd90] sm:$0xff]  ;;  %v3167_v11 = vld [vmem:[#allocation8 + $0xc98] sm:$0xff] }
 0x227   : > { %3936 = vmatprep.subr.bf16.mxu0 %v4991_v36  ;;  %3977 = vmatprep.subr.bf16.mxu1 %v4993_v37  ;;  %v5071_v36 = vcombine.high %v3236_v29, %v3240_v27  ;;  %v5073_v37 = vcombine.high %v3237_v30, %v3241_v32  ;;  %v3202_v21 = vld [vmem:[#allocation8 + $0xdb0] sm:$0xff] }
 0x228   : > { %v5035_v8 = vcombine.high %v3198_v20, %v3202_v21  ;;  %v3170_v10 = vld [vmem:[#allocation8 + $0xcb0] sm:$0xff] }
 0x22a   : > { %3937 = vmatpush1.bf16.msra.mxu0 %v4990_v53  ;;  %3978 = vmatpush1.bf16.msra.mxu1 %v4992_v42  ;;  %v5070_v53 = vcombine.low %v3236_v29, %v3240_v27  ;;  %v5072_v42 = vcombine.low %v3237_v30, %v3241_v32  ;;  %v3190_v29 = vld [vmem:[#allocation8 + $0xd50] sm:$0xff]  ;;  %v3191_v32 = vld [vmem:[#allocation8 + $0xd58] sm:$0xff] }
 0x22b   : > { %3938 = vmatprep.subr.bf16.mxu0 %v4983_v58  ;;  %3979 = vmatprep.subr.bf16.mxu1 %v4985_v62  ;;  %v5063_v58 = vcombine.high %v3228_v38, %v3232_v39  ;;  %v5065_v62 = vcombine.high %v3229_v40, %v3233_v41  ;;  %v3194_v27 = vld [vmem:[#allocation8 + $0xd70] sm:$0xff] }
 0x22e   : > { %3939 = vmatpush1.bf16.msra.mxu0 %v4982_v54  ;;  %3980 = vmatpush1.bf16.msra.mxu1 %v4984_v56  ;;  %v5062_v54 = vcombine.low %v3228_v38, %v3232_v39  ;;  %v5064_v56 = vcombine.low %v3229_v40, %v3233_v41  ;;  %v5027_v39 = vcombine.high %v3190_v29, %v3194_v27 }
 0x22f   : > { %3940 = vmatprep.subr.bf16.mxu0 %v5103_v57  ;;  %3981 = vmatprep.subr.bf16.mxu1 %v5105_v59  ;;  %v5055_v57 = vcombine.high %v3220_v45, %v3224_v47  ;;  %v5057_v59 = vcombine.high %v3221_v49, %v3225_v52 }
 0x232   : > { %3941 = vmatpush2.bf16.msra.mxu0 %v5102_v3  ;;  %3982 = vmatpush2.bf16.msra.mxu1 %v5104_v26  ;;  %v5054_v3 = vcombine.low %v3220_v45, %v3224_v47  ;;  %v5056_v26 = vcombine.low %v3221_v49, %v3225_v52  ;;  %v3187_v45 = vld [vmem:[#allocation8 + $0xd38] sm:$0xff]  ;;  %v5026_v49 = vcombine.low %v3190_v29, %v3194_v27 }
 0x233   : > { %3942 = vmatprep.subr.bf16.mxu0 %v5095_v5  ;;  %3983 = vmatprep.subr.bf16.mxu1 %v5097_v7  ;;  %v5047_v5 = vcombine.high %v3212_v9, %v3216_v48  ;;  %v5049_v7 = vcombine.high %v3213_v0, %v3217_v1  ;;  %v3155_v29 = vld [vmem:[#allocation8 + $0xc38] sm:$0xff] }
 0x236   : > { %3943 = vmatpush2.bf16.msra.mxu0 %v5094_v50  ;;  %3984 = vmatpush2.bf16.msra.mxu1 %v5096_v14  ;;  %v3207_v50 = vld [vmem:[#allocation8 + $0xdd8] sm:$0xff] }
 0x237   : > { %3944 = vmatprep.subr.bf16.mxu0 %v5087_v15  ;;  %3985 = vmatprep.subr.bf16.mxu1 %v5089_v17  ;;  %v3211_v14 = vld [vmem:[#allocation8 + $0xdf8] sm:$0xff]  ;;  %v5046_v15 = vcombine.low %v3212_v9, %v3216_v48  ;;  %v5048_v17 = vcombine.low %v3213_v0, %v3217_v1  ;;  %v3174_v9 = vld [vmem:[#allocation8 + $0xcd0] sm:$0xff] }
 0x238   : > { %v5045_v19 = vcombine.high %v3207_v50, %v3211_v14  ;;  %v5044_v61 = vcombine.low %v3207_v50, %v3211_v14  ;;  %v3178_v48 = vld [vmem:[#allocation8 + $0xcf0] sm:$0xff]  ;;  %v3175_v0 = vld [vmem:[#allocation8 + $0xcd8] sm:$0xff] }
 0x239   : > { %v3179_v1 = vld [vmem:[#allocation8 + $0xcf8] sm:$0xff] }
 0x23a   : > { %3945 = vmatpush2.bf16.msra.mxu0 %v5086_v22  ;;  %3986 = vmatpush2.bf16.msra.mxu1 %v5088_v23  ;;  %v5900_v22 = vor.u32 %v3277_v13, %v3276_v12  ;;  %v3199_v23 = vld [vmem:[#allocation8 + $0xd98] sm:$0xff]  ;;  %v5010_v13 = vcombine.low %v3174_v9, %v3178_v48  ;;  %v5012_v50 = vcombine.low %v3175_v0, %v3179_v1 }
 0x23b   : > { %3946 = vmatprep.subr.bf16.mxu0 %v5079_v24  ;;  %3987 = vmatprep.subr.bf16.mxu1 %v5081_v25  ;;  %v3203_v24 = vld [vmem:[#allocation8 + $0xdb8] sm:$0xff] }
 0x23c   : > { %v5037_v25 = vcombine.high %v3199_v23, %v3203_v24  ;;  %v5036_v38 = vcombine.low %v3199_v23, %v3203_v24  ;;  %v3171_v12 = vld [vmem:[#allocation8 + $0xcb8] sm:$0xff] }
 0x23d   : > { %v5004_v23 = vcombine.low %v3167_v11, %v3171_v12 }
 0x23e   : > { %3947 = vmatpush2.bf16.msra.mxu0 %v5078_v55  ;;  %3988 = vmatpush2.bf16.msra.mxu1 %v5080_v34  ;;  %v3195_v55 = vld [vmem:[#allocation8 + $0xd78] sm:$0xff] }
 0x23f   : > { %3948 = vmatprep.subr.bf16.mxu0 %v5071_v36  ;;  %3989 = vmatprep.subr.bf16.mxu1 %v5073_v37  ;;  %v5034_v36 = vcombine.low %v3198_v20, %v3202_v21  ;;  %v5029_v41 = vcombine.high %v3191_v32, %v3195_v55  ;;  %v3163_v20 = vld [vmem:[#allocation8 + $0xc78] sm:$0xff] }
 0x242   : > { %3949 = vmatpush2.bf16.msra.mxu0 %v5070_v53  ;;  %3990 = vmatpush2.bf16.msra.mxu1 %v5072_v42  ;;  %v3182_v53 = vld [vmem:[#allocation8 + $0xd10] sm:$0xff] }
 0x243   : > { %3950 = vmatprep.subr.bf16.mxu0 %v5063_v58  ;;  %3991 = vmatprep.subr.bf16.mxu1 %v5065_v62  ;;  %v3186_v42 = vld [vmem:[#allocation8 + $0xd30] sm:$0xff]  ;;  %v3183_v62 = vld [vmem:[#allocation8 + $0xd18] sm:$0xff] }
 0x246   : > { %3951 = vmatpush2.bf16.msra.mxu0 %v5062_v54  ;;  %3992 = vmatpush2.bf16.msra.mxu1 %v5064_v56  ;;  %v5028_v54 = vcombine.low %v3191_v32, %v3195_v55  ;;  %v5019_v56 = vcombine.high %v3182_v53, %v3186_v42 }
 0x247   : > { %3952 = vmatprep.subr.bf16.mxu0 %v5055_v57  ;;  %3993 = vmatprep.subr.bf16.mxu1 %v5057_v59  ;;  %v5021_v59 = vcombine.high %v3183_v62, %v3187_v45 }
 0x24a   : > { %3953 = vmatpush2.bf16.msra.mxu0 %v5054_v3  ;;  %3994 = vmatpush2.bf16.msra.mxu1 %v5056_v26  ;;  %v5018_v3 = vcombine.low %v3182_v53, %v3186_v42  ;;  %v5011_v26 = vcombine.high %v3174_v9, %v3178_v48  ;;  %v3275_v53 = vld [vmem:[#allocation8 + $0xff8] sm:$0xff]  ;;  %v3254_v48 = vld [vmem:[#allocation8 + $0xf50] sm:$0xff] }
 0x24b   : > { %3954 = vmatprep.subr.bf16.mxu0 %v5047_v5  ;;  %3995 = vmatprep.subr.bf16.mxu1 %v5049_v7  ;;  %v5013_v5 = vcombine.high %v3175_v0, %v3179_v1  ;;  %v3166_v7 = vld [vmem:[#allocation8 + $0xc90] sm:$0xff]  ;;  %v3255_v1 = vld [vmem:[#allocation8 + $0xf58] sm:$0xff] }
 0x24c   : > { %v5003_v14 = vcombine.high %v3166_v7, %v3170_v10  ;;  %v5002_v21 = vcombine.low %v3166_v7, %v3170_v10  ;;  %v3258_v0 = vld [vmem:[#allocation8 + $0xf70] sm:$0xff] }
 0x24d   : > { %v3246_v10 = vld [vmem:[#allocation8 + $0xf10] sm:$0xff] }
 0x24e   : > { %3955 = vmatpush2.bf16.msra.mxu0 %v5046_v15  ;;  %3996 = vmatpush2.bf16.msra.mxu1 %v5048_v17  ;;  %v5005_v15 = vcombine.high %v3167_v11, %v3171_v12  ;;  %v3158_v17 = vld [vmem:[#allocation8 + $0xc50] sm:$0xff]  ;;  %v3247_v12 = vld [vmem:[#allocation8 + $0xf18] sm:$0xff] }
 0x24f   : > { %4006 = vmatprep.subr.bf16.mxu0 %v5043_v18  ;;  %4047 = vmatprep.subr.bf16.mxu1 %v5045_v19  ;;  %v3162_v18 = vld [vmem:[#allocation8 + $0xc70] sm:$0xff]  ;;  %v3159_v19 = vld [vmem:[#allocation8 + $0xc58] sm:$0xff] }
 0x250   : > { %v4995_v24 = vcombine.high %v3158_v17, %v3162_v18  ;;  %v4994_v27 = vcombine.low %v3158_v17, %v3162_v18  ;;  %v4996_v32 = vcombine.low %v3159_v19, %v3163_v20  ;;  %v3250_v11 = vld [vmem:[#allocation8 + $0xf30] sm:$0xff] }
 0x251   : > { %v5902_v30 = vpop.f32.mrf.mxu0  ;;  %3957 = vmatmul.mubr.bf16.vlgmr.msra.gmra.mxu0 %v5900_v22  ;;  %v5905_v34 = vpop.f32.mrf.mxu1  ;;  %3998 = vmatmul.mubr.bf16.vlgmr.msra.gmra.mxu1 %v5900_v22  ;;  %v3238_v18 = vld [vmem:[#allocation8 + $0xed0] sm:$0xff] }
 0x252   : > { %4007 = vmatpush1.bf16.msra.mxu0 %v5042_v16  ;;  %4048 = vmatpush1.bf16.msra.mxu1 %v5044_v61  ;;  %v4997_v16 = vcombine.high %v3159_v19, %v3163_v20  ;;  %v3150_v61 = vld [vmem:[#allocation8 + $0xc10] sm:$0xff]  ;;  %v3239_v20 = vld [vmem:[#allocation8 + $0xed8] sm:$0xff] }
 0x253   : > { %v5908_v37 = vpop.f32.mrf.mxu0  ;;  %4008 = vmatprep.subr.bf16.mxu0 %v5035_v8  ;;  %v5910_v40 = vpop.f32.mrf.mxu1  ;;  %4049 = vmatprep.subr.bf16.mxu1 %v5037_v25  ;;  %v3154_v8 = vld [vmem:[#allocation8 + $0xc30] sm:$0xff]  ;;  %v3151_v25 = vld [vmem:[#allocation8 + $0xc18] sm:$0xff] }
 0x254   : > { %4038 = vmatprep.mubr.bf16.mxu0 %v5882_v43  ;;  %4079 = vmatprep.mubr.bf16.mxu1 %v5882_v43  ;;  %v5020_v43 = vcombine.low %v3183_v62, %v3187_v45  ;;  %v4987_v55 = vcombine.high %v3150_v61, %v3154_v8  ;;  %v4986_v42 = vcombine.low %v3150_v61, %v3154_v8  ;;  %v3242_v19 = vld [vmem:[#allocation8 + $0xef0] sm:$0xff] }
 0x255   : > { %v2158_v58 = vpop.f32.mrf.mxu0  ;;  %v2199_v47 = vpop.f32.mrf.mxu1  ;;  %v3230_v8 = vld [vmem:[#allocation8 + $0xe90] sm:$0xff] }
 0x256   : > { %4009 = vmatpush1.bf16.msra.mxu0 %v5034_v36  ;;  %4050 = vmatpush1.bf16.msra.mxu1 %v5036_v38  ;;  %v4989_v36 = vcombine.high %v3151_v25, %v3155_v29  ;;  %v3270_v38 = vld [vmem:[#allocation8 + $0xfd0] sm:$0xff]  ;;  %v4988_v58 = vcombine.low %v3151_v25, %v3155_v29  ;;  %v3231_v29 = vld [vmem:[#allocation8 + $0xe98] sm:$0xff] }
 0x257   : > { %v2159_v52 = vpop.f32.mrf.mxu0  ;;  %4010 = vmatprep.subr.bf16.mxu0 %v5027_v39  ;;  %v2200_v57 = vpop.f32.mrf.mxu1  ;;  %4051 = vmatprep.subr.bf16.mxu1 %v5029_v41  ;;  %v3274_v39 = vld [vmem:[#allocation8 + $0xff0] sm:$0xff]  ;;  %v3271_v41 = vld [vmem:[#allocation8 + $0xfd8] sm:$0xff] }
 0x258   : > { %v5107_v62 = vcombine.high %v3270_v38, %v3274_v39  ;;  %v5109_v45 = vcombine.high %v3271_v41, %v3275_v53  ;;  %v3262_v47 = vld [vmem:[#allocation8 + $0xf90] sm:$0xff]  ;;  %v3263_v52 = vld [vmem:[#allocation8 + $0xf98] sm:$0xff]  ;;  %v5108_v57 = vcombine.low %v3271_v41, %v3275_v53 }
 0x259   : > { %v3234_v25 = vld [vmem:[#allocation8 + $0xeb0] sm:$0xff]  ;;  %v3223_v53 = vld [vmem:[#allocation8 + $0xe58] sm:$0xff] }
 0x25a   : > { %4011 = vmatpush1.bf16.msra.mxu0 %v5026_v49  ;;  %4052 = vmatpush1.bf16.msra.mxu1 %v5028_v54  ;;  %v3266_v49 = vld [vmem:[#allocation8 + $0xfb0] sm:$0xff]  ;;  %v3267_v54 = vld [vmem:[#allocation8 + $0xfb8] sm:$0xff] }
 0x25b   : > { %4012 = vmatprep.subr.bf16.mxu0 %v5019_v56  ;;  %4053 = vmatprep.subr.bf16.mxu1 %v5021_v59  ;;  %v5106_v56 = vcombine.low %v3270_v38, %v3274_v39  ;;  %v5099_v59 = vcombine.high %v3262_v47, %v3266_v49  ;;  %v5101_v9 = vcombine.high %v3263_v52, %v3267_v54  ;;  %v3222_v39 = vld [vmem:[#allocation8 + $0xe50] sm:$0xff] }
 0x25c   : > { %v3226_v41 = vld [vmem:[#allocation8 + $0xe70] sm:$0xff] }
 0x25e   : > { %4013 = vmatpush1.bf16.msra.mxu0 %v5018_v3  ;;  %4054 = vmatpush1.bf16.msra.mxu1 %v5020_v43  ;;  %v3259_v3 = vld [vmem:[#allocation8 + $0xf78] sm:$0xff]  ;;  %v5098_v43 = vcombine.low %v3262_v47, %v3266_v49  ;;  %v3214_v49 = vld [vmem:[#allocation8 + $0xe10] sm:$0xff] }
 0x25f   : > { %4014 = vmatprep.subr.bf16.mxu0 %v5011_v26  ;;  %4055 = vmatprep.subr.bf16.mxu1 %v5013_v5  ;;  %v5100_v26 = vcombine.low %v3263_v52, %v3267_v54  ;;  %v5091_v5 = vcombine.high %v3254_v48, %v3258_v0  ;;  %v5093_v7 = vcombine.high %v3255_v1, %v3259_v3  ;;  %v3218_v52 = vld [vmem:[#allocation8 + $0xe30] sm:$0xff]  ;;  %v3215_v54 = vld [vmem:[#allocation8 + $0xe18] sm:$0xff] }
 0x262   : > { %4015 = vmatpush1.bf16.msra.mxu0 %v5010_v13  ;;  %4056 = vmatpush1.bf16.msra.mxu1 %v5012_v50  ;;  %v3251_v13 = vld [vmem:[#allocation8 + $0xf38] sm:$0xff]  ;;  %v5090_v50 = vcombine.low %v3254_v48, %v3258_v0  ;;  %v5050_v0 = vcombine.low %v3214_v49, %v3218_v52 }
 0x263   : > { %4016 = vmatprep.subr.bf16.mxu0 %v5003_v14  ;;  %4057 = vmatprep.subr.bf16.mxu1 %v5005_v15  ;;  %v5092_v14 = vcombine.low %v3255_v1, %v3259_v3  ;;  %v5083_v15 = vcombine.high %v3246_v10, %v3250_v11  ;;  %v5085_v17 = vcombine.high %v3247_v12, %v3251_v13 }
 0x264   : > { %v2073_v3 = vadd.f32 %v5884_v44, %v5851_v28 }
 0x266   : > { %4017 = vmatpush1.bf16.msra.mxu0 %v5002_v21  ;;  %4058 = vmatpush1.bf16.msra.mxu1 %v5004_v23  ;;  %v3243_v21 = vld [vmem:[#allocation8 + $0xef8] sm:$0xff]  ;;  %v5082_v23 = vcombine.low %v3246_v10, %v3250_v11  ;;  %v2116_v11 = vadd.f32 %v5892_v51, %v5859_v35  ;;  %v5297_v35 = vld [vmem:[#allocation9 + $0x30] sm:$0xff]  }
 0x267   : > { %4018 = vmatprep.subr.bf16.mxu0 %v4995_v24  ;;  %4059 = vmatprep.subr.bf16.mxu1 %v4997_v16  ;;  %v5084_v24 = vcombine.low %v3247_v12, %v3251_v13  ;;  %v5075_v16 = vcombine.high %v3238_v18, %v3242_v19  ;;  %v5077_v61 = vcombine.high %v3239_v20, %v3243_v21  ;;  %v5298_v51 = vld [vmem:[#allocation9 + $0xb0] sm:$0xff]  }
 0x26a   : > { %4019 = vmatpush1.bf16.msra.mxu0 %v4994_v27  ;;  %4060 = vmatpush1.bf16.msra.mxu1 %v4996_v32  ;;  %v3235_v27 = vld [vmem:[#allocation8 + $0xeb8] sm:$0xff]  ;;  %v5074_v32 = vcombine.low %v3238_v18, %v3242_v19  ;;  %v5296_v19 = vld [vmem:[#allocation9 + $0xf0] sm:$0xff]  }
 0x26b   : > { %4020 = vmatprep.subr.bf16.mxu0 %v4987_v55  ;;  %4061 = vmatprep.subr.bf16.mxu1 %v4989_v36  ;;  %v5076_v55 = vcombine.low %v3239_v20, %v3243_v21  ;;  %v5067_v36 = vcombine.high %v3230_v8, %v3234_v25  ;;  %v5069_v38 = vcombine.high %v3231_v29, %v3235_v27  ;;  %v5294_v18 = vld [vmem:[#allocation9 + $0xb8] sm:$0xff]   ;;  %v5299_v20 = vld [vmem:[#allocation9 + $0x68] sm:$0xff]  }
 0x26c   : > { %v5300_v21 = vld [vmem:[#allocation9 + $0xe8] sm:$0xff]  }
 0x26e   : > { %4021 = vmatpush1.bf16.msra.mxu0 %v4986_v42  ;;  %4062 = vmatpush1.bf16.msra.mxu1 %v4988_v58  ;;  %v3227_v42 = vld [vmem:[#allocation8 + $0xe78] sm:$0xff]  ;;  %v5066_v58 = vcombine.low %v3230_v8, %v3234_v25  ;;  %v5305_v8 = vld [vmem:[#allocation9 + $0x20] sm:$0xff]  }
 0x26f   : > { %4022 = vmatprep.subr.bf16.mxu0 %v5107_v62  ;;  %4063 = vmatprep.subr.bf16.mxu1 %v5109_v45  ;;  %v5068_v62 = vcombine.low %v3231_v29, %v3235_v27  ;;  %v5059_v45 = vcombine.high %v3222_v39, %v3226_v41  ;;  %v5061_v47 = vcombine.high %v3223_v53, %v3227_v42  ;;  %v5306_v25 = vld [vmem:[#allocation9 + $0xa0] sm:$0xff]   ;;  %v5307_v29 = vld [vmem:[#allocation9 + $0x58] sm:$0xff]  }
 0x270   : > { %v5308_v27 = vld [vmem:[#allocation9 + $0xd8] sm:$0xff]  }
 0x272   : > { %4023 = vmatpush2.bf16.msra.mxu0 %v5106_v56  ;;  %4064 = vmatpush2.bf16.msra.mxu1 %v5108_v57  ;;  %v3219_v56 = vld [vmem:[#allocation8 + $0xe38] sm:$0xff]  ;;  %v5058_v57 = vcombine.low %v3222_v39, %v3226_v41  ;;  %v5312_v39 = vld [vmem:[#allocation9 + $0xd0] sm:$0xff]   ;;  %v2196_v41 = vadd.f32 %v5905_v34, %v5869_v2  ;;  %v5315_v2 = vld [vmem:[#allocation9 + $0x48] sm:$0xff]  }
 0x273   : > { %4024 = vmatprep.subr.bf16.mxu0 %v5099_v59  ;;  %4065 = vmatprep.subr.bf16.mxu1 %v5101_v9  ;;  %v5060_v59 = vcombine.low %v3223_v53, %v3227_v42  ;;  %v5051_v9 = vcombine.high %v3214_v49, %v3218_v52  ;;  %v5053_v48 = vcombine.high %v3215_v54, %v3219_v56  ;;  %v5313_v42 = vld [vmem:[#allocation9 + $0x10] sm:$0xff]   ;;  %v5316_v34 = vld [vmem:[#allocation9 + $0xc8] sm:$0xff]  }
 0x274   : > { %v5052_v1 = vcombine.low %v3215_v54, %v3219_v56  ;;  %v2198_v49 = vadd.f32 %v5910_v40, %v5874_v6  ;;  %v5319_v6 = vld [vmem:[#allocation9 + $0x40] sm:$0xff]  }
 0x275   : > { %v5320_v40 = vld [vmem:[#allocation9 + $0xc0] sm:$0xff]  }
 0x276   : > { %4025 = vmatpush2.bf16.msra.mxu0 %v5098_v43  ;;  %4066 = vmatpush2.bf16.msra.mxu1 %v5100_v26  ;;  %v2114_v43 = vadd.f32 %v5887_v63, %v5854_v31 }
 0x277   : > { %4026 = vmatprep.subr.bf16.mxu0 %v5091_v5  ;;  %4067 = vmatprep.subr.bf16.mxu1 %v5093_v7  ;;  %v2075_v5 = vadd.f32 %v5890_v46, %v5857_v33  ;;  %v5291_v46 = vld [vmem:[#allocation9 + $0x78] sm:$0xff]  }
 0x27a   : > { %4027 = vmatpush2.bf16.msra.mxu0 %v5090_v50  ;;  %4068 = vmatpush2.bf16.msra.mxu1 %v5092_v14 }
 0x27b   : > { %4028 = vmatprep.subr.bf16.mxu0 %v5083_v15  ;;  %4069 = vmatprep.subr.bf16.mxu1 %v5085_v17  ;;  %v5292_v15 = vld [vmem:[#allocation9 + $0xf8] sm:$0xff]  }
 0x27c   : > { %v5293_v17 = vld [vmem:[#allocation9 + $0x38] sm:$0xff]  }
 0x27e   : > { %4029 = vmatpush2.bf16.msra.mxu0 %v5082_v23  ;;  %4070 = vmatpush2.bf16.msra.mxu1 %v5084_v24  ;;  %v5301_v23 = vld [vmem:[#allocation9 + $0x28] sm:$0xff]  }
 0x27f   : > { %4030 = vmatprep.subr.bf16.mxu0 %v5075_v16  ;;  %4071 = vmatprep.subr.bf16.mxu1 %v5077_v61  ;;  %v5302_v24 = vld [vmem:[#allocation9 + $0xa8] sm:$0xff]   ;;  %v5303_v16 = vld [vmem:[#allocation9 + $0x60] sm:$0xff]  }
 0x280   : > { %v5304_v61 = vld [vmem:[#allocation9 + $0xe0] sm:$0xff]  }
 0x282   : > { %4031 = vmatpush2.bf16.msra.mxu0 %v5074_v32  ;;  %4072 = vmatpush2.bf16.msra.mxu1 %v5076_v55  ;;  %v5309_v32 = vld [vmem:[#allocation9 + $0x18] sm:$0xff]  }
 0x283   : > { %4032 = vmatprep.subr.bf16.mxu0 %v5067_v36  ;;  %4073 = vmatprep.subr.bf16.mxu1 %v5069_v38  ;;  %v5310_v55 = vld [vmem:[#allocation9 + $0x98] sm:$0xff]   ;;  %v2155_v36 = vadd.f32 %v5902_v30, %v5866_v60  ;;  %v5311_v38 = vld [vmem:[#allocation9 + $0x50] sm:$0xff]  }
 0x286   : > { %4033 = vmatpush2.bf16.msra.mxu0 %v5066_v58  ;;  %4074 = vmatpush2.bf16.msra.mxu1 %v5068_v62  ;;  %v5314_v58 = vld [vmem:[#allocation9 + $0x90] sm:$0xff]   ;;  %v2157_v62 = vadd.f32 %v5908_v37, %v5872_v4 }
 0x287   : > { %4034 = vmatprep.subr.bf16.mxu0 %v5059_v45  ;;  %4075 = vmatprep.subr.bf16.mxu1 %v5061_v47 }
 0x28a   : > { %4035 = vmatpush2.bf16.msra.mxu0 %v5058_v57  ;;  %4076 = vmatpush2.bf16.msra.mxu1 %v5060_v59  ;;  %v5317_v59 = vld [vmem:[#allocation9 + $0x8] sm:$0xff]  }
 0x28b   : > { %4036 = vmatprep.subr.bf16.mxu0 %v5051_v9  ;;  %4077 = vmatprep.subr.bf16.mxu1 %v5053_v48  ;;  %v5318_v9 = vld [vmem:[#allocation9 + $0x88] sm:$0xff]  }
 0x28e   : > { %4037 = vmatpush2.bf16.msra.mxu0 %v5050_v0  ;;  %4078 = vmatpush2.bf16.msra.mxu1 %v5052_v1  ;;  %v5321_v0 = vld [vmem:[#allocation9] sm:$0xff]  }
 0x28f   : > { %5147 = vmatprep.subr.bf16.mxu0 %v5291_v46  ;;  %5169 = vmatprep.subr.bf16.mxu1 %v5292_v15  ;;  %v5322_v1 = vld [vmem:[#allocation9 + $0x80] sm:$0xff]  }
 0x291   : > { %v3010_v26 = vpop.f32.mrf.mxu0  ;;  %4039 = vmatmul.mubr.bf16.vlgmr.msra.gmra.mxu0 %v5900_v22  ;;  %v3051_v10 = vpop.f32.mrf.mxu1  ;;  %4080 = vmatmul.mubr.bf16.vlgmr.msra.gmra.mxu1 %v5900_v22  ;;  %v5295_v22 = vld [vmem:[#allocation9 + $0x70] sm:$0xff]  }
 0x292   : > { %v5921_v7 = vadd.f32 %v3010_v26, %v2073_v3  ;;  %v5926_v12 = vadd.f32 %v3051_v10, %v2114_v43  ;;  %5148 = vmatpush3.bf16.msra.mxu0 %v5293_v17  ;;  %5170 = vmatpush3.bf16.msra.mxu1 %v5294_v18 }
 0x293   : > { %v3012_v28 = vpop.f32.mrf.mxu0  ;;  %v3053_v31 = vpop.f32.mrf.mxu1  ;;  %5149 = vmatprep.subr.bf16.mxu0 %v5295_v22  ;;  %5171 = vmatprep.subr.bf16.mxu1 %v5296_v19 }
 0x294   : > { %v5928_v44 = vadd.f32 %v3012_v28, %v2075_v5  ;;  %v5930_v63 = vadd.f32 %v3053_v31, %v2116_v11 }
 0x295   : > { %v3014_v13 = vpop.f32.mrf.mxu0  ;;  %v3055_v50 = vpop.f32.mrf.mxu1 }
 0x296   : > { %5150 = vmatpush3.bf16.msra.mxu0 %v5297_v35  ;;  %5172 = vmatpush3.bf16.msra.mxu1 %v5298_v51 }
 0x297   : > { %v3015_v14 = vpop.f32.mrf.mxu0  ;;  %v3056_v33 = vpop.f32.mrf.mxu1  ;;  %5151 = vmatprep.subr.bf16.mxu0 %v5299_v20  ;;  %5173 = vmatprep.subr.bf16.mxu1 %v5300_v21 }
 0x29a   : > { %5152 = vmatpush3.bf16.msra.mxu0 %v5301_v23  ;;  %5174 = vmatpush3.bf16.msra.mxu1 %v5302_v24 }
 0x29b   : > { %5153 = vmatprep.subr.bf16.mxu0 %v5303_v16  ;;  %5175 = vmatprep.subr.bf16.mxu1 %v5304_v61 }
 0x29e   : > { %5154 = vmatpush3.bf16.msra.mxu0 %v5305_v8  ;;  %5176 = vmatpush3.bf16.msra.mxu1 %v5306_v25 }
 0x29f   : > { %5155 = vmatprep.subr.bf16.mxu0 %v5307_v29  ;;  %5177 = vmatprep.subr.bf16.mxu1 %v5308_v27 }
 0x2a2   : > { %5156 = vmatpush3.bf16.msra.mxu0 %v5309_v32  ;;  %5178 = vmatpush3.bf16.msra.mxu1 %v5310_v55 }
 0x2a3   : > { %5157 = vmatprep.subr.bf16.mxu0 %v5311_v38  ;;  %5179 = vmatprep.subr.bf16.mxu1 %v5312_v39 }
 0x2a6   : > { %5158 = vmatpush3.bf16.msra.mxu0 %v5313_v42  ;;  %5180 = vmatpush3.bf16.msra.mxu1 %v5314_v58 }
 0x2a7   : > { %5159 = vmatprep.subr.bf16.mxu0 %v5315_v2  ;;  %5181 = vmatprep.subr.bf16.mxu1 %v5316_v34 }
 0x2aa   : > { %5160 = vmatpush3.bf16.msra.mxu0 %v5317_v59  ;;  %5182 = vmatpush3.bf16.msra.mxu1 %v5318_v9 }
 0x2ab   : > { %5161 = vmatprep.subr.bf16.mxu0 %v5319_v6  ;;  %5183 = vmatprep.subr.bf16.mxu1 %v5320_v40 }
 0x2ae   : > { %5162 = vmatpush3.bf16.msra.mxu0 %v5321_v0  ;;  %5184 = vmatpush3.bf16.msra.mxu1 %v5322_v1 }
 0x2d1   : > { %v3092_v53 = vpop.f32.mrf.mxu0  ;;  %v3133_v47 = vpop.f32.mrf.mxu1 }
 0x2d2   : > { %v3144_v45 = vadd.f32 %v3092_v53, %v2155_v36  ;;  %v3146_v52 = vadd.f32 %v3133_v47, %v2196_v41 }
 0x2d3   : > { %v3094_v60 = vpop.f32.mrf.mxu0  ;;  %v3135_v54 = vpop.f32.mrf.mxu1 }
 0x2d4   : > { %v3145_v30 = vadd.f32 %v3094_v60, %v2157_v62  ;;  %v3147_v56 = vadd.f32 %v3135_v54, %v2198_v49 }
 0x2d5   : > { %v3096_v57 = vpop.f32.mrf.mxu0  ;;  %v3137_v4 = vpop.f32.mrf.mxu1 }
 0x2d7   : > { %v3097_v37 = vpop.f32.mrf.mxu0  ;;  %v3138_v48 = vpop.f32.mrf.mxu1 }
 0x311   : > { %v3958_v3 = vpop.f32.mrf.mxu0  ;;  %v3999_v26 = vpop.f32.mrf.mxu1 }
 0x312   : > { %v4088_v43 = vadd.f32 %v3958_v3, %v5921_v7  ;;  %v4090_v5 = vadd.f32 %v3999_v26, %v5926_v12 }
 0x313   : > { %v3960_v10 = vpop.f32.mrf.mxu0  ;;  %v4001_v28 = vpop.f32.mrf.mxu1 }
 0x314   : > { %v4089_v11 = vadd.f32 %v3960_v10, %v5928_v44  ;;  %v4091_v31 = vadd.f32 %v4001_v28, %v5930_v63  ;;  %v4096_v19 = vmul.f32 %v4088_v43, %v4088_v43  ;;  %v4098_v12 = vmul.f32 %v4090_v5, %v4090_v5 }
 0x315   : > { %v3962_v13 = vpop.f32.mrf.mxu0  ;;  %v4003_v50 = vpop.f32.mrf.mxu1 }
 0x316   : > { %v4097_v23 = vmul.f32 %v4089_v11, %v4089_v11  ;;  %v4099_v61 = vmul.f32 %v4091_v31, %v4091_v31 }
 0x317   : > { %v3963_v14 = vpop.f32.mrf.mxu0  ;;  %v4004_v33 = vpop.f32.mrf.mxu1 }
 0x351   : > { %v4040_v46 = vpop.f32.mrf.mxu0  ;;  %v4081_v17 = vpop.f32.mrf.mxu1 }
 0x352   : > { %v4092_v15 = vadd.f32 %v4040_v46, %v3144_v45  ;;  %v4094_v18 = vadd.f32 %v4081_v17, %v3146_v52  ;;  %v4449_v52 = vstv %s4448_s6 }
 0x353   : > { %v4042_v22 = vpop.f32.mrf.mxu0  ;;  %v4083_v51 = vpop.f32.mrf.mxu1 }
 0x354   : > { %v4100_v7 = vmul.f32 %v4092_v15, %v4092_v15  ;;  %v4093_v35 = vadd.f32 %v4042_v22, %v3145_v30  ;;  %v4102_v20 = vmul.f32 %v4094_v18, %v4094_v18  ;;  %v4095_v21 = vadd.f32 %v4083_v51, %v3147_v56 }
 0x355   : > { %v4044_v44 = vpop.f32.mrf.mxu0  ;;  %v4085_v16 = vpop.f32.mrf.mxu1 }
 0x356   : > { %v4104_v24 = vadd.f32 %v4100_v7, %v4096_v19  ;;  %v4101_v63 = vmul.f32 %v4093_v35, %v4093_v35  ;;  %v4106_v8 = vadd.f32 %v4102_v20, %v4098_v12  ;;  %v4103_v25 = vmul.f32 %v4095_v21, %v4095_v21 }
 0x357   : > { %v4045_v29 = vpop.f32.mrf.mxu0  ;;  %v4086_v32 = vpop.f32.mrf.mxu1 }
 0x358   : > { %v4105_v27 = vadd.f32 %v4101_v63, %v4097_v23  ;;  %v4107_v55 = vadd.f32 %v4103_v25, %v4099_v61  ;;  %v4108_v38 = vpack.c.bf16 %v4104_v24, %v4104_v24  ;;  %v4110_v41 = vpack.c.bf16 %v4106_v8, %v4106_v8 }
 0x35a   : > { %v4109_v36 = vpack.c.bf16 %v4105_v27, %v4105_v27  ;;  %v4111_v39 = vpack.c.bf16 %v4107_v55, %v4107_v55 }
 0x35c   : > { %4400 = vmatprep.mubr.bf16.mxu0 %v4109_v36  ;;  %4440 = vmatprep.mubr.bf16.mxu1 %v4111_v39 }
 0x35d   : > { %4401 = vmatmul.mubr.bf16.vlgmr.msra.gmra.mxu0 %v4108_v38  ;;  %4441 = vmatmul.mubr.bf16.vlgmr.msra.gmra.mxu1 %v4110_v41 }
 0x41d   : > { %v5163_v53 = vpop.f32.mrf.mxu0  ;;  %v5185_v42 = vpop.f32.mrf.mxu1 }
 0x41f   : > { %v5164_v58 = vpop.f32.mrf.mxu0  ;;  %v5186_v45 = vpop.f32.mrf.mxu1 }
 0x420   : > { %v5165_v62 = vadd.f32 %v5164_v58, %v5163_v53  ;;  %v5187_v47 = vadd.f32 %v5186_v45, %v5185_v42 }
 0x421   : > { %v5166_v49 = vpop.f32.mrf.mxu0  ;;  %v5188_v60 = vpop.f32.mrf.mxu1 }
 0x422   : > { %v4443_v30 = vadd.f32 %v5187_v47, %v5165_v62 }
 0x423   : > { %v5167_v54 = vpop.f32.mrf.mxu0  ;;  %v5189_v2 = vpop.f32.mrf.mxu1 }
 0x424   : > { %v4450_v34 = vmul.f32 %v4449_v52, %v4443_v30 }
 0x426   : > { %v4451_v56 = vmax.f32 %v4450_v34, 1e-07 }
 0x428   : > { %5323 = vlog2.f32 %v4451_v56 }
 0x435   : > { %v5324_v57 = vpop.eup %5323 }
 0x436   : > { %v4453_v59 = vmul.f32 0.6931472, %v5324_v57 }
 0x438   : > { %4454 = vst [vmem:[%s311_s15] sm:$0xff] %v4453_v59 }
 0x439   : > { %5447 = shalt.err (!%p5444_p4)
}
 0x43a   : > { %s5448_s20 = scalar_lea.hbm %s4467_s8, 128  ;;  %s5452_s3 = scalar_lea.hbm %s5994_s5, 256 }
 0x43b   : > { %p5449_p5 = scmp.ne.s32.totalorder %s4467_s8, %s5448_s20  ;;  %p5453_p13 = scmp.lt.s32.totalorder %s4467_s8, %s5994_s5 }
 0x43c   : > { %p5454_p1 = scmp.lt.s32.totalorder %s5452_s3, %s5448_s20 }
 0x43d   : > { %p5450_p11 = pnand %p5449_p5, %p6029_p6 }
 0x43e   : > { %p5455_p3 = por %p5454_p1, %p5453_p13 }
 0x43f   : > { %p5451_p7 = pneg %p5450_p11 }
 0x441   : > { %p5456_p12 = pnand %p5455_p3, %p5451_p7 }
 0x443   : > { %5459 = shalt.err (!%p5456_p12)
}
 0x444   : > { %5203 = dma.vmem_to_hbm [thread:$0]  (%p6029_p6), %s4470_s17, 128, %s4467_s8, %s4456_s12  }
 0x445 PF: > { %s4481_s7 = sand.u32 1, %s5522_s23   ;;  %p6030_p8 = scmp.ne.s32.totalorder %s6013_s10, 0 }
 0x446   : > { %p6031_p9 = scmp.ge.s32.totalorder %s5534_s0, 2  ;;  %s4482_s11 = scalar_lea.sflag [#allocation5], %s4481_s7 }
 0x448   : > { %p5220_p10 = pnand %p6031_p9, %p6030_p8 }
 0x44a   : > { %p5221_p2 = pneg %p5220_p10 }
 0x44c   : > { %5505 = dma.done.wait (%p5221_p2), %s4482_s11, 128  }
 0x44d   : > { %5507 = vsyncadd (%p5221_p2), %s4482_s11, 4294967168  ;;  %p23_p6 = scmp.ge.s32.totalorder %s5652_s19, 4   ;;  %s6032_s20 = smov %s5514_s21 }
 0x44e   : > { %s6033_s21 = smov %s5518_s22  ;;  %s6034_s22 = smov %s5729_s27 }
 0x44f   : > { %s6035_s23 = smov %s5526_s24  ;;  %s6036_s24 = smov %s5530_s25 }
 0x450   : > { %s6037_s25 = smov %s5663_s30  ;;  %s6038_s0 = smov %s5652_s19 }
 0x451   :  { %25 = sbr.rel (!%p23_p6) target bundleno = 15 (0xf), region = 106 }
 0x456   :  { %4487 = vsyncpa [#allocation4], 1 }
 0x457   :  { %4489 = vsyncpa [#allocation4 + $0x1], 1 }
 0x458   :  { %4490 = vsyncpa [#allocation7], 1 }
 0x459   :  { %4492 = vsyncpa [#allocation7 + $0x1], 1 }
 0x45a   :  { %4493 = vsyncpa [#allocation10], 1 }
 0x45b   :  { %4494 = vsyncpa [#allocation5], 1 }
 0x45c   :  { %4496 = vsyncpa [#allocation5 + $0x1], 1 }

</bundles_post_ra>
